<compile_context>
chip_gen: v7x
topology: tpu7x:2x2x1
jax: 0.10.0
libtpu: 0.0.40
codegen_flags: <defaults>
</compile_context>

<pallas_src>
import functools

import jax
import jax.numpy as jnp
from jax.experimental import pallas as pl
from jax.experimental.pallas import tpu as pltpu


# Large finite negative (flash-attention-style mask value); avoids inf math.
_MASK_NEG = -0.7 * float(jnp.finfo(jnp.float32).max)


def _round_up(x, m):
    return ((x + m - 1) // m) * m


def _pick_seq_chunk(sp, target=128):
    """Largest multiple of 16 that divides sp and is <= target (sp % 16 == 0)."""
    q = sp // 16
    best = 1
    for d in range(1, max(1, target // 16) + 1):
        if q % d == 0:
            best = d
    return 16 * best


def _vmem_limit_bytes():
    """~3/4 of physical VMEM: ~48 MiB on v7x (64 MiB), ~96 MiB on v5e/v6e (128 MiB)."""
    cap = 64 * 1024 * 1024
    try:
        info = pltpu.get_tpu_info()
        cap = int(getattr(info, "vmem_capacity_bytes", cap))
    except Exception:
        pass
    return min((cap * 3) // 4, 100 * 1024 * 1024)


def lexmae_pool_kernel(h_ref, w_ref, b_ref, m_ref, out_ref, *, sc):
    # h_ref: (tb, Sp, H) bf16      w_ref: (H, tv) bf16     b_ref: (1, tv) f32
    # m_ref: (tb, Sp, 1) f32 additive mask (0 / -BIG)      out_ref: (tb, tv) f32
    tb, sp, hdim = h_ref.shape
    tv = w_ref.shape[1]
    n_chunks = sp // sc

    # Running masked max over the sequence, chunked so the f32 logits
    # intermediate stays at (tb*sc, tv) instead of (tb*Sp, tv).
    running = jnp.full((tb, tv), _MASK_NEG, dtype=jnp.float32)
    for c in range(n_chunks):                    # static, fully unrolled
        h = h_ref[:, pl.ds(c * sc, sc), :].reshape(tb * sc, hdim)
        logits = jnp.dot(h, w_ref[...], preferred_element_type=jnp.float32)
        logits = logits.reshape(tb, sc, tv) + m_ref[:, pl.ds(c * sc, sc), :]
        running = jnp.maximum(running, jnp.max(logits, axis=1))

    # Hoisted epilogue: bias + relu + log1p only on the (tb, tv) maxima.
    # Fully-masked / batch-padded rows: running = -BIG -> relu -> 0 -> log1p -> 0.
    out_ref[...] = jnp.log1p(jnp.maximum(running + b_ref[...], 0.0))


def lexmae_pooled_values(hidden, w_head, b_head, attention_mask,
                         *, tb=None, tv=1024, sc_target=128):
    """values[b, v] = amax_s( log1p(relu(hidden[b,s] @ W[:,v] + b[v])) * mask[b,s] )."""
    B, S, H = hidden.shape
    V = w_head.shape[1]

    # --- tile-size selection -------------------------------------------------
    Sp = _round_up(max(S, 1), 16)               # bf16 sublane pack -> clean reshapes
    if tb is None:                              # fill MXU M / amortize W stream on short S
        tb = 32 if Sp <= 64 else (16 if Sp <= 128 else 8)
    Bp = _round_up(B, tb)
    sc = _pick_seq_chunk(Sp, sc_target)

    tv = max(128, min(tv, _round_up(V, 128)))
    tv = _round_up(tv, 128)
    Vp = _round_up(V, tv)

    # --- operand prep (params should already be stored bf16 -> casts are no-ops)
    hidden_bf = hidden.astype(jnp.bfloat16)
    w_bf = w_head.astype(jnp.bfloat16)
    bias = b_head.astype(jnp.float32)

    if Sp != S or Bp != B:
        hidden_bf = jnp.pad(hidden_bf, ((0, Bp - B), (0, Sp - S), (0, 0)))
        attention_mask = jnp.pad(attention_mask, ((0, Bp - B), (0, Sp - S)))
    if Vp != V:
        w_bf = jnp.pad(w_bf, ((0, 0), (0, Vp - V)))
        bias = jnp.pad(bias, ((0, Vp - V),), constant_values=_MASK_NEG)

    addmask = jnp.where(attention_mask > 0, 0.0, _MASK_NEG).astype(jnp.float32)
    addmask = addmask.reshape(Bp, Sp, 1)
    bias2 = bias.reshape(1, Vp)

    kernel = functools.partial(lexmae_pool_kernel, sc=sc)
    values = pl.pallas_call(
        kernel,
        out_shape=jax.ShapeDtypeStruct((Bp, Vp), jnp.float32),
        grid_spec=pltpu.PrefetchScalarGridSpec(
            num_scalar_prefetch=0,
            # Vocab innermost: hidden/mask blocks stay resident across it (their
            # index_map is constant along v), so only the bf16 W tile streams.
            grid=(Bp // tb, Vp // tv),
            in_specs=[
                pl.BlockSpec((tb, Sp, H), lambda b, v: (b, 0, 0)),   # hidden (resident)
                pl.BlockSpec((H, tv), lambda b, v: (0, v)),          # LM-head W (streams)
                pl.BlockSpec((1, tv), lambda b, v: (0, v)),          # LM-head bias
                pl.BlockSpec((tb, Sp, 1), lambda b, v: (b, 0, 0)),   # additive mask
            ],
            out_specs=pl.BlockSpec((tb, tv), lambda b, v: (b, v)),
        ),
        compiler_params=pltpu.CompilerParams(
            # Shard the long vocab axis across v7x's two TensorCores; the batch
            # axis (often a single group) stays serial.
            dimension_semantics=("arbitrary", "parallel"),
            vmem_limit_bytes=_vmem_limit_bytes()),
    )(hidden_bf, w_bf, bias2, addmask)

    # Slice off batch padding AND vocab padding (padded columns must never
    # participate in the top-k threshold).
    return values[:B, :V]


def sparsify_topk(values, topk):
    """Keep the top-k values per row (>= threshold), zero the rest."""
    V = values.shape[-1]
    k = min(topk, V)
    if V > 8192:
        # TODO(synk): approx_max_k trades exact torch.topk semantics for the TPU
        # fused partial-reduction path (several x faster at V ~ 50k).
        top_vals, _ = jax.lax.approx_max_k(values, k)
    else:
        top_vals, _ = jax.lax.top_k(values, k)
    threshold = top_vals[:, -1:]
    return jnp.where(values >= threshold, values, 0.0)


def lexmae_sentence_embedding(hidden, w_head, b_head, attention_mask,
                              topk=256, **tile_kwargs):
    values = lexmae_pooled_values(hidden, w_head, b_head, attention_mask,
                                  **tile_kwargs)
    return sparsify_topk(values, topk)


if __name__ == "__main__":
    # Small shapes consistent with the module's forward:
    #   input_ids / attention_mask: [B, S]; model logits: [B, S, V]; output: [B, V]
    B, S, H, V = 2, 8, 64, 2048
    VOCAB_IN = 100
    TOPK = 256

    key = jax.random.PRNGKey(0)
    k_emb, k_w, k_b, k_ids = jax.random.split(key, 4)

    # Params stored in bf16 up-front (no per-call f32->bf16 cast of the LM head).
    emb_table = (jax.random.normal(k_emb, (VOCAB_IN, H), dtype=jnp.float32)
                 * 0.5).astype(jnp.bfloat16)
    w_head = (jax.random.normal(k_w, (H, V), dtype=jnp.float32)
              * 0.1).astype(jnp.bfloat16)
    b_head = jax.random.normal(k_b, (V,), dtype=jnp.float32) * 0.1

    input_ids = jax.random.randint(k_ids, (B, S), 0, VOCAB_IN, dtype=jnp.int32)
    attention_mask = jnp.array([[1, 1, 1, 1, 1, 1, 0, 0],
                                [1, 1, 1, 1, 0, 0, 0, 0]], dtype=jnp.int32)

    # Synthetic encoder: embedding lookup producing per-token hidden states.
    # TODO(synk): the full ModernBERT encoder stack is not reimplemented here;
    # the Pallas kernel covers the LexMAE head (logits->relu->log1p->mask->amax).
    hidden = emb_table[input_ids]                                   # [B, S, H] bf16

    pooled = lexmae_pooled_values(hidden, w_head, b_head, attention_mask)
    out = lexmae_sentence_embedding(hidden, w_head, b_head, attention_mask,
                                    topk=TOPK)
    out = jax.block_until_ready(out)

    # Reference uses the ORIGINAL (un-hoisted) math to validate the algebraic
    # commutation of max with bias/relu/log1p and the additive masking scheme.
    logits = jnp.einsum("bsh,hv->bsv", hidden.astype(jnp.bfloat16),
                        w_head.astype(jnp.bfloat16),
                        preferred_element_type=jnp.float32)
    logits = logits + b_head.astype(jnp.float32)
    x = jnp.log1p(jnp.maximum(logits, 0.0))
    x = x * attention_mask[..., None].astype(jnp.float32)
    ref_pooled = jnp.max(x, axis=1)
    ref_out = sparsify_topk(ref_pooled, TOPK)

    assert out.shape == (B, V)
    assert jnp.allclose(pooled, ref_pooled, atol=1e-4, rtol=1e-4), "pooled mismatch"
    assert jnp.allclose(out, ref_out, atol=1e-4, rtol=1e-4), "sparse output mismatch"

    print("KERNEL_OK")
</pallas_src>

<mosaic_0001>
module attributes {stable_mosaic.version = 11 : i64} {
  func.func @lexmae_pool_kernel(%arg0: i32, %arg1: i32, %arg2: memref<32x16x64xbf16, #tpu.memory_space<vmem>>, %arg3: memref<64x1024xbf16, #tpu.memory_space<vmem>>, %arg4: memref<1x1024xf32, #tpu.memory_space<vmem>>, %arg5: memref<32x16x1xf32, #tpu.memory_space<vmem>>, %arg6: memref<32x1024xf32, #tpu.memory_space<vmem>>) attributes {dimension_semantics = [#tpu.dimension_semantics<arbitrary>, #tpu.dimension_semantics<parallel>], iteration_bounds = array<i64: 1, 2>, scalar_prefetch = 0 : i64, scratch_operands = 0 : i64, tpu.core_type = #tpu.core_type<tc>, window_params = [{transform_indices = @transform_0, window_bounds = array<i64: 32, 16, 64>}, {transform_indices = @transform_1, window_bounds = array<i64: 64, 1024>}, {transform_indices = @transform_2, window_bounds = array<i64: 1, 1024>}, {transform_indices = @transform_3, window_bounds = array<i64: 32, 16, 1>}, {transform_indices = @transform_4, window_bounds = array<i64: 32, 1024>}]} {
    %cst = arith.constant -2.38197633E+38 : f32
    %0 = vector.broadcast %cst : f32 to vector<32x1024xf32>
    %c0 = arith.constant 0 : index
    %c0_0 = arith.constant 0 : index
    %c0_1 = arith.constant 0 : index
    %1 = vector.load %arg2[%c0, %c0_0, %c0_1] : memref<32x16x64xbf16, #tpu.memory_space<vmem>>, vector<32x16x64xbf16>
    %2 = vector.shape_cast %1 : vector<32x16x64xbf16> to vector<512x64xbf16>
    %c0_2 = arith.constant 0 : index
    %c0_3 = arith.constant 0 : index
    %3 = vector.load %arg3[%c0_2, %c0_3] : memref<64x1024xbf16, #tpu.memory_space<vmem>>, vector<64x1024xbf16>
    %cst_4 = arith.constant dense<0.000000e+00> : vector<512x1024xf32>
    %4 = tpu.matmul %2, %3, %cst_4 {dimension_numbers = #tpu.dot_dimension_numbers<[1], [0], [0], [1], [0, 0, 1, 1], [], []>} : vector<512x64xbf16>, vector<64x1024xbf16>, vector<512x1024xf32> -> vector<512x1024xf32>
    %5 = vector.shape_cast %4 : vector<512x1024xf32> to vector<32x16x1024xf32>
    %c0_5 = arith.constant 0 : index
    %c0_6 = arith.constant 0 : index
    %c0_7 = arith.constant 0 : index
    %6 = vector.load %arg5[%c0_5, %c0_6, %c0_7] : memref<32x16x1xf32, #tpu.memory_space<vmem>>, vector<32x16x1xf32>
    %7 = vector.broadcast %6 : vector<32x16x1xf32> to vector<32x16x1024xf32>
    %8 = arith.addf %5, %7 : vector<32x16x1024xf32>
    %cst_8 = arith.constant dense<0xFF800000> : vector<32x1024xf32>
    %9 = vector.multi_reduction <maximumf>, %8, %cst_8 [1] : vector<32x16x1024xf32> to vector<32x1024xf32>
    %10 = arith.maximumf %0, %9 : vector<32x1024xf32>
    %c0_9 = arith.constant 0 : index
    %c0_10 = arith.constant 0 : index
    %11 = vector.load %arg4[%c0_9, %c0_10] : memref<1x1024xf32, #tpu.memory_space<vmem>>, vector<1x1024xf32>
    %12 = vector.broadcast %11 : vector<1x1024xf32> to vector<32x1024xf32>
    %13 = arith.addf %10, %12 : vector<32x1024xf32>
    %cst_11 = arith.constant 0.000000e+00 : f32
    %14 = vector.broadcast %cst_11 : f32 to vector<32x1024xf32>
    %15 = arith.maximumf %13, %14 : vector<32x1024xf32>
    %16 = math.log1p %15 : vector<32x1024xf32>
    %c0_12 = arith.constant 0 : index
    %c0_13 = arith.constant 0 : index
    %17 = vector.load %arg6[%c0_12, %c0_13] : memref<32x1024xf32, #tpu.memory_space<vmem>>, vector<32x1024xf32>
    tpu.vector_store %arg6[%c0_12, %c0_13], %16 {strides = array<i32>} : memref<32x1024xf32, #tpu.memory_space<vmem>>, vector<32x1024xf32>,
    return
  }
  func.func @transform_0(%arg0: i32, %arg1: i32) -> (i32, i32, i32) {
    %c0_i32 = arith.constant 0 : i32
    %c0_i32_0 = arith.constant 0 : i32
    %c0_i32_1 = arith.constant 0 : i32
    return %arg0, %c0_i32, %c0_i32_0 : i32, i32, i32
  }
  func.func @transform_1(%arg0: i32, %arg1: i32) -> (i32, i32) {
    %c0_i32 = arith.constant 0 : i32
    %c0_i32_0 = arith.constant 0 : i32
    return %c0_i32, %arg1 : i32, i32
  }
  func.func @transform_2(%arg0: i32, %arg1: i32) -> (i32, i32) {
    %c0_i32 = arith.constant 0 : i32
    %c0_i32_0 = arith.constant 0 : i32
    return %c0_i32, %arg1 : i32, i32
  }
  func.func @transform_3(%arg0: i32, %arg1: i32) -> (i32, i32, i32) {
    %c0_i32 = arith.constant 0 : i32
    %c0_i32_0 = arith.constant 0 : i32
    %c0_i32_1 = arith.constant 0 : i32
    return %arg0, %c0_i32, %c0_i32_0 : i32, i32, i32
  }
  func.func @transform_4(%arg0: i32, %arg1: i32) -> (i32, i32) {
    %c0_i32 = arith.constant 0 : i32
    return %arg0, %arg1 : i32, i32
  }
}

</mosaic_0001>

<bundles_post_ra>
// kernel: tpu_custom_call.1
= control target key start
LH: loop header
LB: loop body
LE: loop exit
PB: predicated region body
PF: predicated region fallthrough
CT: control target
= control target key end

     0   :  { %9 = vsyncpa [#allocation3], 0  ;;  %s16272_s0 = inlined_call_operand.hbm [shape: bf16[32,16,64], index: 0, kind: input, shape index: {}]   ;;  %s16273_s1 = inlined_call_operand.vmem [shape: bf16[64,2048], index: 1, kind: input, shape index: {}]   ;;  %s16274_s2 = inlined_call_operand.vmem [shape: f32[1,2048], index: 2, kind: input, shape index: {}]   ;;  %s16275_s3 = inlined_call_operand.vmem [shape: f32[32,16,1], index: 3, kind: input, shape index: {}]   ;;  %s16276_s4 = inlined_call_operand.hbm [shape: f32[32,2048], index: 4, kind: output, shape index: {}]  }
   0x1   :  { %10 = vsyncpa [#allocation4], 0 }
   0x2   :  { %12 = vsyncpa [#allocation4 + $0x1], 0  ;;  %s10010_s15 = smov 0   ;;  %s10012_s16 = smov 0  }
   0x3   :  { %s10014_s17 = smov 0   ;;  %s10016_s18 = smov 0  }
   0x4   :  { %s10018_s19 = smov 0   ;;  %s10020_s20 = smov 0  }
   0x5 LB: > { %s9001_s21 = sadd.s32 4294967295, %s9975_s20   ;;  %s9002_s22 = sadd.s32 4294967294, %s9975_s20   ;;  %s9975_s20 = sphi %s10020_s20, %s18_s20   ;;  %s9971_s19 = sphi %s10018_s19, %s17574_s19   ;;  %s9967_s18 = sphi %s10016_s18, %s17573_s18   ;;  %s9963_s17 = sphi %s10014_s17, %s17572_s17   ;;  %s9959_s16 = sphi %s10012_s16, %s17571_s16   ;;  %s9955_s15 = sphi %s10010_s15, %s17570_s15  }
   0x6   : > { %s27_s23 = sadd.s32 1, %s9971_s19  ;;  %s63_s24 = sadd.s32 1, %s9963_s17 }
   0x7   : > { %p28_p0 = scmp.ge.s32.totalorder %s27_s23, 2  ;;  %p70_p1 = scmp.ne.s32.totalorder %s9963_s17, %s9959_s16 }
   0x8   : > { %p71_p2 = scmp.eq.s32.totalorder %s9975_s20, 0  ;;  %p154_p3 = scmp.eq.s32.totalorder %s9001_s21, 1 }
   0x9   : > { %s17576_s23 = smov (%p28_p0, %s27_s23), 0  ;;  %p159_p6 = scmp.ne.s32.totalorder %s9959_s16, %s9955_s15 }
   0xa   : > { %p10049_p4 = por %p71_p2, %p70_p1  ;;  %p10053_p5 = por %p154_p3, %p70_p1 }
   0xb   : > { %s60_s27 = ssub.s32 %s9971_s19, %s17576_s23  ;;  %p160_p8 = scmp.eq.s32.totalorder %s9002_s22, 1 }
   0xc   : > { %s16413_s25 = scalar_select %p10049_p4, 1, 0 }
   0xd   : > { %s16414_s26 = scalar_select %p10053_p5, 1, 0 }
   0xe   : > { %p61_p7 = scmp.eq.s32.totalorder %s60_s27, 0  ;;  %p9003_p9 = scmp.ge.s32.totalorder %s9975_s20, 1 }
   0xf   : > { %p167_p10 = scmp.lt.s32.totalorder %s9975_s20, 3  ;;  %p10066_p11 = por %p160_p8, %p159_p6 }
  0x10   : > { %s10064_s28 = scalar_select %p61_p7, %s9963_s17, %s63_s24  }
  0x11   : > { %s16415_s29 = scalar_select %p10066_p11, 1, 0 }
  0x12   : > { %p10070_p12 = pnand %p9003_p9, %p167_p10  ;;  %p10074_p13 = scmp.eq.s32.totalorder %s9001_s21, 0 }
  0x13   : > { %s9977_s6 = smov [#allocation2]   ;;  %s9865_s11 = scalar_lea.hbm %s16272_s0, 4096 }
  0x14   : > { %s16416_s30 = scalar_select %p10070_p12, 1, 0 }
  0x15   : > { %s16417_s5 = scalar_select %p10074_p13, 1, 0 }
  0x16   : > { %p9220_p0 = pneg %p10070_p12  ;;  %s183_s7 = sshll.u32 %s9977_s6, 4  ;;  %s184_s7 = int_to_ptr.vmem [resolvable:$true] %s183_s7 }
  0x17   : > { %p9866_p2 = scmp.ne.s32.totalorder %s16272_s0, %s9865_s11  ;;  %p9872_p8 = scmp.lt.u32.totalorder %s9865_s11, %s16272_s0 }
  0x18   : > { %p10082_p1 = pnand %p10074_p13, %p9220_p0 }
  0x1a   : > { %p9867_p3 = pneg %p10082_p1 }
  0x1c   : > { %p9868_p6 = pnand %p9867_p3, %p9866_p2 }
  0x1e   : > { %p9869_p7 = pneg %p9868_p6 }
  0x20   : > { %p9874_p9 = pnand %p9872_p8, %p9869_p7 }
  0x22   : > { %9877 = shalt.err (!%p9874_p9)
}
  0x23   : > { %s9878_s22 = scalar_lea.vmem %s184_s7, 4096  ;;  %p9886_p5 = scmp.lt.s32.totalorder %s184_s7, %s184_s7 }
  0x24   : > { %p9879_p10 = scmp.ne.s32.totalorder %s184_s7, %s9878_s22  ;;  %p9887_p13 = scmp.lt.s32.totalorder %s9878_s22, %s9878_s22 }
  0x26   : > { %p9881_p0 = pnand %p9879_p10, %p9867_p3  ;;  %p9888_p12 = por %p9887_p13, %p9886_p5 }
  0x28   : > { %p9882_p11 = pneg %p9881_p0 }
  0x2a   : > { %p9889_p4 = pnand %p9888_p12, %p9882_p11 }
  0x2c   : > { %9892 = shalt.err (!%p9889_p4)
}
  0x2d   : > { %s9978_s24 = smov 64   ;;  %s9979_s27 = smov 4  }
  0x2e   : > { %9223 = dma.hbm_to_vmem [thread:$0]  (!%p10082_p1), %s16272_s0, 4096, %s184_s7, [#allocation3], %s9978_s24, %s9978_s24, %s9979_s27  }
  0x2f   : > { %p9006_p2 = scmp.ge.s32.totalorder %s9975_s20, 2 }
  0x30   : > { %p16419_p3 = scmp.ne.s32.totalorder (!%p9006_p2), %s16413_s25, 0 }
  0x31   : > { %203 = sbr.rel (%p9006_p2) target bundleno = 76 (0x4c), region = 24 }
  0x38   : > { %206 = sbr.rel (!%p16419_p3) target bundleno = 76 (0x4c), region = 28  ;;  %s208_s10 = sand.u32 (%p16419_p3), 1, %s9963_s17  }
  0x39   : > { %s9212_s11 = sshll.u32 (%p16419_p3), %s9971_s19, 5  ;;  %s9007_s12 = sshll.u32 (%p16419_p3), %s208_s10, 8 }
  0x3a   : > { %s10112_s8 = scalar_lea.vmem (%p16419_p3), %s16273_s1, %s9212_s11  ;;  %s10117_s25 = scalar_lea.vmem (%p16419_p3), [#allocation5], %s9007_s12 }
  0x3b   : > { %v226_v0 = vld [vmem:[%s10112_s8] sm:$0xff] (%p16419_p3)  ;;  %v228_v1 = vld [vmem:[%s10112_s8 + $0x8] sm:$0xff] (%p16419_p3)  ;;  %v230_v2 = vld [vmem:[%s10112_s8 + $0x10] sm:$0xff] (%p16419_p3) }
  0x3c   : > { %227 = vst [vmem:[%s10117_s25] sm:$0xff] (%p16419_p3), %v226_v0  ;;  %229 = vst [vmem:[%s10117_s25 + $0x8] sm:$0xff] (%p16419_p3), %v228_v1  ;;  %v232_v3 = vld [vmem:[%s10112_s8 + $0x18] sm:$0xff] (%p16419_p3)  ;;  %v234_v4 = vld [vmem:[%s10112_s8 + $0x40] sm:$0xff] (%p16419_p3) }
  0x3d   : > { %231 = vst [vmem:[%s10117_s25 + $0x10] sm:$0xff] (%p16419_p3), %v230_v2  ;;  %v236_v5 = vld [vmem:[%s10112_s8 + $0x48] sm:$0xff] (%p16419_p3)  ;;  %233 = vst [vmem:[%s10117_s25 + $0x18] sm:$0xff] (%p16419_p3), %v232_v3  ;;  %v238_v6 = vld [vmem:[%s10112_s8 + $0x50] sm:$0xff] (%p16419_p3) }
  0x3e   : > { %235 = vst [vmem:[%s10117_s25 + $0x20] sm:$0xff] (%p16419_p3), %v234_v4  ;;  %237 = vst [vmem:[%s10117_s25 + $0x28] sm:$0xff] (%p16419_p3), %v236_v5  ;;  %v240_v7 = vld [vmem:[%s10112_s8 + $0x58] sm:$0xff] (%p16419_p3)  ;;  %v242_v8 = vld [vmem:[%s10112_s8 + $0x80] sm:$0xff] (%p16419_p3) }
  0x3f   : > { %239 = vst [vmem:[%s10117_s25 + $0x30] sm:$0xff] %v238_v6  ;;  %241 = vst [vmem:[%s10117_s25 + $0x38] sm:$0xff] %v240_v7  ;;  %v244_v9 = vld [vmem:[%s10112_s8 + $0x88] sm:$0xff]  ;;  %v246_v10 = vld [vmem:[%s10112_s8 + $0x90] sm:$0xff] }
  0x40   : > { %243 = vst [vmem:[%s10117_s25 + $0x40] sm:$0xff] %v242_v8  ;;  %v248_v11 = vld [vmem:[%s10112_s8 + $0x98] sm:$0xff]  ;;  %245 = vst [vmem:[%s10117_s25 + $0x48] sm:$0xff] %v244_v9  ;;  %v250_v12 = vld [vmem:[%s10112_s8 + $0xc0] sm:$0xff] }
  0x41   : > { %247 = vst [vmem:[%s10117_s25 + $0x50] sm:$0xff] %v246_v10  ;;  %249 = vst [vmem:[%s10117_s25 + $0x58] sm:$0xff] %v248_v11  ;;  %v252_v13 = vld [vmem:[%s10112_s8 + $0xc8] sm:$0xff]  ;;  %v254_v14 = vld [vmem:[%s10112_s8 + $0xd0] sm:$0xff] }
  0x42   : > { %251 = vst [vmem:[%s10117_s25 + $0x60] sm:$0xff] %v250_v12  ;;  %253 = vst [vmem:[%s10117_s25 + $0x68] sm:$0xff] %v252_v13  ;;  %v256_v15 = vld [vmem:[%s10112_s8 + $0xd8] sm:$0xff]  ;;  %v258_v16 = vld [vmem:[%s10112_s8 + $0x100] sm:$0xff] }
  0x43   : > { %255 = vst [vmem:[%s10117_s25 + $0x70] sm:$0xff] %v254_v14  ;;  %v260_v17 = vld [vmem:[%s10112_s8 + $0x108] sm:$0xff]  ;;  %257 = vst [vmem:[%s10117_s25 + $0x78] sm:$0xff] %v256_v15  ;;  %v262_v18 = vld [vmem:[%s10112_s8 + $0x110] sm:$0xff] }
  0x44   : > { %259 = vst [vmem:[%s10117_s25 + $0x80] sm:$0xff] %v258_v16  ;;  %261 = vst [vmem:[%s10117_s25 + $0x88] sm:$0xff] %v260_v17  ;;  %v264_v19 = vld [vmem:[%s10112_s8 + $0x118] sm:$0xff]  ;;  %v266_v20 = vld [vmem:[%s10112_s8 + $0x140] sm:$0xff] }
  0x45   : > { %263 = vst [vmem:[%s10117_s25 + $0x90] sm:$0xff] %v262_v18  ;;  %265 = vst [vmem:[%s10117_s25 + $0x98] sm:$0xff] %v264_v19  ;;  %v268_v21 = vld [vmem:[%s10112_s8 + $0x148] sm:$0xff]  ;;  %v270_v22 = vld [vmem:[%s10112_s8 + $0x150] sm:$0xff] }
  0x46   : > { %267 = vst [vmem:[%s10117_s25 + $0xa0] sm:$0xff] %v266_v20  ;;  %v272_v23 = vld [vmem:[%s10112_s8 + $0x158] sm:$0xff]  ;;  %269 = vst [vmem:[%s10117_s25 + $0xa8] sm:$0xff] %v268_v21  ;;  %v274_v24 = vld [vmem:[%s10112_s8 + $0x180] sm:$0xff] }
  0x47   : > { %271 = vst [vmem:[%s10117_s25 + $0xb0] sm:$0xff] %v270_v22  ;;  %273 = vst [vmem:[%s10117_s25 + $0xb8] sm:$0xff] %v272_v23  ;;  %v276_v25 = vld [vmem:[%s10112_s8 + $0x188] sm:$0xff]  ;;  %v278_v26 = vld [vmem:[%s10112_s8 + $0x190] sm:$0xff] }
  0x48   : > { %275 = vst [vmem:[%s10117_s25 + $0xc0] sm:$0xff] %v274_v24  ;;  %277 = vst [vmem:[%s10117_s25 + $0xc8] sm:$0xff] %v276_v25  ;;  %v280_v27 = vld [vmem:[%s10112_s8 + $0x198] sm:$0xff]  ;;  %v282_v28 = vld [vmem:[%s10112_s8 + $0x1c0] sm:$0xff] }
  0x49   : > { %279 = vst [vmem:[%s10117_s25 + $0xd0] sm:$0xff] %v278_v26  ;;  %v284_v29 = vld [vmem:[%s10112_s8 + $0x1c8] sm:$0xff]  ;;  %281 = vst [vmem:[%s10117_s25 + $0xd8] sm:$0xff] %v280_v27  ;;  %v286_v30 = vld [vmem:[%s10112_s8 + $0x1d0] sm:$0xff] }
  0x4a   : > { %283 = vst [vmem:[%s10117_s25 + $0xe0] sm:$0xff] %v282_v28  ;;  %285 = vst [vmem:[%s10117_s25 + $0xe8] sm:$0xff] %v284_v29  ;;  %v288_v31 = vld [vmem:[%s10112_s8 + $0x1d8] sm:$0xff] }
  0x4b   : > { %287 = vst [vmem:[%s10117_s25 + $0xf0] sm:$0xff] %v286_v30  ;;  %289 = vst [vmem:[%s10117_s25 + $0xf8] sm:$0xff] %v288_v31 }
  0x4c PF: > { %p16420_p4 = scmp.ne.s32.totalorder %s16416_s30, 0 }
  0x4e   : > { %306 = sbr.rel (%p16420_p4) target bundleno = 1819 (0x71b), region = 55 }
  0x55   : > { %p16421_p5 = scmp.ne.s32.totalorder %s16417_s5, 0 }
  0x57   : > { %9946 = dma.done.wait (%p16421_p5), [#allocation3], 4096  }
  0x58   : > { %9948 = vsyncadd (%p16421_p5), [#allocation3], 4294963200  ;;  %s313_s7 = sand.u32 1, %s9959_s16   ;;  %v16281_v32 = vmov 0   ;;  %v9288_v7 = vld [vmem:[#allocation2] sm:$0xff]   ;;  %vm781_vm0 = vcmask 523264  }
  0x59   : > { %s10189_s21 = sshll.u32 %s313_s7, 8  ;;  %910 = vmatprep.mubr.bf16.mxu0 %v16281_v32  ;;  %1263 = vmatprep.mubr.bf16.mxu1 %v16281_v32  ;;  %v2290_v17 = vld [vmem:[%s16275_s3] sm:$0xff]  ;;  %v2292_v19 = vld [vmem:[%s16275_s3 + $0x10] sm:$0xff]  ;;  %v9289_v20 = vld [vmem:[#allocation2 + $0x8] sm:$0xff]   ;;  %s9014_s5 = sshll.u32 %s9967_s18, 3  ;;  %vm8349_vm6 = vcmask 1041409  }
  0x5a   : > { %9286 = vset.pattern.permute.xlu0 %v16281_v32  ;;  %9287 = vset.pattern.permute.xlu1 %v16281_v32  ;;  %s10196_s30 = scalar_lea.vmem [#allocation5], %s10189_s21  ;;  %v2291_v21 = vld [vmem:[%s16275_s3 + $0x8] sm:$0xff]  ;;  %v2293_v22 = vld [vmem:[%s16275_s3 + $0x18] sm:$0xff]  ;;  %v2294_v23 = vld [vmem:[%s16275_s3 + $0x20] sm:$0xff]  ;;  %p351_p11 = scmp.lt.s32.totalorder %s9014_s5, 15  ;;  %vm8352_vm10 = vcmask 1042434  }
  0x5b   : > { %v429_v33 = vld [vmem:[%s10196_s30] sm:$0xff]  ;;  %v430_v35 = vld [vmem:[%s10196_s30 + $0x8] sm:$0xff]  ;;  %v431_v60 = vld [vmem:[%s10196_s30 + $0x10] sm:$0xff]  ;;  %2356 = vperm.xlu0 %9286, %v2290_v17   ;;  %2366 = vperm.xlu1 %9287, %v2292_v19   ;;  %vm8355_vm15 = vcmask 1043459   ;;  %s11470_s10 = scalar_lea.vmem [#allocation6], %s10189_s21  ;;  %p17568_p13 = scmp.ne.s32.totalorder %s16414_s26, 0 }
  0x5c   : > { %v433_v34 = vld [vmem:[%s10196_s30 + $0x20] sm:$0xff]  ;;  %v434_v37 = vld [vmem:[%s10196_s30 + $0x28] sm:$0xff]  ;;  %v435_v63 = vld [vmem:[%s10196_s30 + $0x30] sm:$0xff]  ;;  %s17578_s5 = smov (!%p351_p11, %s9014_s5), 15  ;;  %s8884_s14 = sshll.u32 %s11470_s10, 4  ;;  %s16219_s14 = int_to_ptr.vmem [resolvable:$true] %s8884_s14 }
  0x5d   : > { %v9048_v36 = vcombine.high %v429_v33, %v433_v34  ;;  %v9047_v38 = vcombine.low %v429_v33, %v433_v34  ;;  %v437_v39 = vld [vmem:[%s10196_s30 + $0x40] sm:$0xff]  ;;  %v9050_v41 = vcombine.high %v430_v35, %v434_v37  ;;  %v9049_v42 = vcombine.low %v430_v35, %v434_v37  ;;  %v438_v44 = vld [vmem:[%s10196_s30 + $0x48] sm:$0xff]  ;;  %v432_v1 = vld [vmem:[%s10196_s30 + $0x18] sm:$0xff]  ;;  %s10521_s12 = scalar_lea.vmem %s16274_s2, %s17578_s5  ;;  %s9893_s22 = scalar_lea.vmem %s16219_s14, 4096 }
  0x5e   : > { %v441_v40 = vld [vmem:[%s10196_s30 + $0x60] sm:$0xff]  ;;  %v442_v45 = vld [vmem:[%s10196_s30 + $0x68] sm:$0xff]  ;;  %v436_v2 = vld [vmem:[%s10196_s30 + $0x38] sm:$0xff]  ;;  %v9052_v5 = vcombine.high %v431_v60, %v435_v63  ;;  %v9051_v9 = vcombine.low %v431_v60, %v435_v63  ;;  %p9894_p12 = scmp.ne.s32.totalorder %s16219_s14, %s9893_s22  ;;  %s9981_s24 = smov [#allocation6]  }
  0x5f   : > { %v9056_v43 = vcombine.high %v437_v39, %v441_v40  ;;  %v445_v46 = vld [vmem:[%s10196_s30 + $0x80] sm:$0xff]  ;;  %878 = vmatprep.subr.bf16.mxu0 %v9048_v36  ;;  %v9058_v47 = vcombine.high %v438_v44, %v442_v45  ;;  %v446_v49 = vld [vmem:[%s10196_s30 + $0x88] sm:$0xff]  ;;  %1231 = vmatprep.subr.bf16.mxu1 %v9050_v41  ;;  %v9055_v51 = vcombine.low %v437_v39, %v441_v40  ;;  %v439_v8 = vld [vmem:[%s10196_s30 + $0x50] sm:$0xff]  ;;  %s9897_s27 = sshll.u32 %s9981_s24, 4  ;;  %s9898_s27 = int_to_ptr.vmem [resolvable:$false] %s9897_s27 }
  0x60   : > { %v449_v48 = vld [vmem:[%s10196_s30 + $0xa0] sm:$0xff]  ;;  %v450_v50 = vld [vmem:[%s10196_s30 + $0xa8] sm:$0xff]  ;;  %879 = vmatpush1.bf16.msra.mxu0 %v9047_v38  ;;  %1232 = vmatpush1.bf16.msra.mxu1 %v9049_v42  ;;  %v9057_v52 = vcombine.low %v438_v44, %v442_v45  ;;  %v9054_v6 = vcombine.high %v432_v1, %v436_v2  ;;  %v443_v10 = vld [vmem:[%s10196_s30 + $0x70] sm:$0xff]  ;;  %v9053_v13 = vcombine.low %v432_v1, %v436_v2  ;;  %p9895_p1 = pnand %p9894_p12, %p17568_p13  ;;  %s9899_s6 = scalar_lea.vmem %s9898_s27, 8192 }
  0x61   : > { %880 = vmatprep.subr.bf16.mxu0 %v9056_v43  ;;  %v9064_v53 = vcombine.high %v445_v46, %v449_v48  ;;  %1233 = vmatprep.subr.bf16.mxu1 %v9058_v47  ;;  %v9066_v54 = vcombine.high %v446_v49, %v450_v50  ;;  %v453_v55 = vld [vmem:[%s10196_s30 + $0xc0] sm:$0xff]  ;;  %v454_v57 = vld [vmem:[%s10196_s30 + $0xc8] sm:$0xff]  ;;  %v9063_v59 = vcombine.low %v445_v46, %v449_v48  ;;  %v440_v11 = vld [vmem:[%s10196_s30 + $0x58] sm:$0xff]  ;;  %p9900_p7 = scmp.lt.s32.totalorder %s16219_s14, %s9898_s27  ;;  %p9901_p8 = scmp.lt.s32.totalorder %s9899_s6, %s9893_s22 }
  0x62   : > { %v457_v56 = vld [vmem:[%s10196_s30 + $0xe0] sm:$0xff]  ;;  %v458_v58 = vld [vmem:[%s10196_s30 + $0xe8] sm:$0xff]  ;;  %v9065_v61 = vcombine.low %v446_v49, %v450_v50  ;;  %v444_v12 = vld [vmem:[%s10196_s30 + $0x78] sm:$0xff]  ;;  %v9060_v14 = vcombine.high %v439_v8, %v443_v10  ;;  %v9059_v16 = vcombine.low %v439_v8, %v443_v10  ;;  %2361 = vperm.xlu0 %9286, %v2291_v21   ;;  %2371 = vperm.xlu1 %9287, %v2293_v22   ;;  %p9896_p6 = pneg %p9895_p1 }
  0x63   : > { %v9072_v62 = vcombine.high %v453_v55, %v457_v56  ;;  %v9074_v0 = vcombine.high %v454_v57, %v458_v58  ;;  %v9071_v3 = vcombine.low %v453_v55, %v457_v56  ;;  %v9073_v4 = vcombine.low %v454_v57, %v458_v58  ;;  %v447_v24 = vld [vmem:[%s10196_s30 + $0x90] sm:$0xff]  ;;  %v448_v26 = vld [vmem:[%s10196_s30 + $0x98] sm:$0xff]  ;;  %v2295_v27 = vld [vmem:[%s16275_s3 + $0x28] sm:$0xff]  ;;  %p9902_p9 = por %p9901_p8, %p9900_p7 }
  0x64   : > { %881 = vmatpush1.bf16.msra.mxu0 %v9055_v51  ;;  %1234 = vmatpush1.bf16.msra.mxu1 %v9057_v52  ;;  %v9062_v15 = vcombine.high %v440_v11, %v444_v12  ;;  %v9061_v18 = vcombine.low %v440_v11, %v444_v12  ;;  %v451_v25 = vld [vmem:[%s10196_s30 + $0xb0] sm:$0xff]  ;;  %v452_v30 = vld [vmem:[%s10196_s30 + $0xb8] sm:$0xff]  ;;  %v2298_v37 = vld [vmem:[%s16275_s3 + $0x40] sm:$0xff] }
  0x65   : > { %882 = vmatprep.subr.bf16.mxu0 %v9064_v53  ;;  %1235 = vmatprep.subr.bf16.mxu1 %v9066_v54  ;;  %v9067_v28 = vcombine.low %v447_v24, %v451_v25  ;;  %v9068_v29 = vcombine.high %v447_v24, %v451_v25  ;;  %v9290_v31 = vld [vmem:[#allocation2 + $0x10] sm:$0xff]   ;;  %v9069_v33 = vcombine.low %v448_v26, %v452_v30  ;;  %v2297_v36 = vld [vmem:[%s16275_s3 + $0x38] sm:$0xff]  ;;  %v2299_v39 = vld [vmem:[%s16275_s3 + $0x48] sm:$0xff]  ;;  %p9903_p10 = pnand %p9902_p9, %p9896_p6 }
  0x66   : > { %2376 = vperm.xlu0 %9286, %v2294_v23   ;;  %v9070_v34 = vcombine.high %v448_v26, %v452_v30  ;;  %v2296_v35 = vld [vmem:[%s16275_s3 + $0x30] sm:$0xff]  ;;  %2381 = vperm.xlu1 %9287, %v2295_v27   ;;  %v9291_v38 = vld [vmem:[#allocation2 + $0x18] sm:$0xff]   ;;  %v2302_v42 = vld [vmem:[%s16275_s3 + $0x60] sm:$0xff] }
  0x67   : > { %v2300_v40 = vld [vmem:[%s16275_s3 + $0x50] sm:$0xff]  ;;  %v2301_v41 = vld [vmem:[%s16275_s3 + $0x58] sm:$0xff]  ;;  %v2303_v43 = vld [vmem:[%s16275_s3 + $0x68] sm:$0xff] }
  0x68   : > { %883 = vmatpush1.bf16.msra.mxu0 %v9063_v59  ;;  %1236 = vmatpush1.bf16.msra.mxu1 %v9065_v61  ;;  %v9292_v44 = vld [vmem:[#allocation2 + $0x20] sm:$0xff]   ;;  %v2304_v45 = vld [vmem:[%s16275_s3 + $0x70] sm:$0xff]  ;;  %v2305_v46 = vld [vmem:[%s16275_s3 + $0x78] sm:$0xff] }
  0x69   : > { %884 = vmatprep.subr.bf16.mxu0 %v9072_v62  ;;  %1237 = vmatprep.subr.bf16.mxu1 %v9074_v0  ;;  %v2306_v47 = vld [vmem:[%s16275_s3 + $0x80] sm:$0xff]  ;;  %v2307_v48 = vld [vmem:[%s16275_s3 + $0x88] sm:$0xff]  ;;  %v2308_v50 = vld [vmem:[%s16275_s3 + $0x90] sm:$0xff] }
  0x6a   : > { %2386 = vperm.xlu0 %9286, %v2296_v35   ;;  %2391 = vperm.xlu1 %9287, %v2297_v36   ;;  %v9293_v49 = vld [vmem:[#allocation2 + $0x28] sm:$0xff]   ;;  %v2309_v51 = vld [vmem:[%s16275_s3 + $0x98] sm:$0xff]  ;;  %v2310_v52 = vld [vmem:[%s16275_s3 + $0xa0] sm:$0xff] }
  0x6b   : > { %v2311_v53 = vld [vmem:[%s16275_s3 + $0xa8] sm:$0xff]  ;;  %v9294_v54 = vld [vmem:[#allocation2 + $0x30] sm:$0xff]   ;;  %v2313_v56 = vld [vmem:[%s16275_s3 + $0xb8] sm:$0xff] }
  0x6c   : > { %885 = vmatpush1.bf16.msra.mxu0 %v9071_v3  ;;  %1238 = vmatpush1.bf16.msra.mxu1 %v9073_v4  ;;  %v2312_v55 = vld [vmem:[%s16275_s3 + $0xb0] sm:$0xff]  ;;  %v2314_v57 = vld [vmem:[%s16275_s3 + $0xc0] sm:$0xff]  ;;  %v2315_v58 = vld [vmem:[%s16275_s3 + $0xc8] sm:$0xff] }
  0x6d   : > { %1584 = vmatprep.subr.bf16.mxu0 %v9052_v5  ;;  %1937 = vmatprep.subr.bf16.mxu1 %v9054_v6  ;;  %v9295_v59 = vld [vmem:[#allocation2 + $0x38] sm:$0xff]   ;;  %v2316_v60 = vld [vmem:[%s16275_s3 + $0xd0] sm:$0xff]  ;;  %v9296_v62 = vld [vmem:[#allocation2 + $0x40] sm:$0xff]  }
  0x6e   : > { %2396 = vperm.xlu0 %9286, %v2298_v37   ;;  %2401 = vperm.xlu1 %9287, %v2299_v39   ;;  %v2317_v61 = vld [vmem:[%s16275_s3 + $0xd8] sm:$0xff]  ;;  %v455_v63 = vld [vmem:[%s10196_s30 + $0xd0] sm:$0xff]  ;;  %v2318_v5 = vld [vmem:[%s16275_s3 + $0xe0] sm:$0xff] }
  0x6f   : > { %9079 = vmatmul.mubr.msk.bf16.vlgmr.msra.gmra.mrb[0].mxu0 %vm781_vm0, %v9288_v7  ;;  %9111 = vmatmul.mubr.msk.bf16.vlgmr.msra.gmra.mrb[0].mxu1 %vm781_vm0, %v9288_v7  ;;  %v459_v0 = vld [vmem:[%s10196_s30 + $0xf0] sm:$0xff]  ;;  %v456_v1 = vld [vmem:[%s10196_s30 + $0xd8] sm:$0xff]  ;;  %v2319_v6 = vld [vmem:[%s16275_s3 + $0xe8] sm:$0xff] }
  0x70   : > { %1585 = vmatpush1.bf16.msra.mxu0 %v9051_v9  ;;  %1938 = vmatpush1.bf16.msra.mxu1 %v9053_v13  ;;  %v9075_v2 = vcombine.low %v455_v63, %v459_v0  ;;  %v9076_v3 = vcombine.high %v455_v63, %v459_v0  ;;  %v460_v4 = vld [vmem:[%s10196_s30 + $0xf8] sm:$0xff]  ;;  %v9297_v9 = vld [vmem:[#allocation2 + $0x48] sm:$0xff]   ;;  %v2320_v10 = vld [vmem:[%s16275_s3 + $0xf0] sm:$0xff] }
  0x71   : > { %920 = vmatprep.mubr.bf16.mxu0 %v16281_v32  ;;  %1273 = vmatprep.mubr.bf16.mxu1 %v16281_v32  ;;  %v9077_v7 = vcombine.low %v456_v1, %v460_v4  ;;  %v9078_v8 = vcombine.high %v456_v1, %v460_v4  ;;  %v2321_v11 = vld [vmem:[%s16275_s3 + $0xf8] sm:$0xff]  ;;  %v9298_v12 = vld [vmem:[#allocation2 + $0x50] sm:$0xff]   ;;  %v9300_v17 = vld [vmem:[#allocation2 + $0x60] sm:$0xff]  }
  0x72   : > { %1586 = vmatprep.subr.bf16.mxu0 %v9060_v14  ;;  %1939 = vmatprep.subr.bf16.mxu1 %v9062_v15  ;;  %v9299_v13 = vld [vmem:[#allocation2 + $0x58] sm:$0xff]   ;;  %v2322_v14 = vld [vmem:[%s16275_s3 + $0x100] sm:$0xff]  ;;  %v2323_v15 = vld [vmem:[%s16275_s3 + $0x108] sm:$0xff] }
  0x73   : > { %2406 = vperm.xlu0 %9286, %v2300_v40   ;;  %2411 = vperm.xlu1 %9287, %v2301_v41   ;;  %v2340_v19 = vld [vmem:[%s16275_s3 + $0x190] sm:$0xff]  ;;  %v2341_v21 = vld [vmem:[%s16275_s3 + $0x198] sm:$0xff]  ;;  %v2326_v22 = vld [vmem:[%s16275_s3 + $0x120] sm:$0xff] }
  0x74   : > { %1587 = vmatpush1.bf16.msra.mxu0 %v9059_v16  ;;  %1940 = vmatpush1.bf16.msra.mxu1 %v9061_v18  ;;  %v2324_v16 = vld [vmem:[%s16275_s3 + $0x110] sm:$0xff]  ;;  %v2325_v18 = vld [vmem:[%s16275_s3 + $0x118] sm:$0xff]  ;;  %v2327_v24 = vld [vmem:[%s16275_s3 + $0x128] sm:$0xff] }
  0x75   : > { %1588 = vmatprep.subr.bf16.mxu0 %v9068_v29  ;;  %1941 = vmatprep.subr.bf16.mxu1 %v9070_v34  ;;  %v9302_v23 = vld [vmem:[#allocation2 + $0x70] sm:$0xff]   ;;  %v2342_v25 = vld [vmem:[%s16275_s3 + $0x1a0] sm:$0xff]  ;;  %v9303_v26 = vld [vmem:[#allocation2 + $0x78] sm:$0xff]  }
  0x76   : > { %v9304_v27 = vld [vmem:[#allocation2 + $0x80] sm:$0xff]   ;;  %v2328_v29 = vld [vmem:[%s16275_s3 + $0x130] sm:$0xff]  ;;  %v9305_v30 = vld [vmem:[#allocation2 + $0x88] sm:$0xff]  }
  0x77   : > { %9080 = vmatmul.mubr.msk.bf16.gmra.mrb[4].mxu0 %vm781_vm0, %v9289_v20  ;;  %9112 = vmatmul.mubr.msk.bf16.gmra.mrb[4].mxu1 %vm781_vm0, %v9289_v20  ;;  %v9301_v20 = vld [vmem:[#allocation2 + $0x68] sm:$0xff]   ;;  %v9306_v34 = vld [vmem:[#allocation2 + $0x90] sm:$0xff]   ;;  %v9307_v35 = vld [vmem:[#allocation2 + $0x98] sm:$0xff]  }
  0x78   : > { %930 = vmatprep.mubr.bf16.mxu0 %v16281_v32  ;;  %1283 = vmatprep.mubr.bf16.mxu1 %v16281_v32  ;;  %v2339_v36 = vld [vmem:[%s16275_s3 + $0x188] sm:$0xff]  ;;  %v9308_v37 = vld [vmem:[#allocation2 + $0xa0] sm:$0xff]   ;;  %v2345_v39 = vld [vmem:[%s16275_s3 + $0x1b8] sm:$0xff] }
  0x79   : > { %1589 = vmatpush1.bf16.msra.mxu0 %v9067_v28  ;;  %1942 = vmatpush1.bf16.msra.mxu1 %v9069_v33  ;;  %v2343_v28 = vld [vmem:[%s16275_s3 + $0x1a8] sm:$0xff]  ;;  %v2338_v33 = vld [vmem:[%s16275_s3 + $0x180] sm:$0xff]  ;;  %v9315_v63 = vld [vmem:[#allocation2 + $0xd8] sm:$0xff]  }
  0x7a   : > { %2416 = vperm.xlu0 %9286, %v2302_v42   ;;  %2421 = vperm.xlu1 %9287, %v2303_v43   ;;  %v2330_v40 = vld [vmem:[%s16275_s3 + $0x140] sm:$0xff]  ;;  %v9309_v41 = vld [vmem:[#allocation2 + $0xa8] sm:$0xff]   ;;  %v9310_v43 = vld [vmem:[#allocation2 + $0xb0] sm:$0xff]  }
  0x7b   : > { %1590 = vmatprep.subr.bf16.mxu0 %v9076_v3  ;;  %1943 = vmatprep.subr.bf16.mxu1 %v9078_v8  ;;  %v2331_v42 = vld [vmem:[%s16275_s3 + $0x148] sm:$0xff] }
  0x7d   : > { %1591 = vmatpush1.bf16.msra.mxu0 %v9075_v2  ;;  %1944 = vmatpush1.bf16.msra.mxu1 %v9077_v7 }
  0x7e   : > { %2426 = vperm.xlu0 %9286, %v2304_v45   ;;  %2431 = vperm.xlu1 %9287, %v2305_v46   ;;  %v2346_v45 = vld [vmem:[%s16275_s3 + $0x1c0] sm:$0xff]  ;;  %v2347_v46 = vld [vmem:[%s16275_s3 + $0x1c8] sm:$0xff] }
  0x7f   : > { %9081 = vmatmul.mubr.msk.bf16.gmra.mrb[8].mxu0 %vm781_vm0, %v9290_v31  ;;  %9113 = vmatmul.mubr.msk.bf16.gmra.mrb[8].mxu1 %vm781_vm0, %v9290_v31  ;;  %v2329_v31 = vld [vmem:[%s16275_s3 + $0x138] sm:$0xff] }
  0x80   : > { %940 = vmatprep.mubr.bf16.mxu0 %v16281_v32  ;;  %1293 = vmatprep.mubr.bf16.mxu1 %v16281_v32 }
  0x82   : > { %2436 = vperm.xlu0 %9286, %v2306_v47   ;;  %2441 = vperm.xlu1 %9287, %v2307_v48   ;;  %v2332_v47 = vld [vmem:[%s16275_s3 + $0x150] sm:$0xff]  ;;  %v9312_v48 = vld [vmem:[#allocation2 + $0xc0] sm:$0xff]  }
  0x86   : > { %2446 = vperm.xlu0 %9286, %v2308_v50   ;;  %2451 = vperm.xlu1 %9287, %v2309_v51   ;;  %v9313_v50 = vld [vmem:[#allocation2 + $0xc8] sm:$0xff]   ;;  %v2348_v51 = vld [vmem:[%s16275_s3 + $0x1d0] sm:$0xff] }
  0x87   : > { %9082 = vmatmul.mubr.msk.bf16.gmra.mrb[12].mxu0 %vm781_vm0, %v9291_v38  ;;  %9114 = vmatmul.mubr.msk.bf16.gmra.mrb[12].mxu1 %vm781_vm0, %v9291_v38  ;;  %v2344_v38 = vld [vmem:[%s16275_s3 + $0x1b0] sm:$0xff] }
  0x88   : > { %950 = vmatprep.mubr.bf16.mxu0 %v16281_v32  ;;  %1303 = vmatprep.mubr.bf16.mxu1 %v16281_v32 }
  0x8a   : > { %2456 = vperm.xlu0 %9286, %v2310_v52   ;;  %2461 = vperm.xlu1 %9287, %v2311_v53   ;;  %v9314_v52 = vld [vmem:[#allocation2 + $0xd0] sm:$0xff]   ;;  %v2349_v53 = vld [vmem:[%s16275_s3 + $0x1d8] sm:$0xff] }
  0x8e   : > { %2466 = vperm.xlu0 %9286, %v2312_v55   ;;  %2471 = vperm.xlu1 %9287, %v2313_v56   ;;  %v5236_v55 = vlaneseq  ;;  %v2334_v56 = vld [vmem:[%s16275_s3 + $0x160] sm:$0xff] }
  0x8f   : > { %9083 = vmatmul.mubr.msk.bf16.gmra.mrb[16].mxu0 %vm781_vm0, %v9292_v44  ;;  %9115 = vmatmul.mubr.msk.bf16.gmra.mrb[16].mxu1 %vm781_vm0, %v9292_v44  ;;  %v9311_v44 = vld [vmem:[#allocation2 + $0xb8] sm:$0xff]  }
  0x90   : > { %960 = vmatprep.mubr.bf16.mxu0 %v16281_v32  ;;  %1313 = vmatprep.mubr.bf16.mxu1 %v16281_v32 }
  0x92   : > { %2476 = vperm.xlu0 %9286, %v2314_v57   ;;  %2481 = vperm.xlu1 %9287, %v2315_v58   ;;  %v10510_v57 = vshrl.u32 %v5236_v55, 7 }
  0x94   : > { %16423 = vst [vmem:[#allocation10_spill] sm:$0xff] %v10510_v57  ;;  %v5238_v2 = vsub.s32 0, %v10510_v57  ;;  %v5242_v8 = vsub.s32 1, %v10510_v57 }
  0x96   : > { %2486 = vperm.xlu0 %9286, %v2316_v60   ;;  %2491 = vperm.xlu1 %9287, %v2317_v61  }
  0x97   : > { %9084 = vmatmul.mubr.msk.bf16.gmra.mrb[20].mxu0 %vm781_vm0, %v9293_v49  ;;  %9116 = vmatmul.mubr.msk.bf16.gmra.mrb[20].mxu1 %vm781_vm0, %v9293_v49  ;;  %v2333_v49 = vld [vmem:[%s16275_s3 + $0x158] sm:$0xff] }
  0x98   : > { %970 = vmatprep.mubr.bf16.mxu0 %v16281_v32  ;;  %1323 = vmatprep.mubr.bf16.mxu1 %v16281_v32 }
  0x9a   : > { %2496 = vperm.xlu0 %9286, %v2318_v5   ;;  %2501 = vperm.xlu1 %9287, %v2319_v6   ;;  %v5246_v6 = vsub.s32 2, %v10510_v57 }
  0x9e   : > { %2506 = vperm.xlu0 %9286, %v2320_v10   ;;  %2511 = vperm.xlu1 %9287, %v2321_v11   ;;  %v5234_v11 = vld [vmem:[%s10521_s12] sm:$0xff] }
  0x9f   : > { %9085 = vmatmul.mubr.msk.bf16.gmra.mrb[24].mxu0 %vm781_vm0, %v9294_v54  ;;  %9117 = vmatmul.mubr.msk.bf16.gmra.mrb[24].mxu1 %vm781_vm0, %v9294_v54 }
  0xa0   : > { %980 = vmatprep.mubr.bf16.mxu0 %v16281_v32  ;;  %1333 = vmatprep.mubr.bf16.mxu1 %v16281_v32 }
  0xa2   : > { %2516 = vperm.xlu0 %9286, %v2322_v14   ;;  %2521 = vperm.xlu1 %9287, %v2323_v15  }
  0xa6   : > { %2526 = vperm.xlu0 %9286, %v2324_v16   ;;  %2531 = vperm.xlu1 %9287, %v2325_v18   ;;  %v5250_v18 = vsub.s32 3, %v10510_v57 }
  0xa7   : > { %9086 = vmatmul.mubr.msk.bf16.gmra.mrb[28].mxu0 %vm781_vm0, %v9295_v59  ;;  %9118 = vmatmul.mubr.msk.bf16.gmra.mrb[28].mxu1 %vm781_vm0, %v9295_v59 }
  0xa8   : > { %990 = vmatprep.mubr.bf16.mxu0 %v16281_v32  ;;  %1343 = vmatprep.mubr.bf16.mxu1 %v16281_v32 }
  0xaa   : > { %2606 = vperm.xlu0 %9286, %v2340_v19   ;;  %2611 = vperm.xlu1 %9287, %v2341_v21   ;;  %v2335_v21 = vld [vmem:[%s16275_s3 + $0x168] sm:$0xff] }
  0xae   : > { %2536 = vperm.xlu0 %9286, %v2326_v22   ;;  %2541 = vperm.xlu1 %9287, %v2327_v24  }
  0xaf   : > { %9087 = vmatmul.mubr.msk.bf16.gmra.mrb[32].mxu0 %vm781_vm0, %v9296_v62  ;;  %9119 = vmatmul.mubr.msk.bf16.gmra.mrb[32].mxu1 %vm781_vm0, %v9296_v62 }
  0xb0   : > { %1000 = vmatprep.mubr.bf16.mxu0 %v16281_v32  ;;  %1353 = vmatprep.mubr.bf16.mxu1 %v16281_v32 }
  0xb2   : > { %2616 = vperm.xlu0 %9286, %v2342_v25   ;;  %2621 = vperm.xlu1 %9287, %v2343_v28   ;;  %v10547_v28 = vrot.slane %v5234_v11, %v5242_v8  ;;  %v2350_v8 = vld [vmem:[%s16275_s3 + $0x1e0] sm:$0xff] }
  0xb6   : > { %2546 = vperm.xlu0 %9286, %v2328_v29   ;;  %2551 = vperm.xlu1 %9287, %v2329_v31  }
  0xb7   : > { %9088 = vmatmul.mubr.msk.bf16.gmra.mrb[36].mxu0 %vm781_vm0, %v9297_v9  ;;  %9120 = vmatmul.mubr.msk.bf16.gmra.mrb[36].mxu1 %vm781_vm0, %v9297_v9 }
  0xb8   : > { %1010 = vmatprep.mubr.bf16.mxu0 %v16281_v32  ;;  %1363 = vmatprep.mubr.bf16.mxu1 %v16281_v32 }
  0xba   : > { %2596 = vperm.xlu0 %9286, %v2338_v33   ;;  %2601 = vperm.xlu1 %9287, %v2339_v36  }
  0xbe   : > { %2626 = vperm.xlu0 %9286, %v2344_v38   ;;  %2631 = vperm.xlu1 %9287, %v2345_v39   ;;  %v9316_v38 = vld [vmem:[#allocation2 + $0xe0] sm:$0xff]  }
  0xbf   : > { %9089 = vmatmul.mubr.msk.bf16.gmra.mrb[40].mxu0 %vm781_vm0, %v9298_v12  ;;  %9121 = vmatmul.mubr.msk.bf16.gmra.mrb[40].mxu1 %vm781_vm0, %v9298_v12 }
  0xc0   : > { %1020 = vmatprep.mubr.bf16.mxu0 %v16281_v32  ;;  %1373 = vmatprep.mubr.bf16.mxu1 %v16281_v32 }
  0xc2   : > { %2556 = vperm.xlu0 %9286, %v2330_v40   ;;  %2561 = vperm.xlu1 %9287, %v2331_v42  }
  0xc6   : > { %2636 = vperm.xlu0 %9286, %v2346_v45   ;;  %2641 = vperm.xlu1 %9287, %v2347_v46  }
  0xc7   : > { %9090 = vmatmul.mubr.msk.bf16.gmra.mrb[44].mxu0 %vm781_vm0, %v9299_v13  ;;  %9122 = vmatmul.mubr.msk.bf16.gmra.mrb[44].mxu1 %vm781_vm0, %v9299_v13 }
  0xc8   : > { %1030 = vmatprep.mubr.bf16.mxu0 %v16281_v32  ;;  %1383 = vmatprep.mubr.bf16.mxu1 %v16281_v32 }
  0xca   : > { %2566 = vperm.xlu0 %9286, %v2332_v47   ;;  %2571 = vperm.xlu1 %9287, %v2333_v49  }
  0xce   : > { %2646 = vperm.xlu0 %9286, %v2348_v51   ;;  %2651 = vperm.xlu1 %9287, %v2349_v53  }
  0xcf   : > { %9091 = vmatmul.mubr.msk.bf16.gmra.mrb[48].mxu0 %vm781_vm0, %v9300_v17  ;;  %9123 = vmatmul.mubr.msk.bf16.gmra.mrb[48].mxu1 %vm781_vm0, %v9300_v17 }
  0xd0   : > { %1040 = vmatprep.mubr.bf16.mxu0 %v16281_v32  ;;  %1393 = vmatprep.mubr.bf16.mxu1 %v16281_v32 }
  0xd2   : > { %2576 = vperm.xlu0 %9286, %v2334_v56   ;;  %2581 = vperm.xlu1 %9287, %v2335_v21   ;;  %v2351_v21 = vld [vmem:[%s16275_s3 + $0x1e8] sm:$0xff] }
  0xd6   : > { %2656 = vperm.xlu0 %9286, %v2350_v8   ;;  %2661 = vperm.xlu1 %9287, %v2351_v21  }
  0xd7   : > { %9092 = vmatmul.mubr.msk.bf16.gmra.mrb[52].mxu0 %vm781_vm0, %v9301_v20  ;;  %9124 = vmatmul.mubr.msk.bf16.gmra.mrb[52].mxu1 %vm781_vm0, %v9301_v20 }
  0xd8   : > { %1050 = vmatprep.mubr.bf16.mxu0 %v16281_v32  ;;  %1403 = vmatprep.mubr.bf16.mxu1 %v16281_v32 }
  0xda   : > { %v10503_v54 = vpop.permute.xlu0 %2356  ;;  %v10514_v58 = vpop.permute.xlu1 %2366 }
  0xdb   : > { %16422 = vst [vmem:[#allocation9_spill] sm:$0xff] %v10503_v54  ;;  %16424 = vst [vmem:[#allocation11_spill] sm:$0xff] %v10514_v58 }
  0xdf   : > { %9093 = vmatmul.mubr.msk.bf16.gmra.mrb[56].mxu0 %vm781_vm0, %v9302_v23  ;;  %9125 = vmatmul.mubr.msk.bf16.gmra.mrb[56].mxu1 %vm781_vm0, %v9302_v23  ;;  %v10542_v23 = vrot.slane %v5234_v11, %v5238_v2 }
  0xe0   : > { %1060 = vmatprep.mubr.bf16.mxu0 %v16281_v32  ;;  %1413 = vmatprep.mubr.bf16.mxu1 %v16281_v32 }
  0xe1   : > { %v10516_v60 = vpop.permute.xlu0 %2361 }
  0xe2   : > { %16425 = vst [vmem:[#allocation12_spill] sm:$0xff] %v10516_v60 }
  0xe7   : > { %9094 = vmatmul.mubr.msk.bf16.gmra.mrb[60].mxu0 %vm781_vm0, %v9303_v26  ;;  %9126 = vmatmul.mubr.msk.bf16.gmra.mrb[60].mxu1 %vm781_vm0, %v9303_v26  ;;  %v10545_v26 = vrot.slane %v5234_v11, %v5246_v6 }
  0xe8   : > { %1070 = vmatprep.mubr.bf16.mxu0 %v16281_v32  ;;  %1423 = vmatprep.mubr.bf16.mxu1 %v16281_v32 }
  0xef   : > { %9095 = vmatmul.mubr.msk.bf16.gmra.mrb[64].mxu0 %vm781_vm0, %v9304_v27  ;;  %9127 = vmatmul.mubr.msk.bf16.gmra.mrb[64].mxu1 %vm781_vm0, %v9304_v27 }
  0xf0   : > { %1080 = vmatprep.mubr.bf16.mxu0 %v16281_v32  ;;  %1433 = vmatprep.mubr.bf16.mxu1 %v16281_v32 }
  0xf7   : > { %9096 = vmatmul.mubr.msk.bf16.gmra.mrb[68].mxu0 %vm781_vm0, %v9305_v30  ;;  %9128 = vmatmul.mubr.msk.bf16.gmra.mrb[68].mxu1 %vm781_vm0, %v9305_v30  ;;  %v10549_v30 = vpop.permute.xlu1 %2371 }
  0xf8   : > { %1090 = vmatprep.mubr.bf16.mxu0 %v16281_v32  ;;  %1443 = vmatprep.mubr.bf16.mxu1 %v16281_v32  ;;  %16426 = vst [vmem:[#allocation13_spill] sm:$0xff] %v10549_v30 }
  0xff   : > { %9097 = vmatmul.mubr.msk.bf16.gmra.mrb[72].mxu0 %vm781_vm0, %v9306_v34  ;;  %9129 = vmatmul.mubr.msk.bf16.gmra.mrb[72].mxu1 %vm781_vm0, %v9306_v34  ;;  %v10551_v34 = vrot.slane %v5234_v11, %v5250_v18 }
 0x100   : > { %1100 = vmatprep.mubr.bf16.mxu0 %v16281_v32  ;;  %1453 = vmatprep.mubr.bf16.mxu1 %v16281_v32 }
 0x107   : > { %9098 = vmatmul.mubr.msk.bf16.gmra.mrb[76].mxu0 %vm781_vm0, %v9307_v35  ;;  %9130 = vmatmul.mubr.msk.bf16.gmra.mrb[76].mxu1 %vm781_vm0, %v9307_v35 }
 0x108   : > { %1110 = vmatprep.mubr.bf16.mxu0 %v16281_v32  ;;  %1463 = vmatprep.mubr.bf16.mxu1 %v16281_v32 }
 0x10f   : > { %9099 = vmatmul.mubr.msk.bf16.gmra.mrb[80].mxu0 %vm781_vm0, %v9308_v37  ;;  %9131 = vmatmul.mubr.msk.bf16.gmra.mrb[80].mxu1 %vm781_vm0, %v9308_v37 }
 0x110   : > { %1120 = vmatprep.mubr.bf16.mxu0 %v16281_v32  ;;  %1473 = vmatprep.mubr.bf16.mxu1 %v16281_v32 }
 0x117   : > { %9100 = vmatmul.mubr.msk.bf16.gmra.mrb[84].mxu0 %vm781_vm0, %v9309_v41  ;;  %9132 = vmatmul.mubr.msk.bf16.gmra.mrb[84].mxu1 %vm781_vm0, %v9309_v41 }
 0x118   : > { %1130 = vmatprep.mubr.bf16.mxu0 %v16281_v32  ;;  %1483 = vmatprep.mubr.bf16.mxu1 %v16281_v32 }
 0x11f   : > { %9101 = vmatmul.mubr.msk.bf16.gmra.mrb[88].mxu0 %vm781_vm0, %v9310_v43  ;;  %9133 = vmatmul.mubr.msk.bf16.gmra.mrb[88].mxu1 %vm781_vm0, %v9310_v43 }
 0x120   : > { %1140 = vmatprep.mubr.bf16.mxu0 %v16281_v32  ;;  %1493 = vmatprep.mubr.bf16.mxu1 %v16281_v32 }
 0x127   : > { %9102 = vmatmul.mubr.msk.bf16.gmra.mrb[92].mxu0 %vm781_vm0, %v9311_v44  ;;  %9134 = vmatmul.mubr.msk.bf16.gmra.mrb[92].mxu1 %vm781_vm0, %v9311_v44 }
 0x128   : > { %1150 = vmatprep.mubr.bf16.mxu0 %v16281_v32  ;;  %1503 = vmatprep.mubr.bf16.mxu1 %v16281_v32 }
 0x12f   : > { %9103 = vmatmul.mubr.msk.bf16.gmra.mrb[96].mxu0 %vm781_vm0, %v9312_v48  ;;  %9135 = vmatmul.mubr.msk.bf16.gmra.mrb[96].mxu1 %vm781_vm0, %v9312_v48 }
 0x130   : > { %1160 = vmatprep.mubr.bf16.mxu0 %v16281_v32  ;;  %1513 = vmatprep.mubr.bf16.mxu1 %v16281_v32 }
 0x137   : > { %9104 = vmatmul.mubr.msk.bf16.gmra.mrb[100].mxu0 %vm781_vm0, %v9313_v50  ;;  %9136 = vmatmul.mubr.msk.bf16.gmra.mrb[100].mxu1 %vm781_vm0, %v9313_v50 }
 0x138   : > { %1170 = vmatprep.mubr.bf16.mxu0 %v16281_v32  ;;  %1523 = vmatprep.mubr.bf16.mxu1 %v16281_v32 }
 0x13f   : > { %9105 = vmatmul.mubr.msk.bf16.gmra.mrb[104].mxu0 %vm781_vm0, %v9314_v52  ;;  %9137 = vmatmul.mubr.msk.bf16.gmra.mrb[104].mxu1 %vm781_vm0, %v9314_v52 }
 0x140   : > { %1180 = vmatprep.mubr.bf16.mxu0 %v16281_v32  ;;  %1533 = vmatprep.mubr.bf16.mxu1 %v16281_v32 }
 0x142   : > { %v912_v59 = vpop.f32.mrb[0].mxu0  ;;  %v1265_v61 = vpop.f32.mrb[0].mxu1 }
 0x143   : > { %v914_v62 = vpop.f32.mrb[1].mxu0  ;;  %v1267_v0 = vpop.f32.mrb[1].mxu1  ;;  %v2674_v3 = vadd.f32 %v10503_v54, %v912_v59  ;;  %v2676_v9 = vadd.f32 %v10503_v54, %v1265_v61 }
 0x144   : > { %v916_v1 = vpop.f32.mrb[2].mxu0  ;;  %v1269_v5 = vpop.f32.mrb[2].mxu1  ;;  %v2675_v10 = vadd.f32 %v10503_v54, %v914_v62  ;;  %v2677_v15 = vadd.f32 %v10503_v54, %v1267_v0  ;;  %v9832_v54 = vld [vmem:[#allocation2] sm:$0xff]  }
 0x145   : > { %v2682_v4 = vadd.f32 %v10516_v60, %v916_v1  ;;  %v918_v7 = vpop.f32.mrb[3].mxu0  ;;  %v2684_v12 = vadd.f32 %v10516_v60, %v1269_v5  ;;  %v1271_v14 = vpop.f32.mrb[3].mxu1 }
 0x146   : > { %v2683_v13 = vadd.f32 %v10516_v60, %v918_v7  ;;  %v2685_v17 = vadd.f32 %v10516_v60, %v1271_v14 }
 0x147   : > { %v3186_v16 = vmax.f32 %v2674_v3, %v2682_v4  ;;  %9106 = vmatmul.mubr.msk.bf16.gmra.mrb[108].mxu0 %vm781_vm0, %v9315_v63  ;;  %v3200_v19 = vmax.f32 %v2676_v9, %v2684_v12  ;;  %9138 = vmatmul.mubr.msk.bf16.gmra.mrb[108].mxu1 %vm781_vm0, %v9315_v63 }
 0x148   : > { %v3193_v20 = vmax.f32 %v2675_v10, %v2683_v13  ;;  %1190 = vmatprep.mubr.bf16.mxu0 %v16281_v32  ;;  %v3207_v24 = vmax.f32 %v2677_v15, %v2685_v17  ;;  %1543 = vmatprep.mubr.bf16.mxu1 %v16281_v32 }
 0x149   : > { %v3187_v22 = vrot.slane %v3186_v16, 4  ;;  %v3201_v25 = vrot.slane %v3200_v19, 4 }
 0x14a   : > { %v3194_v27 = vrot.slane %v3193_v20, 4  ;;  %v922_v29 = vpop.f32.mrb[4].mxu0  ;;  %v3208_v33 = vrot.slane %v3207_v24, 4  ;;  %v1275_v36 = vpop.f32.mrb[4].mxu1 }
 0x14b   : > { %v3188_v31 = vmax.f32 %v3186_v16, %v3187_v22  ;;  %v2690_v35 = vadd.f32 %v10514_v58, %v922_v29  ;;  %v924_v37 = vpop.f32.mrb[5].mxu0  ;;  %v3202_v39 = vmax.f32 %v3200_v19, %v3201_v25  ;;  %v2692_v41 = vadd.f32 %v10514_v58, %v1275_v36  ;;  %v1277_v43 = vpop.f32.mrb[5].mxu1 }
 0x14c   : > { %v3195_v40 = vmax.f32 %v3193_v20, %v3194_v27  ;;  %v2691_v42 = vadd.f32 %v10514_v58, %v924_v37  ;;  %v926_v44 = vpop.f32.mrb[6].mxu0  ;;  %v3209_v46 = vmax.f32 %v3207_v24, %v3208_v33  ;;  %v2693_v47 = vadd.f32 %v10514_v58, %v1277_v43  ;;  %v1279_v49 = vpop.f32.mrb[6].mxu1  ;;  %v9317_v20 = vld [vmem:[#allocation2 + $0xe8] sm:$0xff]  }
 0x14d   : > { %v3189_v45 = vrot.slane %v3188_v31, 2  ;;  %v2698_v48 = vadd.f32 %v10549_v30, %v926_v44  ;;  %v928_v50 = vpop.f32.mrb[7].mxu0  ;;  %v3203_v51 = vrot.slane %v3202_v39, 2  ;;  %v2700_v53 = vadd.f32 %v10549_v30, %v1279_v49  ;;  %v1281_v56 = vpop.f32.mrb[7].mxu1 }
 0x14e   : > { %v3196_v52 = vrot.slane %v3195_v40, 2  ;;  %v2699_v55 = vadd.f32 %v10549_v30, %v928_v50  ;;  %v3210_v61 = vrot.slane %v3209_v46, 2  ;;  %v2701_v63 = vadd.f32 %v10549_v30, %v1281_v56 }
 0x14f   : > { %v3190_v59 = vmax.f32 %v3188_v31, %v3189_v45  ;;  %v3242_v62 = vmax.f32 %v2690_v35, %v2698_v48  ;;  %9107 = vmatmul.mubr.msk.bf16.gmra.mrb[112].mxu0 %vm781_vm0, %v9316_v38  ;;  %v3204_v0 = vmax.f32 %v3202_v39, %v3203_v51  ;;  %v3256_v2 = vmax.f32 %v2692_v41, %v2700_v53 }
 0x150   : > { %v3197_v1 = vmax.f32 %v3195_v40, %v3196_v52  ;;  %v3249_v3 = vmax.f32 %v2691_v42, %v2699_v55  ;;  %9139 = vmatmul.mubr.msk.bf16.gmra.mrb[112].mxu1 %vm781_vm0, %v9316_v38  ;;  %v3211_v5 = vmax.f32 %v3209_v46, %v3210_v61  ;;  %v3263_v7 = vmax.f32 %v2693_v47, %v2701_v63  ;;  %v2336_v40 = vld [vmem:[%s16275_s3 + $0x170] sm:$0xff] }
 0x151   : > { %v3191_v4 = vrot.slane %v3190_v59, 1  ;;  %v3243_v6 = vrot.slane %v3242_v62, 4  ;;  %1200 = vmatprep.mubr.bf16.mxu0 %v16281_v32  ;;  %1553 = vmatprep.mubr.bf16.mxu1 %v16281_v32  ;;  %v3205_v9 = vrot.slane %v3204_v0, 1  ;;  %v3257_v11 = vrot.slane %v3256_v2, 4 }
 0x152   : > { %v3198_v10 = vrot.slane %v3197_v1, 1  ;;  %v3250_v12 = vrot.slane %v3249_v3, 4  ;;  %v10568_v13 = vpop.f32.mrb[8].mxu0  ;;  %v3212_v15 = vrot.slane %v3211_v5, 1  ;;  %v3264_v17 = vrot.slane %v3263_v7, 4  ;;  %v10570_v18 = vpop.f32.mrb[8].mxu1  ;;  %2586 = vperm.xlu0 %9286, %v2336_v40  }
 0x153   : > { %v3192_v14 = vmax.f32 %v3190_v59, %v3191_v4  ;;  %v3244_v16 = vmax.f32 %v3242_v62, %v3243_v6  ;;  %v10572_v19 = vpop.f32.mrb[9].mxu0  ;;  %v3206_v22 = vmax.f32 %v3204_v0, %v3205_v9  ;;  %v3258_v25 = vmax.f32 %v3256_v2, %v3257_v11  ;;  %v10577_v29 = vpop.f32.mrb[9].mxu1 }
 0x154   : > { %v3199_v24 = vmax.f32 %v3197_v1, %v3198_v10  ;;  %v3251_v27 = vmax.f32 %v3249_v3, %v3250_v12  ;;  %v10579_v31 = vpop.f32.mrb[10].mxu0  ;;  %v3213_v35 = vmax.f32 %v3211_v5, %v3212_v15  ;;  %v3265_v37 = vmax.f32 %v3263_v7, %v3264_v17  ;;  %v10581_v38 = vpop.f32.mrb[10].mxu1  ;;  %v9318_v3 = vld [vmem:[#allocation2 + $0xf0] sm:$0xff]  }
 0x155   : > { %v4978_v33 = vmax.f32 %v3192_v14, -2.3819763e+38  ;;  %v3245_v36 = vrot.slane %v3244_v16, 2  ;;  %v10583_v39 = vpop.f32.mrb[11].mxu0  ;;  %v4980_v41 = vmax.f32 %v3206_v22, -2.3819763e+38 }
 0x156   : > { %v4979_v42 = vmax.f32 %v3199_v24, -2.3819763e+38  ;;  %v3259_v43 = vrot.slane %v3258_v25, 2  ;;  %v3252_v44 = vrot.slane %v3251_v27, 2  ;;  %v4981_v46 = vmax.f32 %v3213_v35, -2.3819763e+38 }
 0x157   : > { %v5276_v45 = vadd.f32 %v10542_v23, %v4978_v33  ;;  %v10589_v47 = vpop.f32.mrb[11].mxu1  ;;  %9108 = vmatmul.mubr.msk.bf16.gmra.mrb[116].mxu0 %vm781_vm0, %v9317_v20  ;;  %v5278_v48 = vadd.f32 %v10545_v26, %v4980_v41  ;;  %v3246_v52 = vmax.f32 %v3244_v16, %v3245_v36  ;;  %v3266_v61 = vrot.slane %v3265_v37, 2 }
 0x158   : > { %v5277_v49 = vadd.f32 %v10547_v28, %v4979_v42  ;;  %9140 = vmatmul.mubr.msk.bf16.gmra.mrb[116].mxu1 %vm781_vm0, %v9317_v20  ;;  %v5279_v51 = vadd.f32 %v10551_v34, %v4981_v46  ;;  %v3260_v53 = vmax.f32 %v3258_v25, %v3259_v43  ;;  %1210 = vmatprep.mubr.bf16.mxu0 %v16281_v32  ;;  %v2337_v25 = vld [vmem:[%s16275_s3 + $0x178] sm:$0xff]  ;;  %v10639_v42 = vpop.permute.xlu0 %2376  ;;  %v10643_v46 = vpop.permute.xlu1 %2381 }
 0x159   : > { %v10595_v50 = vmax.f32 %v5276_v45, 0.0  ;;  %1563 = vmatprep.mubr.bf16.mxu1 %v16281_v32  ;;  %v10600_v55 = vmax.f32 %v5278_v48, 0.0  ;;  %v3253_v59 = vmax.f32 %v3251_v27, %v3252_v44  ;;  %v3247_v9 = vrot.slane %v3246_v52, 1  ;;  %16427 = vst [vmem:[#allocation14_spill] sm:$0xff] %v10639_v42  ;;  %2591 = vperm.xlu1 %9287, %v2337_v25   ;;  %16428 = vst [vmem:[#allocation15_spill] sm:$0xff] %v10643_v46 }
 0x15a   : > { %v10602_v56 = vmax.f32 %v5277_v49, 0.0  ;;  %v10604_v62 = vpop.f32.mrb[12].mxu0  ;;  %v10608_v1 = vmax.f32 %v5279_v51, 0.0  ;;  %v10610_v2 = vpop.f32.mrb[12].mxu1  ;;  %v3261_v10 = vrot.slane %v3260_v53, 1  ;;  %v3267_v15 = vmax.f32 %v3265_v37, %v3266_v61  ;;  %v9319_v49 = vld [vmem:[#allocation2 + $0xf8] sm:$0xff]  }
 0x15b   : > { %v5788_v63 = vadd.f32 1.0, %v10595_v50  ;;  %v5791_v0 = vmul.f32 -0.5, %v10595_v50  ;;  %v5806_v4 = vadd.f32 1.0, %v10600_v55  ;;  %v5809_v5 = vmul.f32 -0.5, %v10600_v55  ;;  %v10615_v7 = vpop.f32.mrb[13].mxu0  ;;  %v10618_v11 = vpop.f32.mrb[13].mxu1 }
 0x15c   : > { %v5797_v6 = vadd.f32 1.0, %v10602_v56  ;;  %v5800_v8 = vmul.f32 -0.5, %v10602_v56  ;;  %v10620_v12 = vpop.f32.mrb[14].mxu0  ;;  %v3254_v14 = vrot.slane %v3253_v59, 1  ;;  %v10622_v16 = vpop.f32.mrb[14].mxu1  ;;  %v5815_v21 = vadd.f32 1.0, %v10608_v1 }
 0x15d   : > { %9320 = vlog2.f32 %v5788_v63  ;;  %v5792_v17 = vadd.f32 1.0, %v5791_v0  ;;  %v5810_v20 = vadd.f32 1.0, %v5809_v5  ;;  %v10625_v22 = vpop.f32.mrb[15].mxu0  ;;  %v10627_v24 = vpop.f32.mrb[15].mxu1  ;;  %v5794_v27 = vand.u32 2147483647, %v10595_v50 }
 0x15e   : > { %9322 = vlog2.f32 %v5806_v4  ;;  %v5812_v33 = vand.u32 2147483647, %v10600_v55  ;;  %v5801_v35 = vadd.f32 1.0, %v5800_v8  ;;  %v5818_v36 = vmul.f32 -0.5, %v10608_v1 }
 0x15f   : > { %9324 = vlog2.f32 %v5797_v6  ;;  %9109 = vmatmul.mubr.msk.bf16.gmra.mrb[120].mxu0 %vm781_vm0, %v9318_v3  ;;  %v5803_v37 = vand.u32 2147483647, %v10602_v56  ;;  %v3248_v40 = vmax.f32 %v3246_v52, %v3247_v9  ;;  %v3262_v41 = vmax.f32 %v3260_v53, %v3261_v10 }
 0x160   : > { %9141 = vmatmul.mubr.msk.bf16.gmra.mrb[120].mxu1 %vm781_vm0, %v9318_v3  ;;  %1220 = vmatprep.mubr.bf16.mxu0 %v16281_v32  ;;  %9326 = vlog2.f32 %v5815_v21  ;;  %v5821_v43 = vand.u32 2147483647, %v10608_v1  ;;  %v3255_v44 = vmax.f32 %v3253_v59, %v3254_v14  ;;  %v3268_v45 = vrot.slane %v3267_v15, 1 }
 0x161   : > { %1573 = vmatprep.mubr.bf16.mxu1 %v16281_v32  ;;  %v10648_v51 = vmul.f32 %v5792_v17, %v10595_v50  ;;  %v10651_v52 = vmul.f32 %v5810_v20, %v10600_v55  ;;  %v4986_v53 = vmax.f32 %v3248_v40, -2.3819763e+38  ;;  %v4988_v61 = vmax.f32 %v3262_v41, -2.3819763e+38 }
 0x162   : > { %v10645_v48 = vpop.f32.mrb[16].mxu0  ;;  %v10653_v63 = vpop.f32.mrb[16].mxu1  ;;  %vm10657_vm1 = vcmp.lt.f32.partialorder %v5794_v27, 0.0004427343  ;;  %v10662_v3 = vmul.f32 %v5801_v35, %v10602_v56  ;;  %v5819_v4 = vadd.f32 1.0, %v5818_v36  ;;  %v3269_v50 = vmax.f32 %v3267_v15, %v3268_v45 }
 0x163   : > { %v10655_v0 = vpop.f32.mrb[17].mxu0  ;;  %v4987_v5 = vmax.f32 %v3255_v44, -2.3819763e+38  ;;  %v10664_v6 = vpop.f32.mrb[17].mxu1  ;;  %vm10668_vm2 = vcmp.lt.f32.partialorder %v5812_v33, 0.0004427343  ;;  %v5284_v10 = vadd.f32 %v10542_v23, %v4986_v53  ;;  %v5286_v56 = vadd.f32 %v10545_v26, %v4988_v61 }
 0x164   : > { %v10666_v55 = vpop.f32.mrb[18].mxu0  ;;  %vm10672_vm3 = vcmp.lt.f32.partialorder %v5803_v37, 0.0004427343  ;;  %v2706_v14 = vadd.f32 %v10639_v42, %v10568_v13  ;;  %v2714_v15 = vadd.f32 %v10643_v46, %v10579_v31  ;;  %v10682_v17 = vpop.f32.mrb[18].mxu1  ;;  %v4989_v25 = vmax.f32 %v3269_v50, -2.3819763e+38 }
 0x165   : > { %v10684_v20 = vpop.f32.mrb[19].mxu0  ;;  %v5285_v21 = vadd.f32 %v10547_v28, %v4987_v5  ;;  %v2708_v27 = vadd.f32 %v10639_v42, %v10570_v18  ;;  %v2716_v33 = vadd.f32 %v10643_v46, %v10581_v38  ;;  %v10691_v35 = vpop.f32.mrb[19].mxu1  ;;  %vm10693_vm4 = vcmp.lt.f32.partialorder %v5821_v43, 0.0004427343 }
 0x166   : > { %v5540_v31 = vmax.f32 %v5284_v10, 0.0  ;;  %v10697_v37 = vmax.f32 %v5286_v56, 0.0  ;;  %v3298_v40 = vmax.f32 %v2706_v14, %v2714_v15  ;;  %v2707_v18 = vadd.f32 %v10639_v42, %v10572_v19 }
 0x167   : > { %v9321_v36 = vpop.eup %9320  ;;  %9110 = vmatmul.mubr.msk.bf16.gmra.mrb[124].mxu0 %vm781_vm0, %v9319_v49  ;;  %v2709_v38 = vadd.f32 %v10639_v42, %v10577_v29  ;;  %v10706_v45 = vmax.f32 %v2708_v27, %v2716_v33  ;;  %v10712_v50 = vmax.f32 %v5285_v21, 0.0  ;;  %v5287_v56 = vadd.f32 %v10551_v34, %v4989_v25 }
 0x168   : > { %v9323_v41 = vpop.eup %9322  ;;  %v10700_v44 = vmul.f32 0.6931472, %v9321_v36  ;;  %9142 = vmatmul.mubr.msk.bf16.gmra.mrb[124].mxu1 %vm781_vm0, %v9319_v49  ;;  %1616 = vmatprep.mubr.bf16.mxu0 %v16281_v32  ;;  %v5860_v61 = vadd.f32 1.0, %v5540_v31  ;;  %v5863_v5 = vmul.f32 -0.5, %v5540_v31  ;;  %v5878_v19 = vadd.f32 1.0, %v10697_v37 }
 0x169   : > { %v9325_v43 = vpop.eup %9324  ;;  %v10710_v53 = vmul.f32 0.6931472, %v9323_v41  ;;  %1969 = vmatprep.mubr.bf16.mxu1 %v16281_v32  ;;  %v5881_v29 = vmul.f32 -0.5, %v10697_v37  ;;  %v10723_v15 = vmul.f32 %v5819_v4, %v10608_v1  ;;  %v5866_v21 = vand.u32 2147483647, %v5540_v31 }
 0x16a   : > { %v10715_v10 = vmul.f32 0.6931472, %v9325_v43  ;;  %v10720_v49 = vpop.f32.mrb[20].mxu0  ;;  %v9327_v14 = vpop.eup %9326  ;;  %9328 = vlog2.f32 %v5860_v61  ;;  %v5864_v27 = vadd.f32 1.0, %v5863_v5  ;;  %v2715_v43 = vadd.f32 %v10643_v46, %v10583_v39 }
 0x16b   : > { %16437 = vst [vmem:[#allocation16_spill] sm:$0xff] %v10720_v49  ;;  %v10725_v33 = vpop.f32.mrb[20].mxu1  ;;  %v10727_v36 = vpop.f32.mrb[21].mxu0  ;;  %v10729_v41 = vmul.f32 0.6931472, %v9327_v14  ;;  %9330 = vlog2.f32 %v5878_v19  ;;  %v2717_v25 = vadd.f32 %v10643_v46, %v10589_v47  ;;  %v5882_v61 = vadd.f32 1.0, %v5881_v29 }
 0x16c   : > { %16438 = vst [vmem:[#allocation17_spill] sm:$0xff] %v10725_v33  ;;  %v10735_v32 = vpop.f32.mrb[21].mxu1  ;;  %v10737_v1 = vpop.f32.mrb[22].mxu0  ;;  %v5869_v5 = vadd.f32 1.0, %v10712_v50  ;;  %v5872_v19 = vmul.f32 -0.5, %v10712_v50  ;;  %v10758_v4 = vmax.f32 %v5287_v56, 0.0  ;;  %v10762_v30 = vmul.f32 %v5864_v27, %v5540_v31 }
 0x16d   : > { %16439 = vst [vmem:[#allocation18_spill] sm:$0xff] %v10735_v32  ;;  %16440 = vst [vmem:[#allocation19_spill] sm:$0xff] %v10737_v1  ;;  %v10745_v14 = vpop.f32.mrb[22].mxu1  ;;  %v10747_v39 = vpop.f32.mrb[23].mxu0  ;;  %v5884_v29 = vand.u32 2147483647, %v10697_v37  ;;  %v3319_v33 = vmax.f32 %v2709_v38, %v2717_v25 }
 0x16e   : > { %16441 = vst [vmem:[#allocation20_spill] sm:$0xff] %v10745_v14  ;;  %16442 = vst [vmem:[#allocation21_spill] sm:$0xff] %v10747_v39  ;;  %v10760_v42 = vpop.f32.mrb[23].mxu1  ;;  %vm10764_vm5 = vcmp.lt.f32.partialorder %v5866_v21, 0.0004427343  ;;  %9332 = vlog2.f32 %v5869_v5  ;;  %v3299_v57 = vrot.slane %v3298_v40, 4  ;;  %v5883_v5 = vmul.f32 %v5882_v61, %v10697_v37  ;;  %v10780_v14 = vpop.permute.xlu0 %2386 }
 0x16f   : > { %16443 = vst [vmem:[#allocation22_spill] sm:$0xff] %v10760_v42  ;;  %v5875_v47 = vand.u32 2147483647, %v10712_v50  ;;  %9143 = vmatmul.mubr.msk.bf16.vlgmr.msra.gmra.mrb[128].mxu0 %vm781_vm0, %v9832_v54  ;;  %v5873_v46 = vadd.f32 1.0, %v5872_v19  ;;  %v5887_v31 = vadd.f32 1.0, %v10758_v4  ;;  %v5890_v27 = vmul.f32 -0.5, %v10758_v4 }
 0x170   : > { %9175 = vmatmul.mubr.msk.bf16.vlgmr.msra.gmra.mrb[128].mxu1 %vm781_vm0, %v9832_v54  ;;  %v16446_v21 = vmov 0   ;;  %v3300_v60 = vmax.f32 %v3298_v40, %v3299_v57  ;;  %v3313_v42 = vrot.slane %v10706_v45, 4  ;;  %v3305_v39 = vmax.f32 %v2707_v18, %v2715_v43  ;;  %16447 = vst [vmem:[#allocation23_spill] sm:$0xff] %v10780_v14  ;;  %v10787_v54 = vpop.permute.xlu1 %2391 }
 0x171   : > { %1626 = vmatprep.mubr.bf16.mxu0 %v16446_v21  ;;  %1979 = vmatprep.mubr.bf16.mxu1 %v16446_v21  ;;  %vm10783_vm7 = vcmp.lt.f32.partialorder %v5884_v29, 0.0004427343  ;;  %9334 = vlog2.f32 %v5887_v31  ;;  %v5891_v56 = vadd.f32 1.0, %v5890_v27  ;;  %16450 = vst [vmem:[#allocation24_spill] sm:$0xff] %v10787_v54  ;;  %vm10791_vm8 = vcmp.lt.f32.partialorder %v5875_v47, 0.0004427343 }
 0x172   : > { %v10789_v1 = vpop.f32.mrb[24].mxu0  ;;  %v3301_v40 = vrot.slane %v3300_v60, 2  ;;  %v3314_v18 = vmax.f32 %v10706_v45, %v3313_v42  ;;  %v3306_v43 = vrot.slane %v3305_v39, 4  ;;  %v10797_v61 = vpop.f32.mrb[24].mxu1  ;;  %v5874_v38 = vmul.f32 %v5873_v46, %v10712_v50 }
 0x173   : > { %16451 = vst [vmem:[#allocation25_spill] sm:$0xff] %v10789_v1  ;;  %16454 = vst [vmem:[#allocation26_spill] sm:$0xff] %v10797_v61  ;;  %v10799_v29 = vpop.f32.mrb[25].mxu0  ;;  %v10803_v25 = vmul.f32 %v5891_v56, %v10758_v4  ;;  %v3320_v31 = vrot.slane %v3319_v33, 4  ;;  %v2722_v47 = vadd.f32 %v10780_v14, %v10604_v62  ;;  %v10807_v27 = vpop.f32.mrb[25].mxu1  ;;  %v2730_v61 = vadd.f32 %v10787_v54, %v10620_v12  ;;  %v9833_v12 = vld [vmem:[#allocation2 + $0x8] sm:$0xff]  }
 0x174   : > { %16455 = vst [vmem:[#allocation27_spill] sm:$0xff] %v10799_v29  ;;  %16456 = vst [vmem:[#allocation28_spill] sm:$0xff] %v10807_v27  ;;  %v10809_v37 = vpop.f32.mrb[26].mxu0  ;;  %v9329_v1 = vpop.eup %9328  ;;  %v3302_v42 = vmax.f32 %v3300_v60, %v3301_v40  ;;  %v3315_v45 = vrot.slane %v3314_v18, 2  ;;  %v3307_v49 = vmax.f32 %v3305_v39, %v3306_v43  ;;  %v2724_v62 = vadd.f32 %v10780_v14, %v10610_v2 }
 0x175   : > { %16457 = vst [vmem:[#allocation29_spill] sm:$0xff] %v10809_v37  ;;  %v10813_v29 = vpop.f32.mrb[26].mxu1  ;;  %v10815_v46 = vpop.f32.mrb[27].mxu0  ;;  %v5862_v56 = vmul.f32 0.6931472, %v9329_v1  ;;  %v3321_v32 = vmax.f32 %v3319_v33, %v3320_v31  ;;  %v2732_v27 = vadd.f32 %v10787_v54, %v10622_v16  ;;  %v3354_v31 = vmax.f32 %v2722_v47, %v2730_v61 }
 0x176   : > { %16458 = vst [vmem:[#allocation30_spill] sm:$0xff] %v10815_v46  ;;  %v9331_v50 = vpop.eup %9330  ;;  %v10821_v37 = vpop.f32.mrb[27].mxu1  ;;  %v3303_v39 = vrot.slane %v3302_v42, 1  ;;  %v3316_v40 = vmax.f32 %v3314_v18, %v3315_v45  ;;  %v3308_v43 = vrot.slane %v3307_v49, 2  ;;  %v16460_v47 = vsel %vm10657_vm1, %v10648_v51, %v10700_v44 }
 0x177   : > { %16459 = vst [vmem:[#allocation31_spill] sm:$0xff] %v10821_v37  ;;  %v5880_v60 = vmul.f32 0.6931472, %v9331_v50  ;;  %9144 = vmatmul.mubr.msk.bf16.gmra.mrb[132].mxu0 %vm781_vm0, %v9833_v12  ;;  %v5868_v1 = vsel %vm10764_vm5, %v10762_v30, %v5862_v56  ;;  %v3322_v33 = vrot.slane %v3321_v32, 2  ;;  %v10827_v46 = vmax.f32 %v2724_v62, %v2732_v27 }
 0x178   : > { %9176 = vmatmul.mubr.msk.bf16.gmra.mrb[132].mxu1 %vm781_vm0, %v9833_v12  ;;  %1636 = vmatprep.mubr.bf16.mxu0 %v16446_v21  ;;  %v9333_v2 = vpop.eup %9332  ;;  %v8348_v16 = vrot.slane %v5868_v1, 7  ;;  %v3304_v45 = vmax.f32 %v3302_v42, %v3303_v39  ;;  %v3317_v50 = vrot.slane %v3316_v40, 1  ;;  %v3309_v30 = vmax.f32 %v3307_v49, %v3308_v43 }
 0x179   : > { %v5886_v18 = vsel %vm10783_vm7, %v5883_v5, %v5880_v60  ;;  %1989 = vmatprep.mubr.bf16.mxu1 %v16446_v21  ;;  %v5871_v58 = vmul.f32 0.6931472, %v9333_v2  ;;  %v3323_v56 = vmax.f32 %v3321_v32, %v3322_v33  ;;  %v3355_v42 = vrot.slane %v3354_v31, 4 }
 0x17a   : > { %v8383_v37 = vrot.slane %v5886_v18, 7  ;;  %v10834_v61 = vpop.f32.mrb[28].mxu0  ;;  %v10842_v27 = vsel %vm8349_vm6, %v8348_v16, %v16460_v47  ;;  %v4994_v19 = vmax.f32 %v3304_v45, -2.3819763e+38  ;;  %v3318_v5 = vmax.f32 %v3316_v40, %v3317_v50  ;;  %v10844_v62 = vpop.f32.mrb[28].mxu1 }
 0x17b   : > { %v10846_v60 = vpop.f32.mrb[29].mxu0  ;;  %v9335_v39 = vpop.eup %9334  ;;  %v16461_v32 = vsel %vm10668_vm2, %v10651_v52, %v10710_v53  ;;  %v5877_v51 = vsel %vm10791_vm8, %v5874_v38, %v5871_v58  ;;  %v3310_v44 = vrot.slane %v3309_v30, 1  ;;  %v3324_v49 = vrot.slane %v3323_v56, 1 }
 0x17c   : > { %v10854_v59 = vsel %vm8349_vm6, %v8383_v37, %v16461_v32  ;;  %v10858_v40 = vpop.f32.mrb[29].mxu1  ;;  %v10860_v43 = vpop.f32.mrb[30].mxu0  ;;  %v8369_v12 = vrot.slane %v5877_v51, 7  ;;  %v5889_v1 = vmul.f32 0.6931472, %v9335_v39  ;;  %v5292_v33 = vadd.f32 %v10542_v23, %v4994_v19 }
 0x17d   : > { %v4996_v8 = vmax.f32 %v3318_v5, -2.3819763e+38  ;;  %v10863_v2 = vpop.f32.mrb[30].mxu1  ;;  %v16462_v52 = vand.u32 2147483647, %v10758_v4  ;;  %v3311_v53 = vmax.f32 %v3309_v30, %v3310_v44  ;;  %v3325_v37 = vmax.f32 %v3323_v56, %v3324_v49  ;;  %v10867_v38 = vpop.f32.mrb[31].mxu0 }
 0x17e   : > { %v3356_v57 = vmax.f32 %v3354_v31, %v3355_v42  ;;  %v10869_v16 = vpop.f32.mrb[31].mxu1  ;;  %v16463_v18 = vsel %vm10672_vm3, %v10662_v3, %v10715_v10  ;;  %v5548_v58 = vmax.f32 %v5292_v33, 0.0  ;;  %v9834_v30 = vld [vmem:[#allocation2 + $0x10] sm:$0xff]   ;;  %v3369_v5 = vrot.slane %v10827_v46, 4 }
 0x17f   : > { %vm5894_vm9 = vcmp.lt.f32.partialorder %v16462_v52, 0.0004427343  ;;  %v10877_v45 = vsel %vm8349_vm6, %v8369_v12, %v16463_v18  ;;  %v5294_v4 = vadd.f32 %v10545_v26, %v4996_v8  ;;  %9145 = vmatmul.mubr.msk.bf16.gmra.mrb[136].mxu0 %vm781_vm0, %v9834_v30  ;;  %v4995_v56 = vmax.f32 %v3311_v53, -2.3819763e+38 }
 0x180   : > { %v5895_v50 = vsel %vm5894_vm9, %v10803_v25, %v5889_v1  ;;  %v4997_v47 = vmax.f32 %v3325_v37, -2.3819763e+38  ;;  %v3357_v19 = vrot.slane %v3356_v57, 2  ;;  %9177 = vmatmul.mubr.msk.bf16.gmra.mrb[136].mxu1 %vm781_vm0, %v9834_v30  ;;  %1646 = vmatprep.mubr.bf16.mxu0 %v16446_v21  ;;  %v5932_v3 = vadd.f32 1.0, %v5548_v58 }
 0x181   : > { %v8397_v31 = vrot.slane %v5895_v50, 7  ;;  %v5935_v9 = vmul.f32 -0.5, %v5548_v58  ;;  %v5550_v10 = vmax.f32 %v5294_v4, 0.0  ;;  %1999 = vmatprep.mubr.bf16.mxu1 %v16446_v21  ;;  %v16464_v25 = vsel %vm10693_vm4, %v10723_v15, %v10729_v41 }
 0x182   : > { %v5293_v39 = vadd.f32 %v10547_v28, %v4995_v56  ;;  %v5295_v32 = vadd.f32 %v10551_v34, %v4997_v47  ;;  %v3358_v51 = vmax.f32 %v3356_v57, %v3357_v19  ;;  %v10896_v44 = vpop.f32.mrb[32].mxu0  ;;  %9336 = vlog2.f32 %v5932_v3  ;;  %v10898_v12 = vpop.f32.mrb[32].mxu1 }
 0x183   : > { %v10892_v42 = vsel %vm8349_vm6, %v8397_v31, %v16464_v25  ;;  %v5950_v49 = vadd.f32 1.0, %v5550_v10  ;;  %v10900_v1 = vpop.f32.mrb[33].mxu0  ;;  %v5953_v13 = vmul.f32 -0.5, %v5550_v10  ;;  %v2723_v15 = vadd.f32 %v10780_v14, %v10615_v7  ;;  %v10906_v41 = vpop.f32.mrb[33].mxu1 }
 0x184   : > { %16465 = vst [vmem:[#allocation32_spill] sm:$0xff] %v10900_v1  ;;  %v5549_v33 = vmax.f32 %v5293_v39, 0.0  ;;  %v10902_v8 = vmax.f32 %v5295_v32, 0.0  ;;  %16466 = vst [vmem:[#allocation33_spill] sm:$0xff] %v10906_v41  ;;  %v5936_v52 = vadd.f32 1.0, %v5935_v9  ;;  %v3359_v37 = vrot.slane %v3358_v51, 1 }
 0x185   : > { %v5938_v53 = vand.u32 2147483647, %v5548_v58  ;;  %9338 = vlog2.f32 %v5950_v49  ;;  %v10908_v57 = vpop.f32.mrb[34].mxu0  ;;  %v10910_v18 = vpop.f32.mrb[34].mxu1  ;;  %v5956_v50 = vand.u32 2147483647, %v5550_v10  ;;  %v3370_v31 = vmax.f32 %v10827_v46, %v3369_v5 }
 0x186   : > { %v5941_v4 = vadd.f32 1.0, %v5549_v33  ;;  %v5944_v30 = vmul.f32 -0.5, %v5549_v33  ;;  %v10913_v56 = vpop.f32.mrb[35].mxu0  ;;  %v5954_v47 = vadd.f32 1.0, %v5953_v13  ;;  %v5959_v7 = vadd.f32 1.0, %v10902_v8  ;;  %v9835_v9 = vld [vmem:[#allocation2 + $0x18] sm:$0xff]   ;;  %v10929_v13 = vpop.permute.xlu0 %2396 }
 0x187   : > { %v5962_v19 = vmul.f32 -0.5, %v10902_v8  ;;  %v2725_v3 = vadd.f32 %v10780_v14, %v10618_v11  ;;  %9146 = vmatmul.mubr.msk.bf16.gmra.mrb[140].mxu0 %vm781_vm0, %v9835_v9  ;;  %v5947_v39 = vand.u32 2147483647, %v5549_v33  ;;  %v3360_v32 = vmax.f32 %v3358_v51, %v3359_v37  ;;  %v10920_v49 = vpop.f32.mrb[35].mxu1  ;;  %16470 = vst [vmem:[#allocation35_spill] sm:$0xff] %v10929_v13 }
 0x188   : > { %9340 = vlog2.f32 %v5941_v4  ;;  %v5945_v25 = vadd.f32 1.0, %v5944_v30  ;;  %16467 = vst [vmem:[#allocation34_spill] sm:$0xff] %v10920_v49  ;;  %9178 = vmatmul.mubr.msk.bf16.gmra.mrb[140].mxu1 %vm781_vm0, %v9835_v9  ;;  %1656 = vmatprep.mubr.bf16.mxu0 %v16446_v21  ;;  %v5937_v46 = vmul.f32 %v5936_v52, %v5548_v58  ;;  %vm10924_vm11 = vcmp.lt.f32.partialorder %v5938_v53, 0.0004427343  ;;  %v10938_v52 = vpop.permute.xlu1 %2401 }
 0x189   : > { %9342 = vlog2.f32 %v5959_v7  ;;  %v5965_v11 = vand.u32 2147483647, %v10902_v8  ;;  %2009 = vmatprep.mubr.bf16.mxu1 %v16446_v21  ;;  %vm10932_vm12 = vcmp.lt.f32.partialorder %v5956_v50, 0.0004427343  ;;  %v5002_v37 = vmax.f32 %v3360_v32, -2.3819763e+38 }
 0x18a   : > { %v3371_v4 = vrot.slane %v3370_v31, 2  ;;  %v2731_v58 = vadd.f32 %v10787_v54, %v10625_v22  ;;  %16473 = vst [vmem:[#allocation36_spill] sm:$0xff] %v10938_v52  ;;  %v10940_v53 = vpop.f32.mrb[36].mxu0  ;;  %v5955_v30 = vmul.f32 %v5954_v47, %v5550_v10  ;;  %v5946_v7 = vmul.f32 %v5945_v25, %v5549_v33  ;;  %v10944_v49 = vpop.f32.mrb[36].mxu1 }
 0x18b   : > { %v5963_v9 = vadd.f32 1.0, %v5962_v19  ;;  %v2733_v14 = vadd.f32 %v10787_v54, %v10627_v24  ;;  %16474 = vst [vmem:[#allocation37_spill] sm:$0xff] %v10944_v49  ;;  %v10946_v50 = vpop.f32.mrb[37].mxu0  ;;  %vm10948_vm13 = vcmp.lt.f32.partialorder %v5947_v39, 0.0004427343  ;;  %v5300_v22 = vadd.f32 %v10542_v23, %v5002_v37  ;;  %v10955_v33 = vpop.f32.mrb[37].mxu1 }
 0x18c   : > { %v3372_v41 = vmax.f32 %v3370_v31, %v3371_v4  ;;  %v3361_v1 = vmax.f32 %v2723_v15, %v2731_v58  ;;  %v2738_v10 = vadd.f32 %v10929_v13, %v10645_v48  ;;  %16477 = vst [vmem:[#allocation38_spill] sm:$0xff] %v10955_v33  ;;  %v10957_v47 = vpop.f32.mrb[38].mxu0  ;;  %v9337_v24 = vpop.eup %9336  ;;  %vm10959_vm14 = vcmp.lt.f32.partialorder %v5965_v11, 0.0004427343 }
 0x18d   : > { %16478 = vst [vmem:[#allocation39_spill] sm:$0xff] %v10957_v47  ;;  %v3375_v25 = vmax.f32 %v2725_v3, %v2733_v14  ;;  %v2746_v39 = vadd.f32 %v10938_v52, %v10666_v55  ;;  %v2740_v31 = vadd.f32 %v10929_v13, %v10653_v63  ;;  %v2748_v15 = vadd.f32 %v10938_v52, %v10682_v17  ;;  %v10969_v48 = vpop.f32.mrb[38].mxu1  ;;  %v10973_v54 = vpop.f32.mrb[39].mxu0  ;;  %v9836_v47 = vld [vmem:[#allocation2 + $0x20] sm:$0xff]  }
 0x18e   : > { %v5934_v37 = vmul.f32 0.6931472, %v9337_v24  ;;  %v10971_v4 = vmax.f32 %v5300_v22, 0.0  ;;  %v3373_v58 = vrot.slane %v3372_v41, 1  ;;  %v3362_v11 = vrot.slane %v3361_v1, 4  ;;  %16481 = vst [vmem:[#allocation40_spill] sm:$0xff] %v10973_v54 }
 0x18f   : > { %v9339_v49 = vpop.eup %9338  ;;  %v5964_v14 = vmul.f32 %v5963_v9, %v10902_v8  ;;  %v3376_v3 = vrot.slane %v3375_v25, 4  ;;  %v3410_v55 = vmax.f32 %v2738_v10, %v2746_v39  ;;  %v3424_v33 = vmax.f32 %v2740_v31, %v2748_v15  ;;  %9147 = vmatmul.mubr.msk.bf16.gmra.mrb[144].mxu0 %vm781_vm0, %v9836_v47 }
 0x190   : > { %v5940_v63 = vsel %vm10924_vm11, %v5937_v46, %v5934_v37  ;;  %v5952_v17 = vmul.f32 0.6931472, %v9339_v49  ;;  %v6004_v22 = vadd.f32 1.0, %v10971_v4  ;;  %v6007_v24 = vmul.f32 -0.5, %v10971_v4  ;;  %9179 = vmatmul.mubr.msk.bf16.gmra.mrb[144].mxu1 %vm781_vm0, %v9836_v47  ;;  %1666 = vmatprep.mubr.bf16.mxu0 %v16446_v21  ;;  %v10990_v47 = vpop.f32.mrb[39].mxu1 }
 0x191   : > { %v8351_v54 = vrot.slane %v5940_v63, 6  ;;  %v3374_v8 = vmax.f32 %v3372_v41, %v3373_v58  ;;  %v3363_v9 = vmax.f32 %v3361_v1, %v3362_v11  ;;  %v2739_v10 = vadd.f32 %v10929_v13, %v10655_v0  ;;  %2019 = vmatprep.mubr.bf16.mxu1 %v16446_v21 }
 0x192   : > { %v9341_v39 = vpop.eup %9340  ;;  %v5958_v49 = vsel %vm10932_vm12, %v5955_v30, %v5952_v17  ;;  %9344 = vlog2.f32 %v6004_v22  ;;  %v3377_v46 = vmax.f32 %v3375_v25, %v3376_v3  ;;  %v2747_v5 = vadd.f32 %v10938_v52, %v10684_v20 }
 0x193   : > { %v9343_v31 = vpop.eup %9342  ;;  %v10994_v1 = vsel %vm8352_vm10, %v8351_v54, %v10842_v27  ;;  %v8385_v41 = vrot.slane %v5958_v49, 6  ;;  %v5943_v0 = vmul.f32 0.6931472, %v9341_v39  ;;  %v6010_v15 = vand.u32 2147483647, %v10971_v4  ;;  %v9837_v49 = vld [vmem:[#allocation2 + $0x28] sm:$0xff]  }
 0x194   : > { %v5961_v37 = vmul.f32 0.6931472, %v9343_v31  ;;  %v6008_v58 = vadd.f32 1.0, %v6007_v24  ;;  %v5004_v51 = vmax.f32 %v3374_v8, -2.3819763e+38  ;;  %v3364_v30 = vrot.slane %v3363_v9, 2 }
 0x195   : > { %v10999_v25 = vsel %vm8352_vm10, %v8385_v41, %v10854_v59  ;;  %v5949_v20 = vsel %vm10948_vm13, %v5946_v7, %v5943_v0  ;;  %v3378_v11 = vrot.slane %v3377_v46, 2  ;;  %v3411_v3 = vrot.slane %v3410_v55, 4  ;;  %v11015_v31 = vpop.f32.mrb[40].mxu1 }
 0x196   : > { %v8371_v63 = vrot.slane %v5949_v20, 6  ;;  %v5967_v54 = vsel %vm10959_vm14, %v5964_v14, %v5961_v37  ;;  %v5302_v27 = vadd.f32 %v10545_v26, %v5004_v51  ;;  %v3365_v17 = vmax.f32 %v3363_v9, %v3364_v30  ;;  %v11013_v14 = vpop.f32.mrb[40].mxu0  ;;  %16482 = vst [vmem:[#allocation41_spill] sm:$0xff] %v11015_v31  ;;  %v11033_v51 = vpop.f32.mrb[41].mxu1 }
 0x197   : > { %v8399_v22 = vrot.slane %v5967_v54, 6  ;;  %v3379_v24 = vmax.f32 %v3377_v46, %v3378_v11  ;;  %v3412_v8 = vmax.f32 %v3410_v55, %v3411_v3  ;;  %v3425_v39 = vrot.slane %v3424_v33, 4  ;;  %9148 = vmatmul.mubr.msk.bf16.gmra.mrb[148].mxu0 %vm781_vm0, %v9837_v49  ;;  %v11023_v41 = vpop.f32.mrb[41].mxu0 }
 0x198   : > { %v11009_v59 = vsel %vm8352_vm10, %v8371_v63, %v10877_v45  ;;  %v11011_v7 = vmax.f32 %v5302_v27, 0.0  ;;  %v3366_v32 = vrot.slane %v3365_v17, 1  ;;  %v3417_v19 = vmax.f32 %v2739_v10, %v2747_v5  ;;  %9180 = vmatmul.mubr.msk.bf16.gmra.mrb[148].mxu1 %vm781_vm0, %v9837_v49  ;;  %1676 = vmatprep.mubr.bf16.mxu0 %v16446_v21  ;;  %v11035_v11 = vpop.f32.mrb[42].mxu0  ;;  %v11039_v27 = vpop.f32.mrb[42].mxu1 }
 0x199   : > { %v11021_v55 = vsel %vm8352_vm10, %v8399_v22, %v10892_v42  ;;  %v3380_v9 = vrot.slane %v3379_v24, 1  ;;  %v3413_v46 = vrot.slane %v3412_v8, 2  ;;  %v3426_v45 = vmax.f32 %v3424_v33, %v3425_v39  ;;  %2029 = vmatprep.mubr.bf16.mxu1 %v16446_v21  ;;  %16485 = vst [vmem:[#allocation42_spill] sm:$0xff] %v11039_v27  ;;  %v11051_v10 = vpop.f32.mrb[43].mxu0 }
 0x19a   : > { %vm11026_vm1 = vcmp.lt.f32.partialorder %v6010_v15, 0.0004427343  ;;  %v6022_v5 = vadd.f32 1.0, %v11011_v7  ;;  %v3367_v0 = vmax.f32 %v3365_v17, %v3366_v32  ;;  %v2741_v37 = vadd.f32 %v10929_v13, %v10664_v6  ;;  %16486 = vst [vmem:[#allocation43_spill] sm:$0xff] %v11051_v10  ;;  %v11114_v10 = vpop.f32.mrb[44].mxu0 }
 0x19b   : > { %v3381_v42 = vmax.f32 %v3379_v24, %v3380_v9  ;;  %v3414_v30 = vmax.f32 %v3412_v8, %v3413_v46  ;;  %v3427_v20 = vrot.slane %v3426_v45, 2  ;;  %v3418_v33 = vrot.slane %v3417_v19, 4  ;;  %v11119_v27 = vpop.f32.mrb[45].mxu0 }
 0x19c   : > { %v9345_v3 = vpop.eup %9344  ;;  %v6009_v15 = vmul.f32 %v6008_v58, %v10971_v4  ;;  %9346 = vlog2.f32 %v6022_v5  ;;  %v6025_v63 = vmul.f32 -0.5, %v11011_v7  ;;  %v5003_v54 = vmax.f32 %v3367_v0, -2.3819763e+38  ;;  %v9838_v5 = vld [vmem:[#allocation2 + $0x30] sm:$0xff]  }
 0x19d   : > { %v6006_v17 = vmul.f32 0.6931472, %v9345_v3  ;;  %v5005_v22 = vmax.f32 %v3381_v42, -2.3819763e+38  ;;  %v3415_v6 = vrot.slane %v3414_v30, 1  ;;  %v3428_v39 = vmax.f32 %v3426_v45, %v3427_v20 }
 0x19e   : > { %v6028_v24 = vand.u32 2147483647, %v11011_v7  ;;  %v5301_v8 = vadd.f32 %v10547_v28, %v5003_v54  ;;  %v3419_v49 = vmax.f32 %v3417_v19, %v3418_v33  ;;  %v2749_v32 = vadd.f32 %v10938_v52, %v10691_v35  ;;  %v11058_v54 = vpop.permute.xlu0 %2406 }
 0x19f   : > { %v6012_v4 = vsel %vm11026_vm1, %v6009_v15, %v6006_v17  ;;  %v5303_v58 = vadd.f32 %v10551_v34, %v5005_v22  ;;  %v3416_v9 = vmax.f32 %v3414_v30, %v3415_v6  ;;  %v3429_v46 = vrot.slane %v3428_v39, 1  ;;  %9149 = vmatmul.mubr.msk.bf16.gmra.mrb[152].mxu0 %vm781_vm0, %v9838_v5  ;;  %16487 = vst [vmem:[#allocation44_spill] sm:$0xff] %v11058_v54 }
 0x1a0   : > { %v8354_v0 = vrot.slane %v6012_v4, 5  ;;  %v6026_v45 = vadd.f32 1.0, %v6025_v63  ;;  %v5557_v42 = vmax.f32 %v5301_v8, 0.0  ;;  %v3431_v20 = vmax.f32 %v2741_v37, %v2749_v32  ;;  %9181 = vmatmul.mubr.msk.bf16.gmra.mrb[152].mxu1 %vm781_vm0, %v9838_v5  ;;  %1686 = vmatprep.mubr.bf16.mxu0 %v16446_v21 }
 0x1a1   : > { %v5559_v19 = vmax.f32 %v5303_v58, 0.0  ;;  %v5010_v35 = vmax.f32 %v3416_v9, -2.3819763e+38  ;;  %v3430_v33 = vmax.f32 %v3428_v39, %v3429_v46  ;;  %2039 = vmatprep.mubr.bf16.mxu1 %v16446_v21  ;;  %v3420_v63 = vrot.slane %v3419_v49, 2 }
 0x1a2   : > { %v11056_v30 = vsel %vm8355_vm15, %v8354_v0, %v10994_v1  ;;  %v6013_v3 = vadd.f32 1.0, %v5557_v42  ;;  %v6016_v15 = vmul.f32 -0.5, %v5557_v42  ;;  %vm11060_vm2 = vcmp.lt.f32.partialorder %v6028_v24, 0.0004427343 }
 0x1a3   : > { %v6031_v17 = vadd.f32 1.0, %v5559_v19  ;;  %v6034_v22 = vmul.f32 -0.5, %v5559_v19  ;;  %v5308_v6 = vadd.f32 %v10542_v23, %v5010_v35  ;;  %v6027_v39 = vmul.f32 %v6026_v45, %v11011_v7  ;;  %v9839_v45 = vld [vmem:[#allocation2 + $0x38] sm:$0xff]  }
 0x1a4   : > { %9348 = vlog2.f32 %v6013_v3  ;;  %v6019_v8 = vand.u32 2147483647, %v5557_v42  ;;  %v5012_v32 = vmax.f32 %v3430_v33, -2.3819763e+38  ;;  %v6037_v1 = vand.u32 2147483647, %v5559_v19 }
 0x1a5   : > { %9350 = vlog2.f32 %v6031_v17  ;;  %v5564_v4 = vmax.f32 %v5308_v6, 0.0  ;;  %v11068_v58 = vadd.f32 %v11058_v54, %v10727_v36  ;;  %v6017_v9 = vadd.f32 1.0, %v6016_v15  ;;  %v11078_v15 = vpop.f32.mrb[43].mxu1  ;;  %v16510_v33 = vld [vmem:[#allocation22_spill] sm:$0xff] }
 0x1a6   : > { %v9347_v24 = vpop.eup %9346  ;;  %v5310_v46 = vadd.f32 %v10545_v26, %v5012_v32  ;;  %v3421_v5 = vmax.f32 %v3419_v49, %v3420_v63  ;;  %v3432_v0 = vrot.slane %v3431_v20, 4  ;;  %v6035_v35 = vadd.f32 1.0, %v6034_v22  ;;  %16492 = vst [vmem:[#allocation45_spill] sm:$0xff] %v11078_v15  ;;  %v16502_v15 = vld [vmem:[#allocation20_spill] sm:$0xff] }
 0x1a7   : > { %v6024_v52 = vmul.f32 0.6931472, %v9347_v24  ;;  %v6076_v13 = vadd.f32 1.0, %v5564_v4  ;;  %v6079_v7 = vmul.f32 -0.5, %v5564_v4  ;;  %9150 = vmatmul.mubr.msk.bf16.gmra.mrb[156].mxu0 %vm781_vm0, %v9839_v45  ;;  %vm11072_vm3 = vcmp.lt.f32.partialorder %v6019_v8, 0.0004427343  ;;  %v11091_v24 = vpop.permute.xlu1 %2411 }
 0x1a8   : > { %v11076_v3 = vmax.f32 %v5310_v46, 0.0  ;;  %v3422_v36 = vrot.slane %v3421_v5, 1  ;;  %v3433_v17 = vmax.f32 %v3431_v20, %v3432_v0  ;;  %9182 = vmatmul.mubr.msk.bf16.gmra.mrb[156].mxu1 %vm781_vm0, %v9839_v45  ;;  %1696 = vmatprep.mubr.bf16.mxu0 %v16446_v21  ;;  %vm11084_vm4 = vcmp.lt.f32.partialorder %v6037_v1, 0.0004427343  ;;  %16495 = vst [vmem:[#allocation46_spill] sm:$0xff] %v11091_v24  ;;  %v16496_v1 = vld [vmem:[#allocation18_spill] sm:$0xff] }
 0x1a9   : > { %v6030_v49 = vsel %vm11060_vm2, %v6027_v39, %v6024_v52  ;;  %9352 = vlog2.f32 %v6076_v13  ;;  %v6082_v22 = vand.u32 2147483647, %v5564_v4  ;;  %2049 = vmatprep.mubr.bf16.mxu1 %v16446_v21  ;;  %v6080_v8 = vadd.f32 1.0, %v6079_v7  ;;  %16503 = vst [vmem:[#allocation18_spill] sm:$0xff] %v11114_v10 }
 0x1aa   : > { %v8387_v6 = vrot.slane %v6030_v49, 5  ;;  %v6094_v20 = vadd.f32 1.0, %v11076_v3  ;;  %v6097_v32 = vmul.f32 -0.5, %v11076_v3  ;;  %v6018_v46 = vmul.f32 %v6017_v9, %v5557_v42 }
 0x1ab   : > { %v6036_v0 = vmul.f32 %v6035_v35, %v5559_v19  ;;  %v3423_v37 = vmax.f32 %v3421_v5, %v3422_v36  ;;  %v3434_v52 = vrot.slane %v3433_v17, 2  ;;  %v6100_v13 = vand.u32 2147483647, %v11076_v3  ;;  %v16499_v19 = vld [vmem:[#allocation16_spill] sm:$0xff]  ;;  %v16500_v5 = vld [vmem:[#allocation19_spill] sm:$0xff] }
 0x1ac   : > { %v11095_v39 = vsel %vm8355_vm15, %v8387_v6, %v10999_v25  ;;  %9354 = vlog2.f32 %v6094_v20  ;;  %v11100_v7 = vadd.f32 %v11058_v54, %v16496_v1  ;;  %vm11102_vm5 = vcmp.lt.f32.partialorder %v6082_v22, 0.0004427343  ;;  %v16501_v20 = vld [vmem:[#allocation17_spill] sm:$0xff]  ;;  %16505 = vst [vmem:[#allocation19_spill] sm:$0xff] %v11119_v27 }
 0x1ad   : > { %v5011_v49 = vmax.f32 %v3423_v37, -2.3819763e+38  ;;  %v3435_v42 = vmax.f32 %v3433_v17, %v3434_v52  ;;  %v2754_v9 = vadd.f32 %v11058_v54, %v16499_v19  ;;  %v2762_v25 = vadd.f32 %v11091_v24, %v16500_v5  ;;  %v11116_v37 = vpop.f32.mrb[44].mxu1 }
 0x1ae   : > { %v9349_v35 = vpop.eup %9348  ;;  %v6081_v36 = vmul.f32 %v6080_v8, %v5564_v4  ;;  %vm8358_vm7 = vcmask 1044484   ;;  %v6098_v6 = vadd.f32 1.0, %v6097_v32  ;;  %v2756_v1 = vadd.f32 %v11058_v54, %v16501_v20  ;;  %16504 = vst [vmem:[#allocation16_spill] sm:$0xff] %v11116_v37  ;;  %v9840_v4 = vld [vmem:[#allocation2 + $0x40] sm:$0xff]   ;;  %v11128_v37 = vpop.f32.mrb[45].mxu1 }
 0x1af   : > { %v2764_v22 = vadd.f32 %v11091_v24, %v16502_v15  ;;  %v9351_v17 = vpop.eup %9350  ;;  %v6015_v52 = vmul.f32 0.6931472, %v9349_v35  ;;  %v5309_v19 = vadd.f32 %v10547_v28, %v5011_v49  ;;  %v3436_v31 = vrot.slane %v3435_v42, 1  ;;  %9151 = vmatmul.mubr.msk.bf16.gmra.mrb[160].mxu0 %vm781_vm0, %v9840_v4  ;;  %v16508_v20 = vld [vmem:[#allocation21_spill] sm:$0xff]  ;;  %16509 = vst [vmem:[#allocation17_spill] sm:$0xff] %v11128_v37  ;;  %v11178_v32 = vpop.permute.xlu1 %2421 }
 0x1b0   : > { %v3466_v5 = vmax.f32 %v2754_v9, %v2762_v25  ;;  %v6033_v8 = vmul.f32 0.6931472, %v9351_v17  ;;  %vm11122_vm8 = vcmp.lt.f32.partialorder %v6100_v13, 0.0004427343  ;;  %v2763_v54 = vadd.f32 %v11091_v24, %v16508_v20  ;;  %9183 = vmatmul.mubr.msk.bf16.gmra.mrb[160].mxu1 %vm781_vm0, %v9840_v4  ;;  %1706 = vmatprep.mubr.bf16.mxu0 %v16446_v21  ;;  %v11134_v13 = vpop.f32.mrb[46].mxu0  ;;  %16515 = vst [vmem:[#allocation22_spill] sm:$0xff] %v11178_v32 }
 0x1b1   : > { %v3480_v15 = vmax.f32 %v2756_v1, %v2764_v22  ;;  %v6021_v49 = vsel %vm11072_vm3, %v6018_v46, %v6015_v52  ;;  %v5565_v9 = vmax.f32 %v5309_v19, 0.0  ;;  %v3437_v25 = vmax.f32 %v3435_v42, %v3436_v31  ;;  %2059 = vmatprep.mubr.bf16.mxu1 %v16446_v21 }
 0x1b2   : > { %v3467_v35 = vrot.slane %v3466_v5, 4  ;;  %v8373_v1 = vrot.slane %v6021_v49, 5  ;;  %v6039_v22 = vsel %vm11084_vm4, %v6036_v0, %v6033_v8  ;;  %v3473_v20 = vmax.f32 %v11068_v58, %v2763_v54  ;;  %v11146_v49 = vpop.f32.mrb[46].mxu1 }
 0x1b3   : > { %v3481_v17 = vrot.slane %v3480_v15, 4  ;;  %v9353_v4 = vpop.eup %9352  ;;  %v8401_v10 = vrot.slane %v6039_v22, 5  ;;  %v6085_v37 = vadd.f32 1.0, %v5565_v9  ;;  %v6088_v27 = vmul.f32 -0.5, %v5565_v9 }
 0x1b4   : > { %v2765_v46 = vadd.f32 %v11091_v24, %v16510_v33  ;;  %v11144_v31 = vsel %vm8355_vm15, %v8373_v1, %v11009_v59  ;;  %v6078_v42 = vmul.f32 0.6931472, %v9353_v4  ;;  %v5013_v52 = vmax.f32 %v3437_v25, -2.3819763e+38  ;;  %v9841_v33 = vld [vmem:[#allocation2 + $0x48] sm:$0xff]  }
 0x1b5   : > { %v3468_v19 = vmax.f32 %v3466_v5, %v3467_v35  ;;  %v11150_v63 = vsel %vm8355_vm15, %v8401_v10, %v11021_v55  ;;  %v6099_v54 = vmul.f32 %v6098_v6, %v11076_v3  ;;  %9356 = vlog2.f32 %v6085_v37 }
 0x1b6   : > { %v6091_v58 = vand.u32 2147483647, %v5565_v9  ;;  %v9355_v0 = vpop.eup %9354  ;;  %v6084_v8 = vsel %vm11102_vm5, %v6081_v36, %v6078_v42  ;;  %v5311_v59 = vadd.f32 %v10551_v34, %v5013_v52  ;;  %v3482_v22 = vmax.f32 %v3480_v15, %v3481_v17  ;;  %v11174_v17 = vpop.f32.mrb[47].mxu0 }
 0x1b7   : > { %v3469_v1 = vrot.slane %v3468_v19, 2  ;;  %v8357_v25 = vrot.slane %v6084_v8, 4  ;;  %v6096_v5 = vmul.f32 0.6931472, %v9355_v0  ;;  %v6089_v35 = vadd.f32 1.0, %v6088_v27  ;;  %9152 = vmatmul.mubr.msk.bf16.gmra.mrb[164].mxu0 %vm781_vm0, %v9841_v33  ;;  %16513 = vst [vmem:[#allocation20_spill] sm:$0xff] %v11174_v17 }
 0x1b8   : > { %v3474_v4 = vrot.slane %v3473_v20, 4  ;;  %v11157_v55 = vmax.f32 %v5311_v59, 0.0  ;;  %v3483_v3 = vrot.slane %v3482_v22, 2  ;;  %v3487_v6 = vmax.f32 %v11100_v7, %v2765_v46  ;;  %9184 = vmatmul.mubr.msk.bf16.gmra.mrb[164].mxu1 %vm781_vm0, %v9841_v33  ;;  %1716 = vmatprep.mubr.bf16.mxu0 %v16446_v21 }
 0x1b9   : > { %v3470_v10 = vmax.f32 %v3468_v19, %v3469_v1  ;;  %v11164_v45 = vsel %vm8358_vm7, %v8357_v25, %v11056_v30  ;;  %v6102_v27 = vsel %vm11122_vm8, %v6099_v54, %v6096_v5  ;;  %2069 = vmatprep.mubr.bf16.mxu1 %v16446_v21  ;;  %vm11169_vm9 = vcmp.lt.f32.partialorder %v6091_v58, 0.0004427343  ;;  %v11176_v19 = vpop.permute.xlu0 %2416  ;;  %v16516_v25 = vld [vmem:[#allocation27_spill] sm:$0xff] }
 0x1ba   : > { %v3475_v36 = vmax.f32 %v3473_v20, %v3474_v4  ;;  %v8389_v37 = vrot.slane %v6102_v27, 4  ;;  %v6103_v7 = vadd.f32 1.0, %v11157_v55  ;;  %v3484_v42 = vmax.f32 %v3482_v22, %v3483_v3  ;;  %16514 = vst [vmem:[#allocation21_spill] sm:$0xff] %v11176_v19  ;;  %v16517_v4 = vld [vmem:[#allocation25_spill] sm:$0xff]  ;;  %v11192_v27 = vpop.f32.mrb[47].mxu1 }
 0x1bb   : > { %v3471_v46 = vrot.slane %v3470_v10, 1  ;;  %v3488_v30 = vrot.slane %v3487_v6, 4  ;;  %v6090_v54 = vmul.f32 %v6089_v35, %v5565_v9  ;;  %v6106_v58 = vmul.f32 -0.5, %v11157_v55  ;;  %v16518_v3 = vld [vmem:[#allocation29_spill] sm:$0xff]  ;;  %16519 = vst [vmem:[#allocation27_spill] sm:$0xff] %v11192_v27 }
 0x1bc   : > { %v3476_v52 = vrot.slane %v3475_v36, 2  ;;  %v11182_v20 = vsel %vm8358_vm7, %v8389_v37, %v11095_v39  ;;  %9358 = vlog2.f32 %v6103_v7  ;;  %v3485_v8 = vrot.slane %v3484_v42, 1 }
 0x1bd   : > { %v3472_v0 = vmax.f32 %v3470_v10, %v3471_v46  ;;  %v3489_v1 = vmax.f32 %v3487_v6, %v3488_v30  ;;  %v6109_v22 = vand.u32 2147483647, %v11157_v55  ;;  %v2771_v5 = vadd.f32 %v11176_v19, %v16516_v25  ;;  %v16520_v30 = vld [vmem:[#allocation26_spill] sm:$0xff] }
 0x1be   : > { %v3477_v59 = vmax.f32 %v3475_v36, %v3476_v52  ;;  %v2770_v33 = vadd.f32 %v11176_v19, %v16517_v4  ;;  %v2778_v39 = vadd.f32 %v11178_v32, %v16518_v3  ;;  %v3486_v37 = vmax.f32 %v3484_v42, %v3485_v8  ;;  %v9842_v36 = vld [vmem:[#allocation2 + $0x50] sm:$0xff]  }
 0x1bf   : > { %v9357_v9 = vpop.eup %9356  ;;  %v5018_v35 = vmax.f32 %v3472_v0, -2.3819763e+38  ;;  %v3490_v7 = vrot.slane %v3489_v1, 2  ;;  %9153 = vmatmul.mubr.msk.bf16.gmra.mrb[168].mxu0 %vm781_vm0, %v9842_v36  ;;  %v6107_v46 = vadd.f32 1.0, %v6106_v58  ;;  %v2772_v25 = vadd.f32 %v11176_v19, %v16520_v30 }
 0x1c0   : > { %v3478_v10 = vrot.slane %v3477_v59, 1  ;;  %v6087_v6 = vmul.f32 0.6931472, %v9357_v9  ;;  %v3522_v52 = vmax.f32 %v2770_v33, %v2778_v39  ;;  %9185 = vmatmul.mubr.msk.bf16.gmra.mrb[168].mxu1 %vm781_vm0, %v9842_v36  ;;  %1726 = vmatprep.mubr.bf16.mxu0 %v16446_v21  ;;  %v5020_v3 = vmax.f32 %v3486_v37, -2.3819763e+38  ;;  %v16521_v33 = vld [vmem:[#allocation30_spill] sm:$0xff] }
 0x1c1   : > { %v5316_v4 = vadd.f32 %v10542_v23, %v5018_v35  ;;  %v3491_v42 = vmax.f32 %v3489_v1, %v3490_v7  ;;  %2079 = vmatprep.mubr.bf16.mxu1 %v16446_v21  ;;  %v2780_v58 = vadd.f32 %v11178_v32, %v10813_v29  ;;  %v2779_v39 = vadd.f32 %v11178_v32, %v16521_v33 }
 0x1c2   : > { %v3479_v0 = vmax.f32 %v3477_v59, %v3478_v10  ;;  %v6093_v8 = vsel %vm11169_vm9, %v6090_v54, %v6087_v6  ;;  %v3523_v9 = vrot.slane %v3522_v52, 4  ;;  %v5318_v24 = vadd.f32 %v10545_v26, %v5020_v3 }
 0x1c3   : > { %v8375_v36 = vrot.slane %v6093_v8, 4  ;;  %v5572_v30 = vmax.f32 %v5316_v4, 0.0  ;;  %v3492_v37 = vrot.slane %v3491_v42, 1  ;;  %v3536_v1 = vmax.f32 %v2772_v25, %v2780_v58 }
 0x1c4   : > { %v5019_v35 = vmax.f32 %v3479_v0, -2.3819763e+38  ;;  %v3524_v59 = vmax.f32 %v3522_v52, %v3523_v9  ;;  %v3529_v10 = vmax.f32 %v2771_v5, %v2779_v39  ;;  %vm11212_vm11 = vcmp.lt.f32.partialorder %v6109_v22, 0.0004427343  ;;  %v11217_v0 = vpop.f32.mrb[48].mxu0  ;;  %v11219_v52 = vpop.f32.mrb[48].mxu1 }
 0x1c5   : > { %v11210_v15 = vsel %vm8358_vm7, %v8375_v36, %v11144_v31  ;;  %v6148_v29 = vadd.f32 1.0, %v5572_v30  ;;  %v5574_v6 = vmax.f32 %v5318_v24, 0.0  ;;  %v3493_v8 = vmax.f32 %v3491_v42, %v3492_v37  ;;  %16524 = vst [vmem:[#allocation25_spill] sm:$0xff] %v11217_v0  ;;  %16525 = vst [vmem:[#allocation29_spill] sm:$0xff] %v11219_v52  ;;  %v11222_v22 = vpop.f32.mrb[49].mxu0  ;;  %v9843_v9 = vld [vmem:[#allocation2 + $0x58] sm:$0xff]  }
 0x1c6   : > { %v9359_v7 = vpop.eup %9358  ;;  %v5317_v4 = vadd.f32 %v10547_v28, %v5019_v35  ;;  %v3525_v3 = vrot.slane %v3524_v59, 2  ;;  %v6108_v25 = vmul.f32 %v6107_v46, %v11157_v55  ;;  %v6151_v31 = vmul.f32 -0.5, %v5572_v30  ;;  %16526 = vst [vmem:[#allocation26_spill] sm:$0xff] %v11222_v22  ;;  %v11225_v39 = vpop.f32.mrb[49].mxu1 }
 0x1c7   : > { %v6105_v5 = vmul.f32 0.6931472, %v9359_v7  ;;  %9360 = vlog2.f32 %v6148_v29  ;;  %9154 = vmatmul.mubr.msk.bf16.gmra.mrb[172].mxu0 %vm781_vm0, %v9843_v9  ;;  %v6154_v58 = vand.u32 2147483647, %v5572_v30  ;;  %v6166_v24 = vadd.f32 1.0, %v5574_v6  ;;  %16527 = vst [vmem:[#allocation30_spill] sm:$0xff] %v11225_v39 }
 0x1c8   : > { %v5573_v33 = vmax.f32 %v5317_v4, 0.0  ;;  %9186 = vmatmul.mubr.msk.bf16.gmra.mrb[172].mxu1 %vm781_vm0, %v9843_v9  ;;  %1736 = vmatprep.mubr.bf16.mxu0 %v16446_v21  ;;  %v6169_v55 = vmul.f32 -0.5, %v5574_v6  ;;  %v5021_v46 = vmax.f32 %v3493_v8, -2.3819763e+38  ;;  %v3526_v36 = vmax.f32 %v3524_v59, %v3525_v3  ;;  %v11231_v35 = vpop.f32.mrb[50].mxu0  ;;  %v16529_v29 = vld [vmem:[#allocation28_spill] sm:$0xff] }
 0x1c9   : > { %v6111_v42 = vsel %vm11212_vm11, %v6108_v25, %v6105_v5  ;;  %16528 = vst [vmem:[#allocation47_spill] sm:$0xff] %v11231_v35  ;;  %2089 = vmatprep.mubr.bf16.mxu1 %v16446_v21  ;;  %9362 = vlog2.f32 %v6166_v24  ;;  %v2773_v7 = vadd.f32 %v11176_v19, %v16529_v29  ;;  %v11236_v4 = vpop.f32.mrb[50].mxu1  ;;  %v6152_v9 = vadd.f32 1.0, %v6151_v31  ;;  %v9844_v39 = vld [vmem:[#allocation2 + $0x60] sm:$0xff]  }
 0x1ca   : > { %v8403_v37 = vrot.slane %v6111_v42, 4  ;;  %16530 = vst [vmem:[#allocation28_spill] sm:$0xff] %v11236_v4  ;;  %v6157_v52 = vadd.f32 1.0, %v5573_v33  ;;  %v6160_v0 = vmul.f32 -0.5, %v5573_v33  ;;  %v5319_v54 = vadd.f32 %v10551_v34, %v5021_v46  ;;  %v16533_v46 = vld [vmem:[#allocation31_spill] sm:$0xff] }
 0x1cb   : > { %vm11243_vm12 = vcmp.lt.f32.partialorder %v6154_v58, 0.0004427343  ;;  %vm8361_vm13 = vcmask 1045509   ;;  %v3527_v3 = vrot.slane %v3526_v36, 1  ;;  %v3537_v5 = vrot.slane %v3536_v1, 4 }
 0x1cc   : > { %v11241_v8 = vsel %vm8358_vm7, %v8403_v37, %v11150_v63  ;;  %v6170_v25 = vadd.f32 1.0, %v6169_v55  ;;  %v6172_v24 = vand.u32 2147483647, %v5574_v6  ;;  %9364 = vlog2.f32 %v6157_v52 }
 0x1cd   : > { %v11247_v42 = vmax.f32 %v5319_v54, 0.0  ;;  %v3528_v31 = vmax.f32 %v3526_v36, %v3527_v3  ;;  %v3538_v29 = vmax.f32 %v3536_v1, %v3537_v5  ;;  %v3530_v19 = vrot.slane %v3529_v10, 4  ;;  %v11271_v5 = vpop.permute.xlu1 %2431 }
 0x1ce   : > { %v2781_v4 = vadd.f32 %v11178_v32, %v16533_v46  ;;  %v6153_v63 = vmul.f32 %v6152_v9, %v5572_v30  ;;  %v6161_v37 = vadd.f32 1.0, %v6160_v0  ;;  %v6163_v58 = vand.u32 2147483647, %v5573_v33  ;;  %16540 = vst [vmem:[#allocation49_spill] sm:$0xff] %v11271_v5 }
 0x1cf   : > { %v6175_v35 = vadd.f32 1.0, %v11247_v42  ;;  %9155 = vmatmul.mubr.msk.bf16.gmra.mrb[176].mxu0 %vm781_vm0, %v9844_v39  ;;  %v5026_v22 = vmax.f32 %v3528_v31, -2.3819763e+38  ;;  %v3539_v55 = vrot.slane %v3538_v29, 2  ;;  %v3531_v27 = vmax.f32 %v3529_v10, %v3530_v19 }
 0x1d0   : > { %v3543_v52 = vmax.f32 %v2773_v7, %v2781_v4  ;;  %9187 = vmatmul.mubr.msk.bf16.gmra.mrb[176].mxu1 %vm781_vm0, %v9844_v39  ;;  %1746 = vmatprep.mubr.bf16.mxu0 %v16446_v21  ;;  %v6171_v36 = vmul.f32 %v6170_v25, %v5574_v6  ;;  %vm11255_vm14 = vcmp.lt.f32.partialorder %v6172_v24, 0.0004427343  ;;  %v6178_v30 = vmul.f32 -0.5, %v11247_v42  ;;  %v11262_v7 = vpop.permute.xlu0 %2426  ;;  %v11264_v39 = vpop.f32.mrb[51].mxu0 }
 0x1d1   : > { %v9361_v1 = vpop.eup %9360  ;;  %9366 = vlog2.f32 %v6175_v35  ;;  %2099 = vmatprep.mubr.bf16.mxu1 %v16446_v21  ;;  %v5324_v9 = vadd.f32 %v10542_v23, %v5026_v22  ;;  %v3540_v19 = vmax.f32 %v3538_v29, %v3539_v55  ;;  %v3532_v10 = vrot.slane %v3531_v27, 2  ;;  %16536 = vst [vmem:[#allocation31_spill] sm:$0xff] %v11262_v7  ;;  %16537 = vst [vmem:[#allocation48_spill] sm:$0xff] %v11264_v39  ;;  %v11273_v25 = vpop.f32.mrb[51].mxu1 }
 0x1d2   : > { %v6150_v0 = vmul.f32 0.6931472, %v9361_v1  ;;  %v6162_v4 = vmul.f32 %v6161_v37, %v5573_v33  ;;  %vm11266_vm1 = vcmp.lt.f32.partialorder %v6163_v58, 0.0004427343  ;;  %v6181_v35 = vand.u32 2147483647, %v11247_v42 }
 0x1d3   : > { %v3544_v3 = vrot.slane %v3543_v52, 4  ;;  %16541 = vst [vmem:[#allocation50_spill] sm:$0xff] %v11273_v25  ;;  %v9363_v24 = vpop.eup %9362  ;;  %v11277_v31 = vmax.f32 %v5324_v9, 0.0  ;;  %v3541_v29 = vrot.slane %v3540_v19, 1  ;;  %v3533_v46 = vmax.f32 %v3531_v27, %v3532_v10  ;;  %v11315_v6 = vpop.f32.mrb[52].mxu0 }
 0x1d4   : > { %v6156_v22 = vsel %vm11243_vm12, %v6153_v63, %v6150_v0  ;;  %v6168_v37 = vmul.f32 0.6931472, %v9363_v24  ;;  %v6179_v58 = vadd.f32 1.0, %v6178_v30  ;;  %v2786_v39 = vadd.f32 %v11262_v7, %v10834_v61 }
 0x1d5   : > { %v8360_v33 = vrot.slane %v6156_v22, 3  ;;  %v3545_v55 = vmax.f32 %v3543_v52, %v3544_v3  ;;  %v6220_v1 = vadd.f32 1.0, %v11277_v31  ;;  %v3542_v32 = vmax.f32 %v3540_v19, %v3541_v29  ;;  %v9845_v52 = vld [vmem:[#allocation2 + $0x68] sm:$0xff]  }
 0x1d6   : > { %v2794_v25 = vadd.f32 %v11271_v5, %v10860_v43  ;;  %v9365_v17 = vpop.eup %9364  ;;  %v6174_v27 = vsel %vm11255_vm14, %v6171_v36, %v6168_v37  ;;  %v3534_v63 = vrot.slane %v3533_v46, 1  ;;  %v6223_v61 = vmul.f32 -0.5, %v11277_v31  ;;  %v9846_v43 = vld [vmem:[#allocation2 + $0x70] sm:$0xff]  }
 0x1d7   : > { %v11286_v59 = vsel %vm8361_vm13, %v8360_v33, %v11164_v45  ;;  %v3546_v30 = vrot.slane %v3545_v55, 2  ;;  %9156 = vmatmul.mubr.msk.bf16.gmra.mrb[180].mxu0 %vm781_vm0, %v9845_v52  ;;  %v8391_v0 = vrot.slane %v6174_v27, 3  ;;  %v6159_v9 = vmul.f32 0.6931472, %v9365_v17 }
 0x1d8   : > { %9368 = vlog2.f32 %v6220_v1  ;;  %9188 = vmatmul.mubr.msk.bf16.gmra.mrb[180].mxu1 %vm781_vm0, %v9845_v52  ;;  %1756 = vmatprep.mubr.bf16.mxu0 %v16446_v21  ;;  %vm11294_vm2 = vcmp.lt.f32.partialorder %v6181_v35, 0.0004427343  ;;  %v5028_v45 = vmax.f32 %v3542_v32, -2.3819763e+38  ;;  %v3535_v36 = vmax.f32 %v3533_v46, %v3534_v63  ;;  %v11325_v63 = vpop.f32.mrb[53].mxu0 }
 0x1d9   : > { %v3547_v54 = vmax.f32 %v3545_v55, %v3546_v30  ;;  %2109 = vmatprep.mubr.bf16.mxu1 %v16446_v21  ;;  %v11301_v19 = vsel %vm8361_vm13, %v8391_v0, %v11182_v20  ;;  %v6165_v17 = vsel %vm11266_vm1, %v6162_v4, %v6159_v9  ;;  %v6180_v10 = vmul.f32 %v6179_v58, %v11247_v42 }
 0x1da   : > { %v3578_v3 = vmax.f32 %v2786_v39, %v2794_v25  ;;  %v8377_v35 = vrot.slane %v6165_v17, 3  ;;  %v5326_v22 = vadd.f32 %v10545_v26, %v5028_v45  ;;  %v5027_v29 = vmax.f32 %v3535_v36, -2.3819763e+38  ;;  %v11317_v25 = vpop.f32.mrb[52].mxu1 }
 0x1db   : > { %v9367_v24 = vpop.eup %9366  ;;  %v3548_v32 = vrot.slane %v3547_v54, 1  ;;  %v6224_v33 = vadd.f32 1.0, %v6223_v61  ;;  %v6226_v37 = vand.u32 2147483647, %v11277_v31  ;;  %vm8364_vm3 = vcmask 1046534   ;;  %v11331_v61 = vpop.f32.mrb[53].mxu1 }
 0x1dc   : > { %v6177_v46 = vmul.f32 0.6931472, %v9367_v24  ;;  %v3579_v55 = vrot.slane %v3578_v3, 4  ;;  %v11310_v20 = vsel %vm8361_vm13, %v8377_v35, %v11210_v15  ;;  %v11312_v4 = vmax.f32 %v5326_v22, 0.0 }
 0x1dd   : > { %v5325_v42 = vadd.f32 %v10547_v28, %v5027_v29  ;;  %v3549_v39 = vmax.f32 %v3547_v54, %v3548_v32  ;;  %v2788_v27 = vadd.f32 %v11262_v7, %v10844_v62  ;;  %v2796_v15 = vadd.f32 %v11271_v5, %v10863_v2  ;;  %v11334_v2 = vpop.f32.mrb[54].mxu0 }
 0x1de   : > { %v6183_v58 = vsel %vm11294_vm2, %v6180_v10, %v6177_v46  ;;  %v3580_v1 = vmax.f32 %v3578_v3, %v3579_v55  ;;  %v6238_v52 = vadd.f32 1.0, %v11312_v4  ;;  %v6241_v0 = vmul.f32 -0.5, %v11312_v4  ;;  %v11346_v3 = vpop.f32.mrb[54].mxu1 }
 0x1df   : > { %v8405_v30 = vrot.slane %v6183_v58, 3  ;;  %v2787_v9 = vadd.f32 %v11262_v7, %v10846_v60  ;;  %9157 = vmatmul.mubr.msk.bf16.gmra.mrb[184].mxu0 %vm781_vm0, %v9846_v43  ;;  %v5581_v45 = vmax.f32 %v5325_v42, 0.0  ;;  %v5029_v62 = vmax.f32 %v3549_v39, -2.3819763e+38 }
 0x1e0   : > { %v3581_v36 = vrot.slane %v3580_v1, 2  ;;  %v3592_v54 = vmax.f32 %v2788_v27, %v2796_v15  ;;  %9189 = vmatmul.mubr.msk.bf16.gmra.mrb[184].mxu1 %vm781_vm0, %v9846_v43  ;;  %1766 = vmatprep.mubr.bf16.mxu0 %v16446_v21  ;;  %9370 = vlog2.f32 %v6238_v52  ;;  %v2789_v60 = vadd.f32 %v11262_v7, %v10858_v40  ;;  %v11352_v7 = vpop.f32.mrb[55].mxu0 }
 0x1e1   : > { %v11340_v17 = vsel %vm8361_vm13, %v8405_v30, %v11241_v8  ;;  %v2795_v10 = vadd.f32 %v11271_v5, %v10867_v38  ;;  %2119 = vmatprep.mubr.bf16.mxu1 %v16446_v21  ;;  %v6225_v35 = vmul.f32 %v6224_v33, %v11277_v31  ;;  %vm6227_vm4 = vcmp.lt.f32.partialorder %v6226_v37, 0.0004427343 }
 0x1e2   : > { %v9369_v24 = vpop.eup %9368  ;;  %v6229_v22 = vadd.f32 1.0, %v5581_v45  ;;  %v5327_v29 = vadd.f32 %v10551_v34, %v5029_v62  ;;  %v6232_v32 = vmul.f32 -0.5, %v5581_v45  ;;  %v3582_v46 = vmax.f32 %v3580_v1, %v3581_v36  ;;  %v9847_v1 = vld [vmem:[#allocation2 + $0x78] sm:$0xff]  }
 0x1e3   : > { %v6222_v8 = vmul.f32 0.6931472, %v9369_v24  ;;  %v3593_v55 = vrot.slane %v3592_v54, 4  ;;  %v6242_v42 = vadd.f32 1.0, %v6241_v0  ;;  %v6244_v40 = vand.u32 2147483647, %v11312_v4 }
 0x1e4   : > { %9372 = vlog2.f32 %v6229_v22  ;;  %v5583_v38 = vmax.f32 %v5327_v29, 0.0  ;;  %v3583_v58 = vrot.slane %v3582_v46, 1  ;;  %v3585_v15 = vmax.f32 %v2787_v9, %v2795_v10  ;;  %v11367_v29 = vpop.permute.xlu0 %2436 }
 0x1e5   : > { %v6228_v39 = vsel %vm6227_vm4, %v6225_v35, %v6222_v8  ;;  %v3594_v27 = vmax.f32 %v3592_v54, %v3593_v55  ;;  %v6235_v52 = vand.u32 2147483647, %v5581_v45  ;;  %v6233_v37 = vadd.f32 1.0, %v6232_v32  ;;  %16546 = vst [vmem:[#allocation51_spill] sm:$0xff] %v11367_v29 }
 0x1e6   : > { %v8363_v30 = vrot.slane %v6228_v39, 2  ;;  %v6247_v31 = vadd.f32 1.0, %v5583_v38  ;;  %v6250_v33 = vmul.f32 -0.5, %v5583_v38  ;;  %v3584_v43 = vmax.f32 %v3582_v46, %v3583_v58 }
 0x1e7   : > { %v3595_v62 = vrot.slane %v3594_v27, 2  ;;  %v3586_v24 = vrot.slane %v3585_v15, 4  ;;  %9158 = vmatmul.mubr.msk.bf16.gmra.mrb[188].mxu0 %vm781_vm0, %v9847_v1  ;;  %vm11359_vm5 = vcmp.lt.f32.partialorder %v6244_v40, 0.0004427343  ;;  %v2797_v9 = vadd.f32 %v11271_v5, %v10869_v16  ;;  %v16585_v5 = vld [vmem:[#allocation42_spill] sm:$0xff] }
 0x1e8   : > { %v11357_v0 = vsel %vm8364_vm3, %v8363_v30, %v11286_v59  ;;  %9374 = vlog2.f32 %v6247_v31  ;;  %9190 = vmatmul.mubr.msk.bf16.gmra.mrb[188].mxu1 %vm781_vm0, %v9847_v1  ;;  %1776 = vmatprep.mubr.bf16.mxu0 %v16446_v21  ;;  %v6253_v54 = vand.u32 2147483647, %v5583_v38  ;;  %v5034_v10 = vmax.f32 %v3584_v43, -2.3819763e+38  ;;  %v11369_v59 = vpop.permute.xlu1 %2441 }
 0x1e9   : > { %v3596_v35 = vmax.f32 %v3594_v27, %v3595_v62  ;;  %v3587_v22 = vmax.f32 %v3585_v15, %v3586_v24  ;;  %16547 = vst [vmem:[#allocation52_spill] sm:$0xff] %v11369_v59  ;;  %2129 = vmatprep.mubr.bf16.mxu1 %v16446_v21  ;;  %v6243_v8 = vmul.f32 %v6242_v42, %v11312_v4  ;;  %vm11373_vm8 = vcmp.lt.f32.partialorder %v6235_v52, 0.0004427343  ;;  %v11378_v15 = vpop.f32.mrb[55].mxu1  ;;  %v9849_v42 = vld [vmem:[#allocation2 + $0x88] sm:$0xff]  }
 0x1ea   : > { %v6251_v16 = vadd.f32 1.0, %v6250_v33  ;;  %v3599_v46 = vmax.f32 %v2789_v60, %v2797_v9  ;;  %v9371_v55 = vpop.eup %9370  ;;  %v6234_v40 = vmul.f32 %v6233_v37, %v5581_v45  ;;  %v5332_v39 = vadd.f32 %v10542_v23, %v5034_v10 }
 0x1eb   : > { %v3597_v58 = vrot.slane %v3596_v35, 1  ;;  %v3588_v27 = vrot.slane %v3587_v22, 2  ;;  %v6240_v30 = vmul.f32 0.6931472, %v9371_v55  ;;  %v2802_v43 = vadd.f32 %v11367_v29, %v10896_v44 }
 0x1ec   : > { %v3600_v31 = vrot.slane %v3599_v46, 4  ;;  %v2810_v4 = vadd.f32 %v11369_v59, %v10908_v57  ;;  %vm11384_vm9 = vcmp.lt.f32.partialorder %v6253_v54, 0.0004427343  ;;  %v11388_v60 = vmax.f32 %v5332_v39, 0.0  ;;  %v9848_v54 = vld [vmem:[#allocation2 + $0x80] sm:$0xff]  }
 0x1ed   : > { %v3598_v45 = vmax.f32 %v3596_v35, %v3597_v58  ;;  %v3589_v52 = vmax.f32 %v3587_v22, %v3588_v27  ;;  %v6246_v37 = vsel %vm11359_vm5, %v6243_v8, %v6240_v30  ;;  %v6252_v62 = vmul.f32 %v6251_v16, %v5583_v38 }
 0x1ee   : > { %v9373_v33 = vpop.eup %9372  ;;  %v3601_v24 = vmax.f32 %v3599_v46, %v3600_v31  ;;  %v3634_v1 = vmax.f32 %v2802_v43, %v2810_v4  ;;  %v8393_v9 = vrot.slane %v6246_v37, 2  ;;  %v6292_v10 = vadd.f32 1.0, %v11388_v60 }
 0x1ef   : > { %v6231_v44 = vmul.f32 0.6931472, %v9373_v33  ;;  %v2804_v57 = vadd.f32 %v11367_v29, %v10898_v12  ;;  %9159 = vmatmul.mubr.msk.bf16.gmra.mrb[192].mxu0 %vm781_vm0, %v9848_v54  ;;  %v5036_v55 = vmax.f32 %v3598_v45, -2.3819763e+38  ;;  %v3590_v35 = vrot.slane %v3589_v52, 1  ;;  %v11417_v45 = vpop.f32.mrb[56].mxu0 }
 0x1f0   : > { %v3602_v22 = vrot.slane %v3601_v24, 2  ;;  %v2812_v36 = vadd.f32 %v11369_v59, %v10910_v18  ;;  %9191 = vmatmul.mubr.msk.bf16.gmra.mrb[192].mxu1 %vm781_vm0, %v9848_v54  ;;  %1786 = vmatprep.mubr.bf16.mxu0 %v16446_v21  ;;  %v11402_v38 = vsel %vm8364_vm3, %v8393_v9, %v11301_v19  ;;  %9376 = vlog2.f32 %v6292_v10  ;;  %v16552_v19 = vld [vmem:[#allocation32_spill] sm:$0xff]  ;;  %v11419_v33 = vpop.f32.mrb[56].mxu1 }
 0x1f1   : > { %v6237_v12 = vsel %vm11373_vm8, %v6234_v40, %v6231_v44  ;;  %v2811_v8 = vadd.f32 %v11369_v59, %v10913_v56  ;;  %2139 = vmatprep.mubr.bf16.mxu1 %v16446_v21  ;;  %v6295_v18 = vmul.f32 -0.5, %v11388_v60  ;;  %v5334_v39 = vadd.f32 %v10545_v26, %v5036_v55  ;;  %16553 = vst [vmem:[#allocation32_spill] sm:$0xff] %v11419_v33  ;;  %v11423_v44 = vpop.f32.mrb[57].mxu0  ;;  %v16607_v33 = vld [vmem:[#allocation18_spill] sm:$0xff] }
 0x1f2   : > { %v9375_v16 = vpop.eup %9374  ;;  %v8379_v46 = vrot.slane %v6237_v12, 2  ;;  %v3591_v58 = vmax.f32 %v3589_v52, %v3590_v35  ;;  %v3603_v30 = vmax.f32 %v3601_v24, %v3602_v22  ;;  %v2803_v31 = vadd.f32 %v11367_v29, %v16552_v19  ;;  %v11425_v35 = vpop.f32.mrb[57].mxu1 }
 0x1f3   : > { %v6249_v27 = vmul.f32 0.6931472, %v9375_v16  ;;  %v3635_v32 = vrot.slane %v3634_v1, 4  ;;  %v5590_v56 = vmax.f32 %v5334_v39, 0.0  ;;  %v3648_v4 = vmax.f32 %v2804_v57, %v2812_v36  ;;  %16554 = vst [vmem:[#allocation53_spill] sm:$0xff] %v11425_v35  ;;  %v11428_v16 = vpop.f32.mrb[58].mxu0 }
 0x1f4   : > { %v11415_v40 = vsel %vm8364_vm3, %v8379_v46, %v11310_v20  ;;  %v5035_v43 = vmax.f32 %v3591_v58, -2.3819763e+38  ;;  %v3604_v37 = vrot.slane %v3603_v30, 1  ;;  %v3641_v9 = vmax.f32 %v2803_v31, %v2811_v8  ;;  %v11440_v58 = vpop.f32.mrb[58].mxu1 }
 0x1f5   : > { %v6255_v52 = vsel %vm11384_vm9, %v6252_v62, %v6249_v27  ;;  %v3636_v24 = vmax.f32 %v3634_v1, %v3635_v32  ;;  %v6296_v54 = vadd.f32 1.0, %v6295_v18  ;;  %v6310_v55 = vadd.f32 1.0, %v5590_v56 }
 0x1f6   : > { %v8407_v10 = vrot.slane %v6255_v52, 2  ;;  %v6313_v20 = vmul.f32 -0.5, %v5590_v56  ;;  %v5333_v57 = vadd.f32 %v10547_v28, %v5035_v43  ;;  %v3605_v22 = vmax.f32 %v3603_v30, %v3604_v37 }
 0x1f7   : > { %v3637_v36 = vrot.slane %v3636_v24, 2  ;;  %v3649_v12 = vrot.slane %v3648_v4, 4  ;;  %9160 = vmatmul.mubr.msk.bf16.gmra.mrb[196].mxu0 %vm781_vm0, %v9849_v42  ;;  %v6298_v1 = vand.u32 2147483647, %v11388_v60  ;;  %9378 = vlog2.f32 %v6310_v55 }
 0x1f8   : > { %v11433_v62 = vsel %vm8364_vm3, %v8407_v10, %v11340_v17  ;;  %9192 = vmatmul.mubr.msk.bf16.gmra.mrb[196].mxu1 %vm781_vm0, %v9849_v42  ;;  %1796 = vmatprep.mubr.bf16.mxu0 %v16446_v21  ;;  %v11438_v8 = vmax.f32 %v5333_v57, 0.0  ;;  %v5037_v46 = vmax.f32 %v3605_v22, -2.3819763e+38  ;;  %v6297_v27 = vmul.f32 %v6296_v54, %v11388_v60  ;;  %v16555_v17 = vld [vmem:[#allocation33_spill] sm:$0xff]  ;;  %v16556_v60 = vld [vmem:[#allocation34_spill] sm:$0xff]  ;;  %v11452_v22 = vpop.f32.mrb[59].mxu0 }
 0x1f9   : > { %v3638_v18 = vmax.f32 %v3636_v24, %v3637_v36  ;;  %v3650_v39 = vmax.f32 %v3648_v4, %v3649_v12  ;;  %2149 = vmatprep.mubr.bf16.mxu1 %v16446_v21  ;;  %vm8367_vm11 = vcmask 1047559   ;;  %v2805_v30 = vadd.f32 %v11367_v29, %v16555_v17  ;;  %16557 = vst [vmem:[#allocation33_spill] sm:$0xff] %v11452_v22 }
 0x1fa   : > { %v3642_v19 = vrot.slane %v3641_v9, 4  ;;  %v9377_v31 = vpop.eup %9376  ;;  %v6314_v32 = vadd.f32 1.0, %v6313_v20  ;;  %v6316_v43 = vand.u32 2147483647, %v5590_v56  ;;  %v6301_v52 = vadd.f32 1.0, %v11438_v8 }
 0x1fb   : > { %v5335_v37 = vadd.f32 %v10551_v34, %v5037_v46  ;;  %v6294_v24 = vmul.f32 0.6931472, %v9377_v31  ;;  %v3639_v4 = vrot.slane %v3638_v18, 1  ;;  %v3651_v10 = vrot.slane %v3650_v39, 2 }
 0x1fc   : > { %v3643_v55 = vmax.f32 %v3641_v9, %v3642_v19  ;;  %vm6299_vm12 = vcmp.lt.f32.partialorder %v6298_v1, 0.0004427343  ;;  %9380 = vlog2.f32 %v6301_v52  ;;  %v2813_v54 = vadd.f32 %v11369_v59, %v16556_v60  ;;  %v9850_v19 = vld [vmem:[#allocation2 + $0x90] sm:$0xff]   ;;  %v11475_v60 = vpop.permute.xlu1 %2451 }
 0x1fd   : > { %v11448_v57 = vmax.f32 %v5335_v37, 0.0  ;;  %v6300_v36 = vsel %vm6299_vm12, %v6297_v27, %v6294_v24  ;;  %v3640_v20 = vmax.f32 %v3638_v18, %v3639_v4  ;;  %v3652_v12 = vmax.f32 %v3650_v39, %v3651_v10  ;;  %v11461_v18 = vpop.permute.xlu0 %2446  ;;  %16561 = vst [vmem:[#allocation54_spill] sm:$0xff] %v11475_v60 }
 0x1fe   : > { %v3644_v42 = vrot.slane %v3643_v55, 2  ;;  %v8366_v17 = vrot.slane %v6300_v36, 1  ;;  %vm11454_vm14 = vcmp.lt.f32.partialorder %v6316_v43, 0.0004427343  ;;  %v6304_v9 = vmul.f32 -0.5, %v11438_v8  ;;  %16560 = vst [vmem:[#allocation34_spill] sm:$0xff] %v11461_v18 }
 0x1ff   : > { %v6319_v1 = vadd.f32 1.0, %v11448_v57  ;;  %9161 = vmatmul.mubr.msk.bf16.gmra.mrb[200].mxu0 %vm781_vm0, %v9850_v19  ;;  %v6315_v31 = vmul.f32 %v6314_v32, %v5590_v56  ;;  %v5042_v52 = vmax.f32 %v3640_v20, -2.3819763e+38  ;;  %v3653_v37 = vrot.slane %v3652_v12, 1 }
 0x200   : > { %v3645_v27 = vmax.f32 %v3643_v55, %v3644_v42  ;;  %9193 = vmatmul.mubr.msk.bf16.gmra.mrb[200].mxu1 %vm781_vm0, %v9850_v19  ;;  %1806 = vmatprep.mubr.bf16.mxu0 %v16446_v21  ;;  %v8368_v39 = vsel %vm8367_vm11, %v8366_v17, %v11357_v0  ;;  %v6307_v43 = vand.u32 2147483647, %v11438_v8  ;;  %v3655_v24 = vmax.f32 %v2805_v30, %v2813_v54  ;;  %v11477_v0 = vpop.f32.mrb[59].mxu1 }
 0x201   : > { %9382 = vlog2.f32 %v6319_v1  ;;  %2159 = vmatprep.mubr.bf16.mxu1 %v16446_v21  ;;  %v9379_v4 = vpop.eup %9378  ;;  %8835 = vst [vmem:[%s11470_s10] sm:$0xff] %v8368_v39  ;;  %v6322_v56 = vmul.f32 -0.5, %v11448_v57  ;;  %v5340_v32 = vadd.f32 %v10542_v23, %v5042_v52  ;;  %v3654_v10 = vmax.f32 %v3652_v12, %v3653_v37  ;;  %16562 = vst [vmem:[#allocation55_spill] sm:$0xff] %v11477_v0  ;;  %v16563_v39 = vld [vmem:[#allocation39_spill] sm:$0xff] }
 0x202   : > { %v3646_v55 = vrot.slane %v3645_v27, 1  ;;  %v6312_v36 = vmul.f32 0.6931472, %v9379_v4  ;;  %v6305_v20 = vadd.f32 1.0, %v6304_v9  ;;  %v3656_v30 = vrot.slane %v3655_v24, 4 }
 0x203   : > { %v11481_v54 = vadd.f32 %v11461_v18, %v10946_v50  ;;  %v6325_v42 = vand.u32 2147483647, %v11448_v57  ;;  %v11484_v17 = vmax.f32 %v5340_v32, 0.0  ;;  %v5044_v1 = vmax.f32 %v3654_v10, -2.3819763e+38 }
 0x204   : > { %v3647_v19 = vmax.f32 %v3645_v27, %v3646_v55  ;;  %v6318_v12 = vsel %vm11454_vm14, %v6315_v31, %v6312_v36  ;;  %v3657_v52 = vmax.f32 %v3655_v24, %v3656_v30  ;;  %v2818_v37 = vadd.f32 %v11461_v18, %v10940_v53  ;;  %v9851_v36 = vld [vmem:[#allocation2 + $0x98] sm:$0xff]  }
 0x205   : > { %v2826_v9 = vadd.f32 %v11475_v60, %v16563_v39  ;;  %v8395_v4 = vrot.slane %v6318_v12, 1  ;;  %vm11492_vm1 = vcmp.lt.f32.partialorder %v6307_v43, 0.0004427343  ;;  %v6323_v32 = vadd.f32 1.0, %v6322_v56  ;;  %v9852_v12 = vld [vmem:[#allocation2 + $0xa0] sm:$0xff]  }
 0x206   : > { %v6364_v10 = vadd.f32 1.0, %v11484_v17  ;;  %v9381_v27 = vpop.eup %9380  ;;  %v5342_v46 = vadd.f32 %v10545_v26, %v5044_v1  ;;  %v5043_v31 = vmax.f32 %v3647_v19, -2.3819763e+38  ;;  %v3658_v24 = vrot.slane %v3657_v52, 2 }
 0x207   : > { %v3690_v55 = vmax.f32 %v2818_v37, %v2826_v9  ;;  %9162 = vmatmul.mubr.msk.bf16.gmra.mrb[204].mxu0 %vm781_vm0, %v9851_v36  ;;  %v8396_v53 = vsel %vm8367_vm11, %v8395_v4, %v11402_v38  ;;  %v6303_v43 = vmul.f32 0.6931472, %v9381_v27  ;;  %v6306_v30 = vmul.f32 %v6305_v20, %v11438_v8 }
 0x208   : > { %vm11502_vm2 = vcmp.lt.f32.partialorder %v6325_v42, 0.0004427343  ;;  %9194 = vmatmul.mubr.msk.bf16.gmra.mrb[204].mxu1 %vm781_vm0, %v9851_v36  ;;  %1816 = vmatprep.mubr.bf16.mxu0 %v16446_v21  ;;  %8837 = vst [vmem:[%s11470_s10 + $0x10] sm:$0xff] %v8396_v53  ;;  %9384 = vlog2.f32 %v6364_v10  ;;  %v11509_v56 = vmax.f32 %v5342_v46, 0.0  ;;  %v5341_v1 = vadd.f32 %v10547_v28, %v5043_v31  ;;  %v11523_v31 = vpop.f32.mrb[60].mxu0  ;;  %v16571_v53 = vld [vmem:[#allocation37_spill] sm:$0xff] }
 0x209   : > { %v3659_v19 = vmax.f32 %v3657_v52, %v3658_v24  ;;  %2169 = vmatprep.mubr.bf16.mxu1 %v16446_v21  ;;  %v6309_v38 = vsel %vm11492_vm1, %v6306_v30, %v6303_v43  ;;  %v6324_v8 = vmul.f32 %v6323_v32, %v11448_v57  ;;  %v6367_v20 = vmul.f32 -0.5, %v11484_v17  ;;  %16568 = vst [vmem:[#allocation39_spill] sm:$0xff] %v11523_v31  ;;  %v11525_v57 = vpop.f32.mrb[60].mxu1  ;;  %v16570_v24 = vld [vmem:[#allocation38_spill] sm:$0xff] }
 0x20a   : > { %v3691_v42 = vrot.slane %v3690_v55, 4  ;;  %v8381_v39 = vrot.slane %v6309_v38, 1  ;;  %v6382_v9 = vadd.f32 1.0, %v11509_v56  ;;  %v6385_v4 = vmul.f32 -0.5, %v11509_v56  ;;  %16569 = vst [vmem:[#allocation56_spill] sm:$0xff] %v11525_v57  ;;  %v16591_v57 = vld [vmem:[#allocation43_spill] sm:$0xff] }
 0x20b   : > { %v9383_v37 = vpop.eup %9382  ;;  %v2828_v52 = vadd.f32 %v11475_v60, %v10969_v48  ;;  %v11521_v27 = vmax.f32 %v5341_v1, 0.0  ;;  %v3660_v50 = vrot.slane %v3659_v19, 1  ;;  %v2821_v36 = vadd.f32 %v11461_v18, %v16570_v24  ;;  %v11533_v48 = vpop.f32.mrb[61].mxu0 }
 0x20c   : > { %v6321_v10 = vmul.f32 0.6931472, %v9383_v37  ;;  %v3692_v46 = vmax.f32 %v3690_v55, %v3691_v42  ;;  %v8382_v32 = vsel %vm8367_vm11, %v8381_v39, %v11415_v40  ;;  %9386 = vlog2.f32 %v6382_v9  ;;  %16572 = vst [vmem:[#allocation38_spill] sm:$0xff] %v11533_v48  ;;  %v2352_v55 = vld [vmem:[%s16275_s3 + $0x1f0] sm:$0xff]  ;;  %v11544_v42 = vpop.f32.mrb[61].mxu1 }
 0x20d   : > { %v2820_v43 = vadd.f32 %v11461_v18, %v16571_v53  ;;  %8836 = vst [vmem:[%s11470_s10 + $0x8] sm:$0xff] %v8382_v32  ;;  %v6370_v1 = vand.u32 2147483647, %v11484_v17  ;;  %v6373_v40 = vadd.f32 1.0, %v11521_v27  ;;  %v6376_v38 = vmul.f32 -0.5, %v11521_v27  ;;  %16573 = vst [vmem:[#allocation37_spill] sm:$0xff] %v11544_v42  ;;  %2666 = vperm.xlu0 %9286, %v2352_v55  }
 0x20e   : > { %v6327_v30 = vsel %vm11502_vm2, %v6324_v8, %v6321_v10  ;;  %v6368_v39 = vadd.f32 1.0, %v6367_v20  ;;  %v3661_v9 = vmax.f32 %v3659_v19, %v3660_v50  ;;  %v3693_v24 = vrot.slane %v3692_v46, 2  ;;  %v11546_v53 = vpop.f32.mrb[62].mxu0  ;;  %v11548_v32 = vpop.f32.mrb[62].mxu1  ;;  %v16576_v55 = vld [vmem:[#allocation40_spill] sm:$0xff]  ;;  %v16592_v42 = vld [vmem:[#allocation45_spill] sm:$0xff] }
 0x20f   : > { %v8409_v37 = vrot.slane %v6327_v30, 1  ;;  %16574 = vst [vmem:[#allocation57_spill] sm:$0xff] %v11546_v53  ;;  %16575 = vst [vmem:[#allocation58_spill] sm:$0xff] %v11548_v32  ;;  %9163 = vmatmul.mubr.msk.bf16.gmra.mrb[208].mxu0 %vm781_vm0, %v9852_v12  ;;  %v6386_v8 = vadd.f32 1.0, %v6385_v4  ;;  %v6388_v10 = vand.u32 2147483647, %v11509_v56  ;;  %v3704_v59 = vmax.f32 %v2820_v43, %v2828_v52 }
 0x210   : > { %v6377_v18 = vadd.f32 1.0, %v6376_v38  ;;  %9195 = vmatmul.mubr.msk.bf16.gmra.mrb[208].mxu1 %vm781_vm0, %v9852_v12  ;;  %1826 = vmatprep.mubr.bf16.mxu0 %v16446_v21  ;;  %v5045_v20 = vmax.f32 %v3661_v9, -2.3819763e+38  ;;  %v3694_v50 = vmax.f32 %v3692_v46, %v3693_v24  ;;  %v2827_v30 = vadd.f32 %v11475_v60, %v16576_v55  ;;  %v11571_v24 = vpop.permute.xlu0 %2456 }
 0x211   : > { %v8410_v19 = vsel %vm8367_vm11, %v8409_v37, %v11433_v62  ;;  %2179 = vmatprep.mubr.bf16.mxu1 %v16446_v21  ;;  %vm11560_vm4 = vcmp.lt.f32.partialorder %v6370_v1, 0.0004427343  ;;  %9388 = vlog2.f32 %v6373_v40  ;;  %v3705_v52 = vrot.slane %v3704_v59, 4  ;;  %16579 = vst [vmem:[#allocation40_spill] sm:$0xff] %v11571_v24 }
 0x212   : > { %8838 = vst [vmem:[%s11470_s10 + $0x18] sm:$0xff] %v8410_v19  ;;  %v2829_v43 = vadd.f32 %v11475_v60, %v10990_v47  ;;  %v9385_v38 = vpop.eup %9384  ;;  %v11567_v62 = vmul.f32 %v6368_v39, %v11484_v17  ;;  %v5343_v46 = vadd.f32 %v10551_v34, %v5045_v20  ;;  %v3695_v37 = vrot.slane %v3694_v50, 1  ;;  %v11580_v19 = vpop.permute.xlu1 %2461 }
 0x213   : > { %v3697_v9 = vmax.f32 %v11481_v54, %v2827_v30  ;;  %v11574_v1 = vmul.f32 %v6386_v8, %v11509_v56  ;;  %vm11576_vm5 = vcmp.lt.f32.partialorder %v6388_v10, 0.0004427343  ;;  %v3706_v12 = vmax.f32 %v3704_v59, %v3705_v52  ;;  %16582 = vst [vmem:[#allocation59_spill] sm:$0xff] %v11580_v19  ;;  %v2353_v56 = vld [vmem:[%s16275_s3 + $0x1f8] sm:$0xff] }
 0x214   : > { %v3711_v47 = vmax.f32 %v2821_v36, %v2829_v43  ;;  %v11583_v17 = vmul.f32 %v6377_v18, %v11521_v27  ;;  %v11585_v39 = vmax.f32 %v5343_v46, 0.0  ;;  %v3696_v20 = vmax.f32 %v3694_v50, %v3695_v37  ;;  %2671 = vperm.xlu1 %9287, %v2353_v56   ;;  %v11596_v36 = vpop.f32.mrb[63].mxu0 }
 0x215   : > { %v3698_v54 = vrot.slane %v3697_v9, 4  ;;  %v11590_v8 = vmul.f32 0.6931472, %v9385_v38  ;;  %v3707_v10 = vrot.slane %v3706_v12, 2  ;;  %v11594_v59 = vadd.f32 %v11571_v24, %v11023_v41  ;;  %16583 = vst [vmem:[#allocation60_spill] sm:$0xff] %v11596_v36  ;;  %v9853_v38 = vld [vmem:[#allocation2 + $0xa8] sm:$0xff]  }
 0x216   : > { %v3712_v55 = vrot.slane %v3711_v47, 4  ;;  %v9387_v18 = vpop.eup %9386  ;;  %v6391_v30 = vadd.f32 1.0, %v11585_v39  ;;  %v5050_v50 = vmax.f32 %v3696_v20, -2.3819763e+38  ;;  %v2834_v52 = vadd.f32 %v11571_v24, %v11013_v14  ;;  %v11716_v0 = vpop.permute.xlu1 %2471 }
 0x217   : > { %v2842_v43 = vadd.f32 %v11580_v19, %v11035_v11  ;;  %9164 = vmatmul.mubr.msk.bf16.gmra.mrb[212].mxu0 %vm781_vm0, %v9853_v38  ;;  %v6379_v46 = vand.u32 2147483647, %v11521_v27  ;;  %v3708_v41 = vmax.f32 %v3706_v12, %v3707_v10  ;;  %v3699_v37 = vmax.f32 %v3697_v9, %v3698_v54  ;;  %v11611_v11 = vpop.f32.mrb[63].mxu1 }
 0x218   : > { %v3713_v56 = vmax.f32 %v3711_v47, %v3712_v55  ;;  %9196 = vmatmul.mubr.msk.bf16.gmra.mrb[212].mxu1 %vm781_vm0, %v9853_v38  ;;  %1836 = vmatprep.mubr.bf16.mxu0 %v16446_v21  ;;  %v11607_v60 = vmul.f32 0.6931472, %v9387_v18  ;;  %9390 = vlog2.f32 %v6391_v30  ;;  %v6394_v14 = vmul.f32 -0.5, %v11585_v39  ;;  %16584 = vst [vmem:[#allocation61_spill] sm:$0xff] %v11611_v11  ;;  %v11655_v32 = vpop.f32.mrb[64].mxu1 }
 0x219   : > { %v5348_v20 = vadd.f32 %v10542_v23, %v5050_v50  ;;  %2189 = vmatprep.mubr.bf16.mxu1 %v16446_v21  ;;  %v3709_v29 = vrot.slane %v3708_v41, 1  ;;  %v3700_v27 = vrot.slane %v3699_v37, 2  ;;  %v2837_v9 = vadd.f32 %v11571_v24, %v11033_v51 }
 0x21a   : > { %v3714_v12 = vrot.slane %v3713_v56, 2  ;;  %v6397_v54 = vand.u32 2147483647, %v11585_v39  ;;  %v3746_v55 = vmax.f32 %v2834_v52, %v2842_v43  ;;  %v2844_v11 = vadd.f32 %v11580_v19, %v16585_v5  ;;  %v16588_v52 = vld [vmem:[#allocation41_spill] sm:$0xff] }
 0x21b   : > { %v11621_v10 = vmax.f32 %v5348_v20, 0.0  ;;  %v9389_v18 = vpop.eup %9388  ;;  %v3710_v30 = vmax.f32 %v3708_v41, %v3709_v29  ;;  %v3701_v50 = vmax.f32 %v3699_v37, %v3700_v27  ;;  %vm11629_vm8 = vcmp.lt.f32.partialorder %v6379_v46, 0.0004427343  ;;  %16594 = vst [vmem:[#allocation41_spill] sm:$0xff] %v11655_v32 }
 0x21c   : > { %v3715_v38 = vmax.f32 %v3713_v56, %v3714_v12  ;;  %v6395_v47 = vadd.f32 1.0, %v6394_v14  ;;  %v2836_v29 = vadd.f32 %v11571_v24, %v16588_v52  ;;  %v3747_v56 = vrot.slane %v3746_v55, 4  ;;  %v9854_v14 = vld [vmem:[#allocation2 + $0xb0] sm:$0xff]  }
 0x21d   : > { %v6436_v20 = vadd.f32 1.0, %v11621_v10  ;;  %v5052_v43 = vmax.f32 %v3710_v30, -2.3819763e+38  ;;  %v3702_v41 = vrot.slane %v3701_v50, 1  ;;  %v11636_v5 = vmul.f32 0.6931472, %v9389_v18 }
 0x21e   : > { %v3716_v37 = vrot.slane %v3715_v38, 1  ;;  %vm11638_vm9 = vcmp.lt.f32.partialorder %v6397_v54, 0.0004427343  ;;  %v6439_v46 = vmul.f32 -0.5, %v11621_v10  ;;  %v3760_v12 = vmax.f32 %v2836_v29, %v2844_v11  ;;  %v11653_v29 = vpop.f32.mrb[64].mxu0 }
 0x21f   : > { %9392 = vlog2.f32 %v6436_v20  ;;  %9165 = vmatmul.mubr.msk.bf16.gmra.mrb[216].mxu0 %vm781_vm0, %v9854_v14  ;;  %v5350_v51 = vadd.f32 %v10545_v26, %v5052_v43  ;;  %v3703_v52 = vmax.f32 %v3701_v50, %v3702_v41  ;;  %v3748_v24 = vmax.f32 %v3746_v55, %v3747_v56  ;;  %16593 = vst [vmem:[#allocation42_spill] sm:$0xff] %v11653_v29  ;;  %v11663_v56 = vpop.f32.mrb[65].mxu1 }
 0x220   : > { %v3717_v30 = vmax.f32 %v3715_v38, %v3716_v37  ;;  %9197 = vmatmul.mubr.msk.bf16.gmra.mrb[216].mxu1 %vm781_vm0, %v9854_v14  ;;  %v11647_v18 = vmul.f32 %v6395_v47, %v11585_v39  ;;  %v3761_v54 = vrot.slane %v3760_v12, 4  ;;  %v2843_v20 = vadd.f32 %v11580_v19, %v16591_v57  ;;  %1846 = vmatprep.mubr.bf16.mxu0 %v16446_v21 }
 0x221   : > { %v2845_v11 = vadd.f32 %v11580_v19, %v16592_v42  ;;  %2199 = vmatprep.mubr.bf16.mxu1 %v16446_v21  ;;  %v5606_v55 = vmax.f32 %v5350_v51, 0.0  ;;  %v5051_v50 = vmax.f32 %v3703_v52, -2.3819763e+38  ;;  %v3749_v39 = vrot.slane %v3748_v24, 2  ;;  %v11661_v42 = vpop.f32.mrb[65].mxu0  ;;  %16596 = vst [vmem:[#allocation45_spill] sm:$0xff] %v11663_v56  ;;  %v11667_v51 = vpop.permute.xlu0 %2466 }
 0x222   : > { %v5053_v38 = vmax.f32 %v3717_v30, -2.3819763e+38  ;;  %v9391_v47 = vpop.eup %9390  ;;  %v6442_v43 = vand.u32 2147483647, %v11621_v10  ;;  %v3762_v41 = vmax.f32 %v3760_v12, %v3761_v54  ;;  %v3753_v57 = vmax.f32 %v11594_v59, %v2843_v20  ;;  %16595 = vst [vmem:[#allocation43_spill] sm:$0xff] %v11661_v42  ;;  %16597 = vst [vmem:[#allocation62_spill] sm:$0xff] %v11667_v51 }
 0x223   : > { %v3767_v37 = vmax.f32 %v2837_v9, %v2845_v11  ;;  %v11665_v14 = vmul.f32 0.6931472, %v9391_v47  ;;  %v6440_v19 = vadd.f32 1.0, %v6439_v46  ;;  %v6454_v32 = vadd.f32 1.0, %v5606_v55  ;;  %v11671_v54 = vpop.f32.mrb[66].mxu0  ;;  %v11673_v59 = vpop.f32.mrb[66].mxu1 }
 0x224   : > { %v6457_v29 = vmul.f32 -0.5, %v5606_v55  ;;  %v5349_v52 = vadd.f32 %v10547_v28, %v5051_v50  ;;  %v5351_v30 = vadd.f32 %v10551_v34, %v5053_v38  ;;  %v3750_v48 = vmax.f32 %v3748_v24, %v3749_v39  ;;  %16598 = vst [vmem:[#allocation63_spill] sm:$0xff] %v11671_v54  ;;  %16599 = vst [vmem:[#allocation64_spill] sm:$0xff] %v11673_v59  ;;  %v9855_v24 = vld [vmem:[#allocation2 + $0xb8] sm:$0xff]   ;;  %v16605_v42 = vld [vmem:[#allocation17_spill] sm:$0xff] }
 0x225   : > { %v3763_v12 = vrot.slane %v3762_v41, 2  ;;  %9394 = vlog2.f32 %v6454_v32  ;;  %v6460_v20 = vand.u32 2147483647, %v5606_v55  ;;  %v6441_v56 = vmul.f32 %v6440_v19, %v11621_v10 }
 0x226   : > { %v6458_v46 = vadd.f32 1.0, %v6457_v29  ;;  %v11679_v11 = vmax.f32 %v5349_v52, 0.0  ;;  %v11681_v47 = vmax.f32 %v5351_v30, 0.0  ;;  %v3751_v50 = vrot.slane %v3750_v48, 1  ;;  %v16602_v29 = vld [vmem:[#allocation19_spill] sm:$0xff] }
 0x227   : > { %v3764_v38 = vmax.f32 %v3762_v41, %v3763_v12  ;;  %9166 = vmatmul.mubr.msk.bf16.gmra.mrb[220].mxu0 %vm781_vm0, %v9855_v24  ;;  %vm11689_vm12 = vcmp.lt.f32.partialorder %v6442_v43, 0.0004427343  ;;  %v11695_v52 = vadd.f32 %v11667_v51, %v16602_v29  ;;  %v3754_v19 = vrot.slane %v3753_v57, 4  ;;  %16606 = vst [vmem:[#allocation19_spill] sm:$0xff] %v11716_v0 }
 0x228   : > { %9198 = vmatmul.mubr.msk.bf16.gmra.mrb[220].mxu1 %vm781_vm0, %v9855_v24  ;;  %1856 = vmatprep.mubr.bf16.mxu0 %v16446_v21  ;;  %v6445_v30 = vadd.f32 1.0, %v11679_v11  ;;  %v6448_v12 = vmul.f32 -0.5, %v11679_v11  ;;  %v6463_v39 = vadd.f32 1.0, %v11681_v47  ;;  %vm11703_vm14 = vcmp.lt.f32.partialorder %v6460_v20, 0.0004427343 }
 0x229   : > { %v9393_v41 = vpop.eup %9392  ;;  %2209 = vmatprep.mubr.bf16.mxu1 %v16446_v21  ;;  %v6466_v29 = vmul.f32 -0.5, %v11681_v47  ;;  %v3752_v24 = vmax.f32 %v3750_v48, %v3751_v50  ;;  %v3768_v9 = vrot.slane %v3767_v37, 4  ;;  %v6459_v59 = vmul.f32 %v6458_v46, %v5606_v55  ;;  %v11718_v46 = vpop.f32.mrb[67].mxu0 }
 0x22a   : > { %v6438_v10 = vmul.f32 0.6931472, %v9393_v41  ;;  %9396 = vlog2.f32 %v6445_v30  ;;  %v3765_v54 = vrot.slane %v3764_v38, 1  ;;  %v11710_v53 = vadd.f32 %v11667_v51, %v16605_v42 }
 0x22b   : > { %v6451_v41 = vand.u32 2147483647, %v11679_v11  ;;  %9398 = vlog2.f32 %v6463_v39  ;;  %v6469_v20 = vand.u32 2147483647, %v11681_v47  ;;  %v6449_v48 = vadd.f32 1.0, %v6448_v12 }
 0x22c   : > { %v6444_v31 = vsel %vm11689_vm12, %v6441_v56, %v6438_v10  ;;  %v5058_v50 = vmax.f32 %v3752_v24, -2.3819763e+38  ;;  %v3766_v55 = vmax.f32 %v3764_v38, %v3765_v54  ;;  %v6467_v30 = vadd.f32 1.0, %v6466_v29  ;;  %v11733_v38 = vpop.f32.mrb[67].mxu1 }
 0x22d   : > { %v8467_v22 = vrot.slane %v6444_v31, 7  ;;  %v3755_v35 = vmax.f32 %v3753_v57, %v3754_v19  ;;  %v3769_v42 = vmax.f32 %v3767_v37, %v3768_v9  ;;  %v2850_v32 = vadd.f32 %v11667_v51, %v16607_v33  ;;  %v9856_v57 = vld [vmem:[#allocation2 + $0xc0] sm:$0xff]   ;;  %v16609_v9 = vld [vmem:[#allocation16_spill] sm:$0xff] }
 0x22e   : > { %v16608_v56 = vsel %vm11560_vm4, %v11567_v62, %v11590_v8  ;;  %v5356_v31 = vadd.f32 %v10542_v23, %v5058_v50  ;;  %v5060_v12 = vmax.f32 %v3766_v55, -2.3819763e+38  ;;  %v2858_v54 = vadd.f32 %v11716_v0, %v11134_v13 }
 0x22f   : > { %v11728_v39 = vsel %vm8349_vm6, %v8467_v22, %v16608_v56  ;;  %9167 = vmatmul.mubr.msk.bf16.gmra.mrb[224].mxu0 %vm781_vm0, %v9856_v57  ;;  %v9395_v33 = vpop.eup %9394  ;;  %v3756_v37 = vrot.slane %v3755_v35, 2  ;;  %v3770_v4 = vrot.slane %v3769_v42, 2  ;;  %v2852_v62 = vadd.f32 %v11667_v51, %v16609_v9 }
 0x230   : > { %v2860_v22 = vadd.f32 %v11716_v0, %v11146_v49  ;;  %9199 = vmatmul.mubr.msk.bf16.gmra.mrb[224].mxu1 %vm781_vm0, %v9856_v57  ;;  %1866 = vmatprep.mubr.bf16.mxu0 %v16446_v21  ;;  %v6456_v8 = vmul.f32 0.6931472, %v9395_v33  ;;  %v5612_v13 = vmax.f32 %v5356_v31, 0.0  ;;  %v5358_v19 = vadd.f32 %v10545_v26, %v5060_v12 }
 0x231   : > { %v3802_v10 = vmax.f32 %v2850_v32, %v2858_v54  ;;  %2219 = vmatprep.mubr.bf16.mxu1 %v16446_v21  ;;  %vm11744_vm1 = vcmp.lt.f32.partialorder %v6451_v41, 0.0004427343  ;;  %v3757_v24 = vmax.f32 %v3755_v35, %v3756_v37  ;;  %v3771_v50 = vmax.f32 %v3769_v42, %v3770_v4 }
 0x232   : > { %v3816_v55 = vmax.f32 %v2852_v62, %v2860_v22  ;;  %v6462_v49 = vsel %vm11703_vm14, %v6459_v59, %v6456_v8  ;;  %vm11750_vm2 = vcmp.lt.f32.partialorder %v6469_v20, 0.0004427343  ;;  %v6508_v31 = vadd.f32 1.0, %v5612_v13 }
 0x233   : > { %v6511_v57 = vmul.f32 -0.5, %v5612_v13  ;;  %v8495_v12 = vrot.slane %v6462_v49, 7  ;;  %v5614_v32 = vmax.f32 %v5358_v19, 0.0  ;;  %v3758_v54 = vrot.slane %v3757_v24, 1 }
 0x234   : > { %v3772_v33 = vrot.slane %v3771_v50, 1  ;;  %v9397_v41 = vpop.eup %9396  ;;  %v6450_v9 = vmul.f32 %v6449_v48, %v11679_v11  ;;  %v6468_v35 = vmul.f32 %v6467_v30, %v11681_v47  ;;  %9400 = vlog2.f32 %v6508_v31  ;;  %v16615_v11 = vld [vmem:[#allocation20_spill] sm:$0xff]  ;;  %v9857_v48 = vld [vmem:[#allocation2 + $0xc8] sm:$0xff]  }
 0x235   : > { %v3803_v42 = vrot.slane %v3802_v10, 4  ;;  %v9399_v37 = vpop.eup %9398  ;;  %v16614_v59 = vsel %vm11576_vm5, %v11574_v1, %v11607_v60  ;;  %v6447_v20 = vmul.f32 0.6931472, %v9397_v41  ;;  %v6526_v4 = vadd.f32 1.0, %v5614_v32 }
 0x236   : > { %v11762_v43 = vsel %vm8349_vm6, %v8495_v12, %v16614_v59  ;;  %v6529_v62 = vmul.f32 -0.5, %v5614_v32  ;;  %v6465_v22 = vmul.f32 0.6931472, %v9399_v37  ;;  %v6514_v8 = vand.u32 2147483647, %v5612_v13  ;;  %v11795_v37 = vpop.f32.mrb[68].mxu0 }
 0x237   : > { %v3759_v19 = vmax.f32 %v3757_v24, %v3758_v54  ;;  %v2859_v47 = vadd.f32 %v11716_v0, %v16615_v11  ;;  %9168 = vmatmul.mubr.msk.bf16.gmra.mrb[228].mxu0 %vm781_vm0, %v9857_v48  ;;  %v6453_v40 = vsel %vm11744_vm1, %v6450_v9, %v6447_v20  ;;  %v6512_v30 = vadd.f32 1.0, %v6511_v57  ;;  %v11797_v59 = vpop.f32.mrb[68].mxu1 }
 0x238   : > { %9402 = vlog2.f32 %v6526_v4  ;;  %v3773_v60 = vmax.f32 %v3771_v50, %v3772_v33  ;;  %9200 = vmatmul.mubr.msk.bf16.gmra.mrb[228].mxu1 %vm781_vm0, %v9857_v48  ;;  %1876 = vmatprep.mubr.bf16.mxu0 %v16446_v21  ;;  %v8481_v1 = vrot.slane %v6453_v40, 7  ;;  %v6471_v24 = vsel %vm11750_vm2, %v6468_v35, %v6465_v22  ;;  %v11812_v11 = vpop.f32.mrb[69].mxu1  ;;  %v16630_v48 = vld [vmem:[#allocation28_spill] sm:$0xff] }
 0x239   : > { %v6532_v49 = vand.u32 2147483647, %v5614_v32  ;;  %v5059_v31 = vmax.f32 %v3759_v19, -2.3819763e+38  ;;  %2229 = vmatprep.mubr.bf16.mxu1 %v16446_v21  ;;  %v8509_v12 = vrot.slane %v6471_v24, 7  ;;  %v6530_v54 = vadd.f32 1.0, %v6529_v62  ;;  %v11810_v19 = vpop.permute.xlu0 %2476 }
 0x23a   : > { %v5061_v41 = vmax.f32 %v3773_v60, -2.3819763e+38  ;;  %v3804_v29 = vmax.f32 %v3802_v10, %v3803_v42  ;;  %v16616_v50 = vsel %vm11629_vm8, %v11583_v17, %v11636_v5  ;;  %v3817_v56 = vrot.slane %v3816_v55, 4  ;;  %v16618_v17 = vld [vmem:[#allocation27_spill] sm:$0xff]  ;;  %16621 = vst [vmem:[#allocation17_spill] sm:$0xff] %v11810_v19 }
 0x23b   : > { %v11780_v57 = vsel %vm8349_vm6, %v8481_v1, %v16616_v50  ;;  %v5357_v33 = vadd.f32 %v10547_v28, %v5059_v31  ;;  %v3809_v9 = vmax.f32 %v11695_v52, %v2859_v47  ;;  %v16617_v35 = vsel %vm11638_vm9, %v11647_v18, %v11665_v14  ;;  %v11805_v14 = vpop.f32.mrb[69].mxu0 }
 0x23c   : > { %v11790_v10 = vsel %vm8349_vm6, %v8509_v12, %v16617_v35  ;;  %v5359_v36 = vadd.f32 %v10551_v34, %v5061_v41  ;;  %v3805_v42 = vrot.slane %v3804_v29, 2  ;;  %v2861_v5 = vadd.f32 %v11716_v0, %v16618_v17  ;;  %v11819_v60 = vpop.f32.mrb[70].mxu0  ;;  %v16625_v12 = vld [vmem:[#allocation30_spill] sm:$0xff]  ;;  %v11834_v41 = vpop.f32.mrb[70].mxu1 }
 0x23d   : > { %vm11799_vm4 = vcmp.lt.f32.partialorder %v6514_v8, 0.0004427343  ;;  %v11803_v27 = vmax.f32 %v5357_v33, 0.0  ;;  %v3818_v18 = vmax.f32 %v3816_v55, %v3817_v56  ;;  %v6513_v20 = vmul.f32 %v6512_v30, %v5612_v13  ;;  %v9858_v13 = vld [vmem:[#allocation2 + $0xd0] sm:$0xff]  }
 0x23e   : > { %v11807_v4 = vmax.f32 %v5359_v36, 0.0  ;;  %v3806_v62 = vmax.f32 %v3804_v29, %v3805_v42  ;;  %v3823_v22 = vmax.f32 %v11710_v53, %v2861_v5  ;;  %v9401_v47 = vpop.eup %9400  ;;  %v6531_v8 = vmul.f32 %v6530_v54, %v5614_v32  ;;  %v11836_v29 = vpop.f32.mrb[71].mxu0 }
 0x23f   : > { %vm11814_vm5 = vcmp.lt.f32.partialorder %v6532_v49, 0.0004427343  ;;  %v6517_v55 = vadd.f32 1.0, %v11803_v27  ;;  %v3810_v40 = vrot.slane %v3809_v9, 4  ;;  %9169 = vmatmul.mubr.msk.bf16.gmra.mrb[232].mxu0 %vm781_vm0, %v9858_v13  ;;  %v6510_v30 = vmul.f32 0.6931472, %v9401_v47 }
 0x240   : > { %v6520_v53 = vmul.f32 -0.5, %v11803_v27  ;;  %v6535_v1 = vadd.f32 1.0, %v11807_v4  ;;  %v3819_v24 = vrot.slane %v3818_v18, 2  ;;  %9201 = vmatmul.mubr.msk.bf16.gmra.mrb[232].mxu1 %vm781_vm0, %v9858_v13  ;;  %1886 = vmatprep.mubr.bf16.mxu0 %v16446_v21  ;;  %v3807_v32 = vrot.slane %v3806_v62, 1  ;;  %v16624_v49 = vld [vmem:[#allocation26_spill] sm:$0xff] }
 0x241   : > { %9404 = vlog2.f32 %v6517_v55  ;;  %v11828_v31 = vadd.f32 %v11810_v19, %v16624_v49  ;;  %v11832_v54 = vadd.f32 %v11810_v19, %v16625_v12  ;;  %2239 = vmatprep.mubr.bf16.mxu1 %v16446_v21  ;;  %v6516_v33 = vsel %vm11799_vm4, %v6513_v20, %v6510_v30  ;;  %v11844_v12 = vpop.permute.xlu1 %2481 }
 0x242   : > { %v9403_v50 = vpop.eup %9402  ;;  %v6523_v56 = vand.u32 2147483647, %v11803_v27  ;;  %9406 = vlog2.f32 %v6535_v1  ;;  %v6538_v35 = vmul.f32 -0.5, %v11807_v4  ;;  %v8469_v36 = vrot.slane %v6516_v33, 6  ;;  %16626 = vst [vmem:[#allocation18_spill] sm:$0xff] %v11844_v12  ;;  %v16627_v1 = vld [vmem:[#allocation25_spill] sm:$0xff] }
 0x243   : > { %v6528_v42 = vmul.f32 0.6931472, %v9403_v50  ;;  %v6541_v17 = vand.u32 2147483647, %v11807_v4  ;;  %v3808_v5 = vmax.f32 %v3806_v62, %v3807_v32  ;;  %v6521_v47 = vadd.f32 1.0, %v6520_v53 }
 0x244   : > { %v3820_v55 = vmax.f32 %v3818_v18, %v3819_v24  ;;  %v3811_v13 = vmax.f32 %v3809_v9, %v3810_v40  ;;  %v3824_v49 = vrot.slane %v3823_v22, 4  ;;  %v11848_v52 = vsel %vm8352_vm10, %v8469_v36, %v11728_v39  ;;  %v11854_v18 = vpop.f32.mrb[71].mxu1  ;;  %v16628_v40 = vld [vmem:[#allocation47_spill] sm:$0xff]  ;;  %v16629_v39 = vld [vmem:[#allocation29_spill] sm:$0xff]  ;;  %v9859_v36 = vld [vmem:[#allocation2 + $0xd8] sm:$0xff]  }
 0x245   : > { %v6534_v20 = vsel %vm11814_vm5, %v6531_v8, %v6528_v42  ;;  %v5066_v30 = vmax.f32 %v3808_v5, -2.3819763e+38  ;;  %v2866_v50 = vadd.f32 %v11810_v19, %v16627_v1  ;;  %v2874_v24 = vadd.f32 %v11844_v12, %v16628_v40 }
 0x246   : > { %v8497_v33 = vrot.slane %v6534_v20, 6  ;;  %v3821_v0 = vrot.slane %v3820_v55, 1  ;;  %v3812_v62 = vrot.slane %v3811_v13, 2  ;;  %v3825_v53 = vmax.f32 %v3823_v22, %v3824_v49 }
 0x247   : > { %v5364_v9 = vadd.f32 %v10542_v23, %v5066_v30  ;;  %v2868_v32 = vadd.f32 %v11810_v19, %v16629_v39  ;;  %v2876_v8 = vadd.f32 %v11844_v12, %v16630_v48  ;;  %9170 = vmatmul.mubr.msk.bf16.gmra.mrb[236].mxu0 %vm781_vm0, %v9859_v36  ;;  %v6539_v20 = vadd.f32 1.0, %v6538_v35  ;;  %v9860_v39 = vld [vmem:[#allocation2 + $0xe0] sm:$0xff]  }
 0x248   : > { %v11866_v42 = vsel %vm8352_vm10, %v8497_v33, %v11762_v43  ;;  %v3822_v22 = vmax.f32 %v3820_v55, %v3821_v0  ;;  %v3813_v5 = vmax.f32 %v3811_v13, %v3812_v62  ;;  %v3826_v49 = vrot.slane %v3825_v53, 2  ;;  %9202 = vmatmul.mubr.msk.bf16.gmra.mrb[236].mxu1 %vm781_vm0, %v9859_v36  ;;  %1896 = vmatprep.mubr.bf16.mxu0 %v16446_v21 }
 0x249   : > { %v11870_v30 = vmax.f32 %v5364_v9, 0.0  ;;  %v3858_v1 = vmax.f32 %v2866_v50, %v2874_v24  ;;  %v11872_v40 = vmax.f32 %v2868_v32, %v2876_v8  ;;  %2249 = vmatprep.mubr.bf16.mxu1 %v16446_v21  ;;  %vm11875_vm8 = vcmp.lt.f32.partialorder %v6523_v56, 0.0004427343 }
 0x24a   : > { %v5068_v43 = vmax.f32 %v3822_v22, -2.3819763e+38  ;;  %v3814_v0 = vrot.slane %v3813_v5, 1  ;;  %v3827_v55 = vmax.f32 %v3825_v53, %v3826_v49  ;;  %v6522_v33 = vmul.f32 %v6521_v47, %v11803_v27  ;;  %v11892_v49 = vpop.f32.mrb[72].mxu0 }
 0x24b   : > { %v9405_v13 = vpop.eup %9404  ;;  %vm11880_vm9 = vcmp.lt.f32.partialorder %v6541_v17, 0.0004427343  ;;  %v6580_v35 = vadd.f32 1.0, %v11870_v30  ;;  %v3859_v50 = vrot.slane %v3858_v1, 4  ;;  %v6540_v36 = vmul.f32 %v6539_v20, %v11807_v4  ;;  %v16635_v4 = vld [vmem:[#allocation48_spill] sm:$0xff] }
 0x24c   : > { %v9407_v9 = vpop.eup %9406  ;;  %v6519_v24 = vmul.f32 0.6931472, %v9405_v13  ;;  %v5366_v56 = vadd.f32 %v10545_v26, %v5068_v43  ;;  %v3815_v32 = vmax.f32 %v3813_v5, %v3814_v0  ;;  %v3828_v48 = vrot.slane %v3827_v55, 1  ;;  %v11894_v13 = vpop.f32.mrb[72].mxu1 }
 0x24d   : > { %v6537_v8 = vmul.f32 0.6931472, %v9407_v9  ;;  %9408 = vlog2.f32 %v6580_v35  ;;  %v6583_v53 = vmul.f32 -0.5, %v11870_v30  ;;  %v3860_v0 = vmax.f32 %v3858_v1, %v3859_v50  ;;  %v11900_v35 = vpop.f32.mrb[73].mxu0 }
 0x24e   : > { %v6525_v27 = vsel %vm11875_vm8, %v6522_v33, %v6519_v24  ;;  %v11890_v17 = vmax.f32 %v5366_v56, 0.0  ;;  %v5067_v47 = vmax.f32 %v3815_v32, -2.3819763e+38  ;;  %v3829_v22 = vmax.f32 %v3827_v55, %v3828_v48  ;;  %v16636_v24 = vld [vmem:[#allocation50_spill] sm:$0xff]  ;;  %v11907_v32 = vpop.f32.mrb[73].mxu1 }
 0x24f   : > { %v8483_v43 = vrot.slane %v6525_v27, 6  ;;  %v6543_v5 = vsel %vm11880_vm9, %v6540_v36, %v6537_v8  ;;  %v2875_v20 = vadd.f32 %v11844_v12, %v16635_v4  ;;  %9171 = vmatmul.mubr.msk.bf16.gmra.mrb[240].mxu0 %vm781_vm0, %v9860_v39  ;;  %v6586_v55 = vand.u32 2147483647, %v11870_v30  ;;  %16637 = vst [vmem:[#allocation16_spill] sm:$0xff] %v11907_v32  ;;  %v11916_v8 = vpop.f32.mrb[74].mxu0  ;;  %v11924_v4 = vpop.f32.mrb[74].mxu1 }
 0x250   : > { %v8511_v33 = vrot.slane %v6543_v5, 6  ;;  %v6598_v9 = vadd.f32 1.0, %v11890_v17  ;;  %v2877_v56 = vadd.f32 %v11844_v12, %v16636_v24  ;;  %9203 = vmatmul.mubr.msk.bf16.gmra.mrb[240].mxu1 %vm781_vm0, %v9860_v39  ;;  %1906 = vmatprep.mubr.bf16.mxu0 %v16446_v21  ;;  %v5365_v62 = vadd.f32 %v10547_v28, %v5067_v47  ;;  %16638 = vst [vmem:[#allocation20_spill] sm:$0xff] %v11924_v4  ;;  %v11941_v32 = vpop.f32.mrb[75].mxu0 }
 0x251   : > { %v11913_v1 = vsel %vm8352_vm10, %v8483_v43, %v11780_v57  ;;  %v5069_v50 = vmax.f32 %v3829_v22, -2.3819763e+38  ;;  %v3861_v48 = vrot.slane %v3860_v0, 2  ;;  %2259 = vmatprep.mubr.bf16.mxu1 %v16446_v21  ;;  %v6584_v27 = vadd.f32 1.0, %v6583_v53  ;;  %16641 = vst [vmem:[#allocation27_spill] sm:$0xff] %v11941_v32  ;;  %v11956_v32 = vpop.permute.xlu1 %2491 }
 0x252   : > { %v11921_v36 = vsel %vm8352_vm10, %v8511_v33, %v11790_v10  ;;  %9410 = vlog2.f32 %v6598_v9  ;;  %v6601_v5 = vmul.f32 -0.5, %v11890_v17  ;;  %v5621_v57 = vmax.f32 %v5365_v62, 0.0  ;;  %16644 = vst [vmem:[#allocation26_spill] sm:$0xff] %v11956_v32 }
 0x253   : > { %v5367_v43 = vadd.f32 %v10551_v34, %v5069_v50  ;;  %v3862_v47 = vmax.f32 %v3860_v0, %v3861_v48  ;;  %v3873_v22 = vrot.slane %v11872_v40, 4  ;;  %vm11928_vm12 = vcmp.lt.f32.partialorder %v6586_v55, 0.0004427343 }
 0x254   : > { %v3865_v24 = vmax.f32 %v11828_v31, %v2875_v20  ;;  %v3879_v10 = vmax.f32 %v11832_v54, %v2877_v56  ;;  %v6604_v53 = vand.u32 2147483647, %v11890_v17  ;;  %v6589_v33 = vadd.f32 1.0, %v5621_v57  ;;  %v9861_v20 = vld [vmem:[#allocation2 + $0xe8] sm:$0xff]  }
 0x255   : > { %v6592_v9 = vmul.f32 -0.5, %v5621_v57  ;;  %v11935_v12 = vmax.f32 %v5367_v43, 0.0  ;;  %v6602_v62 = vadd.f32 1.0, %v6601_v5  ;;  %v3863_v19 = vrot.slane %v3862_v47, 1  ;;  %v11949_v5 = vpop.f32.mrb[75].mxu1 }
 0x256   : > { %v3874_v0 = vmax.f32 %v11872_v40, %v3873_v22  ;;  %v3866_v50 = vrot.slane %v3865_v24, 4  ;;  %v6585_v55 = vmul.f32 %v6584_v27, %v11870_v30  ;;  %9412 = vlog2.f32 %v6589_v33 }
 0x257   : > { %v9409_v48 = vpop.eup %9408  ;;  %v6607_v51 = vadd.f32 1.0, %v11935_v12  ;;  %v3880_v31 = vrot.slane %v3879_v10, 4  ;;  %9172 = vmatmul.mubr.msk.bf16.gmra.mrb[244].mxu0 %vm781_vm0, %v9861_v20  ;;  %v6593_v56 = vadd.f32 1.0, %v6592_v9  ;;  %v6595_v4 = vand.u32 2147483647, %v5621_v57 }
 0x258   : > { %v6582_v54 = vmul.f32 0.6931472, %v9409_v48  ;;  %v3864_v43 = vmax.f32 %v3862_v47, %v3863_v19  ;;  %9204 = vmatmul.mubr.msk.bf16.gmra.mrb[244].mxu1 %vm781_vm0, %v9861_v20  ;;  %1916 = vmatprep.mubr.bf16.mxu0 %v16446_v21  ;;  %vm11945_vm14 = vcmp.lt.f32.partialorder %v6604_v53, 0.0004427343  ;;  %v3875_v30 = vrot.slane %v3874_v0, 2 }
 0x259   : > { %9414 = vlog2.f32 %v6607_v51  ;;  %v3867_v27 = vmax.f32 %v3865_v24, %v3866_v50  ;;  %2269 = vmatprep.mubr.bf16.mxu1 %v16446_v21  ;;  %v6603_v47 = vmul.f32 %v6602_v62, %v11890_v17  ;;  %v6610_v22 = vmul.f32 -0.5, %v11935_v12  ;;  %v11964_v17 = vpop.permute.xlu0 %2486 }
 0x25a   : > { %v6588_v19 = vsel %vm11928_vm12, %v6585_v55, %v6582_v54  ;;  %v5074_v33 = vmax.f32 %v3864_v43, -2.3819763e+38  ;;  %v3876_v53 = vmax.f32 %v3874_v0, %v3875_v30  ;;  %v3881_v20 = vmax.f32 %v3879_v10, %v3880_v31  ;;  %16647 = vst [vmem:[#allocation30_spill] sm:$0xff] %v11964_v17 }
 0x25b   : > { %v8471_v9 = vrot.slane %v6588_v19, 5  ;;  %v3868_v48 = vrot.slane %v3867_v27, 2  ;;  %v6594_v24 = vmul.f32 %v6593_v56, %v5621_v57  ;;  %vm11958_vm1 = vcmp.lt.f32.partialorder %v6595_v4, 0.0004427343 }
 0x25c   : > { %v9411_v51 = vpop.eup %9410  ;;  %v6613_v39 = vand.u32 2147483647, %v11935_v12  ;;  %v5372_v55 = vadd.f32 %v10542_v23, %v5074_v33  ;;  %v3877_v10 = vrot.slane %v3876_v53, 1  ;;  %v6611_v54 = vadd.f32 1.0, %v6610_v22 }
 0x25d   : > { %v11968_v62 = vsel %vm8355_vm15, %v8471_v9, %v11848_v52  ;;  %v6600_v0 = vmul.f32 0.6931472, %v9411_v51  ;;  %v3869_v31 = vmax.f32 %v3867_v27, %v3868_v48  ;;  %v3882_v4 = vrot.slane %v3881_v20, 2  ;;  %v9862_v52 = vld [vmem:[#allocation2 + $0xf0] sm:$0xff]  }
 0x25e   : > { %v11970_v43 = vmax.f32 %v5372_v55, 0.0  ;;  %v2890_v57 = vadd.f32 %v11956_v32, %v11334_v2  ;;  %v3878_v30 = vmax.f32 %v3876_v53, %v3877_v10  ;;  %v2882_v33 = vadd.f32 %v11964_v17, %v11315_v6 }
 0x25f   : > { %v6606_v56 = vsel %vm11945_vm14, %v6603_v47, %v6600_v0  ;;  %v3870_v19 = vrot.slane %v3869_v31, 1  ;;  %9173 = vmatmul.mubr.msk.bf16.gmra.mrb[248].mxu0 %vm781_vm0, %v9862_v52  ;;  %vm11979_vm2 = vcmp.lt.f32.partialorder %v6613_v39, 0.0004427343  ;;  %v2892_v2 = vadd.f32 %v11956_v32, %v11346_v3 }
 0x260   : > { %v8499_v9 = vrot.slane %v6606_v56, 5  ;;  %v6652_v22 = vadd.f32 1.0, %v11970_v43  ;;  %9205 = vmatmul.mubr.msk.bf16.gmra.mrb[248].mxu1 %vm781_vm0, %v9862_v52  ;;  %1926 = vmatprep.mubr.bf16.mxu0 %v16446_v21  ;;  %v9413_v40 = vpop.eup %9412  ;;  %v5076_v47 = vmax.f32 %v3878_v30, -2.3819763e+38  ;;  %v3883_v53 = vmax.f32 %v3881_v20, %v3882_v4 }
 0x261   : > { %v3871_v6 = vmax.f32 %v3869_v31, %v3870_v19  ;;  %v3914_v48 = vmax.f32 %v2882_v33, %v2890_v57  ;;  %2279 = vmatprep.mubr.bf16.mxu1 %v16446_v21  ;;  %v6591_v39 = vmul.f32 0.6931472, %v9413_v40  ;;  %v6655_v55 = vmul.f32 -0.5, %v11970_v43  ;;  %v9863_v40 = vld [vmem:[#allocation2 + $0xf8] sm:$0xff]  }
 0x262   : > { %v11991_v51 = vsel %vm8355_vm15, %v8499_v9, %v11866_v42  ;;  %9416 = vlog2.f32 %v6652_v22  ;;  %v6612_v0 = vmul.f32 %v6611_v54, %v11935_v12  ;;  %v5374_v10 = vadd.f32 %v10545_v26, %v5076_v47 }
 0x263   : > { %v9415_v3 = vpop.eup %9414  ;;  %v5075_v56 = vmax.f32 %v3871_v6, -2.3819763e+38  ;;  %v3884_v30 = vrot.slane %v3883_v53, 1  ;;  %v6597_v20 = vsel %vm11958_vm1, %v6594_v24, %v6591_v39  ;;  %v3915_v21 = vrot.slane %v3914_v48, 4 }
 0x264   : > { %v6609_v31 = vmul.f32 0.6931472, %v9415_v3  ;;  %v2884_v42 = vadd.f32 %v11964_v17, %v11317_v25  ;;  %v8485_v4 = vrot.slane %v6597_v20, 5  ;;  %v5630_v57 = vmax.f32 %v5374_v10, 0.0  ;;  %v12020_v20 = vpop.f32.mrb[76].mxu0 }
 0x265   : > { %v5373_v19 = vadd.f32 %v10547_v28, %v5075_v56  ;;  %v3885_v33 = vmax.f32 %v3883_v53, %v3884_v30  ;;  %v6656_v54 = vadd.f32 1.0, %v6655_v55  ;;  %v3916_v52 = vmax.f32 %v3914_v48, %v3915_v21 }
 0x266   : > { %v6615_v12 = vsel %vm11979_vm2, %v6612_v0, %v6609_v31  ;;  %v3928_v9 = vmax.f32 %v2884_v42, %v2892_v2  ;;  %v12005_v50 = vsel %vm8355_vm15, %v8485_v4, %v11913_v1  ;;  %v6670_v22 = vadd.f32 1.0, %v5630_v57  ;;  %v12024_v4 = vpop.f32.mrb[77].mxu0 }
 0x267   : > { %v8513_v24 = vrot.slane %v6615_v12, 5  ;;  %v2891_v25 = vadd.f32 %v11956_v32, %v11352_v7  ;;  %9174 = vmatmul.mubr.msk.bf16.gmra.mrb[252].mxu0 %vm781_vm0, %v9863_v40  ;;  %v6673_v47 = vmul.f32 -0.5, %v5630_v57  ;;  %v5629_v6 = vmax.f32 %v5373_v19, 0.0 }
 0x268   : > { %v5077_v53 = vmax.f32 %v3885_v33, -2.3819763e+38  ;;  %v3917_v27 = vrot.slane %v3916_v52, 2  ;;  %9206 = vmatmul.mubr.msk.bf16.gmra.mrb[252].mxu1 %vm781_vm0, %v9863_v40  ;;  %9418 = vlog2.f32 %v6670_v22  ;;  %v2883_v1 = vadd.f32 %v11964_v17, %v11325_v63 }
 0x269   : > { %v12013_v2 = vsel %vm8355_vm15, %v8513_v24, %v11921_v36  ;;  %v3929_v48 = vrot.slane %v3928_v9, 4  ;;  %v6657_v7 = vmul.f32 %v6656_v54, %v11970_v43  ;;  %v6658_v39 = vand.u32 2147483647, %v11970_v43  ;;  %v12022_v36 = vpop.f32.mrb[76].mxu1 }
 0x26a   : > { %v6676_v55 = vand.u32 2147483647, %v5630_v57  ;;  %v6661_v3 = vadd.f32 1.0, %v5629_v6  ;;  %v6664_v0 = vmul.f32 -0.5, %v5629_v6  ;;  %v5375_v10 = vadd.f32 %v10551_v34, %v5077_v53  ;;  %v12026_v19 = vpop.f32.mrb[77].mxu1 }
 0x26b   : > { %v3918_v56 = vmax.f32 %v3916_v52, %v3917_v27  ;;  %v3930_v30 = vmax.f32 %v3928_v9, %v3929_v48  ;;  %v6674_v21 = vadd.f32 1.0, %v6673_v47  ;;  %v6667_v63 = vand.u32 2147483647, %v5629_v6  ;;  %v12030_v52 = vpop.f32.mrb[78].mxu0 }
 0x26c   : > { %v9417_v31 = vpop.eup %9416  ;;  %9420 = vlog2.f32 %v6661_v3  ;;  %v3921_v42 = vmax.f32 %v2883_v1, %v2891_v25  ;;  %v12028_v33 = vmax.f32 %v5375_v10, 0.0  ;;  %vm6659_vm0 = vcmp.lt.f32.partialorder %v6658_v39, 0.0004427343  ;;  %v12036_v25 = vpop.f32.mrb[78].mxu1 }
 0x26d   : > { %v6654_v43 = vmul.f32 0.6931472, %v9417_v31  ;;  %v3919_v12 = vrot.slane %v3918_v56, 1  ;;  %v3931_v54 = vrot.slane %v3930_v30, 2  ;;  %v2885_v9 = vadd.f32 %v11964_v17, %v11331_v61  ;;  %v12043_v10 = vpop.permute.xlu0 %2496 }
 0x26e   : > { %v3922_v24 = vrot.slane %v3921_v42, 4  ;;  %v2893_v22 = vadd.f32 %v11956_v32, %v11378_v15  ;;  %vm12038_vm4 = vcmp.lt.f32.partialorder %v6676_v55, 0.0004427343  ;;  %v6665_v53 = vadd.f32 1.0, %v6664_v0  ;;  %16652 = vst [vmem:[#allocation25_spill] sm:$0xff] %v12043_v10 }
 0x26f   : > { %v6660_v40 = vsel %vm6659_vm0, %v6657_v7, %v6654_v43  ;;  %v6679_v27 = vadd.f32 1.0, %v12028_v33  ;;  %v3920_v48 = vmax.f32 %v3918_v56, %v3919_v12  ;;  %v3932_v39 = vmax.f32 %v3930_v30, %v3931_v54  ;;  %v12049_v7 = vpop.f32.mrb[79].mxu0  ;;  %v12055_v30 = vpop.permute.xlu1 %2501 }
 0x270   : > { %v8473_v1 = vrot.slane %v6660_v40, 4  ;;  %v3923_v3 = vmax.f32 %v3921_v42, %v3922_v24  ;;  %v6675_v61 = vmul.f32 %v6674_v21, %v5630_v57  ;;  %vm12045_vm5 = vcmp.lt.f32.partialorder %v6667_v63, 0.0004427343  ;;  %16655 = vst [vmem:[#allocation47_spill] sm:$0xff] %v12055_v30  ;;  %v12062_v54 = vpop.f32.mrb[79].mxu1 }
 0x271   : > { %9422 = vlog2.f32 %v6679_v27  ;;  %v3935_v15 = vmax.f32 %v2885_v9, %v2893_v22  ;;  %v5082_v0 = vmax.f32 %v3920_v48, -2.3819763e+38  ;;  %v3933_v43 = vrot.slane %v3932_v39, 1 }
 0x272   : > { %v12053_v55 = vsel %vm8358_vm7, %v8473_v1, %v11968_v62  ;;  %v3924_v56 = vrot.slane %v3923_v3, 2  ;;  %v9419_v42 = vpop.eup %9418  ;;  %v6666_v12 = vmul.f32 %v6665_v53, %v5629_v6  ;;  %v6682_v57 = vmul.f32 -0.5, %v12028_v33 }
 0x273   : > { %v3936_v21 = vrot.slane %v3935_v15, 4  ;;  %v12060_v63 = vadd.f32 %v12043_v10, %v11423_v44  ;;  %v6672_v9 = vmul.f32 0.6931472, %v9419_v42  ;;  %v5380_v62 = vadd.f32 %v10542_v23, %v5082_v0 }
 0x274   : > { %v3934_v24 = vmax.f32 %v3932_v39, %v3933_v43  ;;  %v3925_v22 = vmax.f32 %v3923_v3, %v3924_v56  ;;  %v6685_v40 = vand.u32 2147483647, %v12028_v33  ;;  %v2898_v6 = vadd.f32 %v12043_v10, %v11417_v45 }
 0x275   : > { %v3937_v27 = vmax.f32 %v3935_v15, %v3936_v21  ;;  %v2906_v53 = vadd.f32 %v12055_v30, %v11428_v16  ;;  %v6678_v44 = vsel %vm12038_vm4, %v6675_v61, %v6672_v9  ;;  %v12072_v48 = vmax.f32 %v5380_v62, 0.0 }
 0x276   : > { %v9421_v1 = vpop.eup %9420  ;;  %v5084_v42 = vmax.f32 %v3934_v24, -2.3819763e+38  ;;  %v3926_v32 = vrot.slane %v3925_v22, 1  ;;  %v8501_v0 = vrot.slane %v6678_v44, 4  ;;  %v6683_v56 = vadd.f32 1.0, %v6682_v57  ;;  %v16656_v24 = vld [vmem:[#allocation32_spill] sm:$0xff] }
 0x277   : > { %v6663_v39 = vmul.f32 0.6931472, %v9421_v1  ;;  %v3938_v3 = vrot.slane %v3937_v27, 2  ;;  %v3970_v43 = vmax.f32 %v2898_v6, %v2906_v53  ;;  %v6724_v15 = vadd.f32 1.0, %v12072_v48 }
 0x278   : > { %v5382_v45 = vadd.f32 %v10545_v26, %v5084_v42  ;;  %v2908_v16 = vadd.f32 %v12055_v30, %v11440_v58  ;;  %v12080_v47 = vsel %vm8358_vm7, %v8501_v0, %v11991_v51  ;;  %v3927_v21 = vmax.f32 %v3925_v22, %v3926_v32  ;;  %v12092_v22 = vpop.f32.mrb[80].mxu0 }
 0x279   : > { %v6669_v61 = vsel %vm12045_vm5, %v6666_v12, %v6663_v39  ;;  %v3939_v9 = vmax.f32 %v3937_v27, %v3938_v3  ;;  %9424 = vlog2.f32 %v6724_v15  ;;  %v6727_v57 = vmul.f32 -0.5, %v12072_v48  ;;  %v12094_v27 = vpop.f32.mrb[80].mxu1  ;;  %v12097_v15 = vpop.f32.mrb[81].mxu0 }
 0x27a   : > { %v8487_v62 = vrot.slane %v6669_v61, 4  ;;  %v2900_v6 = vadd.f32 %v12043_v10, %v16656_v24  ;;  %v5638_v1 = vmax.f32 %v5382_v45, 0.0  ;;  %v5083_v44 = vmax.f32 %v3927_v21, -2.3819763e+38  ;;  %16657 = vst [vmem:[#allocation29_spill] sm:$0xff] %v12094_v27  ;;  %16658 = vst [vmem:[#allocation28_spill] sm:$0xff] %v12097_v15 }
 0x27b   : > { %v9423_v53 = vpop.eup %9422  ;;  %v3940_v58 = vrot.slane %v3939_v9, 1  ;;  %v3971_v42 = vrot.slane %v3970_v43, 4  ;;  %v6684_v32 = vmul.f32 %v6683_v56, %v12028_v33  ;;  %vm6686_vm8 = vcmp.lt.f32.partialorder %v6685_v40, 0.0004427343  ;;  %v16674_v27 = vld [vmem:[#allocation57_spill] sm:$0xff] }
 0x27c   : > { %v12089_v51 = vsel %vm8358_vm7, %v8487_v62, %v12005_v50  ;;  %v6681_v31 = vmul.f32 0.6931472, %v9423_v53  ;;  %v3984_v12 = vmax.f32 %v2900_v6, %v2908_v16  ;;  %v6742_v0 = vadd.f32 1.0, %v5638_v1  ;;  %v12099_v62 = vpop.f32.mrb[81].mxu1  ;;  %v12102_v16 = vpop.f32.mrb[82].mxu0 }
 0x27d   : > { %v6745_v39 = vmul.f32 -0.5, %v5638_v1  ;;  %v5381_v3 = vadd.f32 %v10547_v28, %v5083_v44  ;;  %v3941_v61 = vmax.f32 %v3939_v9, %v3940_v58  ;;  %v3972_v21 = vmax.f32 %v3970_v43, %v3971_v42  ;;  %16659 = vst [vmem:[#allocation48_spill] sm:$0xff] %v12099_v62  ;;  %16660 = vst [vmem:[#allocation50_spill] sm:$0xff] %v12102_v16  ;;  %v12104_v40 = vpop.f32.mrb[82].mxu1  ;;  %v16662_v9 = vld [vmem:[#allocation53_spill] sm:$0xff] }
 0x27e   : > { %v6687_v45 = vsel %vm6686_vm8, %v6684_v32, %v6681_v31  ;;  %v3985_v50 = vrot.slane %v3984_v12, 4  ;;  %v6728_v33 = vadd.f32 1.0, %v6727_v57  ;;  %v6730_v56 = vand.u32 2147483647, %v12072_v48  ;;  %16661 = vst [vmem:[#allocation32_spill] sm:$0xff] %v12104_v40  ;;  %v16663_v57 = vld [vmem:[#allocation33_spill] sm:$0xff] }
 0x27f   : > { %v8515_v24 = vrot.slane %v6687_v45, 4  ;;  %9426 = vlog2.f32 %v6742_v0  ;;  %v12106_v6 = vmax.f32 %v5381_v3, 0.0  ;;  %v5085_v53 = vmax.f32 %v3941_v61, -2.3819763e+38  ;;  %v16664_v31 = vld [vmem:[#allocation55_spill] sm:$0xff] }
 0x280   : > { %v3973_v44 = vrot.slane %v3972_v21, 2  ;;  %v3986_v17 = vmax.f32 %v3984_v12, %v3985_v50  ;;  %v2901_v58 = vadd.f32 %v12043_v10, %v16662_v9  ;;  %v2907_v42 = vadd.f32 %v12055_v30, %v16663_v57 }
 0x281   : > { %v12110_v43 = vsel %vm8358_vm7, %v8515_v24, %v12013_v2  ;;  %v2909_v32 = vadd.f32 %v12055_v30, %v16664_v31  ;;  %v6746_v0 = vadd.f32 1.0, %v6745_v39  ;;  %v6748_v45 = vand.u32 2147483647, %v5638_v1  ;;  %v12126_v39 = vpop.f32.mrb[83].mxu0 }
 0x282   : > { %v6733_v3 = vadd.f32 1.0, %v12106_v6  ;;  %v5383_v61 = vadd.f32 %v10551_v34, %v5085_v53  ;;  %v3974_v12 = vmax.f32 %v3972_v21, %v3973_v44  ;;  %v3987_v50 = vrot.slane %v3986_v17, 2  ;;  %16667 = vst [vmem:[#allocation53_spill] sm:$0xff] %v12126_v39  ;;  %v12138_v39 = vpop.permute.xlu1 %2511 }
 0x283   : > { %v3977_v2 = vmax.f32 %v12060_v63, %v2907_v42  ;;  %v3991_v24 = vmax.f32 %v2901_v58, %v2909_v32  ;;  %v9425_v62 = vpop.eup %9424  ;;  %v6729_v9 = vmul.f32 %v6728_v33, %v12072_v48  ;;  %vm12122_vm9 = vcmp.lt.f32.partialorder %v6730_v56, 0.0004427343  ;;  %16671 = vst [vmem:[#allocation55_spill] sm:$0xff] %v12138_v39 }
 0x284   : > { %9428 = vlog2.f32 %v6733_v3  ;;  %v5639_v57 = vmax.f32 %v5383_v61, 0.0  ;;  %v6726_v31 = vmul.f32 0.6931472, %v9425_v62  ;;  %v3975_v30 = vrot.slane %v3974_v12, 1 }
 0x285   : > { %v3988_v15 = vmax.f32 %v3986_v17, %v3987_v50  ;;  %v3978_v53 = vrot.slane %v3977_v2, 4  ;;  %v6747_v21 = vmul.f32 %v6746_v0, %v5638_v1  ;;  %vm12128_vm12 = vcmp.lt.f32.partialorder %v6748_v45, 0.0004427343  ;;  %v12136_v50 = vpop.permute.xlu0 %2506 }
 0x286   : > { %v6736_v63 = vmul.f32 -0.5, %v12106_v6  ;;  %v6751_v48 = vadd.f32 1.0, %v5639_v57  ;;  %v6732_v33 = vsel %vm12122_vm9, %v6729_v9, %v6726_v31  ;;  %v3976_v56 = vmax.f32 %v3974_v12, %v3975_v30  ;;  %16670 = vst [vmem:[#allocation33_spill] sm:$0xff] %v12136_v50 }
 0x287   : > { %v3989_v58 = vrot.slane %v3988_v15, 1  ;;  %v3979_v42 = vmax.f32 %v3977_v2, %v3978_v53  ;;  %v8475_v32 = vrot.slane %v6732_v33, 3  ;;  %v6739_v62 = vand.u32 2147483647, %v12106_v6  ;;  %v12145_v33 = vpop.f32.mrb[83].mxu1 }
 0x288   : > { %9430 = vlog2.f32 %v6751_v48  ;;  %v6754_v17 = vmul.f32 -0.5, %v5639_v57  ;;  %v5090_v1 = vmax.f32 %v3976_v56, -2.3819763e+38  ;;  %v3992_v61 = vrot.slane %v3991_v24, 4  ;;  %16672 = vst [vmem:[#allocation65_spill] sm:$0xff] %v12145_v33  ;;  %v16688_v33 = vld [vmem:[#allocation61_spill] sm:$0xff] }
 0x289   : > { %v9427_v3 = vpop.eup %9426  ;;  %v3990_v0 = vmax.f32 %v3988_v15, %v3989_v58  ;;  %v3980_v45 = vrot.slane %v3979_v42, 2  ;;  %v12142_v10 = vsel %vm8361_vm13, %v8475_v32, %v12053_v55  ;;  %v6737_v12 = vadd.f32 1.0, %v6736_v63  ;;  %v16673_v58 = vld [vmem:[#allocation39_spill] sm:$0xff] }
 0x28a   : > { %v6744_v30 = vmul.f32 0.6931472, %v9427_v3  ;;  %v6757_v2 = vand.u32 2147483647, %v5639_v57  ;;  %v5388_v9 = vadd.f32 %v10542_v23, %v5090_v1  ;;  %v3993_v48 = vmax.f32 %v3991_v24, %v3992_v61 }
 0x28b   : > { %v5092_v31 = vmax.f32 %v3990_v0, -2.3819763e+38  ;;  %v3981_v53 = vmax.f32 %v3979_v42, %v3980_v45  ;;  %v6755_v56 = vadd.f32 1.0, %v6754_v17  ;;  %v2914_v40 = vadd.f32 %v12136_v50, %v16673_v58  ;;  %v16685_v0 = vld [vmem:[#allocation56_spill] sm:$0xff] }
 0x28c   : > { %v6750_v15 = vsel %vm12128_vm12, %v6747_v21, %v6744_v30  ;;  %v2922_v55 = vadd.f32 %v12138_v39, %v16674_v27  ;;  %v12153_v63 = vmax.f32 %v5388_v9, 0.0  ;;  %v6738_v24 = vmul.f32 %v6737_v12, %v12106_v6 }
 0x28d   : > { %v8503_v32 = vrot.slane %v6750_v15, 3  ;;  %v5390_v3 = vadd.f32 %v10545_v26, %v5092_v31  ;;  %v3982_v1 = vrot.slane %v3981_v53, 1  ;;  %vm12157_vm14 = vcmp.lt.f32.partialorder %v6739_v62, 0.0004427343  ;;  %v12174_v15 = vpop.f32.mrb[84].mxu0 }
 0x28e   : > { %v9429_v42 = vpop.eup %9428  ;;  %v3994_v21 = vrot.slane %v3993_v48, 2  ;;  %v4026_v44 = vmax.f32 %v2914_v40, %v2922_v55  ;;  %vm12165_vm1 = vcmp.lt.f32.partialorder %v6757_v2, 0.0004427343  ;;  %v6796_v61 = vadd.f32 1.0, %v12153_v63  ;;  %v16679_v40 = vld [vmem:[#allocation38_spill] sm:$0xff]  ;;  %16680 = vst [vmem:[#allocation39_spill] sm:$0xff] %v12174_v15 }
 0x28f   : > { %v12163_v17 = vsel %vm8361_vm13, %v8503_v32, %v12080_v47  ;;  %v6735_v27 = vmul.f32 0.6931472, %v9429_v42  ;;  %v6756_v30 = vmul.f32 %v6755_v56, %v5639_v57  ;;  %v5646_v9 = vmax.f32 %v5390_v3, 0.0  ;;  %v12176_v2 = vpop.f32.mrb[84].mxu1  ;;  %v16682_v56 = vld [vmem:[#allocation58_spill] sm:$0xff]  ;;  %v16684_v42 = vld [vmem:[#allocation37_spill] sm:$0xff] }
 0x290   : > { %v3983_v6 = vmax.f32 %v3981_v53, %v3982_v1  ;;  %v3995_v62 = vmax.f32 %v3993_v48, %v3994_v21  ;;  %9432 = vlog2.f32 %v6796_v61  ;;  %v2915_v31 = vadd.f32 %v12136_v50, %v16679_v40  ;;  %16681 = vst [vmem:[#allocation57_spill] sm:$0xff] %v12176_v2  ;;  %v12181_v48 = vpop.f32.mrb[85].mxu0  ;;  %v12192_v40 = vpop.f32.mrb[85].mxu1 }
 0x291   : > { %v6741_v12 = vsel %vm12157_vm14, %v6738_v24, %v6735_v27  ;;  %v4027_v47 = vrot.slane %v4026_v44, 4  ;;  %v6799_v32 = vmul.f32 -0.5, %v12153_v63  ;;  %v6814_v57 = vadd.f32 1.0, %v5646_v9  ;;  %16683 = vst [vmem:[#allocation38_spill] sm:$0xff] %v12181_v48  ;;  %16686 = vst [vmem:[#allocation58_spill] sm:$0xff] %v12192_v40  ;;  %v12203_v16 = vpop.f32.mrb[86].mxu0 }
 0x292   : > { %v9431_v58 = vpop.eup %9430  ;;  %v8489_v55 = vrot.slane %v6741_v12, 3  ;;  %v2924_v53 = vadd.f32 %v12138_v39, %v16682_v56  ;;  %v5091_v1 = vmax.f32 %v3983_v6, -2.3819763e+38  ;;  %v2917_v24 = vadd.f32 %v12136_v50, %v16684_v42  ;;  %16689 = vst [vmem:[#allocation37_spill] sm:$0xff] %v12203_v16  ;;  %v12219_v16 = vpop.f32.mrb[86].mxu1 }
 0x293   : > { %v6753_v3 = vmul.f32 0.6931472, %v9431_v58  ;;  %v2916_v21 = vadd.f32 %v12136_v50, %v16685_v0  ;;  %v6802_v61 = vand.u32 2147483647, %v12153_v63  ;;  %9434 = vlog2.f32 %v6814_v57 }
 0x294   : > { %v12189_v27 = vsel %vm8361_vm13, %v8489_v55, %v12089_v51  ;;  %v3996_v12 = vrot.slane %v3995_v62, 1  ;;  %v6817_v6 = vmul.f32 -0.5, %v5646_v9  ;;  %v5389_v56 = vadd.f32 %v10547_v28, %v5091_v1  ;;  %v16687_v55 = vld [vmem:[#allocation60_spill] sm:$0xff] }
 0x295   : > { %v6759_v58 = vsel %vm12165_vm1, %v6756_v30, %v6753_v3  ;;  %v4028_v42 = vmax.f32 %v4026_v44, %v4027_v47  ;;  %v6800_v15 = vadd.f32 1.0, %v6799_v32  ;;  %v4040_v50 = vmax.f32 %v2916_v21, %v2924_v53 }
 0x296   : > { %v8517_v2 = vrot.slane %v6759_v58, 3  ;;  %v3997_v0 = vmax.f32 %v3995_v62, %v3996_v12  ;;  %v12197_v48 = vmax.f32 %v5389_v56, 0.0  ;;  %v2923_v57 = vadd.f32 %v12138_v39, %v16687_v55  ;;  %v12215_v58 = vpop.permute.xlu0 %2516 }
 0x297   : > { %v4029_v51 = vrot.slane %v4028_v42, 2  ;;  %v2925_v40 = vadd.f32 %v12138_v39, %v16688_v33  ;;  %vm12209_vm2 = vcmp.lt.f32.partialorder %v6802_v61, 0.0004427343  ;;  %v4041_v62 = vrot.slane %v4040_v50, 4  ;;  %16692 = vst [vmem:[#allocation56_spill] sm:$0xff] %v12215_v58 }
 0x298   : > { %v12207_v45 = vsel %vm8361_vm13, %v8517_v2, %v12110_v43  ;;  %v5093_v30 = vmax.f32 %v3997_v0, -2.3819763e+38  ;;  %v6818_v47 = vadd.f32 1.0, %v6817_v6  ;;  %v6820_v32 = vand.u32 2147483647, %v5646_v9 }
 0x299   : > { %v6805_v53 = vadd.f32 1.0, %v12197_v48  ;;  %v4030_v3 = vmax.f32 %v4028_v42, %v4029_v51  ;;  %v4042_v33 = vmax.f32 %v4040_v50, %v4041_v62  ;;  %v4033_v21 = vmax.f32 %v2915_v31, %v2923_v57 }
 0x29a   : > { %v5391_v1 = vadd.f32 %v10551_v34, %v5093_v30  ;;  %v4047_v12 = vmax.f32 %v2917_v24, %v2925_v40  ;;  %v9433_v43 = vpop.eup %9432  ;;  %v6801_v2 = vmul.f32 %v6800_v15, %v12153_v63  ;;  %v6808_v61 = vmul.f32 -0.5, %v12197_v48  ;;  %v16695_v24 = vld [vmem:[#allocation43_spill] sm:$0xff] }
 0x29b   : > { %9436 = vlog2.f32 %v6805_v53  ;;  %v4031_v56 = vrot.slane %v4030_v3, 1  ;;  %v6798_v0 = vmul.f32 0.6931472, %v9433_v43  ;;  %v4043_v55 = vrot.slane %v4042_v33, 2  ;;  %v12232_v43 = vpop.permute.xlu1 %2521 }
 0x29c   : > { %v5647_v6 = vmax.f32 %v5391_v1, 0.0  ;;  %v4034_v39 = vrot.slane %v4033_v21, 4  ;;  %v6819_v42 = vmul.f32 %v6818_v47, %v5646_v9  ;;  %vm12221_vm0 = vcmp.lt.f32.partialorder %v6820_v32, 0.0004427343  ;;  %16696 = vst [vmem:[#allocation60_spill] sm:$0xff] %v12232_v43 }
 0x29d   : > { %v4032_v31 = vmax.f32 %v4030_v3, %v4031_v56  ;;  %v12227_v40 = vadd.f32 %v12215_v58, %v16695_v24  ;;  %v9435_v63 = vpop.eup %9434  ;;  %v6804_v15 = vsel %vm12209_vm2, %v6801_v2, %v6798_v0  ;;  %v4048_v30 = vrot.slane %v4047_v12, 4  ;;  %v12241_v24 = vpop.f32.mrb[87].mxu0 }
 0x29e   : > { %v6823_v51 = vadd.f32 1.0, %v5647_v6  ;;  %v6826_v57 = vmul.f32 -0.5, %v5647_v6  ;;  %v8477_v62 = vrot.slane %v6804_v15, 2  ;;  %v6816_v53 = vmul.f32 0.6931472, %v9435_v63  ;;  %16697 = vst [vmem:[#allocation61_spill] sm:$0xff] %v12241_v24 }
 0x29f   : > { %v5098_v1 = vmax.f32 %v4032_v31, -2.3819763e+38  ;;  %v4044_v9 = vmax.f32 %v4042_v33, %v4043_v55  ;;  %v6809_v47 = vadd.f32 1.0, %v6808_v61  ;;  %v6811_v32 = vand.u32 2147483647, %v12197_v48  ;;  %v16698_v15 = vld [vmem:[#allocation63_spill] sm:$0xff] }
 0x2a0   : > { %9438 = vlog2.f32 %v6823_v51  ;;  %v4035_v3 = vmax.f32 %v4033_v21, %v4034_v39  ;;  %v12236_v56 = vsel %vm8364_vm3, %v8477_v62, %v12142_v10  ;;  %v6822_v44 = vsel %vm12221_vm0, %v6819_v42, %v6816_v53  ;;  %v12247_v51 = vpop.f32.mrb[87].mxu1  ;;  %v16700_v53 = vld [vmem:[#allocation42_spill] sm:$0xff]  ;;  %v16703_v24 = vld [vmem:[#allocation41_spill] sm:$0xff] }
 0x2a1   : > { %v5396_v2 = vadd.f32 %v10542_v23, %v5098_v1  ;;  %v4045_v0 = vrot.slane %v4044_v9, 1  ;;  %v8505_v33 = vrot.slane %v6822_v44, 2  ;;  %v6829_v61 = vand.u32 2147483647, %v5647_v6  ;;  %16699 = vst [vmem:[#allocation43_spill] sm:$0xff] %v12247_v51 }
 0x2a2   : > { %v4036_v55 = vrot.slane %v4035_v3, 2  ;;  %v4049_v31 = vmax.f32 %v4047_v12, %v4048_v30  ;;  %v6827_v63 = vadd.f32 1.0, %v6826_v57  ;;  %v2938_v10 = vadd.f32 %v12232_v43, %v16698_v15 }
 0x2a3   : > { %v12243_v39 = vmax.f32 %v5396_v2, 0.0  ;;  %v4046_v21 = vmax.f32 %v4044_v9, %v4045_v0  ;;  %v12251_v42 = vsel %vm8364_vm3, %v8505_v33, %v12163_v17  ;;  %v2930_v1 = vadd.f32 %v12215_v58, %v16700_v53 }
 0x2a4   : > { %v4037_v50 = vmax.f32 %v4035_v3, %v4036_v55  ;;  %v4050_v62 = vrot.slane %v4049_v31, 2  ;;  %v6810_v12 = vmul.f32 %v6809_v47, %v12197_v48  ;;  %vm6812_vm4 = vcmp.lt.f32.partialorder %v6811_v32, 0.0004427343 }
 0x2a5   : > { %v9437_v44 = vpop.eup %9436  ;;  %v6868_v57 = vadd.f32 1.0, %v12243_v39  ;;  %v5100_v30 = vmax.f32 %v4046_v21, -2.3819763e+38  ;;  %v4082_v15 = vmax.f32 %v2930_v1, %v2938_v10  ;;  %v6828_v51 = vmul.f32 %v6827_v63, %v5647_v6  ;;  %v12266_v6 = vpop.f32.mrb[88].mxu0 }
 0x2a6   : > { %v6807_v9 = vmul.f32 0.6931472, %v9437_v44  ;;  %v4038_v2 = vrot.slane %v4037_v50, 1  ;;  %v4051_v0 = vmax.f32 %v4049_v31, %v4050_v62  ;;  %vm12257_vm5 = vcmp.lt.f32.partialorder %v6829_v61, 0.0004427343  ;;  %v16704_v44 = vld [vmem:[#allocation64_spill] sm:$0xff] }
 0x2a7   : > { %9440 = vlog2.f32 %v6868_v57  ;;  %v5398_v3 = vadd.f32 %v10545_v26, %v5100_v30  ;;  %v4083_v48 = vrot.slane %v4082_v15, 4  ;;  %v2932_v21 = vadd.f32 %v12215_v58, %v16703_v24  ;;  %v12268_v61 = vpop.f32.mrb[88].mxu1 }
 0x2a8   : > { %v6813_v33 = vsel %vm6812_vm4, %v6810_v12, %v6807_v9  ;;  %v4039_v55 = vmax.f32 %v4037_v50, %v4038_v2  ;;  %v4052_v53 = vrot.slane %v4051_v0, 1  ;;  %v2940_v31 = vadd.f32 %v12232_v43, %v16704_v44  ;;  %16705 = vst [vmem:[#allocation63_spill] sm:$0xff] %v12268_v61  ;;  %v12271_v12 = vpop.f32.mrb[89].mxu0  ;;  %v12279_v2 = vpop.f32.mrb[89].mxu1 }
 0x2a9   : > { %v8491_v47 = vrot.slane %v6813_v33, 2  ;;  %v5654_v32 = vmax.f32 %v5398_v3, 0.0  ;;  %v6871_v10 = vmul.f32 -0.5, %v12243_v39  ;;  %v4084_v50 = vmax.f32 %v4082_v15, %v4083_v48  ;;  %16706 = vst [vmem:[#allocation42_spill] sm:$0xff] %v12279_v2  ;;  %v12287_v48 = vpop.f32.mrb[90].mxu1 }
 0x2aa   : > { %v9439_v63 = vpop.eup %9438  ;;  %v5099_v62 = vmax.f32 %v4039_v55, -2.3819763e+38  ;;  %v4053_v1 = vmax.f32 %v4051_v0, %v4052_v53  ;;  %v2939_v9 = vadd.f32 %v12232_v43, %v11718_v46  ;;  %v12282_v0 = vpop.f32.mrb[90].mxu0  ;;  %v4096_v53 = vmax.f32 %v2932_v21, %v2940_v31  ;;  %16708 = vst [vmem:[#allocation64_spill] sm:$0xff] %v12287_v48 }
 0x2ab   : > { %v12275_v57 = vsel %vm8364_vm3, %v8491_v47, %v12189_v27  ;;  %v6825_v24 = vmul.f32 0.6931472, %v9439_v63  ;;  %v6886_v30 = vadd.f32 1.0, %v5654_v32  ;;  %v6889_v3 = vmul.f32 -0.5, %v5654_v32  ;;  %16707 = vst [vmem:[#allocation41_spill] sm:$0xff] %v12282_v0 }
 0x2ac   : > { %v5397_v33 = vadd.f32 %v10547_v28, %v5099_v62  ;;  %v5101_v44 = vmax.f32 %v4053_v1, -2.3819763e+38  ;;  %v4085_v55 = vrot.slane %v4084_v50, 2  ;;  %v6874_v27 = vand.u32 2147483647, %v12243_v39 }
 0x2ad   : > { %v6831_v15 = vsel %vm12257_vm5, %v6828_v51, %v6825_v24  ;;  %9442 = vlog2.f32 %v6886_v30  ;;  %v6872_v46 = vadd.f32 1.0, %v6871_v10  ;;  %v4097_v62 = vrot.slane %v4096_v53, 4 }
 0x2ae   : > { %v8519_v47 = vrot.slane %v6831_v15, 2  ;;  %v5653_v63 = vmax.f32 %v5397_v33, 0.0  ;;  %v5399_v2 = vadd.f32 %v10551_v34, %v5101_v44  ;;  %v4086_v61 = vmax.f32 %v4084_v50, %v4085_v55  ;;  %v12298_v50 = vpop.f32.mrb[91].mxu0 }
 0x2af   : > { %v4089_v1 = vmax.f32 %v12227_v40, %v2939_v9  ;;  %v6890_v51 = vadd.f32 1.0, %v6889_v3  ;;  %v6892_v17 = vand.u32 2147483647, %v5654_v32  ;;  %v4098_v15 = vmax.f32 %v4096_v53, %v4097_v62 }
 0x2b0   : > { %v12293_v0 = vsel %vm8364_vm3, %v8519_v47, %v12207_v45  ;;  %v6877_v24 = vadd.f32 1.0, %v5653_v63  ;;  %v12295_v21 = vmax.f32 %v5399_v2, 0.0  ;;  %v4087_v31 = vrot.slane %v4086_v61, 1  ;;  %v16709_v47 = vld [vmem:[#allocation45_spill] sm:$0xff] }
 0x2b1   : > { %v9441_v30 = vpop.eup %9440  ;;  %v4090_v10 = vrot.slane %v4089_v1, 4  ;;  %v6873_v44 = vmul.f32 %v6872_v46, %v12243_v39  ;;  %vm6875_vm8 = vcmp.lt.f32.partialorder %v6874_v27, 0.0004427343  ;;  %v6880_v40 = vmul.f32 -0.5, %v5653_v63 }
 0x2b2   : > { %v6870_v33 = vmul.f32 0.6931472, %v9441_v30  ;;  %9444 = vlog2.f32 %v6877_v24  ;;  %v6883_v9 = vand.u32 2147483647, %v5653_v63  ;;  %v6895_v45 = vadd.f32 1.0, %v12295_v21 }
 0x2b3   : > { %v4088_v3 = vmax.f32 %v4086_v61, %v4087_v31  ;;  %v2933_v2 = vadd.f32 %v12215_v58, %v16709_v47  ;;  %v4099_v48 = vrot.slane %v4098_v15, 2  ;;  %v4091_v53 = vmax.f32 %v4089_v1, %v4090_v10 }
 0x2b4   : > { %v6876_v55 = vsel %vm6875_vm8, %v6873_v44, %v6870_v33  ;;  %v6891_v30 = vmul.f32 %v6890_v51, %v5654_v32  ;;  %vm12303_vm9 = vcmp.lt.f32.partialorder %v6892_v17, 0.0004427343  ;;  %9446 = vlog2.f32 %v6895_v45  ;;  %v12316_v51 = vpop.f32.mrb[91].mxu1  ;;  %v12322_v45 = vpop.permute.xlu1 %2531 }
 0x2b5   : > { %v8479_v62 = vrot.slane %v6876_v55, 1  ;;  %v5106_v27 = vmax.f32 %v4088_v3, -2.3819763e+38  ;;  %v4100_v46 = vmax.f32 %v4098_v15, %v4099_v48  ;;  %v4092_v24 = vrot.slane %v4091_v53, 2  ;;  %16715 = vst [vmem:[#allocation66_spill] sm:$0xff] %v12322_v45 }
 0x2b6   : > { %v2941_v61 = vadd.f32 %v12232_v43, %v11733_v38  ;;  %v6881_v44 = vadd.f32 1.0, %v6880_v40  ;;  %vm12311_vm12 = vcmp.lt.f32.partialorder %v6883_v9, 0.0004427343  ;;  %v6898_v32 = vmul.f32 -0.5, %v12295_v21  ;;  %v12320_v38 = vpop.permute.xlu0 %2526 }
 0x2b7   : > { %v9443_v31 = vpop.eup %9442  ;;  %v8480_v33 = vsel %vm8367_vm11, %v8479_v62, %v12236_v56  ;;  %v5404_v48 = vadd.f32 %v10542_v23, %v5106_v27  ;;  %v4101_v15 = vrot.slane %v4100_v46, 1  ;;  %v4093_v10 = vmax.f32 %v4091_v53, %v4092_v24  ;;  %16714 = vst [vmem:[#allocation45_spill] sm:$0xff] %v12320_v38 }
 0x2b8   : > { %8843 = vst [vmem:[%s11470_s10 + $0x40] sm:$0xff] %v8480_v33  ;;  %v6888_v17 = vmul.f32 0.6931472, %v9443_v31  ;;  %v6901_v56 = vand.u32 2147483647, %v12295_v21  ;;  %v4103_v40 = vmax.f32 %v2933_v2, %v2941_v61  ;;  %v2946_v9 = vadd.f32 %v12320_v38, %v11795_v37 }
 0x2b9   : > { %v2954_v3 = vadd.f32 %v12322_v45, %v11819_v60  ;;  %v12331_v47 = vmax.f32 %v5404_v48, 0.0  ;;  %v4102_v53 = vmax.f32 %v4100_v46, %v4101_v15  ;;  %v4094_v62 = vrot.slane %v4093_v10, 1 }
 0x2ba   : > { %v6894_v55 = vsel %vm12303_vm9, %v6891_v30, %v6888_v17  ;;  %v6882_v24 = vmul.f32 %v6881_v44, %v5653_v63  ;;  %v4104_v31 = vrot.slane %v4103_v40, 4  ;;  %v6899_v2 = vadd.f32 1.0, %v6898_v32 }
 0x2bb   : > { %v8507_v27 = vrot.slane %v6894_v55, 1  ;;  %v4138_v33 = vmax.f32 %v2946_v9, %v2954_v3  ;;  %v6940_v61 = vadd.f32 1.0, %v12331_v47  ;;  %v5108_v37 = vmax.f32 %v4102_v53, -2.3819763e+38 }
 0x2bc   : > { %v9445_v43 = vpop.eup %9444  ;;  %v2956_v60 = vadd.f32 %v12322_v45, %v11834_v41  ;;  %v4095_v17 = vmax.f32 %v4093_v10, %v4094_v62  ;;  %v4105_v48 = vmax.f32 %v4103_v40, %v4104_v31  ;;  %vm12339_vm14 = vcmp.lt.f32.partialorder %v6901_v56, 0.0004427343 }
 0x2bd   : > { %v8508_v30 = vsel %vm8367_vm11, %v8507_v27, %v12251_v42  ;;  %v6879_v39 = vmul.f32 0.6931472, %v9445_v43  ;;  %9448 = vlog2.f32 %v6940_v61  ;;  %v5406_v63 = vadd.f32 %v10545_v26, %v5108_v37 }
 0x2be   : > { %8845 = vst [vmem:[%s11470_s10 + $0x50] sm:$0xff] %v8508_v30  ;;  %v2948_v44 = vadd.f32 %v12320_v38, %v11797_v59  ;;  %v9447_v32 = vpop.eup %9446  ;;  %v5107_v42 = vmax.f32 %v4095_v17, -2.3819763e+38  ;;  %v4106_v43 = vrot.slane %v4105_v48, 2  ;;  %v4139_v15 = vrot.slane %v4138_v33, 4 }
 0x2bf   : > { %v6885_v41 = vsel %vm12311_vm12, %v6882_v24, %v6879_v39  ;;  %v6897_v40 = vmul.f32 0.6931472, %v9447_v32  ;;  %v6900_v56 = vmul.f32 %v6899_v2, %v12295_v21  ;;  %v5662_v9 = vmax.f32 %v5406_v63, 0.0  ;;  %v12358_v2 = vpop.f32.mrb[92].mxu0 }
 0x2c0   : > { %v8493_v10 = vrot.slane %v6885_v41, 1  ;;  %v5405_v3 = vadd.f32 %v10547_v28, %v5107_v42  ;;  %v4107_v55 = vmax.f32 %v4105_v48, %v4106_v43  ;;  %v4140_v53 = vmax.f32 %v4138_v33, %v4139_v15  ;;  %v12363_v30 = vpop.f32.mrb[93].mxu0 }
 0x2c1   : > { %v4152_v62 = vmax.f32 %v2948_v44, %v2956_v60  ;;  %v6903_v1 = vsel %vm12339_vm14, %v6900_v56, %v6897_v40  ;;  %v6958_v27 = vadd.f32 1.0, %v5662_v9  ;;  %v6943_v31 = vmul.f32 -0.5, %v12331_v47  ;;  %16719 = vst [vmem:[#allocation68_spill] sm:$0xff] %v12363_v30  ;;  %v12376_v43 = vpop.f32.mrb[94].mxu0 }
 0x2c2   : > { %v8494_v59 = vsel %vm8367_vm11, %v8493_v10, %v12275_v57  ;;  %v8521_v24 = vrot.slane %v6903_v1, 1  ;;  %v12356_v61 = vmax.f32 %v5405_v3, 0.0  ;;  %v4108_v21 = vrot.slane %v4107_v55, 1  ;;  %v12361_v57 = vpop.f32.mrb[92].mxu1  ;;  %16721 = vst [vmem:[#allocation70_spill] sm:$0xff] %v12376_v43  ;;  %v12378_v10 = vpop.permute.xlu0 %2606 }
 0x2c3   : > { %8844 = vst [vmem:[%s11470_s10 + $0x48] sm:$0xff] %v8494_v59  ;;  %v6946_v33 = vand.u32 2147483647, %v12331_v47  ;;  %9450 = vlog2.f32 %v6958_v27  ;;  %v4141_v37 = vrot.slane %v4140_v53, 2  ;;  %v4153_v60 = vrot.slane %v4152_v62, 4  ;;  %16718 = vst [vmem:[#allocation67_spill] sm:$0xff] %v12361_v57  ;;  %v12390_v27 = vpop.permute.xlu1 %2611 }
 0x2c4   : > { %v8522_v39 = vsel %vm8367_vm11, %v8521_v24, %v12293_v0  ;;  %v6961_v17 = vmul.f32 -0.5, %v5662_v9  ;;  %v6949_v48 = vadd.f32 1.0, %v12356_v61  ;;  %v2947_v46 = vadd.f32 %v12320_v38, %v11805_v14  ;;  %v12370_v63 = vpop.f32.mrb[93].mxu1  ;;  %16722 = vst [vmem:[#allocation71_spill] sm:$0xff] %v12378_v10  ;;  %16726 = vst [vmem:[#allocation73_spill] sm:$0xff] %v12390_v27  ;;  %v16736_v27 = vld [vmem:[#allocation20_spill] sm:$0xff] }
 0x2c5   : > { %16720 = vst [vmem:[#allocation69_spill] sm:$0xff] %v12370_v63  ;;  %8846 = vst [vmem:[%s11470_s10 + $0x58] sm:$0xff] %v8522_v39  ;;  %v6952_v44 = vmul.f32 -0.5, %v12356_v61  ;;  %v4109_v32 = vmax.f32 %v4107_v55, %v4108_v21  ;;  %v2949_v41 = vadd.f32 %v12320_v38, %v11812_v11  ;;  %v4142_v42 = vmax.f32 %v4140_v53, %v4141_v37  ;;  %v12382_v56 = vpop.f32.mrb[94].mxu1 }
 0x2c6   : > { %v6944_v15 = vadd.f32 1.0, %v6943_v31  ;;  %v6964_v0 = vand.u32 2147483647, %v5662_v9  ;;  %v4154_v40 = vmax.f32 %v4152_v62, %v4153_v60  ;;  %v2955_v14 = vadd.f32 %v12322_v45, %v11836_v29  ;;  %16723 = vst [vmem:[#allocation72_spill] sm:$0xff] %v12382_v56 }
 0x2c7   : > { %v9449_v3 = vpop.eup %9448  ;;  %vm12384_vm1 = vcmp.lt.f32.partialorder %v6946_v33, 0.0004427343  ;;  %v5109_v55 = vmax.f32 %v4109_v32, -2.3819763e+38  ;;  %v4143_v11 = vrot.slane %v4142_v42, 1  ;;  %v2957_v53 = vadd.f32 %v12322_v45, %v11854_v18 }
 0x2c8   : > { %v6962_v1 = vadd.f32 1.0, %v6961_v17  ;;  %9452 = vlog2.f32 %v6949_v48  ;;  %v4155_v62 = vrot.slane %v4154_v40, 2  ;;  %v4145_v24 = vmax.f32 %v2947_v46, %v2955_v14 }
 0x2c9   : > { %v6953_v31 = vadd.f32 1.0, %v6952_v44  ;;  %v5407_v29 = vadd.f32 %v10551_v34, %v5109_v55  ;;  %v4144_v21 = vmax.f32 %v4142_v42, %v4143_v11  ;;  %v4159_v37 = vmax.f32 %v2949_v41, %v2957_v53 }
 0x2ca   : > { %v12394_v33 = vmul.f32 %v6944_v15, %v12331_v47  ;;  %vm12396_vm2 = vcmp.lt.f32.partialorder %v6964_v0, 0.0004427343  ;;  %v4156_v39 = vmax.f32 %v4154_v40, %v4155_v62  ;;  %v4146_v18 = vrot.slane %v4145_v24, 4  ;;  %v12407_v47 = vpop.permute.xlu0 %2536  ;;  %v12409_v15 = vpop.f32.mrb[95].mxu0 }
 0x2cb   : > { %v12400_v17 = vmul.f32 0.6931472, %v9449_v3  ;;  %v12402_v48 = vmax.f32 %v5407_v29, 0.0  ;;  %v5114_v32 = vmax.f32 %v4144_v21, -2.3819763e+38  ;;  %v4160_v46 = vrot.slane %v4159_v37, 4 }
 0x2cc   : > { %v12404_v44 = vmul.f32 %v6962_v1, %v5662_v9  ;;  %v6955_v42 = vand.u32 2147483647, %v12356_v61  ;;  %v4157_v41 = vrot.slane %v4156_v39, 1  ;;  %v4147_v14 = vmax.f32 %v4145_v24, %v4146_v18  ;;  %16729 = vst [vmem:[#allocation74_spill] sm:$0xff] %v12407_v47  ;;  %16730 = vst [vmem:[#allocation75_spill] sm:$0xff] %v12409_v15  ;;  %v12419_v24 = vpop.permute.xlu1 %2541  ;;  %v12421_v29 = vpop.f32.mrb[95].mxu1 }
 0x2cd   : > { %v9451_v0 = vpop.eup %9450  ;;  %v12412_v40 = vmul.f32 %v6953_v31, %v12356_v61  ;;  %v6967_v3 = vadd.f32 1.0, %v12402_v48  ;;  %v5412_v55 = vadd.f32 %v10542_v23, %v5114_v32  ;;  %v2962_v9 = vadd.f32 %v12407_v47, %v11892_v49  ;;  %16731 = vst [vmem:[#allocation76_spill] sm:$0xff] %v12419_v24  ;;  %16732 = vst [vmem:[#allocation77_spill] sm:$0xff] %v12421_v29  ;;  %v16735_v61 = vld [vmem:[#allocation16_spill] sm:$0xff] }
 0x2ce   : > { %v6970_v11 = vmul.f32 -0.5, %v12402_v48  ;;  %v4158_v53 = vmax.f32 %v4156_v39, %v4157_v41  ;;  %v4148_v1 = vrot.slane %v4147_v14, 2  ;;  %v4161_v62 = vmax.f32 %v4159_v37, %v4160_v46  ;;  %v12467_v57 = vpop.permute.xlu0 %2616 }
 0x2cf   : > { %v12427_v31 = vmul.f32 0.6931472, %v9451_v0  ;;  %v5668_v21 = vmax.f32 %v5412_v55, 0.0  ;;  %v2970_v49 = vadd.f32 %v12419_v24, %v11916_v8  ;;  %v2964_v37 = vadd.f32 %v12407_v47, %v11894_v13  ;;  %16742 = vst [vmem:[#allocation79_spill] sm:$0xff] %v12467_v57 }
 0x2d0   : > { %v5116_v18 = vmax.f32 %v4158_v53, -2.3819763e+38  ;;  %v4149_v32 = vmax.f32 %v4147_v14, %v4148_v1  ;;  %v4162_v39 = vrot.slane %v4161_v62, 2  ;;  %vm12433_vm0 = vcmp.lt.f32.partialorder %v6955_v42, 0.0004427343 }
 0x2d1   : > { %9454 = vlog2.f32 %v6967_v3  ;;  %v7012_v41 = vadd.f32 1.0, %v5668_v21  ;;  %v2963_v0 = vadd.f32 %v12407_v47, %v11900_v35  ;;  %v12441_v55 = vadd.f32 %v12407_v47, %v16735_v61 }
 0x2d2   : > { %v9453_v8 = vpop.eup %9452  ;;  %v6971_v53 = vadd.f32 1.0, %v6970_v11  ;;  %v5414_v14 = vadd.f32 %v10545_v26, %v5116_v18  ;;  %v4150_v1 = vrot.slane %v4149_v32, 1  ;;  %v4163_v45 = vmax.f32 %v4161_v62, %v4162_v39  ;;  %v16737_v62 = vld [vmem:[#allocation27_spill] sm:$0xff] }
 0x2d3   : > { %v6973_v42 = vand.u32 2147483647, %v12402_v48  ;;  %9456 = vlog2.f32 %v7012_v41  ;;  %v4194_v3 = vmax.f32 %v2962_v9, %v2970_v49  ;;  %v7015_v35 = vmul.f32 -0.5, %v5668_v21 }
 0x2d4   : > { %v5670_v38 = vmax.f32 %v5414_v14, 0.0  ;;  %v4151_v58 = vmax.f32 %v4149_v32, %v4150_v1  ;;  %v4164_v61 = vrot.slane %v4163_v45, 1  ;;  %v12449_v47 = vmul.f32 0.6931472, %v9453_v8  ;;  %v12458_v1 = vpop.f32.mrb[96].mxu0  ;;  %v12460_v8 = vpop.f32.mrb[96].mxu1 }
 0x2d5   : > { %v4195_v11 = vrot.slane %v4194_v3, 4  ;;  %v2972_v18 = vadd.f32 %v12419_v24, %v16736_v27  ;;  %v2971_v39 = vadd.f32 %v12419_v24, %v16737_v62  ;;  %v12456_v10 = vmul.f32 %v6971_v53, %v12402_v48  ;;  %16738 = vst [vmem:[#allocation16_spill] sm:$0xff] %v12458_v1  ;;  %16739 = vst [vmem:[#allocation20_spill] sm:$0xff] %v12460_v8  ;;  %v12463_v62 = vpop.f32.mrb[97].mxu0  ;;  %v12465_v48 = vpop.f32.mrb[97].mxu1 }
 0x2d6   : > { %v7018_v13 = vand.u32 2147483647, %v5668_v21  ;;  %v7030_v29 = vadd.f32 1.0, %v5670_v38  ;;  %v5115_v41 = vmax.f32 %v4151_v58, -2.3819763e+38  ;;  %v4165_v9 = vmax.f32 %v4163_v45, %v4164_v61  ;;  %16740 = vst [vmem:[#allocation27_spill] sm:$0xff] %v12463_v62 }
 0x2d7   : > { %v4196_v49 = vmax.f32 %v4194_v3, %v4195_v11  ;;  %v4208_v14 = vmax.f32 %v2964_v37, %v2972_v18  ;;  %v4201_v32 = vmax.f32 %v2963_v0, %v2971_v39  ;;  %v7016_v15 = vadd.f32 1.0, %v7015_v35  ;;  %16741 = vst [vmem:[#allocation78_spill] sm:$0xff] %v12465_v48  ;;  %v12469_v0 = vpop.f32.mrb[98].mxu0  ;;  %v12479_v11 = vpop.permute.xlu1 %2621 }
 0x2d8   : > { %9458 = vlog2.f32 %v7030_v29  ;;  %v7033_v27 = vmul.f32 -0.5, %v5670_v38  ;;  %v5413_v56 = vadd.f32 %v10547_v28, %v5115_v41  ;;  %v5117_v53 = vmax.f32 %v4165_v9, -2.3819763e+38  ;;  %16743 = vst [vmem:[#allocation80_spill] sm:$0xff] %v12469_v0  ;;  %16746 = vst [vmem:[#allocation81_spill] sm:$0xff] %v12479_v11  ;;  %v12486_v8 = vpop.f32.mrb[98].mxu1 }
 0x2d9   : > { %v4197_v58 = vrot.slane %v4196_v49, 2  ;;  %v4209_v45 = vrot.slane %v4208_v14, 4  ;;  %v4202_v37 = vrot.slane %v4201_v32, 4  ;;  %vm12475_vm4 = vcmp.lt.f32.partialorder %v7018_v13, 0.0004427343  ;;  %16749 = vst [vmem:[#allocation82_spill] sm:$0xff] %v12486_v8 }
 0x2da   : > { %v7036_v35 = vand.u32 2147483647, %v5670_v38  ;;  %v5669_v61 = vmax.f32 %v5413_v56, 0.0  ;;  %v5415_v39 = vadd.f32 %v10551_v34, %v5117_v53  ;;  %vm12482_vm5 = vcmp.lt.f32.partialorder %v6973_v42, 0.0004427343 }
 0x2db   : > { %v9455_v18 = vpop.eup %9454  ;;  %v4198_v41 = vmax.f32 %v4196_v49, %v4197_v58  ;;  %v4210_v9 = vmax.f32 %v4208_v14, %v4209_v45  ;;  %v4203_v57 = vmax.f32 %v4201_v32, %v4202_v37  ;;  %v7017_v0 = vmul.f32 %v7016_v15, %v5668_v21  ;;  %v12500_v37 = vpop.permute.xlu1 %2551 }
 0x2dc   : > { %v7034_v29 = vadd.f32 1.0, %v7033_v27  ;;  %v7021_v13 = vadd.f32 1.0, %v5669_v61  ;;  %v7024_v62 = vmul.f32 -0.5, %v5669_v61  ;;  %v5671_v56 = vmax.f32 %v5415_v39, 0.0  ;;  %v12496_v27 = vpop.permute.xlu0 %2546  ;;  %16753 = vst [vmem:[#allocation84_spill] sm:$0xff] %v12500_v37 }
 0x2dd   : > { %v9457_v1 = vpop.eup %9456  ;;  %v4199_v63 = vrot.slane %v4198_v41, 1  ;;  %v4211_v11 = vrot.slane %v4210_v9, 2  ;;  %v4204_v30 = vrot.slane %v4203_v57, 2  ;;  %vm12488_vm8 = vcmp.lt.f32.partialorder %v7036_v35, 0.0004427343  ;;  %16752 = vst [vmem:[#allocation83_spill] sm:$0xff] %v12496_v27 }
 0x2de   : > { %v7014_v43 = vmul.f32 0.6931472, %v9457_v1  ;;  %9460 = vlog2.f32 %v7021_v13  ;;  %v2973_v42 = vadd.f32 %v12419_v24, %v11949_v5  ;;  %v12494_v15 = vmul.f32 0.6931472, %v9455_v18  ;;  %v12502_v35 = vpop.f32.mrb[99].mxu0 }
 0x2df   : > { %v7039_v21 = vadd.f32 1.0, %v5671_v56  ;;  %v7042_v14 = vmul.f32 -0.5, %v5671_v56  ;;  %v4200_v32 = vmax.f32 %v4198_v41, %v4199_v63  ;;  %v7035_v58 = vmul.f32 %v7034_v29, %v5670_v38 }
 0x2e0   : > { %v7020_v53 = vsel %vm12475_vm4, %v7017_v0, %v7014_v43  ;;  %v4212_v1 = vmax.f32 %v4210_v9, %v4211_v11  ;;  %v4205_v45 = vmax.f32 %v4203_v57, %v4204_v30  ;;  %v7025_v13 = vadd.f32 1.0, %v7024_v62  ;;  %v12513_v62 = vpop.f32.mrb[99].mxu1 }
 0x2e1   : > { %v8579_v39 = vrot.slane %v7020_v53, 7  ;;  %v7027_v5 = vand.u32 2147483647, %v5669_v61  ;;  %9462 = vlog2.f32 %v7039_v21  ;;  %v5122_v24 = vmax.f32 %v4200_v32, -2.3819763e+38  ;;  %v12528_v32 = vpop.permute.xlu1 %2601 }
 0x2e2   : > { %v9459_v18 = vpop.eup %9458  ;;  %v4213_v8 = vrot.slane %v4212_v1, 1  ;;  %v4206_v63 = vrot.slane %v4205_v45, 1  ;;  %v4215_v41 = vmax.f32 %v12441_v55, %v2973_v42  ;;  %v16754_v38 = vsel %vm12384_vm1, %v12394_v33, %v12400_v17  ;;  %v12526_v42 = vpop.permute.xlu0 %2596  ;;  %16758 = vst [vmem:[#allocation86_spill] sm:$0xff] %v12528_v32 }
 0x2e3   : > { %v12511_v57 = vsel %vm8349_vm6, %v8579_v39, %v16754_v38  ;;  %v7032_v30 = vmul.f32 0.6931472, %v9459_v18  ;;  %v7043_v43 = vadd.f32 1.0, %v7042_v14  ;;  %v7045_v0 = vand.u32 2147483647, %v5671_v56  ;;  %16757 = vst [vmem:[#allocation85_spill] sm:$0xff] %v12526_v42 }
 0x2e4   : > { %v5420_v29 = vadd.f32 %v10542_v23, %v5122_v24  ;;  %v4214_v3 = vmax.f32 %v4212_v1, %v4213_v8  ;;  %v4207_v11 = vmax.f32 %v4205_v45, %v4206_v63  ;;  %v4216_v9 = vrot.slane %v4215_v41, 4 }
 0x2e5   : > { %v6975_v59 = vsel %vm12482_vm5, %v12456_v10, %v12494_v15  ;;  %v7038_v33 = vsel %vm12488_vm8, %v7035_v58, %v7032_v30  ;;  %v7026_v17 = vmul.f32 %v7025_v13, %v5669_v61  ;;  %vm12522_vm9 = vcmp.lt.f32.partialorder %v7027_v5, 0.0004427343 }
 0x2e6   : > { %v8607_v21 = vrot.slane %v7038_v33, 7  ;;  %v5676_v24 = vmax.f32 %v5420_v29, 0.0  ;;  %v5124_v8 = vmax.f32 %v4214_v3, -2.3819763e+38  ;;  %v5123_v14 = vmax.f32 %v4207_v11, -2.3819763e+38  ;;  %v12560_v30 = vpop.permute.xlu0 %2626  ;;  %v12562_v3 = vpop.permute.xlu1 %2631 }
 0x2e7   : > { %v7044_v53 = vmul.f32 %v7043_v43, %v5671_v56  ;;  %vm12530_vm12 = vcmp.lt.f32.partialorder %v7045_v0, 0.0004427343  ;;  %v4217_v10 = vmax.f32 %v4215_v41, %v4216_v9  ;;  %v2986_v61 = vadd.f32 %v12500_v37, %v12030_v52  ;;  %16762 = vst [vmem:[#allocation87_spill] sm:$0xff] %v12560_v30  ;;  %16763 = vst [vmem:[#allocation88_spill] sm:$0xff] %v12562_v3 }
 0x2e8   : > { %v9461_v49 = vpop.eup %9460  ;;  %v16761_v15 = vsel %vm12396_vm2, %v12404_v44, %v12427_v31  ;;  %v7084_v1 = vadd.f32 1.0, %v5676_v24  ;;  %v7087_v45 = vmul.f32 -0.5, %v5676_v24  ;;  %v2978_v56 = vadd.f32 %v12496_v27, %v12020_v20 }
 0x2e9   : > { %v12542_v58 = vsel %vm8349_vm6, %v8607_v21, %v16761_v15  ;;  %v7023_v39 = vmul.f32 0.6931472, %v9461_v49  ;;  %v5422_v13 = vadd.f32 %v10545_v26, %v5124_v8  ;;  %v5421_v5 = vadd.f32 %v10547_v28, %v5123_v14 }
 0x2ea   : > { %v4218_v52 = vrot.slane %v4217_v10, 2  ;;  %9464 = vlog2.f32 %v7084_v1  ;;  %v2980_v60 = vadd.f32 %v12496_v27, %v12022_v36  ;;  %v2979_v44 = vadd.f32 %v12496_v27, %v12024_v4  ;;  %v12590_v15 = vpop.permute.xlu0 %2556 }
 0x2eb   : > { %v4250_v31 = vmax.f32 %v2978_v56, %v2986_v61  ;;  %v9463_v18 = vpop.eup %9462  ;;  %v7029_v63 = vsel %vm12522_vm9, %v7026_v17, %v7023_v39  ;;  %v12554_v41 = vmax.f32 %v5422_v13, 0.0  ;;  %v12556_v20 = vmax.f32 %v5421_v5, 0.0  ;;  %16767 = vst [vmem:[#allocation89_spill] sm:$0xff] %v12590_v15  ;;  %v12595_v13 = vpop.permute.xlu1 %2561 }
 0x2ec   : > { %v2988_v38 = vadd.f32 %v12500_v37, %v12036_v25  ;;  %v8593_v43 = vrot.slane %v7029_v63, 7  ;;  %v7041_v0 = vmul.f32 0.6931472, %v9463_v18  ;;  %v7090_v36 = vand.u32 2147483647, %v5676_v24  ;;  %16768 = vst [vmem:[#allocation90_spill] sm:$0xff] %v12595_v13 }
 0x2ed   : > { %v4219_v29 = vmax.f32 %v4217_v10, %v4218_v52  ;;  %v7088_v4 = vadd.f32 1.0, %v7087_v45  ;;  %v7102_v11 = vadd.f32 1.0, %v12554_v41  ;;  %v7093_v9 = vadd.f32 1.0, %v12556_v20 }
 0x2ee   : > { %v4251_v33 = vrot.slane %v4250_v31, 4  ;;  %v16764_v17 = vsel %vm12433_vm0, %v12412_v40, %v12449_v47  ;;  %v7047_v55 = vsel %vm12530_vm12, %v7044_v53, %v7041_v0  ;;  %v7105_v21 = vmul.f32 -0.5, %v12554_v41 }
 0x2ef   : > { %v12572_v25 = vsel %vm8349_vm6, %v8593_v43, %v16764_v17  ;;  %v2987_v8 = vadd.f32 %v12500_v37, %v12049_v7  ;;  %v8621_v14 = vrot.slane %v7047_v55, 7  ;;  %9466 = vlog2.f32 %v7102_v11  ;;  %v16771_v11 = vld [vmem:[#allocation50_spill] sm:$0xff] }
 0x2f0   : > { %v7108_v10 = vand.u32 2147483647, %v12554_v41  ;;  %v7096_v46 = vmul.f32 -0.5, %v12556_v20  ;;  %vm12581_vm14 = vcmp.lt.f32.partialorder %v7090_v36, 0.0004427343  ;;  %9468 = vlog2.f32 %v7093_v9 }
 0x2f1   : > { %v4220_v47 = vrot.slane %v4219_v29, 1  ;;  %v2981_v40 = vadd.f32 %v12496_v27, %v12026_v19  ;;  %v12588_v53 = vsel %vm8349_vm6, %v8621_v14, %v6975_v59  ;;  %v7089_v48 = vmul.f32 %v7088_v4, %v5676_v24 }
 0x2f2   : > { %v4252_v7 = vmax.f32 %v4250_v31, %v4251_v33  ;;  %v4264_v49 = vmax.f32 %v2980_v60, %v2988_v38  ;;  %v7099_v1 = vand.u32 2147483647, %v12556_v20  ;;  %v4257_v56 = vmax.f32 %v2979_v44, %v2987_v8  ;;  %v12601_v60 = vpop.f32.mrb[100].mxu0  ;;  %v12603_v31 = vpop.f32.mrb[100].mxu1 }
 0x2f3   : > { %v4221_v45 = vmax.f32 %v4219_v29, %v4220_v47  ;;  %v2989_v39 = vadd.f32 %v12500_v37, %v12062_v54  ;;  %v7106_v5 = vadd.f32 1.0, %v7105_v21  ;;  %vm12597_vm1 = vcmp.lt.f32.partialorder %v7108_v10, 0.0004427343  ;;  %v12607_v43 = vpop.f32.mrb[101].mxu0  ;;  %v12609_v0 = vpop.f32.mrb[101].mxu1 }
 0x2f4   : > { %v7097_v59 = vadd.f32 1.0, %v7096_v46  ;;  %v4253_v24 = vrot.slane %v4252_v7, 2  ;;  %v4265_v52 = vrot.slane %v4264_v49, 4  ;;  %v9465_v18 = vpop.eup %9464  ;;  %v4258_v44 = vrot.slane %v4257_v56, 4  ;;  %v12613_v33 = vpop.f32.mrb[102].mxu0 }
 0x2f5   : > { %v5125_v63 = vmax.f32 %v4221_v45, -2.3819763e+38  ;;  %v4271_v38 = vmax.f32 %v2981_v40, %v2989_v39  ;;  %v2994_v54 = vadd.f32 %v12590_v15, %v12092_v22  ;;  %v7086_v36 = vmul.f32 0.6931472, %v9465_v18  ;;  %v12615_v17 = vpop.f32.mrb[102].mxu1  ;;  %v16774_v18 = vld [vmem:[#allocation29_spill] sm:$0xff] }
 0x2f6   : > { %v4254_v29 = vmax.f32 %v4252_v7, %v4253_v24  ;;  %v4266_v4 = vmax.f32 %v4264_v49, %v4265_v52  ;;  %v3002_v9 = vadd.f32 %v12595_v13, %v16771_v11  ;;  %vm12617_vm2 = vcmp.lt.f32.partialorder %v7099_v1, 0.0004427343  ;;  %v12630_v61 = vpop.f32.mrb[103].mxu1 }
 0x2f7   : > { %v5423_v22 = vadd.f32 %v10551_v34, %v5125_v63  ;;  %v4259_v21 = vmax.f32 %v4257_v56, %v4258_v44  ;;  %v4272_v8 = vrot.slane %v4271_v38, 4  ;;  %v7092_v14 = vsel %vm12581_vm14, %v7089_v48, %v7086_v36  ;;  %v12628_v63 = vpop.f32.mrb[103].mxu0 }
 0x2f8   : > { %v4255_v10 = vrot.slane %v4254_v29, 1  ;;  %v4267_v46 = vrot.slane %v4266_v4, 2  ;;  %v4306_v47 = vmax.f32 %v2994_v54, %v3002_v9  ;;  %v8581_v40 = vrot.slane %v7092_v14, 6  ;;  %v16775_v9 = vld [vmem:[#allocation32_spill] sm:$0xff] }
 0x2f9   : > { %v7107_v7 = vmul.f32 %v7106_v5, %v12554_v41  ;;  %v5679_v49 = vmax.f32 %v5423_v22, 0.0  ;;  %v4260_v45 = vrot.slane %v4259_v21, 2  ;;  %v9467_v39 = vpop.eup %9466  ;;  %v7098_v1 = vmul.f32 %v7097_v59, %v12556_v20 }
 0x2fa   : > { %v4256_v24 = vmax.f32 %v4254_v29, %v4255_v10  ;;  %v4268_v52 = vmax.f32 %v4266_v4, %v4267_v46  ;;  %v2996_v56 = vadd.f32 %v12590_v15, %v16774_v18  ;;  %v9469_v48 = vpop.eup %9468  ;;  %v12634_v44 = vsel %vm8352_vm10, %v8581_v40, %v12511_v57 }
 0x2fb   : > { %v7104_v41 = vmul.f32 0.6931472, %v9467_v39  ;;  %v7111_v5 = vadd.f32 1.0, %v5679_v49  ;;  %v4273_v54 = vmax.f32 %v4271_v38, %v4272_v8  ;;  %v7095_v36 = vmul.f32 0.6931472, %v9469_v48 }
 0x2fc   : > { %v5130_v11 = vmax.f32 %v4256_v24, -2.3819763e+38  ;;  %v4261_v20 = vmax.f32 %v4259_v21, %v4260_v45  ;;  %v4307_v59 = vrot.slane %v4306_v47, 4  ;;  %v4269_v4 = vrot.slane %v4268_v52, 1 }
 0x2fd   : > { %v7110_v29 = vsel %vm12597_vm1, %v7107_v7, %v7104_v41  ;;  %9470 = vlog2.f32 %v7111_v5  ;;  %v3004_v22 = vadd.f32 %v12595_v13, %v16775_v9  ;;  %v7101_v57 = vsel %vm12617_vm2, %v7098_v1, %v7095_v36  ;;  %v12654_v9 = vpop.f32.mrb[104].mxu1 }
 0x2fe   : > { %v8609_v14 = vrot.slane %v7110_v29, 6  ;;  %v7114_v10 = vmul.f32 -0.5, %v5679_v49  ;;  %v5428_v46 = vadd.f32 %v10542_v23, %v5130_v11  ;;  %v8595_v38 = vrot.slane %v7101_v57, 6 }
 0x2ff   : > { %v7117_v8 = vand.u32 2147483647, %v5679_v49  ;;  %v4270_v40 = vmax.f32 %v4268_v52, %v4269_v4  ;;  %v4262_v21 = vrot.slane %v4261_v20, 1  ;;  %v4274_v45 = vrot.slane %v4273_v54, 2  ;;  %v12652_v4 = vpop.f32.mrb[104].mxu0 }
 0x300   : > { %v12645_v19 = vsel %vm8352_vm10, %v8609_v14, %v12542_v58  ;;  %v5684_v7 = vmax.f32 %v5428_v46, 0.0  ;;  %v4308_v39 = vmax.f32 %v4306_v47, %v4307_v59  ;;  %v12649_v24 = vsel %vm8352_vm10, %v8595_v38, %v12572_v25  ;;  %v12662_v59 = vpop.f32.mrb[105].mxu0 }
 0x301   : > { %v5132_v55 = vmax.f32 %v4270_v40, -2.3819763e+38  ;;  %v4263_v1 = vmax.f32 %v4261_v20, %v4262_v21  ;;  %v4320_v18 = vmax.f32 %v2996_v56, %v3004_v22  ;;  %v7115_v48 = vadd.f32 1.0, %v7114_v10  ;;  %v16778_v56 = vld [vmem:[#allocation28_spill] sm:$0xff]  ;;  %v12667_v46 = vpop.f32.mrb[106].mxu0 }
 0x302   : > { %v7156_v41 = vadd.f32 1.0, %v5684_v7  ;;  %v7159_v5 = vmul.f32 -0.5, %v5684_v7  ;;  %v4275_v36 = vmax.f32 %v4273_v54, %v4274_v45  ;;  %v4309_v29 = vrot.slane %v4308_v39, 2  ;;  %v12664_v54 = vpop.f32.mrb[105].mxu1 }
 0x303   : > { %v5430_v52 = vadd.f32 %v10545_v26, %v5132_v55  ;;  %v5131_v11 = vmax.f32 %v4263_v1, -2.3819763e+38  ;;  %v4321_v58 = vrot.slane %v4320_v18, 4  ;;  %vm12656_vm0 = vcmp.lt.f32.partialorder %v7117_v8, 0.0004427343  ;;  %16779 = vst [vmem:[#allocation50_spill] sm:$0xff] %v12664_v54 }
 0x304   : > { %9472 = vlog2.f32 %v7156_v41  ;;  %v4276_v25 = vrot.slane %v4275_v36, 1  ;;  %v2995_v20 = vadd.f32 %v12590_v15, %v16778_v56  ;;  %v4310_v57 = vmax.f32 %v4308_v39, %v4309_v29  ;;  %v16780_v56 = vld [vmem:[#allocation53_spill] sm:$0xff]  ;;  %v12671_v27 = vpop.f32.mrb[106].mxu1 }
 0x305   : > { %v5686_v22 = vmax.f32 %v5430_v52, 0.0  ;;  %v5429_v14 = vadd.f32 %v10547_v28, %v5131_v11  ;;  %v4322_v10 = vmax.f32 %v4320_v18, %v4321_v58  ;;  %v7116_v38 = vmul.f32 %v7115_v48, %v5679_v49  ;;  %v16781_v49 = vld [vmem:[#allocation65_spill] sm:$0xff] }
 0x306   : > { %v7160_v8 = vadd.f32 1.0, %v7159_v5  ;;  %v7162_v40 = vand.u32 2147483647, %v5684_v7  ;;  %v4277_v21 = vmax.f32 %v4275_v36, %v4276_v25  ;;  %v3003_v37 = vadd.f32 %v12595_v13, %v16780_v56  ;;  %v16782_v25 = vld [vmem:[#allocation48_spill] sm:$0xff] }
 0x307   : > { %v9471_v45 = vpop.eup %9470  ;;  %v7174_v55 = vadd.f32 1.0, %v5686_v22  ;;  %v7177_v1 = vmul.f32 -0.5, %v5686_v22  ;;  %v5685_v41 = vmax.f32 %v5429_v14, 0.0  ;;  %v4311_v11 = vrot.slane %v4310_v57, 1 }
 0x308   : > { %v7113_v52 = vmul.f32 0.6931472, %v9471_v45  ;;  %v5133_v3 = vmax.f32 %v4277_v21, -2.3819763e+38  ;;  %v4323_v39 = vrot.slane %v4322_v10, 2  ;;  %v3005_v48 = vadd.f32 %v12595_v13, %v16781_v49 }
 0x309   : > { %9474 = vlog2.f32 %v7174_v55  ;;  %v7180_v18 = vand.u32 2147483647, %v5686_v22  ;;  %v7165_v29 = vadd.f32 1.0, %v5685_v41  ;;  %v7168_v36 = vmul.f32 -0.5, %v5685_v41 }
 0x30a   : > { %v7119_v5 = vsel %vm12656_vm0, %v7116_v38, %v7113_v52  ;;  %v5431_v58 = vadd.f32 %v10551_v34, %v5133_v3  ;;  %v2997_v14 = vadd.f32 %v12590_v15, %v16782_v25  ;;  %vm12680_vm4 = vcmp.lt.f32.partialorder %v7162_v40, 0.0004427343 }
 0x30b   : > { %v8623_v56 = vrot.slane %v7119_v5, 6  ;;  %9476 = vlog2.f32 %v7165_v29  ;;  %v4312_v45 = vmax.f32 %v4310_v57, %v4311_v11  ;;  %v7161_v55 = vmul.f32 %v7160_v8, %v5684_v7  ;;  %v12692_v5 = vpop.f32.mrb[107].mxu0 }
 0x30c   : > { %v7178_v30 = vadd.f32 1.0, %v7177_v1  ;;  %v5687_v54 = vmax.f32 %v5431_v58, 0.0  ;;  %v4324_v49 = vmax.f32 %v4322_v10, %v4323_v39  ;;  %vm12688_vm5 = vcmp.lt.f32.partialorder %v7180_v18, 0.0004427343  ;;  %v12695_v39 = vpop.permute.xlu0 %2636 }
 0x30d   : > { %v12686_v47 = vsel %vm8352_vm10, %v8623_v56, %v12588_v53  ;;  %v5138_v38 = vmax.f32 %v4312_v45, -2.3819763e+38  ;;  %v4313_v52 = vmax.f32 %v2995_v20, %v3003_v37  ;;  %v4327_v40 = vmax.f32 %v2997_v14, %v3005_v48  ;;  %16787 = vst [vmem:[#allocation29_spill] sm:$0xff] %v12695_v39  ;;  %v12699_v14 = vpop.permute.xlu1 %2641 }
 0x30e   : > { %v9473_v25 = vpop.eup %9472  ;;  %v7169_v29 = vadd.f32 1.0, %v7168_v36  ;;  %v7171_v57 = vand.u32 2147483647, %v5685_v41  ;;  %v7183_v7 = vadd.f32 1.0, %v5687_v54  ;;  %v7186_v8 = vmul.f32 -0.5, %v5687_v54  ;;  %16788 = vst [vmem:[#allocation32_spill] sm:$0xff] %v12699_v14 }
 0x30f   : > { %v7158_v1 = vmul.f32 0.6931472, %v9473_v25  ;;  %v5436_v10 = vadd.f32 %v10542_v23, %v5138_v38  ;;  %v4325_v11 = vrot.slane %v4324_v49, 1  ;;  %v4314_v53 = vrot.slane %v4313_v52, 4  ;;  %v16796_v14 = vld [vmem:[#allocation38_spill] sm:$0xff] }
 0x310   : > { %v7179_v18 = vmul.f32 %v7178_v30, %v5686_v22  ;;  %9478 = vlog2.f32 %v7183_v7  ;;  %v7189_v58 = vand.u32 2147483647, %v5687_v54  ;;  %v4328_v56 = vrot.slane %v4327_v40, 4 }
 0x311   : > { %v7164_v37 = vsel %vm12680_vm4, %v7161_v55, %v7158_v1  ;;  %v5692_v20 = vmax.f32 %v5436_v10, 0.0  ;;  %v4326_v48 = vmax.f32 %v4324_v49, %v4325_v11  ;;  %v4315_v36 = vmax.f32 %v4313_v52, %v4314_v53 }
 0x312   : > { %v8583_v45 = vrot.slane %v7164_v37, 5  ;;  %v7170_v25 = vmul.f32 %v7169_v29, %v5685_v41  ;;  %vm12701_vm8 = vcmp.lt.f32.partialorder %v7171_v57, 0.0004427343  ;;  %v4329_v13 = vmax.f32 %v4327_v40, %v4328_v56  ;;  %v12714_v57 = vpop.permute.xlu0 %2566 }
 0x313   : > { %v9475_v15 = vpop.eup %9474  ;;  %v7187_v30 = vadd.f32 1.0, %v7186_v8  ;;  %v7228_v22 = vadd.f32 1.0, %v5692_v20  ;;  %v7231_v7 = vmul.f32 -0.5, %v5692_v20  ;;  %v5140_v39 = vmax.f32 %v4326_v48, -2.3819763e+38  ;;  %16793 = vst [vmem:[#allocation28_spill] sm:$0xff] %v12714_v57  ;;  %v12722_v48 = vpop.permute.xlu1 %2571 }
 0x314   : > { %v12707_v21 = vsel %vm8355_vm15, %v8583_v45, %v12634_v44  ;;  %v7176_v55 = vmul.f32 0.6931472, %v9475_v15  ;;  %v4316_v49 = vrot.slane %v4315_v36, 2  ;;  %v4330_v52 = vrot.slane %v4329_v13, 2  ;;  %v12716_v8 = vpop.f32.mrb[107].mxu1  ;;  %16795 = vst [vmem:[#allocation65_spill] sm:$0xff] %v12722_v48 }
 0x315   : > { %v9477_v1 = vpop.eup %9476  ;;  %vm12709_vm9 = vcmp.lt.f32.partialorder %v7189_v58, 0.0004427343  ;;  %9480 = vlog2.f32 %v7228_v22  ;;  %v7234_v29 = vand.u32 2147483647, %v5692_v20  ;;  %v5438_v40 = vadd.f32 %v10545_v26, %v5140_v39  ;;  %16794 = vst [vmem:[#allocation53_spill] sm:$0xff] %v12716_v8 }
 0x316   : > { %v7182_v44 = vsel %vm12688_vm5, %v7179_v18, %v7176_v55  ;;  %v7167_v10 = vmul.f32 0.6931472, %v9477_v1  ;;  %v4317_v15 = vmax.f32 %v4315_v36, %v4316_v49  ;;  %v4331_v11 = vmax.f32 %v4329_v13, %v4330_v52  ;;  %v16800_v55 = vld [vmem:[#allocation37_spill] sm:$0xff] }
 0x317   : > { %v8611_v53 = vrot.slane %v7182_v44, 5  ;;  %v7188_v56 = vmul.f32 %v7187_v30, %v5687_v54  ;;  %v7232_v58 = vadd.f32 1.0, %v7231_v7  ;;  %v12720_v37 = vmax.f32 %v5438_v40, 0.0  ;;  %v16801_v40 = vld [vmem:[#allocation58_spill] sm:$0xff] }
 0x318   : > { %v7173_v39 = vsel %vm12701_vm8, %v7170_v25, %v7167_v10  ;;  %v4318_v45 = vrot.slane %v4317_v15, 1  ;;  %v4332_v22 = vrot.slane %v4331_v11, 1  ;;  %v3011_v8 = vadd.f32 %v12714_v57, %v16796_v14  ;;  %v16799_v25 = vld [vmem:[#allocation39_spill] sm:$0xff] }
 0x319   : > { %v12730_v3 = vsel %vm8355_vm15, %v8611_v53, %v12645_v19  ;;  %v8597_v13 = vrot.slane %v7173_v39, 5  ;;  %vm12732_vm12 = vcmp.lt.f32.partialorder %v7234_v29, 0.0004427343  ;;  %v7246_v18 = vadd.f32 1.0, %v12720_v37  ;;  %v16803_v39 = vld [vmem:[#allocation57_spill] sm:$0xff] }
 0x31a   : > { %v9479_v36 = vpop.eup %9478  ;;  %v4319_v30 = vmax.f32 %v4317_v15, %v4318_v45  ;;  %v4333_v38 = vmax.f32 %v4331_v11, %v4332_v22  ;;  %v3010_v7 = vadd.f32 %v12714_v57, %v16799_v25  ;;  %v3018_v14 = vadd.f32 %v12722_v48, %v16800_v55  ;;  %v12747_v15 = vpop.permute.xlu0 %2646  ;;  %v16809_v55 = vld [vmem:[#allocation43_spill] sm:$0xff] }
 0x31b   : > { %v12743_v19 = vsel %vm8355_vm15, %v8597_v13, %v12649_v24  ;;  %v7185_v49 = vmul.f32 0.6931472, %v9479_v36  ;;  %v7233_v52 = vmul.f32 %v7232_v58, %v5692_v20  ;;  %9482 = vlog2.f32 %v7246_v18  ;;  %16802 = vst [vmem:[#allocation48_spill] sm:$0xff] %v12747_v15  ;;  %v12756_v58 = vpop.f32.mrb[108].mxu0  ;;  %v12758_v45 = vpop.f32.mrb[108].mxu1 }
 0x31c   : > { %v5139_v1 = vmax.f32 %v4319_v30, -2.3819763e+38  ;;  %v5141_v29 = vmax.f32 %v4333_v38, -2.3819763e+38  ;;  %v3013_v44 = vadd.f32 %v12714_v57, %v16801_v40  ;;  %v4362_v10 = vmax.f32 %v3010_v7, %v3018_v14  ;;  %16804 = vst [vmem:[#allocation38_spill] sm:$0xff] %v12756_v58  ;;  %16805 = vst [vmem:[#allocation39_spill] sm:$0xff] %v12758_v45 }
 0x31d   : > { %v7191_v11 = vsel %vm12709_vm9, %v7188_v56, %v7185_v49  ;;  %v7249_v53 = vmul.f32 -0.5, %v12720_v37  ;;  %v3012_v24 = vadd.f32 %v12714_v57, %v16803_v39  ;;  %v3020_v20 = vadd.f32 %v12722_v48, %v12219_v16  ;;  %v12762_v41 = vpop.f32.mrb[109].mxu0  ;;  %v12764_v56 = vpop.f32.mrb[109].mxu1  ;;  %v16808_v7 = vld [vmem:[#allocation61_spill] sm:$0xff] }
 0x31e   : > { %v8625_v22 = vrot.slane %v7191_v11, 5  ;;  %v5437_v13 = vadd.f32 %v10547_v28, %v5139_v1  ;;  %v5439_v18 = vadd.f32 %v10551_v34, %v5141_v29  ;;  %v4363_v36 = vrot.slane %v4362_v10, 4  ;;  %16806 = vst [vmem:[#allocation37_spill] sm:$0xff] %v12762_v41  ;;  %16807 = vst [vmem:[#allocation58_spill] sm:$0xff] %v12764_v56  ;;  %v12771_v49 = vpop.f32.mrb[110].mxu0  ;;  %v12779_v39 = vpop.permute.xlu1 %2651 }
 0x31f   : > { %v9481_v30 = vpop.eup %9480  ;;  %v7252_v38 = vand.u32 2147483647, %v12720_v37  ;;  %v4376_v25 = vmax.f32 %v3012_v24, %v3020_v20  ;;  %v3019_v16 = vadd.f32 %v12722_v48, %v16808_v7  ;;  %v3021_v14 = vadd.f32 %v12722_v48, %v16809_v55  ;;  %16810 = vst [vmem:[#allocation57_spill] sm:$0xff] %v12771_v49  ;;  %16811 = vst [vmem:[#allocation61_spill] sm:$0xff] %v12779_v39  ;;  %v12781_v57 = vpop.f32.mrb[110].mxu1 }
 0x320   : > { %v12775_v1 = vsel %vm8355_vm15, %v8625_v22, %v12686_v47  ;;  %v7230_v29 = vmul.f32 0.6931472, %v9481_v30  ;;  %v5693_v40 = vmax.f32 %v5437_v13, 0.0  ;;  %v12777_v11 = vmax.f32 %v5439_v18, 0.0  ;;  %16812 = vst [vmem:[#allocation43_spill] sm:$0xff] %v12781_v57  ;;  %v12787_v18 = vpop.permute.xlu0 %2576  ;;  %v16823_v30 = vld [vmem:[#allocation41_spill] sm:$0xff] }
 0x321   : > { %v7250_v24 = vadd.f32 1.0, %v7249_v53  ;;  %v4364_v20 = vmax.f32 %v4362_v10, %v4363_v36  ;;  %v4369_v7 = vmax.f32 %v3011_v8, %v3019_v16  ;;  %v4383_v15 = vmax.f32 %v3013_v44, %v3021_v14  ;;  %16813 = vst [vmem:[#allocation91_spill] sm:$0xff] %v12787_v18  ;;  %v12799_v36 = vpop.f32.mrb[111].mxu0 }
 0x322   : > { %v7236_v55 = vsel %vm12732_vm12, %v7233_v52, %v7230_v29  ;;  %v7237_v48 = vadd.f32 1.0, %v5693_v40  ;;  %v4377_v49 = vrot.slane %v4376_v25, 4  ;;  %v7240_v47 = vmul.f32 -0.5, %v5693_v40  ;;  %16816 = vst [vmem:[#allocation92_spill] sm:$0xff] %v12799_v36  ;;  %v12803_v29 = vpop.permute.xlu1 %2581  ;;  %v16825_v36 = vld [vmem:[#allocation64_spill] sm:$0xff] }
 0x323   : > { %v8585_v56 = vrot.slane %v7236_v55, 4  ;;  %v7255_v22 = vadd.f32 1.0, %v12777_v11  ;;  %v7258_v13 = vmul.f32 -0.5, %v12777_v11  ;;  %vm12789_vm14 = vcmp.lt.f32.partialorder %v7252_v38, 0.0004427343  ;;  %16817 = vst [vmem:[#allocation93_spill] sm:$0xff] %v12803_v29 }
 0x324   : > { %9484 = vlog2.f32 %v7237_v48  ;;  %v7243_v8 = vand.u32 2147483647, %v5693_v40  ;;  %v4365_v44 = vrot.slane %v4364_v20, 2  ;;  %v7251_v52 = vmul.f32 %v7250_v24, %v12720_v37 }
 0x325   : > { %v9483_v10 = vpop.eup %9482  ;;  %v12795_v54 = vsel %vm8358_vm7, %v8585_v56, %v12707_v21  ;;  %9486 = vlog2.f32 %v7255_v22  ;;  %v7261_v53 = vand.u32 2147483647, %v12777_v11  ;;  %v4378_v14 = vmax.f32 %v4376_v25, %v4377_v49  ;;  %v12813_v49 = vpop.f32.mrb[111].mxu1 }
 0x326   : > { %v7248_v16 = vmul.f32 0.6931472, %v9483_v10  ;;  %v4366_v38 = vmax.f32 %v4364_v20, %v4365_v44  ;;  %v3027_v48 = vadd.f32 %v12787_v18, %v12271_v12  ;;  %v7241_v55 = vadd.f32 1.0, %v7240_v47  ;;  %16820 = vst [vmem:[#allocation94_spill] sm:$0xff] %v12813_v49 }
 0x327   : > { %v7259_v39 = vadd.f32 1.0, %v7258_v13  ;;  %v4370_v57 = vrot.slane %v4369_v7, 4  ;;  %v4384_v21 = vrot.slane %v4383_v15, 4  ;;  %vm12807_vm1 = vcmp.lt.f32.partialorder %v7243_v8, 0.0004427343 }
 0x328   : > { %v7254_v37 = vsel %vm12789_vm14, %v7251_v52, %v7248_v16  ;;  %v4367_v24 = vrot.slane %v4366_v38, 1  ;;  %v4379_v22 = vrot.slane %v4378_v14, 2  ;;  %v3026_v25 = vadd.f32 %v12787_v18, %v12266_v6  ;;  %v16824_v52 = vld [vmem:[#allocation63_spill] sm:$0xff] }
 0x329   : > { %v8613_v12 = vrot.slane %v7254_v37, 4  ;;  %vm12815_vm2 = vcmp.lt.f32.partialorder %v7261_v53, 0.0004427343  ;;  %v4371_v47 = vmax.f32 %v4369_v7, %v4370_v57  ;;  %v4385_v13 = vmax.f32 %v4383_v15, %v4384_v21 }
 0x32a   : > { %v3034_v8 = vadd.f32 %v12803_v29, %v16823_v30  ;;  %v4368_v44 = vmax.f32 %v4366_v38, %v4367_v24  ;;  %v4380_v10 = vmax.f32 %v4378_v14, %v4379_v22  ;;  %v3028_v16 = vadd.f32 %v12787_v18, %v16824_v52 }
 0x32b   : > { %v3036_v6 = vadd.f32 %v12803_v29, %v16825_v36  ;;  %v12827_v37 = vsel %vm8358_vm7, %v8613_v12, %v12730_v3  ;;  %v4372_v53 = vrot.slane %v4371_v47, 2  ;;  %v4386_v49 = vrot.slane %v4385_v13, 2 }
 0x32c   : > { %v4418_v41 = vmax.f32 %v3026_v25, %v3034_v8  ;;  %v5146_v57 = vmax.f32 %v4368_v44, -2.3819763e+38  ;;  %v4381_v15 = vrot.slane %v4380_v10, 1  ;;  %v3035_v38 = vadd.f32 %v12803_v29, %v12298_v50 }
 0x32d   : > { %v4432_v7 = vmax.f32 %v3028_v16, %v3036_v6  ;;  %v7242_v14 = vmul.f32 %v7241_v55, %v5693_v40  ;;  %v4373_v21 = vmax.f32 %v4371_v47, %v4372_v53  ;;  %v4387_v24 = vmax.f32 %v4385_v13, %v4386_v49 }
 0x32e   : > { %v4419_v22 = vrot.slane %v4418_v41, 4  ;;  %v9485_v30 = vpop.eup %9484  ;;  %v5444_v36 = vadd.f32 %v10542_v23, %v5146_v57  ;;  %v4382_v52 = vmax.f32 %v4380_v10, %v4381_v15  ;;  %v12832_v3 = vmax.f32 %v3027_v48, %v3035_v38  ;;  %v12839_v15 = vpop.f32.mrb[112].mxu0 }
 0x32f   : > { %v4433_v45 = vrot.slane %v4432_v7, 4  ;;  %v9487_v12 = vpop.eup %9486  ;;  %v7239_v58 = vmul.f32 0.6931472, %v9485_v30  ;;  %v4374_v25 = vrot.slane %v4373_v21, 1  ;;  %v4388_v8 = vrot.slane %v4387_v24, 1 }
 0x330   : > { %v4420_v44 = vmax.f32 %v4418_v41, %v4419_v22  ;;  %v7257_v16 = vmul.f32 0.6931472, %v9487_v12  ;;  %v7260_v6 = vmul.f32 %v7259_v39, %v12777_v11  ;;  %v5700_v50 = vmax.f32 %v5444_v36, 0.0  ;;  %v12841_v41 = vpop.f32.mrb[112].mxu1  ;;  %v12844_v22 = vpop.f32.mrb[113].mxu0 }
 0x331   : > { %v5148_v40 = vmax.f32 %v4382_v52, -2.3819763e+38  ;;  %v7245_v55 = vsel %vm12807_vm1, %v7242_v14, %v7239_v58  ;;  %v4375_v49 = vmax.f32 %v4373_v21, %v4374_v25  ;;  %v4389_v47 = vmax.f32 %v4387_v24, %v4388_v8  ;;  %16826 = vst [vmem:[#allocation41_spill] sm:$0xff] %v12844_v22  ;;  %v12850_v20 = vpop.f32.mrb[113].mxu1 }
 0x332   : > { %v4434_v13 = vmax.f32 %v4432_v7, %v4433_v45  ;;  %v8599_v10 = vrot.slane %v7245_v55, 4  ;;  %v7263_v48 = vsel %vm12815_vm2, %v7260_v6, %v7257_v16  ;;  %v7300_v53 = vadd.f32 1.0, %v5700_v50  ;;  %16827 = vst [vmem:[#allocation63_spill] sm:$0xff] %v12850_v20  ;;  %v12852_v7 = vpop.f32.mrb[114].mxu0  ;;  %v12862_v12 = vpop.f32.mrb[114].mxu1 }
 0x333   : > { %v4421_v57 = vrot.slane %v4420_v44, 2  ;;  %v8627_v38 = vrot.slane %v7263_v48, 4  ;;  %v5446_v11 = vadd.f32 %v10545_v26, %v5148_v40  ;;  %v5147_v39 = vmax.f32 %v4375_v49, -2.3819763e+38  ;;  %16828 = vst [vmem:[#allocation64_spill] sm:$0xff] %v12852_v7  ;;  %16829 = vst [vmem:[#allocation95_spill] sm:$0xff] %v12862_v12  ;;  %v12864_v40 = vpop.permute.xlu0 %2656 }
 0x334   : > { %v12848_v58 = vsel %vm8358_vm7, %v8599_v10, %v12743_v19  ;;  %9488 = vlog2.f32 %v7300_v53  ;;  %v7303_v45 = vmul.f32 -0.5, %v5700_v50  ;;  %v5149_v56 = vmax.f32 %v4389_v47, -2.3819763e+38  ;;  %16830 = vst [vmem:[#allocation96_spill] sm:$0xff] %v12864_v40 }
 0x335   : > { %v12856_v14 = vsel %vm8358_vm7, %v8627_v38, %v12775_v1  ;;  %v5702_v21 = vmax.f32 %v5446_v11, 0.0  ;;  %v5445_v24 = vadd.f32 %v10547_v28, %v5147_v39  ;;  %v4422_v36 = vmax.f32 %v4420_v44, %v4421_v57  ;;  %v12866_v1 = vpop.permute.xlu1 %2661 }
 0x336   : > { %v5447_v30 = vadd.f32 %v10551_v34, %v5149_v56  ;;  %v4435_v52 = vrot.slane %v4434_v13, 2  ;;  %v3037_v19 = vadd.f32 %v12803_v29, %v12316_v51  ;;  %v7306_v25 = vand.u32 2147483647, %v5700_v50  ;;  %16831 = vst [vmem:[#allocation97_spill] sm:$0xff] %v12866_v1  ;;  %v16832_v56 = vld [vmem:[#allocation42_spill] sm:$0xff] }
 0x337   : > { %v7318_v8 = vadd.f32 1.0, %v5702_v21  ;;  %v7321_v16 = vmul.f32 -0.5, %v5702_v21  ;;  %v5701_v6 = vmax.f32 %v5445_v24, 0.0  ;;  %v7304_v55 = vadd.f32 1.0, %v7303_v45  ;;  %v12882_v1 = vpop.permute.xlu0 %2586 }
 0x338   : > { %v7324_v49 = vand.u32 2147483647, %v5702_v21  ;;  %v5703_v47 = vmax.f32 %v5447_v30, 0.0  ;;  %v4423_v10 = vrot.slane %v4422_v36, 1  ;;  %v4436_v48 = vmax.f32 %v4434_v13, %v4435_v52  ;;  %v12875_v13 = vpop.f32.mrb[115].mxu0  ;;  %16838 = vst [vmem:[#allocation98_spill] sm:$0xff] %v12882_v1 }
 0x339   : > { %9490 = vlog2.f32 %v7318_v8  ;;  %v7309_v44 = vadd.f32 1.0, %v5701_v6  ;;  %v4426_v53 = vrot.slane %v12832_v3, 4  ;;  %v7322_v51 = vadd.f32 1.0, %v7321_v16  ;;  %16835 = vst [vmem:[#allocation42_spill] sm:$0xff] %v12875_v13 }
 0x33a   : > { %v7312_v57 = vmul.f32 -0.5, %v5701_v6  ;;  %v7327_v38 = vadd.f32 1.0, %v5703_v47  ;;  %v7330_v11 = vmul.f32 -0.5, %v5703_v47  ;;  %v7315_v39 = vand.u32 2147483647, %v5701_v6 }
 0x33b   : > { %9492 = vlog2.f32 %v7309_v44  ;;  %v3029_v24 = vadd.f32 %v12787_v18, %v16832_v56  ;;  %v4424_v29 = vmax.f32 %v4422_v36, %v4423_v10  ;;  %v7305_v40 = vmul.f32 %v7304_v55, %v5700_v50  ;;  %v12884_v36 = vpop.permute.xlu1 %2591  ;;  %v12931_v18 = vpop.f32.mrb[116].mxu0 }
 0x33c   : > { %vm12871_vm0 = vcmp.lt.f32.partialorder %v7306_v25, 0.0004427343  ;;  %9494 = vlog2.f32 %v7327_v38  ;;  %v7333_v30 = vand.u32 2147483647, %v5703_v47  ;;  %vm12877_vm4 = vcmp.lt.f32.partialorder %v7324_v49, 0.0004427343 }
 0x33d   : > { %v5154_v8 = vmax.f32 %v4424_v29, -2.3819763e+38  ;;  %v4437_v16 = vrot.slane %v4436_v48, 1  ;;  %v4427_v44 = vmax.f32 %v12832_v3, %v4426_v53  ;;  %16839 = vst [vmem:[#allocation99_spill] sm:$0xff] %v12884_v36  ;;  %v7323_v25 = vmul.f32 %v7322_v51, %v5702_v21  ;;  %v16844_v51 = vld [vmem:[#allocation70_spill] sm:$0xff] }
 0x33e   : > { %v9489_v50 = vpop.eup %9488  ;;  %v7313_v55 = vadd.f32 1.0, %v7312_v57  ;;  %v7331_v10 = vadd.f32 1.0, %v7330_v11  ;;  %v4439_v38 = vmax.f32 %v3029_v24, %v3037_v19  ;;  %vm12886_vm5 = vcmp.lt.f32.partialorder %v7315_v39, 0.0004427343  ;;  %v12899_v57 = vpop.f32.mrb[115].mxu1 }
 0x33f   : > { %v7302_v56 = vmul.f32 0.6931472, %v9489_v50  ;;  %v5452_v49 = vadd.f32 %v10542_v23, %v5154_v8  ;;  %v4438_v29 = vmax.f32 %v4436_v48, %v4437_v16  ;;  %v4428_v20 = vrot.slane %v4427_v44, 2  ;;  %16845 = vst [vmem:[#allocation70_spill] sm:$0xff] %v12899_v57 }
 0x340   : > { %vm12891_vm8 = vcmp.lt.f32.partialorder %v7333_v30, 0.0004427343  ;;  %v4440_v53 = vrot.slane %v4439_v38, 4  ;;  %v3042_v21 = vadd.f32 %v12882_v1, %v12358_v2  ;;  %v3050_v19 = vadd.f32 %v12884_v36, %v16844_v51 }
 0x341   : > { %v7308_v11 = vsel %vm12871_vm0, %v7305_v40, %v7302_v56  ;;  %v5708_v39 = vmax.f32 %v5452_v49, 0.0  ;;  %v5156_v24 = vmax.f32 %v4438_v29, -2.3819763e+38  ;;  %v4429_v48 = vmax.f32 %v4427_v44, %v4428_v20 }
 0x342   : > { %v8587_v8 = vrot.slane %v7308_v11, 3  ;;  %v7314_v30 = vmul.f32 %v7313_v55, %v5701_v6  ;;  %v4441_v16 = vmax.f32 %v4439_v38, %v4440_v53  ;;  %v4474_v50 = vmax.f32 %v3042_v21, %v3050_v19  ;;  %v16846_v6 = vld [vmem:[#allocation68_spill] sm:$0xff]  ;;  %v16847_v11 = vld [vmem:[#allocation69_spill] sm:$0xff] }
 0x343   : > { %v9491_v13 = vpop.eup %9490  ;;  %v7332_v12 = vmul.f32 %v7331_v10, %v5703_v47  ;;  %v7372_v7 = vadd.f32 1.0, %v5708_v39  ;;  %v7375_v22 = vmul.f32 -0.5, %v5708_v39  ;;  %v5454_v2 = vadd.f32 %v10545_v26, %v5156_v24 }
 0x344   : > { %v12906_v51 = vsel %vm8361_vm13, %v8587_v8, %v12795_v54  ;;  %v7320_v57 = vmul.f32 0.6931472, %v9491_v13  ;;  %v4430_v45 = vrot.slane %v4429_v48, 1  ;;  %v4442_v40 = vrot.slane %v4441_v16, 2  ;;  %v16848_v8 = vld [vmem:[#allocation67_spill] sm:$0xff] }
 0x345   : > { %v9493_v56 = vpop.eup %9492  ;;  %9496 = vlog2.f32 %v7372_v7  ;;  %v7378_v20 = vand.u32 2147483647, %v5708_v39  ;;  %v12908_v44 = vmax.f32 %v5454_v2, 0.0  ;;  %v3043_v55 = vadd.f32 %v12882_v1, %v16846_v6  ;;  %v16853_v6 = vld [vmem:[#allocation72_spill] sm:$0xff] }
 0x346   : > { %v9495_v47 = vpop.eup %9494  ;;  %v7326_v10 = vsel %vm12877_vm4, %v7323_v25, %v7320_v57  ;;  %v7311_v38 = vmul.f32 0.6931472, %v9493_v56  ;;  %v7376_v49 = vadd.f32 1.0, %v7375_v22  ;;  %v4431_v29 = vmax.f32 %v4429_v48, %v4430_v45  ;;  %v12933_v48 = vpop.f32.mrb[116].mxu1 }
 0x347   : > { %v8615_v54 = vrot.slane %v7326_v10, 3  ;;  %v7329_v53 = vmul.f32 0.6931472, %v9495_v47  ;;  %v7390_v13 = vadd.f32 1.0, %v12908_v44  ;;  %v4443_v21 = vmax.f32 %v4441_v16, %v4442_v40  ;;  %v12937_v40 = vpop.f32.mrb[117].mxu0  ;;  %v12939_v56 = vpop.f32.mrb[117].mxu1 }
 0x348   : > { %v7317_v7 = vsel %vm12886_vm5, %v7314_v30, %v7311_v38  ;;  %v5155_v19 = vmax.f32 %v4431_v29, -2.3819763e+38  ;;  %v3045_v24 = vadd.f32 %v12882_v1, %v16847_v11  ;;  %v3044_v2 = vadd.f32 %v12882_v1, %v16848_v8  ;;  %16851 = vst [vmem:[#allocation68_spill] sm:$0xff] %v12937_v40  ;;  %16852 = vst [vmem:[#allocation69_spill] sm:$0xff] %v12939_v56  ;;  %v12947_v10 = vpop.f32.mrb[118].mxu0  ;;  %v16854_v29 = vld [vmem:[#allocation75_spill] sm:$0xff] }
 0x349   : > { %v12923_v52 = vsel %vm8361_vm13, %v8615_v54, %v12827_v37  ;;  %v8601_v22 = vrot.slane %v7317_v7, 3  ;;  %v7335_v25 = vsel %vm12891_vm8, %v7332_v12, %v7329_v53  ;;  %vm12927_vm9 = vcmp.lt.f32.partialorder %v7378_v20, 0.0004427343  ;;  %v16855_v7 = vld [vmem:[#allocation77_spill] sm:$0xff] }
 0x34a   : > { %9498 = vlog2.f32 %v7390_v13  ;;  %v8629_v30 = vrot.slane %v7335_v25, 3  ;;  %v7377_v16 = vmul.f32 %v7376_v49, %v5708_v39  ;;  %v7393_v45 = vmul.f32 -0.5, %v12908_v44 }
 0x34b   : > { %v5453_v37 = vadd.f32 %v10547_v28, %v5155_v19  ;;  %v12943_v12 = vsel %vm8361_vm13, %v8601_v22, %v12848_v58  ;;  %v4444_v3 = vrot.slane %v4443_v21, 1  ;;  %v4475_v20 = vrot.slane %v4474_v50, 4 }
 0x34c   : > { %v3052_v47 = vadd.f32 %v12884_v36, %v16853_v6  ;;  %v12951_v39 = vsel %vm8361_vm13, %v8629_v30, %v12856_v14  ;;  %v7396_v38 = vand.u32 2147483647, %v12908_v44  ;;  %v3051_v54 = vadd.f32 %v12884_v36, %v16854_v29  ;;  %v12958_v6 = vpop.f32.mrb[118].mxu1 }
 0x34d   : > { %v5709_v49 = vmax.f32 %v5453_v37, 0.0  ;;  %v4445_v53 = vmax.f32 %v4443_v21, %v4444_v3  ;;  %v4476_v58 = vmax.f32 %v4474_v50, %v4475_v20  ;;  %v3053_v19 = vadd.f32 %v12884_v36, %v16855_v7 }
 0x34e   : > { %v4488_v13 = vmax.f32 %v3044_v2, %v3052_v47  ;;  %v7394_v11 = vadd.f32 1.0, %v7393_v45  ;;  %v4481_v25 = vmax.f32 %v3043_v55, %v3051_v54  ;;  %vm12963_vm12 = vcmp.lt.f32.partialorder %v7396_v38, 0.0004427343  ;;  %v12967_v54 = vpop.f32.mrb[119].mxu0 }
 0x34f   : > { %v7381_v8 = vadd.f32 1.0, %v5709_v49  ;;  %v7384_v22 = vmul.f32 -0.5, %v5709_v49  ;;  %v9497_v14 = vpop.eup %9496  ;;  %v5157_v30 = vmax.f32 %v4445_v53, -2.3819763e+38  ;;  %v4477_v1 = vrot.slane %v4476_v58, 2  ;;  %16858 = vst [vmem:[#allocation67_spill] sm:$0xff] %v12967_v54 }
 0x350   : > { %v4489_v56 = vrot.slane %v4488_v13, 4  ;;  %v4495_v37 = vmax.f32 %v3045_v24, %v3053_v19  ;;  %v7374_v40 = vmul.f32 0.6931472, %v9497_v14  ;;  %v7387_v21 = vand.u32 2147483647, %v5709_v49 }
 0x351   : > { %9500 = vlog2.f32 %v7381_v8  ;;  %v7385_v29 = vadd.f32 1.0, %v7384_v22  ;;  %v5455_v50 = vadd.f32 %v10551_v34, %v5157_v30  ;;  %v4478_v2 = vmax.f32 %v4476_v58, %v4477_v1 }
 0x352   : > { %v4490_v3 = vmax.f32 %v4488_v13, %v4489_v56  ;;  %v4482_v20 = vrot.slane %v4481_v25, 4  ;;  %v7380_v45 = vsel %vm12927_vm9, %v7377_v16, %v7374_v40  ;;  %v4496_v47 = vrot.slane %v4495_v37, 4 }
 0x353   : > { %v8589_v53 = vrot.slane %v7380_v45, 2  ;;  %v12969_v7 = vmax.f32 %v5455_v50, 0.0  ;;  %v4479_v19 = vrot.slane %v4478_v2, 1  ;;  %v7395_v1 = vmul.f32 %v7394_v11, %v12908_v44  ;;  %v16861_v11 = vld [vmem:[#allocation16_spill] sm:$0xff] }
 0x354   : > { %v9499_v24 = vpop.eup %9498  ;;  %v4491_v8 = vrot.slane %v4490_v3, 2  ;;  %v4483_v56 = vmax.f32 %v4481_v25, %v4482_v20  ;;  %v4497_v58 = vmax.f32 %v4495_v37, %v4496_v47  ;;  %v7386_v16 = vmul.f32 %v7385_v29, %v5709_v49  ;;  %v12987_v37 = vpop.f32.mrb[119].mxu1  ;;  %v16864_v47 = vld [vmem:[#allocation27_spill] sm:$0xff] }
 0x355   : > { %v7392_v22 = vmul.f32 0.6931472, %v9499_v24  ;;  %v12974_v57 = vsel %vm8364_vm3, %v8589_v53, %v12906_v51  ;;  %vm12976_vm14 = vcmp.lt.f32.partialorder %v7387_v21, 0.0004427343  ;;  %v7399_v38 = vadd.f32 1.0, %v12969_v7  ;;  %v16862_v51 = vld [vmem:[#allocation20_spill] sm:$0xff] }
 0x356   : > { %v4480_v14 = vmax.f32 %v4478_v2, %v4479_v19  ;;  %v4492_v30 = vmax.f32 %v4490_v3, %v4491_v8  ;;  %v4484_v50 = vrot.slane %v4483_v56, 2  ;;  %v3058_v25 = vadd.f32 %v12526_v42, %v16861_v11  ;;  %16863 = vst [vmem:[#allocation72_spill] sm:$0xff] %v12987_v37 }
 0x357   : > { %v7398_v13 = vsel %vm12963_vm12, %v7395_v1, %v7392_v22  ;;  %9502 = vlog2.f32 %v7399_v38  ;;  %v3060_v49 = vadd.f32 %v12526_v42, %v16862_v51  ;;  %v4498_v45 = vrot.slane %v4497_v58, 2 }
 0x358   : > { %v8617_v44 = vrot.slane %v7398_v13, 2  ;;  %v5162_v29 = vmax.f32 %v4480_v14, -2.3819763e+38  ;;  %v4493_v21 = vrot.slane %v4492_v30, 1  ;;  %v4485_v20 = vmax.f32 %v4483_v56, %v4484_v50  ;;  %v16865_v56 = vld [vmem:[#allocation80_spill] sm:$0xff]  ;;  %v16866_v14 = vld [vmem:[#allocation82_spill] sm:$0xff] }
 0x359   : > { %v7402_v2 = vmul.f32 -0.5, %v12969_v7  ;;  %v7405_v3 = vand.u32 2147483647, %v12969_v7  ;;  %v3059_v24 = vadd.f32 %v12526_v42, %v16864_v47  ;;  %v4499_v1 = vmax.f32 %v4497_v58, %v4498_v45 }
 0x35a   : > { %v12991_v55 = vsel %vm8364_vm3, %v8617_v44, %v12923_v52  ;;  %v5460_v19 = vadd.f32 %v10542_v23, %v5162_v29  ;;  %v4494_v8 = vmax.f32 %v4492_v30, %v4493_v21  ;;  %v4486_v22 = vrot.slane %v4485_v20, 1 }
 0x35b   : > { %v9501_v53 = vpop.eup %9500  ;;  %v3066_v13 = vadd.f32 %v12528_v32, %v16865_v56  ;;  %v3068_v52 = vadd.f32 %v12528_v32, %v16866_v14  ;;  %v3067_v50 = vadd.f32 %v12528_v32, %v12502_v35  ;;  %v4500_v47 = vrot.slane %v4499_v1, 1 }
 0x35c   : > { %v7383_v38 = vmul.f32 0.6931472, %v9501_v53  ;;  %v5716_v44 = vmax.f32 %v5460_v19, 0.0  ;;  %v5164_v11 = vmax.f32 %v4494_v8, -2.3819763e+38  ;;  %v4487_v51 = vmax.f32 %v4485_v20, %v4486_v22  ;;  %v13020_v19 = vpop.f32.mrb[120].mxu1 }
 0x35d   : > { %v4530_v30 = vmax.f32 %v3058_v25, %v3066_v13  ;;  %v4544_v21 = vmax.f32 %v3060_v49, %v3068_v52  ;;  %v4537_v58 = vmax.f32 %v3059_v24, %v3067_v50  ;;  %v7403_v53 = vadd.f32 1.0, %v7402_v2  ;;  %v13018_v24 = vpop.f32.mrb[120].mxu0 }
 0x35e   : > { %v7389_v29 = vsel %vm12976_vm14, %v7386_v16, %v7383_v38  ;;  %v7444_v36 = vadd.f32 1.0, %v5716_v44  ;;  %v5462_v56 = vadd.f32 %v10545_v26, %v5164_v11  ;;  %v5163_v37 = vmax.f32 %v4487_v51, -2.3819763e+38  ;;  %v13025_v38 = vpop.f32.mrb[121].mxu1 }
 0x35f   : > { %v8603_v45 = vrot.slane %v7389_v29, 2  ;;  %v4501_v14 = vmax.f32 %v4499_v1, %v4500_v47  ;;  %v4531_v54 = vrot.slane %v4530_v30, 4  ;;  %vm13011_vm1 = vcmp.lt.f32.partialorder %v7405_v3, 0.0004427343  ;;  %v13023_v1 = vpop.f32.mrb[121].mxu0  ;;  %16869 = vst [vmem:[#allocation75_spill] sm:$0xff] %v13025_v38 }
 0x360   : > { %9504 = vlog2.f32 %v7444_v36  ;;  %v13015_v40 = vmax.f32 %v5462_v56, 0.0  ;;  %v5461_v25 = vadd.f32 %v10547_v28, %v5163_v37  ;;  %v7447_v22 = vmul.f32 -0.5, %v5716_v44  ;;  %v13030_v37 = vpop.f32.mrb[122].mxu0  ;;  %v13036_v29 = vpop.f32.mrb[122].mxu1 }
 0x361   : > { %v13009_v35 = vsel %vm8364_vm3, %v8603_v45, %v12943_v12  ;;  %v9503_v16 = vpop.eup %9502  ;;  %v5165_v49 = vmax.f32 %v4501_v14, -2.3819763e+38  ;;  %v4532_v2 = vmax.f32 %v4530_v30, %v4531_v54  ;;  %v7404_v12 = vmul.f32 %v7403_v53, %v12969_v7  ;;  %v13057_v38 = vpop.f32.mrb[123].mxu0 }
 0x362   : > { %v7401_v8 = vmul.f32 0.6931472, %v9503_v16  ;;  %v4545_v3 = vrot.slane %v4544_v21, 4  ;;  %v7450_v36 = vand.u32 2147483647, %v5716_v44  ;;  %v7462_v13 = vadd.f32 1.0, %v13015_v40 }
 0x363   : > { %v13028_v52 = vmax.f32 %v5461_v25, 0.0  ;;  %v5463_v50 = vadd.f32 %v10551_v34, %v5165_v49  ;;  %v4533_v11 = vrot.slane %v4532_v2, 2  ;;  %v7465_v47 = vmul.f32 -0.5, %v13015_v40  ;;  %v16872_v49 = vld [vmem:[#allocation78_spill] sm:$0xff]  ;;  %16873 = vst [vmem:[#allocation77_spill] sm:$0xff] %v13057_v38 }
 0x364   : > { %v7407_v54 = vsel %vm13011_vm1, %v7404_v12, %v7401_v8  ;;  %v4546_v7 = vmax.f32 %v4544_v21, %v4545_v3  ;;  %9506 = vlog2.f32 %v7462_v13  ;;  %v7448_v30 = vadd.f32 1.0, %v7447_v22  ;;  %v16875_v21 = vld [vmem:[#allocation73_spill] sm:$0xff] }
 0x365   : > { %v8631_v51 = vrot.slane %v7407_v54, 2  ;;  %v7453_v45 = vadd.f32 1.0, %v13028_v52  ;;  %v13039_v53 = vmax.f32 %v5463_v50, 0.0  ;;  %v4538_v56 = vrot.slane %v4537_v58, 4 }
 0x366   : > { %v4534_v20 = vmax.f32 %v4532_v2, %v4533_v11  ;;  %v4547_v16 = vrot.slane %v4546_v7, 2  ;;  %vm13045_vm2 = vcmp.lt.f32.partialorder %v7450_v36, 0.0004427343  ;;  %v3061_v8 = vadd.f32 %v12526_v42, %v16872_v49 }
 0x367   : > { %v13043_v14 = vsel %vm8364_vm3, %v8631_v51, %v12951_v39  ;;  %9508 = vlog2.f32 %v7453_v45  ;;  %v7471_v25 = vadd.f32 1.0, %v13039_v53  ;;  %v7466_v12 = vadd.f32 1.0, %v7465_v47 }
 0x368   : > { %v7456_v22 = vmul.f32 -0.5, %v13028_v52  ;;  %v4535_v3 = vrot.slane %v4534_v20, 1  ;;  %v4548_v13 = vmax.f32 %v4546_v7, %v4547_v16  ;;  %v7449_v39 = vmul.f32 %v7448_v30, %v5716_v44 }
 0x369   : > { %9510 = vlog2.f32 %v7471_v25  ;;  %v4539_v2 = vmax.f32 %v4537_v58, %v4538_v56  ;;  %v3069_v36 = vadd.f32 %v12528_v32, %v12513_v62  ;;  %v7468_v11 = vand.u32 2147483647, %v13015_v40  ;;  %v13063_v56 = vpop.f32.mrb[123].mxu1 }
 0x36a   : > { %v9505_v54 = vpop.eup %9504  ;;  %v7474_v51 = vmul.f32 -0.5, %v13039_v53  ;;  %v4536_v45 = vmax.f32 %v4534_v20, %v4535_v3  ;;  %v7459_v47 = vand.u32 2147483647, %v13028_v52  ;;  %v4549_v49 = vrot.slane %v4548_v13, 1 }
 0x36b   : > { %v7446_v50 = vmul.f32 0.6931472, %v9505_v54  ;;  %v4540_v42 = vrot.slane %v4539_v2, 2  ;;  %v4551_v7 = vmax.f32 %v3061_v8, %v3069_v36  ;;  %v7467_v58 = vmul.f32 %v7466_v12, %v13015_v40  ;;  %v16874_v8 = vld [vmem:[#allocation71_spill] sm:$0xff] }
 0x36c   : > { %v7457_v30 = vadd.f32 1.0, %v7456_v22  ;;  %v5170_v62 = vmax.f32 %v4536_v45, -2.3819763e+38  ;;  %v4550_v25 = vmax.f32 %v4548_v13, %v4549_v49  ;;  %v7475_v32 = vadd.f32 1.0, %v7474_v51 }
 0x36d   : > { %v7452_v44 = vsel %vm13045_vm2, %v7449_v39, %v7446_v50  ;;  %v4541_v20 = vmax.f32 %v4539_v2, %v4540_v42  ;;  %v4552_v3 = vrot.slane %v4551_v7, 4  ;;  %v3074_v36 = vadd.f32 %v16874_v8, %v12601_v60 }
 0x36e   : > { %v8591_v16 = vrot.slane %v7452_v44, 1  ;;  %v9507_v54 = vpop.eup %9506  ;;  %v5468_v38 = vadd.f32 %v10542_v23, %v5170_v62  ;;  %v3082_v39 = vadd.f32 %v16875_v21, %v12613_v33  ;;  %v5172_v22 = vmax.f32 %v4550_v25, -2.3819763e+38 }
 0x36f   : > { %v7464_v12 = vmul.f32 0.6931472, %v9507_v54  ;;  %v4542_v50 = vrot.slane %v4541_v20, 1  ;;  %vm7469_vm0 = vcmp.lt.f32.partialorder %v7468_v11, 0.0004427343  ;;  %v4553_v13 = vmax.f32 %v4551_v7, %v4552_v3 }
 0x370   : > { %v8592_v40 = vsel %vm8367_vm11, %v8591_v16, %v12974_v57  ;;  %v13073_v42 = vmax.f32 %v5468_v38, 0.0  ;;  %v4586_v2 = vmax.f32 %v3074_v36, %v3082_v39  ;;  %v7477_v49 = vand.u32 2147483647, %v13039_v53 }
 0x371   : > { %8851 = vst [vmem:[%s11470_s10 + $0x80] sm:$0xff] %v8592_v40  ;;  %v9509_v51 = vpop.eup %9508  ;;  %v7470_v45 = vsel %vm7469_vm0, %v7467_v58, %v7464_v12  ;;  %v5470_v60 = vadd.f32 %v10545_v26, %v5172_v22  ;;  %v4543_v33 = vmax.f32 %v4541_v20, %v4542_v50  ;;  %v7458_v57 = vmul.f32 %v7457_v30, %v13028_v52  ;;  %v13095_v40 = vpop.f32.mrb[124].mxu1 }
 0x372   : > { %v8619_v44 = vrot.slane %v7470_v45, 1  ;;  %v7455_v62 = vmul.f32 0.6931472, %v9509_v51  ;;  %vm7460_vm4 = vcmp.lt.f32.partialorder %v7459_v47, 0.0004427343  ;;  %v7476_v11 = vmul.f32 %v7475_v32, %v13039_v53  ;;  %v13089_v53 = vpop.f32.mrb[124].mxu0 }
 0x373   : > { %v9511_v16 = vpop.eup %9510  ;;  %v7516_v38 = vadd.f32 1.0, %v13073_v42  ;;  %v13080_v7 = vmax.f32 %v5470_v60, 0.0  ;;  %v5171_v25 = vmax.f32 %v4543_v33, -2.3819763e+38  ;;  %v4554_v36 = vrot.slane %v4553_v13, 2  ;;  %16876 = vst [vmem:[#allocation16_spill] sm:$0xff] %v13095_v40 }
 0x374   : > { %v8620_v58 = vsel %vm8367_vm11, %v8619_v44, %v12991_v55  ;;  %v7461_v3 = vsel %vm7460_vm4, %v7458_v57, %v7455_v62  ;;  %v7473_v54 = vmul.f32 0.6931472, %v9511_v16  ;;  %vm7478_vm5 = vcmp.lt.f32.partialorder %v7477_v49, 0.0004427343  ;;  %v13097_v12 = vpop.f32.mrb[125].mxu0  ;;  %v13104_v51 = vpop.f32.mrb[125].mxu1 }
 0x375   : > { %8853 = vst [vmem:[%s11470_s10 + $0x90] sm:$0xff] %v8620_v58  ;;  %v8605_v20 = vrot.slane %v7461_v3, 1  ;;  %v3084_v52 = vadd.f32 %v16875_v21, %v12615_v17  ;;  %v3083_v32 = vadd.f32 %v16875_v21, %v12628_v63  ;;  %v7534_v30 = vadd.f32 1.0, %v13080_v7  ;;  %16877 = vst [vmem:[#allocation20_spill] sm:$0xff] %v13104_v51  ;;  %v13110_v60 = vpop.f32.mrb[126].mxu0 }
 0x376   : > { %v7479_v47 = vsel %vm7478_vm5, %v7476_v11, %v7473_v54  ;;  %v5469_v55 = vadd.f32 %v10547_v28, %v5171_v25  ;;  %v3076_v39 = vadd.f32 %v16874_v8, %v12603_v31  ;;  %v7519_v63 = vmul.f32 -0.5, %v13073_v42  ;;  %16878 = vst [vmem:[#allocation27_spill] sm:$0xff] %v13110_v60  ;;  %v13119_v11 = vpop.f32.mrb[126].mxu1  ;;  %v16915_v60 = vld [vmem:[#allocation88_spill] sm:$0xff] }
 0x377   : > { %v8606_v17 = vsel %vm8367_vm11, %v8605_v20, %v13009_v35  ;;  %v8633_v22 = vrot.slane %v7479_v47, 1  ;;  %v3075_v50 = vadd.f32 %v16874_v8, %v12607_v43  ;;  %9512 = vlog2.f32 %v7516_v38  ;;  %16879 = vst [vmem:[#allocation80_spill] sm:$0xff] %v13119_v11  ;;  %v16910_v11 = vld [vmem:[#allocation39_spill] sm:$0xff] }
 0x378   : > { %8852 = vst [vmem:[%s11470_s10 + $0x88] sm:$0xff] %v8606_v17  ;;  %v7537_v31 = vmul.f32 -0.5, %v13080_v7  ;;  %v13108_v45 = vmax.f32 %v5469_v55, 0.0  ;;  %v4555_v49 = vmax.f32 %v4553_v13, %v4554_v36  ;;  %v4587_v33 = vrot.slane %v4586_v2, 4 }
 0x379   : > { %v8634_v35 = vsel %vm8367_vm11, %v8633_v22, %v13043_v14  ;;  %v4600_v44 = vmax.f32 %v3076_v39, %v3084_v52  ;;  %v4593_v62 = vmax.f32 %v3075_v50, %v3083_v32  ;;  %9514 = vlog2.f32 %v7534_v30  ;;  %v13125_v22 = vpop.f32.mrb[127].mxu0 }
 0x37a   : > { %8854 = vst [vmem:[%s11470_s10 + $0x98] sm:$0xff] %v8634_v35  ;;  %v7525_v43 = vadd.f32 1.0, %v13108_v45  ;;  %v7528_v57 = vmul.f32 -0.5, %v13108_v45  ;;  %v3077_v16 = vadd.f32 %v16874_v8, %v12609_v0  ;;  %v4556_v13 = vrot.slane %v4555_v49, 1  ;;  %16880 = vst [vmem:[#allocation82_spill] sm:$0xff] %v13125_v22 }
 0x37b   : > { %v4588_v38 = vmax.f32 %v4586_v2, %v4587_v33  ;;  %v4601_v25 = vrot.slane %v4600_v44, 4  ;;  %v4594_v58 = vrot.slane %v4593_v62, 4  ;;  %v7520_v3 = vadd.f32 1.0, %v7519_v63 }
 0x37c   : > { %v7522_v14 = vand.u32 2147483647, %v13073_v42  ;;  %v7538_v54 = vadd.f32 1.0, %v7537_v31  ;;  %v3085_v36 = vadd.f32 %v16875_v21, %v12630_v61  ;;  %v4557_v20 = vmax.f32 %v4555_v49, %v4556_v13  ;;  %v16885_v13 = vld [vmem:[#allocation79_spill] sm:$0xff] }
 0x37d   : > { %v4589_v52 = vrot.slane %v4588_v38, 2  ;;  %v4602_v32 = vmax.f32 %v4600_v44, %v4601_v25  ;;  %v4595_v47 = vmax.f32 %v4593_v62, %v4594_v58  ;;  %v7540_v30 = vand.u32 2147483647, %v13080_v7 }
 0x37e   : > { %9516 = vlog2.f32 %v7525_v43  ;;  %v4607_v0 = vmax.f32 %v3077_v16, %v3085_v36  ;;  %v7529_v55 = vadd.f32 1.0, %v7528_v57  ;;  %v5173_v39 = vmax.f32 %v4557_v20, -2.3819763e+38  ;;  %v16920_v57 = vld [vmem:[#allocation92_spill] sm:$0xff] }
 0x37f   : > { %v4590_v2 = vmax.f32 %v4588_v38, %v4589_v52  ;;  %v4603_v17 = vrot.slane %v4602_v32, 2  ;;  %v13128_v63 = vmul.f32 %v7520_v3, %v13073_v42  ;;  %vm13130_vm8 = vcmp.lt.f32.partialorder %v7522_v14, 0.0004427343 }
 0x380   : > { %v13135_v61 = vmul.f32 %v7538_v54, %v13080_v7  ;;  %v4596_v31 = vrot.slane %v4595_v47, 2  ;;  %v4608_v49 = vrot.slane %v4607_v0, 4  ;;  %v7531_v35 = vand.u32 2147483647, %v13108_v45  ;;  %v16886_v7 = vld [vmem:[#allocation81_spill] sm:$0xff] }
 0x381   : > { %v5471_v33 = vadd.f32 %v10551_v34, %v5173_v39  ;;  %v4591_v44 = vrot.slane %v4590_v2, 1  ;;  %v4604_v62 = vmax.f32 %v4602_v32, %v4603_v17  ;;  %v9513_v43 = vpop.eup %9512  ;;  %vm13139_vm9 = vcmp.lt.f32.partialorder %v7540_v30, 0.0004427343  ;;  %v13159_v17 = vpop.f32.mrb[127].mxu1 }
 0x382   : > { %v4597_v42 = vmax.f32 %v4595_v47, %v4596_v31  ;;  %v4609_v16 = vmax.f32 %v4607_v0, %v4608_v49  ;;  %v3090_v38 = vadd.f32 %v16885_v13, %v12652_v4  ;;  %v3098_v25 = vadd.f32 %v16886_v7, %v12667_v46  ;;  %16887 = vst [vmem:[#allocation78_spill] sm:$0xff] %v13159_v17  ;;  %v16888_v49 = vld [vmem:[#allocation50_spill] sm:$0xff] }
 0x383   : > { %v13148_v58 = vmul.f32 %v7529_v55, %v13108_v45  ;;  %v13150_v3 = vmax.f32 %v5471_v33, 0.0  ;;  %v4592_v14 = vmax.f32 %v4590_v2, %v4591_v44  ;;  %v4605_v54 = vrot.slane %v4604_v62, 1  ;;  %v9515_v36 = vpop.eup %9514 }
 0x384   : > { %v4598_v20 = vrot.slane %v4597_v42, 1  ;;  %v4610_v52 = vrot.slane %v4609_v16, 2  ;;  %v3092_v32 = vadd.f32 %v16885_v13, %v12654_v9  ;;  %v4642_v47 = vmax.f32 %v3090_v38, %v3098_v25 }
 0x385   : > { %v13154_v30 = vmul.f32 0.6931472, %v9513_v43  ;;  %v7543_v4 = vadd.f32 1.0, %v13150_v3  ;;  %v5178_v0 = vmax.f32 %v4592_v14, -2.3819763e+38  ;;  %v3100_v46 = vadd.f32 %v16886_v7, %v12671_v27 }
 0x386   : > { %v4606_v45 = vmax.f32 %v4604_v62, %v4605_v54  ;;  %v4599_v55 = vmax.f32 %v4597_v42, %v4598_v20  ;;  %v4611_v39 = vmax.f32 %v4609_v16, %v4610_v52  ;;  %v4643_v2 = vrot.slane %v4642_v47, 4 }
 0x387   : > { %v13161_v31 = vmul.f32 0.6931472, %v9515_v36  ;;  %9518 = vlog2.f32 %v7543_v4  ;;  %v3091_v9 = vadd.f32 %v16885_v13, %v12662_v59  ;;  %v13167_v33 = vadd.f32 %v16885_v13, %v16888_v49 }
 0x388   : > { %v9517_v44 = vpop.eup %9516  ;;  %vm13169_vm12 = vcmp.lt.f32.partialorder %v7531_v35, 0.0004427343  ;;  %v5476_v27 = vadd.f32 %v10542_v23, %v5178_v0  ;;  %v5180_v62 = vmax.f32 %v4606_v45, -2.3819763e+38  ;;  %v5179_v42 = vmax.f32 %v4599_v55, -2.3819763e+38 }
 0x389   : > { %v4612_v16 = vrot.slane %v4611_v39, 1  ;;  %v7546_v59 = vmul.f32 -0.5, %v13150_v3  ;;  %v4644_v25 = vmax.f32 %v4642_v47, %v4643_v2  ;;  %v4656_v14 = vmax.f32 %v3092_v32, %v3100_v46 }
 0x38a   : > { %v5732_v54 = vmax.f32 %v5476_v27, 0.0  ;;  %v5478_v35 = vadd.f32 %v10545_v26, %v5180_v62  ;;  %v5477_v36 = vadd.f32 %v10547_v28, %v5179_v42  ;;  %v7549_v4 = vand.u32 2147483647, %v13150_v3  ;;  %v13190_v62 = vpop.f32.mrb[128].mxu0  ;;  %v13192_v42 = vpop.f32.mrb[128].mxu1 }
 0x38b   : > { %v4613_v20 = vmax.f32 %v4611_v39, %v4612_v16  ;;  %v4645_v0 = vrot.slane %v4644_v25, 2  ;;  %v4657_v45 = vrot.slane %v4656_v14, 4  ;;  %v13186_v55 = vmul.f32 0.6931472, %v9517_v44  ;;  %16891 = vst [vmem:[#allocation50_spill] sm:$0xff] %v13190_v62  ;;  %16892 = vst [vmem:[#allocation100_spill] sm:$0xff] %v13192_v42 }
 0x38c   : > { %v7588_v49 = vadd.f32 1.0, %v5732_v54  ;;  %v7591_v47 = vmul.f32 -0.5, %v5732_v54  ;;  %v5734_v32 = vmax.f32 %v5478_v35, 0.0  ;;  %v7547_v46 = vadd.f32 1.0, %v7546_v59  ;;  %v13194_v13 = vpop.f32.mrb[129].mxu0  ;;  %v13196_v44 = vpop.f32.mrb[129].mxu1 }
 0x38d   : > { %v5733_v2 = vmax.f32 %v5477_v36, 0.0  ;;  %v5181_v27 = vmax.f32 %v4613_v20, -2.3819763e+38  ;;  %v3099_v39 = vadd.f32 %v16886_v7, %v12692_v5  ;;  %v7594_v16 = vand.u32 2147483647, %v5732_v54  ;;  %16893 = vst [vmem:[#allocation101_spill] sm:$0xff] %v13194_v13 }
 0x38e   : > { %9520 = vlog2.f32 %v7588_v49  ;;  %v7606_v52 = vadd.f32 1.0, %v5734_v32  ;;  %v4646_v38 = vmax.f32 %v4644_v25, %v4645_v0  ;;  %16894 = vst [vmem:[#allocation102_spill] sm:$0xff] %v13196_v44  ;;  %vm13198_vm14 = vcmp.lt.f32.partialorder %v7549_v4, 0.0004427343  ;;  %v13202_v21 = vpop.f32.mrb[130].mxu0  ;;  %v13218_v22 = vpop.f32.mrb[130].mxu1 }
 0x38f   : > { %v7592_v59 = vadd.f32 1.0, %v7591_v47  ;;  %v7609_v36 = vmul.f32 -0.5, %v5734_v32  ;;  %v7597_v20 = vadd.f32 1.0, %v5733_v2  ;;  %v4658_v5 = vmax.f32 %v4656_v14, %v4657_v45  ;;  %16897 = vst [vmem:[#allocation103_spill] sm:$0xff] %v13202_v21  ;;  %v16898_v47 = vld [vmem:[#allocation53_spill] sm:$0xff] }
 0x390   : > { %9522 = vlog2.f32 %v7606_v52  ;;  %v7612_v8 = vand.u32 2147483647, %v5734_v32  ;;  %v7600_v49 = vmul.f32 -0.5, %v5733_v2  ;;  %v5479_v42 = vadd.f32 %v10551_v34, %v5181_v27  ;;  %16901 = vst [vmem:[#allocation53_spill] sm:$0xff] %v13218_v22 }
 0x391   : > { %v9519_v25 = vpop.eup %9518  ;;  %v13210_v0 = vmul.f32 %v7547_v46, %v13150_v3  ;;  %9524 = vlog2.f32 %v7597_v20  ;;  %v3101_v14 = vadd.f32 %v16886_v7, %v16898_v47  ;;  %vm13214_vm1 = vcmp.lt.f32.partialorder %v7594_v16, 0.0004427343 }
 0x392   : > { %v7603_v52 = vand.u32 2147483647, %v5733_v2  ;;  %v5735_v44 = vmax.f32 %v5479_v42, 0.0  ;;  %v4647_v27 = vrot.slane %v4646_v38, 1  ;;  %v7593_v13 = vmul.f32 %v7592_v59, %v5732_v54 }
 0x393   : > { %v7610_v62 = vadd.f32 1.0, %v7609_v36  ;;  %v4659_v21 = vrot.slane %v4658_v5, 2  ;;  %v4649_v17 = vmax.f32 %v3091_v9, %v3099_v39  ;;  %v13220_v4 = vmul.f32 0.6931472, %v9519_v25 }
 0x394   : > { %vm13222_vm2 = vcmp.lt.f32.partialorder %v7612_v8, 0.0004427343  ;;  %v7601_v46 = vadd.f32 1.0, %v7600_v49  ;;  %v7615_v16 = vadd.f32 1.0, %v5735_v44  ;;  %v7618_v20 = vmul.f32 -0.5, %v5735_v44  ;;  %v16907_v49 = vld [vmem:[#allocation87_spill] sm:$0xff] }
 0x395   : > { %v4648_v47 = vmax.f32 %v4646_v38, %v4647_v27  ;;  %v4660_v7 = vmax.f32 %v4658_v5, %v4659_v21  ;;  %v4650_v51 = vrot.slane %v4649_v17, 4  ;;  %v4663_v42 = vmax.f32 %v13167_v33, %v3101_v14  ;;  %v16906_v33 = vld [vmem:[#allocation38_spill] sm:$0xff] }
 0x396   : > { %vm13227_vm0 = vcmp.lt.f32.partialorder %v7603_v52, 0.0004427343  ;;  %9526 = vlog2.f32 %v7615_v16  ;;  %v7619_v9 = vadd.f32 1.0, %v7618_v20  ;;  %v7621_v39 = vand.u32 2147483647, %v5735_v44 }
 0x397   : > { %v5186_v59 = vmax.f32 %v4648_v47, -2.3819763e+38  ;;  %v4661_v8 = vrot.slane %v4660_v7, 1  ;;  %v4651_v36 = vmax.f32 %v4649_v17, %v4650_v51  ;;  %v4664_v25 = vrot.slane %v4663_v42, 4 }
 0x398   : > { %v9521_v22 = vpop.eup %9520  ;;  %v7611_v38 = vmul.f32 %v7610_v62, %v5734_v32  ;;  %v7602_v5 = vmul.f32 %v7601_v46, %v5733_v2  ;;  %v3106_v14 = vadd.f32 %v16907_v49, %v16906_v33  ;;  %v7620_v40 = vmul.f32 %v7619_v9, %v5735_v44  ;;  %v16911_v32 = vld [vmem:[#allocation37_spill] sm:$0xff]  ;;  %v13246_v62 = vpop.f32.mrb[131].mxu0  ;;  %v16913_v33 = vld [vmem:[#allocation58_spill] sm:$0xff] }
 0x399   : > { %v7590_v52 = vmul.f32 0.6931472, %v9521_v22  ;;  %v5484_v27 = vadd.f32 %v10542_v23, %v5186_v59  ;;  %v4662_v16 = vmax.f32 %v4660_v7, %v4661_v8  ;;  %v4652_v20 = vrot.slane %v4651_v36, 2  ;;  %16912 = vst [vmem:[#allocation38_spill] sm:$0xff] %v13246_v62  ;;  %v16914_v62 = vld [vmem:[#allocation57_spill] sm:$0xff] }
 0x39a   : > { %v9523_v47 = vpop.eup %9522  ;;  %vm13238_vm4 = vcmp.lt.f32.partialorder %v7621_v39, 0.0004427343  ;;  %v4665_v17 = vmax.f32 %v4663_v42, %v4664_v25  ;;  %v3108_v21 = vadd.f32 %v16907_v49, %v16910_v11  ;;  %v3107_v2 = vadd.f32 %v16907_v49, %v16911_v32 }
 0x39b   : > { %v9525_v22 = vpop.eup %9524  ;;  %v7596_v7 = vsel %vm13214_vm1, %v7593_v13, %v7590_v52  ;;  %v7608_v46 = vmul.f32 0.6931472, %v9523_v47  ;;  %v13250_v59 = vmax.f32 %v5484_v27, 0.0  ;;  %v5188_v44 = vmax.f32 %v4662_v16, -2.3819763e+38  ;;  %v13270_v27 = vpop.f32.mrb[131].mxu1 }
 0x39c   : > { %v8691_v9 = vrot.slane %v7596_v7, 7  ;;  %v7599_v39 = vmul.f32 0.6931472, %v9525_v22  ;;  %v4653_v8 = vmax.f32 %v4651_v36, %v4652_v20  ;;  %v4666_v42 = vrot.slane %v4665_v17, 2  ;;  %v16917_v47 = vld [vmem:[#allocation43_spill] sm:$0xff] }
 0x39d   : > { %v7614_v11 = vsel %vm13222_vm2, %v7611_v38, %v7608_v46  ;;  %v7660_v25 = vadd.f32 1.0, %v13250_v59  ;;  %v3109_v32 = vadd.f32 %v16907_v49, %v16913_v33  ;;  %v3114_v45 = vadd.f32 %v16915_v60, %v16914_v62 }
 0x39e   : > { %v16916_v13 = vsel %vm13130_vm8, %v13128_v63, %v13154_v30  ;;  %v8719_v36 = vrot.slane %v7614_v11, 7  ;;  %v7605_v3 = vsel %vm13227_vm0, %v7602_v5, %v7599_v39  ;;  %v5486_v38 = vadd.f32 %v10545_v26, %v5188_v44 }
 0x39f   : > { %v13265_v52 = vsel %vm8349_vm6, %v8691_v9, %v16916_v13  ;;  %v8705_v16 = vrot.slane %v7605_v3, 7  ;;  %9528 = vlog2.f32 %v7660_v25  ;;  %v7663_v20 = vmul.f32 -0.5, %v13250_v59 }
 0x3a0   : > { %v3116_v50 = vadd.f32 %v16915_v60, %v16917_v47  ;;  %v9527_v62 = vpop.eup %9526  ;;  %v16918_v63 = vsel %vm13139_vm9, %v13135_v61, %v13161_v31  ;;  %v5742_v54 = vmax.f32 %v5486_v38, 0.0  ;;  %v4654_v5 = vrot.slane %v4653_v8, 1 }
 0x3a1   : > { %v13281_v30 = vsel %vm8349_vm6, %v8719_v36, %v16918_v63  ;;  %v4667_v22 = vmax.f32 %v4665_v17, %v4666_v42  ;;  %v16919_v7 = vsel %vm13169_vm12, %v13148_v58, %v13186_v55  ;;  %v7617_v44 = vmul.f32 0.6931472, %v9527_v62  ;;  %v13307_v63 = vpop.f32.mrb[132].mxu0 }
 0x3a2   : > { %v13289_v46 = vsel %vm8349_vm6, %v8705_v16, %v16919_v7  ;;  %v4698_v9 = vmax.f32 %v3106_v14, %v3114_v45  ;;  %v3115_v39 = vadd.f32 %v16915_v60, %v16920_v57  ;;  %v7666_v61 = vand.u32 2147483647, %v13250_v59  ;;  %v16922_v16 = vld [vmem:[#allocation94_spill] sm:$0xff] }
 0x3a3   : > { %v7678_v31 = vadd.f32 1.0, %v5742_v54  ;;  %v7681_v11 = vmul.f32 -0.5, %v5742_v54  ;;  %v4655_v25 = vmax.f32 %v4653_v8, %v4654_v5  ;;  %v7623_v17 = vsel %vm13238_vm4, %v7620_v40, %v7617_v44  ;;  %v13309_v5 = vpop.f32.mrb[132].mxu1 }
 0x3a4   : > { %v4668_v43 = vrot.slane %v4667_v22, 1  ;;  %v4699_v42 = vrot.slane %v4698_v9, 4  ;;  %v4712_v33 = vmax.f32 %v3108_v21, %v3116_v50  ;;  %v8733_v58 = vrot.slane %v7623_v17, 7 }
 0x3a5   : > { %v7664_v55 = vadd.f32 1.0, %v7663_v20  ;;  %9530 = vlog2.f32 %v7678_v31  ;;  %v7684_v13 = vand.u32 2147483647, %v5742_v54  ;;  %v5187_v36 = vmax.f32 %v4655_v25, -2.3819763e+38 }
 0x3a6   : > { %v4669_v14 = vmax.f32 %v4667_v22, %v4668_v43  ;;  %v4700_v45 = vmax.f32 %v4698_v9, %v4699_v42  ;;  %v4713_v3 = vrot.slane %v4712_v33, 4  ;;  %v16921_v38 = vsel %vm13198_vm14, %v13210_v0, %v13220_v4  ;;  %v13311_v4 = vpop.f32.mrb[133].mxu0  ;;  %v13313_v0 = vpop.f32.mrb[133].mxu1 }
 0x3a7   : > { %v13302_v8 = vsel %vm8349_vm6, %v8733_v58, %v16921_v38  ;;  %v7682_v40 = vadd.f32 1.0, %v7681_v11  ;;  %v4705_v51 = vmax.f32 %v3107_v2, %v3115_v39  ;;  %v3117_v21 = vadd.f32 %v16915_v60, %v16922_v16  ;;  %v13316_v39 = vpop.f32.mrb[134].mxu0  ;;  %v13318_v31 = vpop.f32.mrb[134].mxu1 }
 0x3a8   : > { %v5485_v20 = vadd.f32 %v10547_v28, %v5187_v36  ;;  %v5189_v47 = vmax.f32 %v4669_v14, -2.3819763e+38  ;;  %v4701_v50 = vrot.slane %v4700_v45, 2  ;;  %v4714_v62 = vmax.f32 %v4712_v33, %v4713_v3 }
 0x3a9   : > { %v4706_v35 = vrot.slane %v4705_v51, 4  ;;  %v4719_v22 = vmax.f32 %v3109_v32, %v3117_v21  ;;  %v9529_v7 = vpop.eup %9528  ;;  %v7665_v25 = vmul.f32 %v7664_v55, %v13250_v59  ;;  %vm7667_vm5 = vcmp.lt.f32.partialorder %v7666_v61, 0.0004427343 }
 0x3aa   : > { %v5741_v2 = vmax.f32 %v5485_v20, 0.0  ;;  %v5487_v44 = vadd.f32 %v10551_v34, %v5189_v47  ;;  %v4702_v9 = vmax.f32 %v4700_v45, %v4701_v50  ;;  %v4715_v57 = vrot.slane %v4714_v62, 2  ;;  %v16925_v45 = vld [vmem:[#allocation29_spill] sm:$0xff]  ;;  %v13337_v50 = vpop.f32.mrb[135].mxu0 }
 0x3ab   : > { %v7662_v11 = vmul.f32 0.6931472, %v9529_v7  ;;  %v4707_v17 = vmax.f32 %v4705_v51, %v4706_v35  ;;  %v7683_v32 = vmul.f32 %v7682_v40, %v5742_v54  ;;  %vm13321_vm8 = vcmp.lt.f32.partialorder %v7684_v13, 0.0004427343  ;;  %v16926_v47 = vld [vmem:[#allocation41_spill] sm:$0xff] }
 0x3ac   : > { %v7669_v42 = vadd.f32 1.0, %v5741_v2  ;;  %v5743_v33 = vmax.f32 %v5487_v44, 0.0  ;;  %v4703_v36 = vrot.slane %v4702_v9, 1  ;;  %v4716_v14 = vmax.f32 %v4714_v62, %v4715_v57 }
 0x3ad   : > { %v7668_v58 = vsel %vm7667_vm5, %v7665_v25, %v7662_v11  ;;  %v3122_v3 = vadd.f32 %v16925_v45, %v12839_v15  ;;  %v4708_v16 = vrot.slane %v4707_v17, 2  ;;  %v4720_v21 = vrot.slane %v4719_v22, 4 }
 0x3ae   : > { %v8693_v38 = vrot.slane %v7668_v58, 6  ;;  %9532 = vlog2.f32 %v7669_v42  ;;  %v7672_v61 = vmul.f32 -0.5, %v5741_v2  ;;  %v7687_v55 = vadd.f32 1.0, %v5743_v33 }
 0x3af   : > { %v9531_v59 = vpop.eup %9530  ;;  %v4704_v54 = vmax.f32 %v4702_v9, %v4703_v36  ;;  %v3124_v13 = vadd.f32 %v16925_v45, %v12841_v41  ;;  %v4717_v20 = vrot.slane %v4716_v14, 1  ;;  %v13335_v15 = vadd.f32 %v16925_v45, %v16926_v47  ;;  %v16927_v47 = vld [vmem:[#allocation64_spill] sm:$0xff] }
 0x3b0   : > { %v13331_v40 = vsel %vm8352_vm10, %v8693_v38, %v13265_v52  ;;  %v7680_v51 = vmul.f32 0.6931472, %v9531_v59  ;;  %v7675_v62 = vand.u32 2147483647, %v5741_v2  ;;  %9534 = vlog2.f32 %v7687_v55  ;;  %v13341_v52 = vpop.f32.mrb[135].mxu1  ;;  %v16928_v55 = vld [vmem:[#allocation32_spill] sm:$0xff] }
 0x3b1   : > { %v7690_v35 = vmul.f32 -0.5, %v5743_v33  ;;  %v5194_v7 = vmax.f32 %v4704_v54, -2.3819763e+38  ;;  %v4718_v41 = vmax.f32 %v4716_v14, %v4717_v20  ;;  %v4709_v9 = vmax.f32 %v4707_v17, %v4708_v16 }
 0x3b2   : > { %v7686_v44 = vsel %vm13321_vm8, %v7683_v32, %v7680_v51  ;;  %v4721_v57 = vmax.f32 %v4719_v22, %v4720_v21  ;;  %v7673_v25 = vadd.f32 1.0, %v7672_v61  ;;  %v7693_v42 = vand.u32 2147483647, %v5743_v33  ;;  %v16929_v22 = vld [vmem:[#allocation95_spill] sm:$0xff] }
 0x3b3   : > { %v8721_v11 = vrot.slane %v7686_v44, 6  ;;  %v5492_v58 = vadd.f32 %v10542_v23, %v5194_v7  ;;  %v5196_v36 = vmax.f32 %v4718_v41, -2.3819763e+38  ;;  %v4710_v38 = vrot.slane %v4709_v9, 1 }
 0x3b4   : > { %v4722_v59 = vrot.slane %v4721_v57, 2  ;;  %v3130_v60 = vadd.f32 %v16928_v55, %v16927_v47  ;;  %v7691_v32 = vadd.f32 1.0, %v7690_v35  ;;  %v3132_v14 = vadd.f32 %v16928_v55, %v16929_v22 }
 0x3b5   : > { %v13348_v43 = vsel %vm8352_vm10, %v8721_v11, %v13281_v30  ;;  %v13350_v17 = vmax.f32 %v5492_v58, 0.0  ;;  %v5494_v16 = vadd.f32 %v10545_v26, %v5196_v36  ;;  %v4711_v21 = vmax.f32 %v4709_v9, %v4710_v38  ;;  %v16934_v9 = vld [vmem:[#allocation42_spill] sm:$0xff] }
 0x3b6   : > { %v4723_v61 = vmax.f32 %v4721_v57, %v4722_v59  ;;  %v4754_v54 = vmax.f32 %v3122_v3, %v3130_v60  ;;  %v7674_v51 = vmul.f32 %v7673_v25, %v5741_v2  ;;  %vm13355_vm9 = vcmp.lt.f32.partialorder %v7675_v62, 0.0004427343 }
 0x3b7   : > { %v7732_v7 = vadd.f32 1.0, %v13350_v17  ;;  %v4768_v30 = vmax.f32 %v3124_v13, %v3132_v14  ;;  %v5750_v35 = vmax.f32 %v5494_v16, 0.0  ;;  %v5195_v41 = vmax.f32 %v4711_v21, -2.3819763e+38 }
 0x3b8   : > { %v9533_v44 = vpop.eup %9532  ;;  %v4724_v11 = vrot.slane %v4723_v61, 1  ;;  %v4755_v58 = vrot.slane %v4754_v54, 4  ;;  %vm13360_vm12 = vcmp.lt.f32.partialorder %v7693_v42, 0.0004427343  ;;  %v7735_v60 = vmul.f32 -0.5, %v13350_v17 }
 0x3b9   : > { %v7671_v47 = vmul.f32 0.6931472, %v9533_v44  ;;  %9536 = vlog2.f32 %v7732_v7  ;;  %v7692_v2 = vmul.f32 %v7691_v32, %v5743_v33  ;;  %v7750_v3 = vadd.f32 1.0, %v5750_v35 }
 0x3ba   : > { %v5493_v62 = vadd.f32 %v10547_v28, %v5195_v41  ;;  %v3131_v13 = vadd.f32 %v16928_v55, %v16934_v9  ;;  %v9535_v57 = vpop.eup %9534  ;;  %v7753_v36 = vmul.f32 -0.5, %v5750_v35  ;;  %v4725_v38 = vmax.f32 %v4723_v61, %v4724_v11  ;;  %v13379_v9 = vpop.f32.mrb[136].mxu0 }
 0x3bb   : > { %v7677_v25 = vsel %vm13355_vm9, %v7674_v51, %v7671_v47  ;;  %v4756_v42 = vmax.f32 %v4754_v54, %v4755_v58  ;;  %v7689_v14 = vmul.f32 0.6931472, %v9535_v57  ;;  %v7738_v16 = vand.u32 2147483647, %v13350_v17  ;;  %v13381_v57 = vpop.f32.mrb[136].mxu1 }
 0x3bc   : > { %v8707_v59 = vrot.slane %v7677_v25, 6  ;;  %9538 = vlog2.f32 %v7750_v3  ;;  %v7736_v21 = vadd.f32 1.0, %v7735_v60  ;;  %v5749_v33 = vmax.f32 %v5493_v62, 0.0  ;;  %16935 = vst [vmem:[#allocation39_spill] sm:$0xff] %v13381_v57  ;;  %v13387_v25 = vpop.f32.mrb[137].mxu0  ;;  %v16949_v57 = vld [vmem:[#allocation48_spill] sm:$0xff] }
 0x3bd   : > { %v5197_v32 = vmax.f32 %v4725_v38, -2.3819763e+38  ;;  %v4757_v7 = vrot.slane %v4756_v42, 2  ;;  %v7695_v20 = vsel %vm13360_vm12, %v7692_v2, %v7689_v14  ;;  %v7756_v51 = vand.u32 2147483647, %v5750_v35  ;;  %16936 = vst [vmem:[#allocation37_spill] sm:$0xff] %v13387_v25 }
 0x3be   : > { %v13373_v44 = vsel %vm8352_vm10, %v8707_v59, %v13289_v46  ;;  %v4769_v41 = vrot.slane %v4768_v30, 4  ;;  %v8735_v61 = vrot.slane %v7695_v20, 6  ;;  %v7754_v54 = vadd.f32 1.0, %v7753_v36  ;;  %v13389_v36 = vpop.f32.mrb[137].mxu1 }
 0x3bf   : > { %v7741_v11 = vadd.f32 1.0, %v5749_v33  ;;  %v7744_v58 = vmul.f32 -0.5, %v5749_v33  ;;  %v5495_v47 = vadd.f32 %v10551_v34, %v5197_v32  ;;  %v4758_v3 = vmax.f32 %v4756_v42, %v4757_v7  ;;  %16937 = vst [vmem:[#allocation58_spill] sm:$0xff] %v13389_v36  ;;  %v16942_v7 = vld [vmem:[#allocation63_spill] sm:$0xff] }
 0x3c0   : > { %v4770_v60 = vmax.f32 %v4768_v30, %v4769_v41  ;;  %v4761_v62 = vmax.f32 %v13335_v15, %v3131_v13  ;;  %v13385_v46 = vsel %vm8352_vm10, %v8735_v61, %v13302_v8  ;;  %v7747_v2 = vand.u32 2147483647, %v5749_v33  ;;  %v13391_v15 = vpop.f32.mrb[138].mxu0  ;;  %v13393_v13 = vpop.f32.mrb[138].mxu1  ;;  %v16943_v41 = vld [vmem:[#allocation70_spill] sm:$0xff] }
 0x3c1   : > { %9540 = vlog2.f32 %v7741_v11  ;;  %v7745_v22 = vadd.f32 1.0, %v7744_v58  ;;  %v5751_v38 = vmax.f32 %v5495_v47, 0.0  ;;  %v4759_v42 = vrot.slane %v4758_v3, 1  ;;  %16938 = vst [vmem:[#allocation57_spill] sm:$0xff] %v13391_v15  ;;  %16939 = vst [vmem:[#allocation43_spill] sm:$0xff] %v13393_v13  ;;  %v13404_v11 = vpop.f32.mrb[139].mxu0 }
 0x3c2   : > { %v4771_v30 = vrot.slane %v4770_v60, 2  ;;  %v4762_v59 = vrot.slane %v4761_v62, 4  ;;  %v7737_v32 = vmul.f32 %v7736_v21, %v13350_v17  ;;  %vm13396_vm14 = vcmp.lt.f32.partialorder %v7738_v16, 0.0004427343  ;;  %16944 = vst [vmem:[#allocation92_spill] sm:$0xff] %v13404_v11 }
 0x3c3   : > { %v9537_v14 = vpop.eup %9536  ;;  %v3125_v20 = vadd.f32 %v16925_v45, %v16942_v7  ;;  %v3133_v61 = vadd.f32 %v16928_v55, %v16943_v41  ;;  %v7755_v47 = vmul.f32 %v7754_v54, %v5750_v35  ;;  %vm13406_vm1 = vcmp.lt.f32.partialorder %v7756_v51, 0.0004427343 }
 0x3c4   : > { %v7734_v58 = vmul.f32 0.6931472, %v9537_v14  ;;  %v7759_v36 = vadd.f32 1.0, %v5751_v38  ;;  %vm13410_vm2 = vcmp.lt.f32.partialorder %v7747_v2, 0.0004427343  ;;  %v4760_v16 = vmax.f32 %v4758_v3, %v4759_v42 }
 0x3c5   : > { %v4772_v21 = vmax.f32 %v4770_v60, %v4771_v30  ;;  %v4763_v25 = vmax.f32 %v4761_v62, %v4762_v59  ;;  %v4775_v7 = vmax.f32 %v3125_v20, %v3133_v61  ;;  %v7746_v55 = vmul.f32 %v7745_v22, %v5749_v33 }
 0x3c6   : > { %v9539_v45 = vpop.eup %9538  ;;  %v7740_v41 = vsel %vm13396_vm14, %v7737_v32, %v7734_v58  ;;  %9542 = vlog2.f32 %v7759_v36  ;;  %v7762_v35 = vmul.f32 -0.5, %v5751_v38  ;;  %v5202_v14 = vmax.f32 %v4760_v16, -2.3819763e+38  ;;  %v13425_v36 = vpop.f32.mrb[139].mxu1 }
 0x3c7   : > { %v8695_v51 = vrot.slane %v7740_v41, 5  ;;  %v7752_v54 = vmul.f32 0.6931472, %v9539_v45  ;;  %v4773_v11 = vrot.slane %v4772_v21, 1  ;;  %v7765_v13 = vand.u32 2147483647, %v5751_v38 }
 0x3c8   : > { %v4764_v2 = vrot.slane %v4763_v25, 2  ;;  %v4776_v15 = vrot.slane %v4775_v7, 4  ;;  %v3138_v3 = vadd.f32 %v16949_v57, %v12931_v18  ;;  %v5500_v33 = vadd.f32 %v10542_v23, %v5202_v14 }
 0x3c9   : > { %v13420_v60 = vsel %vm8355_vm15, %v8695_v51, %v13331_v40  ;;  %v7758_v62 = vsel %vm13406_vm1, %v7755_v47, %v7752_v54  ;;  %v4774_v22 = vmax.f32 %v4772_v21, %v4773_v11  ;;  %v3140_v59 = vadd.f32 %v16949_v57, %v12933_v48  ;;  %v16950_v40 = vld [vmem:[#allocation61_spill] sm:$0xff] }
 0x3ca   : > { %v8723_v45 = vrot.slane %v7758_v62, 5  ;;  %v4765_v42 = vmax.f32 %v4763_v25, %v4764_v2  ;;  %v4777_v30 = vmax.f32 %v4775_v7, %v4776_v15  ;;  %v7763_v18 = vadd.f32 1.0, %v7762_v35 }
 0x3cb   : > { %v9541_v32 = vpop.eup %9540  ;;  %v5756_v8 = vmax.f32 %v5500_v33, 0.0  ;;  %v5204_v20 = vmax.f32 %v4774_v22, -2.3819763e+38  ;;  %v3146_v61 = vadd.f32 %v16950_v40, %v12947_v10  ;;  %vm13435_vm0 = vcmp.lt.f32.partialorder %v7765_v13, 0.0004427343  ;;  %v16953_v22 = vld [vmem:[#allocation68_spill] sm:$0xff] }
 0x3cc   : > { %v13433_v49 = vsel %vm8355_vm15, %v8723_v45, %v13348_v43  ;;  %v7743_v11 = vmul.f32 0.6931472, %v9541_v32  ;;  %v4766_v58 = vrot.slane %v4765_v42, 1  ;;  %v4778_v47 = vrot.slane %v4777_v30, 2 }
 0x3cd   : > { %v7804_v15 = vadd.f32 1.0, %v5756_v8  ;;  %v5502_v48 = vadd.f32 %v10545_v26, %v5204_v20  ;;  %v3148_v16 = vadd.f32 %v16950_v40, %v12958_v6  ;;  %v4810_v43 = vmax.f32 %v3138_v3, %v3146_v61 }
 0x3ce   : > { %v7749_v10 = vsel %vm13410_vm2, %v7746_v55, %v7743_v11  ;;  %v4767_v21 = vmax.f32 %v4765_v42, %v4766_v58  ;;  %v4779_v7 = vmax.f32 %v4777_v30, %v4778_v47  ;;  %v7764_v35 = vmul.f32 %v7763_v18, %v5751_v38 }
 0x3cf   : > { %v8709_v41 = vrot.slane %v7749_v10, 5  ;;  %9544 = vlog2.f32 %v7804_v15  ;;  %v7807_v51 = vmul.f32 -0.5, %v5756_v8  ;;  %v5758_v54 = vmax.f32 %v5502_v48, 0.0  ;;  %v13457_v10 = vpop.f32.mrb[140].mxu1 }
 0x3d0   : > { %v9543_v13 = vpop.eup %9542  ;;  %v5203_v14 = vmax.f32 %v4767_v21, -2.3819763e+38  ;;  %v4780_v2 = vrot.slane %v4779_v7, 1  ;;  %v4811_v62 = vrot.slane %v4810_v43, 4  ;;  %v3139_v55 = vadd.f32 %v16949_v57, %v16953_v22 }
 0x3d1   : > { %v13446_v33 = vsel %vm8355_vm15, %v8709_v41, %v13373_v44  ;;  %v7761_v6 = vmul.f32 0.6931472, %v9543_v13  ;;  %v4824_v17 = vmax.f32 %v3140_v59, %v3148_v16  ;;  %v7810_v45 = vand.u32 2147483647, %v5756_v8  ;;  %v16954_v44 = vld [vmem:[#allocation69_spill] sm:$0xff]  ;;  %v13455_v16 = vpop.f32.mrb[140].mxu0 }
 0x3d2   : > { %v7822_v3 = vadd.f32 1.0, %v5758_v54  ;;  %v7825_v42 = vmul.f32 -0.5, %v5758_v54  ;;  %v5501_v38 = vadd.f32 %v10547_v28, %v5203_v14  ;;  %v4781_v32 = vmax.f32 %v4779_v7, %v4780_v2  ;;  %v16957_v7 = vld [vmem:[#allocation67_spill] sm:$0xff]  ;;  %v16958_v41 = vld [vmem:[#allocation72_spill] sm:$0xff]  ;;  %v13473_v13 = vpop.f32.mrb[141].mxu1 }
 0x3d3   : > { %v7767_v30 = vsel %vm13435_vm0, %v7764_v35, %v7761_v6  ;;  %v4812_v18 = vmax.f32 %v4810_v43, %v4811_v62  ;;  %v4825_v20 = vrot.slane %v4824_v17, 4  ;;  %v7808_v11 = vadd.f32 1.0, %v7807_v51  ;;  %v13471_v51 = vpop.f32.mrb[141].mxu0 }
 0x3d4   : > { %v8737_v61 = vrot.slane %v7767_v30, 5  ;;  %9546 = vlog2.f32 %v7822_v3  ;;  %v3141_v58 = vadd.f32 %v16949_v57, %v16954_v44  ;;  %v5757_v47 = vmax.f32 %v5501_v38, 0.0  ;;  %v13476_v6 = vpop.f32.mrb[142].mxu0 }
 0x3d5   : > { %v5205_v15 = vmax.f32 %v4781_v32, -2.3819763e+38  ;;  %v4813_v59 = vrot.slane %v4812_v18, 2  ;;  %v4826_v48 = vmax.f32 %v4824_v17, %v4825_v20  ;;  %vm13463_vm4 = vcmp.lt.f32.partialorder %v7810_v45, 0.0004427343 }
 0x3d6   : > { %v13461_v25 = vsel %vm8355_vm15, %v8737_v61, %v13385_v46  ;;  %v3147_v43 = vadd.f32 %v16950_v40, %v16957_v7  ;;  %v3149_v35 = vadd.f32 %v16950_v40, %v16958_v41  ;;  %v7826_v14 = vadd.f32 1.0, %v7825_v42 }
 0x3d7   : > { %v7828_v2 = vand.u32 2147483647, %v5758_v54  ;;  %v7813_v62 = vadd.f32 1.0, %v5757_v47  ;;  %v5503_v46 = vadd.f32 %v10551_v34, %v5205_v15  ;;  %v4814_v22 = vmax.f32 %v4812_v18, %v4813_v59  ;;  %v13482_v18 = vpop.f32.mrb[142].mxu1 }
 0x3d8   : > { %v4827_v17 = vrot.slane %v4826_v48, 2  ;;  %v4817_v45 = vmax.f32 %v3139_v55, %v3147_v43  ;;  %v4831_v3 = vmax.f32 %v3141_v58, %v3149_v35  ;;  %v7809_v30 = vmul.f32 %v7808_v11, %v5756_v8 }
 0x3d9   : > { %v9545_v38 = vpop.eup %9544  ;;  %9548 = vlog2.f32 %v7813_v62  ;;  %v7816_v32 = vmul.f32 -0.5, %v5757_v47  ;;  %v5759_v20 = vmax.f32 %v5503_v46, 0.0  ;;  %v4815_v44 = vrot.slane %v4814_v22, 1 }
 0x3da   : > { %v7806_v61 = vmul.f32 0.6931472, %v9545_v38  ;;  %v4828_v7 = vmax.f32 %v4826_v48, %v4827_v17  ;;  %v4818_v41 = vrot.slane %v4817_v45, 4  ;;  %v7827_v42 = vmul.f32 %v7826_v14, %v5758_v54  ;;  %v13486_v48 = vpop.f32.mrb[143].mxu0 }
 0x3db   : > { %vm13478_vm5 = vcmp.lt.f32.partialorder %v7828_v2, 0.0004427343  ;;  %v7831_v15 = vadd.f32 1.0, %v5759_v20  ;;  %v7834_v57 = vmul.f32 -0.5, %v5759_v20  ;;  %v4816_v8 = vmax.f32 %v4814_v22, %v4815_v44 }
 0x3dc   : > { %v7812_v55 = vsel %vm13463_vm4, %v7809_v30, %v7806_v61  ;;  %v4829_v11 = vrot.slane %v4828_v7, 1  ;;  %v4819_v58 = vmax.f32 %v4817_v45, %v4818_v41  ;;  %v7817_v43 = vadd.f32 1.0, %v7816_v32 }
 0x3dd   : > { %v8697_v59 = vrot.slane %v7812_v55, 4  ;;  %v7819_v35 = vand.u32 2147483647, %v5757_v47  ;;  %9550 = vlog2.f32 %v7831_v15  ;;  %v5210_v14 = vmax.f32 %v4816_v8, -2.3819763e+38  ;;  %v13499_v15 = vpop.f32.mrb[143].mxu1 }
 0x3de   : > { %v9547_v54 = vpop.eup %9546  ;;  %v4830_v2 = vmax.f32 %v4828_v7, %v4829_v11  ;;  %v4820_v62 = vrot.slane %v4819_v58, 2  ;;  %v4832_v46 = vrot.slane %v4831_v3, 4  ;;  %v7835_v38 = vadd.f32 1.0, %v7834_v57 }
 0x3df   : > { %v13490_v17 = vsel %vm8358_vm7, %v8697_v59, %v13420_v60  ;;  %v7824_v21 = vmul.f32 0.6931472, %v9547_v54  ;;  %v7837_v22 = vand.u32 2147483647, %v5759_v20  ;;  %v5508_v45 = vadd.f32 %v10542_v23, %v5210_v14  ;;  %v16966_v54 = vld [vmem:[#allocation96_spill] sm:$0xff] }
 0x3e0   : > { %v5212_v30 = vmax.f32 %v4830_v2, -2.3819763e+38  ;;  %v4821_v32 = vmax.f32 %v4819_v58, %v4820_v62  ;;  %v4833_v61 = vmax.f32 %v4831_v3, %v4832_v46  ;;  %v7818_v41 = vmul.f32 %v7817_v43, %v5757_v47  ;;  %v16965_v47 = vld [vmem:[#allocation97_spill] sm:$0xff] }
 0x3e1   : > { %v7830_v44 = vsel %vm13478_vm5, %v7827_v42, %v7824_v21  ;;  %vm13495_vm8 = vcmp.lt.f32.partialorder %v7819_v35, 0.0004427343  ;;  %v13501_v55 = vmax.f32 %v5508_v45, 0.0  ;;  %v7836_v59 = vmul.f32 %v7835_v38, %v5759_v20 }
 0x3e2   : > { %v8725_v60 = vrot.slane %v7830_v44, 4  ;;  %v5510_v57 = vadd.f32 %v10545_v26, %v5212_v30  ;;  %v4822_v8 = vrot.slane %v4821_v32, 1  ;;  %vm13504_vm9 = vcmp.lt.f32.partialorder %v7837_v22, 0.0004427343 }
 0x3e3   : > { %v9549_v11 = vpop.eup %9548  ;;  %v4834_v40 = vrot.slane %v4833_v61, 2  ;;  %v3162_v42 = vadd.f32 %v16965_v47, %v13030_v37  ;;  %v7876_v35 = vadd.f32 1.0, %v13501_v55  ;;  %v3154_v14 = vadd.f32 %v16966_v54, %v13018_v24 }
 0x3e4   : > { %v13512_v58 = vsel %vm8358_vm7, %v8725_v60, %v13433_v49  ;;  %v7815_v43 = vmul.f32 0.6931472, %v9549_v11  ;;  %v7879_v20 = vmul.f32 -0.5, %v13501_v55  ;;  %v5766_v2 = vmax.f32 %v5510_v57, 0.0 }
 0x3e5   : > { %v4823_v62 = vmax.f32 %v4821_v32, %v4822_v8  ;;  %v4835_v46 = vmax.f32 %v4833_v61, %v4834_v40  ;;  %9552 = vlog2.f32 %v7876_v35  ;;  %v3156_v37 = vadd.f32 %v16966_v54, %v13020_v19  ;;  %v16967_v61 = vld [vmem:[#allocation75_spill] sm:$0xff] }
 0x3e6   : > { %v7821_v21 = vsel %vm13495_vm8, %v7818_v41, %v7815_v43  ;;  %v4866_v49 = vmax.f32 %v3154_v14, %v3162_v42  ;;  %v7894_v45 = vadd.f32 1.0, %v5766_v2  ;;  %v3155_v30 = vadd.f32 %v16966_v54, %v13023_v1  ;;  %v16968_v41 = vld [vmem:[#allocation77_spill] sm:$0xff]  ;;  %v13537_v42 = vpop.f32.mrb[144].mxu0  ;;  %v13539_v43 = vpop.f32.mrb[144].mxu1 }
 0x3e7   : > { %v9551_v38 = vpop.eup %9550  ;;  %v8711_v22 = vrot.slane %v7821_v21, 4  ;;  %v3164_v24 = vadd.f32 %v16965_v47, %v13036_v29  ;;  %v5211_v32 = vmax.f32 %v4823_v62, -2.3819763e+38  ;;  %v3157_v7 = vadd.f32 %v16966_v54, %v16967_v61  ;;  %v13542_v21 = vpop.f32.mrb[145].mxu0 }
 0x3e8   : > { %v7833_v44 = vmul.f32 0.6931472, %v9551_v38  ;;  %v3163_v60 = vadd.f32 %v16965_v47, %v16968_v41  ;;  %v7880_v57 = vadd.f32 1.0, %v7879_v20  ;;  %9554 = vlog2.f32 %v7894_v45  ;;  %v13544_v20 = vpop.f32.mrb[145].mxu1  ;;  %v13548_v45 = vpop.f32.mrb[146].mxu0 }
 0x3e9   : > { %v13532_v19 = vsel %vm8358_vm7, %v8711_v22, %v13446_v33  ;;  %v4836_v8 = vrot.slane %v4835_v46, 1  ;;  %v7897_v11 = vmul.f32 -0.5, %v5766_v2  ;;  %v5509_v29 = vadd.f32 %v10547_v28, %v5211_v32  ;;  %16969 = vst [vmem:[#allocation94_spill] sm:$0xff] %v13544_v20  ;;  %16970 = vst [vmem:[#allocation41_spill] sm:$0xff] %v13548_v45 }
 0x3ea   : > { %v7839_v1 = vsel %vm13504_vm9, %v7836_v59, %v7833_v44  ;;  %v4867_v40 = vrot.slane %v4866_v49, 4  ;;  %v7882_v14 = vand.u32 2147483647, %v13501_v55  ;;  %v4880_v33 = vmax.f32 %v3156_v37, %v3164_v24 }
 0x3eb   : > { %v8739_v35 = vrot.slane %v7839_v1, 4  ;;  %v4837_v62 = vmax.f32 %v4835_v46, %v4836_v8  ;;  %v5765_v38 = vmax.f32 %v5509_v29, 0.0  ;;  %v4873_v59 = vmax.f32 %v3155_v30, %v3163_v60 }
 0x3ec   : > { %v4868_v3 = vmax.f32 %v4866_v49, %v4867_v40  ;;  %v3165_v22 = vadd.f32 %v16965_v47, %v13063_v56  ;;  %v7881_v32 = vmul.f32 %v7880_v57, %v13501_v55  ;;  %v4881_v37 = vrot.slane %v4880_v33, 4  ;;  %v13556_v56 = vpop.f32.mrb[146].mxu1  ;;  %v13558_v47 = vpop.permute.xlu0 %2666 }
 0x3ed   : > { %v13552_v44 = vsel %vm8358_vm7, %v8739_v35, %v13461_v25  ;;  %v5213_v46 = vmax.f32 %v4837_v62, -2.3819763e+38  ;;  %v7898_v24 = vadd.f32 1.0, %v7897_v11  ;;  %v7900_v61 = vand.u32 2147483647, %v5766_v2  ;;  %16971 = vst [vmem:[#allocation64_spill] sm:$0xff] %v13556_v56 }
 0x3ee   : > { %v7885_v41 = vadd.f32 1.0, %v5765_v38  ;;  %v4869_v8 = vrot.slane %v4868_v3, 2  ;;  %v4882_v30 = vmax.f32 %v4880_v33, %v4881_v37  ;;  %v4874_v60 = vrot.slane %v4873_v59, 4  ;;  %16972 = vst [vmem:[#allocation95_spill] sm:$0xff] %v13558_v47 }
 0x3ef   : > { %v5511_v49 = vadd.f32 %v10551_v34, %v5213_v46  ;;  %v4887_v1 = vmax.f32 %v3157_v7, %v3165_v22  ;;  %v9553_v29 = vpop.eup %9552  ;;  %v7888_v40 = vmul.f32 -0.5, %v5765_v38  ;;  %v7891_v25 = vand.u32 2147483647, %v5765_v38 }
 0x3f0   : > { %9556 = vlog2.f32 %v7885_v41  ;;  %v4870_v35 = vmax.f32 %v4868_v3, %v4869_v8  ;;  %v7878_v55 = vmul.f32 0.6931472, %v9553_v29  ;;  %v4883_v11 = vrot.slane %v4882_v30, 2 }
 0x3f1   : > { %v13560_v57 = vmax.f32 %v5511_v49, 0.0  ;;  %v4875_v62 = vmax.f32 %v4873_v59, %v4874_v60  ;;  %vm7883_vm12 = vcmp.lt.f32.partialorder %v7882_v14, 0.0004427343  ;;  %v7899_v54 = vmul.f32 %v7898_v24, %v5766_v2  ;;  %v13571_v14 = vpop.f32.mrb[147].mxu0  ;;  %v13573_v2 = vpop.f32.mrb[147].mxu1 }
 0x3f2   : > { %vm13562_vm14 = vcmp.lt.f32.partialorder %v7900_v61, 0.0004427343  ;;  %v4871_v7 = vrot.slane %v4870_v35, 1  ;;  %v9555_v22 = vpop.eup %9554  ;;  %v7884_v46 = vsel %vm7883_vm12, %v7881_v32, %v7878_v55  ;;  %v4888_v41 = vrot.slane %v4887_v1, 4  ;;  %16975 = vst [vmem:[#allocation42_spill] sm:$0xff] %v13571_v14  ;;  %16976 = vst [vmem:[#allocation63_spill] sm:$0xff] %v13573_v2  ;;  %v13579_v60 = vpop.permute.xlu1 %2671 }
 0x3f3   : > { %v7903_v37 = vadd.f32 1.0, %v13560_v57  ;;  %v13569_v3 = vadd.f32 %v13558_v47, %v13097_v12  ;;  %v8699_v8 = vrot.slane %v7884_v46, 3  ;;  %v7896_v49 = vmul.f32 0.6931472, %v9555_v22  ;;  %16979 = vst [vmem:[#allocation70_spill] sm:$0xff] %v13579_v60  ;;  %v16980_v2 = vld [vmem:[#allocation27_spill] sm:$0xff] }
 0x3f4   : > { %v4872_v29 = vmax.f32 %v4870_v35, %v4871_v7  ;;  %v4884_v59 = vmax.f32 %v4882_v30, %v4883_v11  ;;  %v7889_v24 = vadd.f32 1.0, %v7888_v40  ;;  %vm13575_vm1 = vcmp.lt.f32.partialorder %v7891_v25, 0.0004427343  ;;  %v16981_v14 = vld [vmem:[#allocation80_spill] sm:$0xff] }
 0x3f5   : > { %9558 = vlog2.f32 %v7903_v37  ;;  %v4876_v32 = vrot.slane %v4875_v62, 2  ;;  %v13583_v12 = vsel %vm8361_vm13, %v8699_v8, %v13490_v17  ;;  %v7902_v30 = vsel %vm13562_vm14, %v7899_v54, %v7896_v49 }
 0x3f6   : > { %v5218_v35 = vmax.f32 %v4872_v29, -2.3819763e+38  ;;  %v4885_v55 = vrot.slane %v4884_v59, 1  ;;  %v8727_v11 = vrot.slane %v7902_v30, 3  ;;  %v7906_v40 = vmul.f32 -0.5, %v13560_v57 }
 0x3f7   : > { %v4877_v25 = vmax.f32 %v4875_v62, %v4876_v32  ;;  %v4889_v7 = vmax.f32 %v4887_v1, %v4888_v41  ;;  %v3170_v37 = vadd.f32 %v13558_v47, %v13089_v53  ;;  %v3178_v17 = vadd.f32 %v13579_v60, %v16980_v2 }
 0x3f8   : > { %v5516_v22 = vadd.f32 %v10542_v23, %v5218_v35  ;;  %v4886_v46 = vmax.f32 %v4884_v59, %v4885_v55  ;;  %v13595_v33 = vsel %vm8361_vm13, %v8727_v11, %v13512_v58  ;;  %v7890_v54 = vmul.f32 %v7889_v24, %v5765_v38 }
 0x3f9   : > { %v4878_v8 = vrot.slane %v4877_v25, 1  ;;  %v4890_v49 = vrot.slane %v4889_v7, 2  ;;  %v7909_v62 = vand.u32 2147483647, %v13560_v57  ;;  %v4922_v32 = vmax.f32 %v3170_v37, %v3178_v17 }
 0x3fa   : > { %v9557_v29 = vpop.eup %9556  ;;  %v5772_v1 = vmax.f32 %v5516_v22, 0.0  ;;  %v5220_v41 = vmax.f32 %v4886_v46, -2.3819763e+38  ;;  %v7907_v30 = vadd.f32 1.0, %v7906_v40  ;;  %v3180_v58 = vadd.f32 %v13579_v60, %v16981_v14  ;;  %v16984_v40 = vld [vmem:[#allocation16_spill] sm:$0xff] }
 0x3fb   : > { %v7887_v59 = vmul.f32 0.6931472, %v9557_v29  ;;  %v4879_v35 = vmax.f32 %v4877_v25, %v4878_v8  ;;  %v4891_v53 = vmax.f32 %v4889_v7, %v4890_v49  ;;  %v4923_v56 = vrot.slane %v4922_v32, 4 }
 0x3fc   : > { %v7948_v55 = vadd.f32 1.0, %v5772_v1  ;;  %v7951_v20 = vmul.f32 -0.5, %v5772_v1  ;;  %v5518_v2 = vadd.f32 %v10545_v26, %v5220_v41  ;;  %vm13603_vm2 = vcmp.lt.f32.partialorder %v7909_v62, 0.0004427343 }
 0x3fd   : > { %v7893_v38 = vsel %vm13575_vm1, %v7890_v54, %v7887_v59  ;;  %v5219_v24 = vmax.f32 %v4879_v35, -2.3819763e+38  ;;  %v4892_v11 = vrot.slane %v4891_v53, 1  ;;  %v3172_v25 = vadd.f32 %v13558_v47, %v16984_v40 }
 0x3fe   : > { %v8713_v22 = vrot.slane %v7893_v38, 3  ;;  %9560 = vlog2.f32 %v7948_v55  ;;  %v13609_v37 = vmax.f32 %v5518_v2, 0.0  ;;  %v4924_v61 = vmax.f32 %v4922_v32, %v4923_v56  ;;  %v16985_v32 = vld [vmem:[#allocation20_spill] sm:$0xff] }
 0x3ff   : > { %v9559_v7 = vpop.eup %9558  ;;  %v5517_v14 = vadd.f32 %v10547_v28, %v5219_v24  ;;  %v4893_v17 = vmax.f32 %v4891_v53, %v4892_v11  ;;  %v7908_v49 = vmul.f32 %v7907_v30, %v13560_v57  ;;  %v4936_v29 = vmax.f32 %v3172_v25, %v3180_v58  ;;  %v16986_v24 = vld [vmem:[#allocation82_spill] sm:$0xff]  ;;  %v13624_v30 = vpop.f32.mrb[148].mxu0 }
 0x400   : > { %v13614_v54 = vsel %vm8361_vm13, %v8713_v22, %v13532_v19  ;;  %v7905_v8 = vmul.f32 0.6931472, %v9559_v7  ;;  %v7952_v62 = vadd.f32 1.0, %v7951_v20  ;;  %v7954_v41 = vand.u32 2147483647, %v5772_v1  ;;  %16987 = vst [vmem:[#allocation68_spill] sm:$0xff] %v13624_v30 }
 0x401   : > { %v7966_v59 = vadd.f32 1.0, %v13609_v37  ;;  %v5773_v35 = vmax.f32 %v5517_v14, 0.0  ;;  %v5221_v2 = vmax.f32 %v4893_v17, -2.3819763e+38  ;;  %v4925_v38 = vrot.slane %v4924_v61, 2  ;;  %v13626_v20 = vpop.f32.mrb[148].mxu1 }
 0x402   : > { %v7911_v55 = vsel %vm13603_vm2, %v7908_v49, %v7905_v8  ;;  %v4937_v53 = vrot.slane %v4936_v29, 4  ;;  %v3173_v19 = vadd.f32 %v13558_v47, %v16985_v32  ;;  %v3179_v57 = vadd.f32 %v13579_v60, %v16986_v24  ;;  %16988 = vst [vmem:[#allocation69_spill] sm:$0xff] %v13626_v20  ;;  %v13631_v40 = vpop.f32.mrb[149].mxu0  ;;  %v13633_v25 = vpop.f32.mrb[149].mxu1 }
 0x403   : > { %v8741_v56 = vrot.slane %v7911_v55, 3  ;;  %9562 = vlog2.f32 %v7966_v59  ;;  %v7969_v58 = vmul.f32 -0.5, %v13609_v37  ;;  %v7972_v11 = vand.u32 2147483647, %v13609_v37  ;;  %16989 = vst [vmem:[#allocation67_spill] sm:$0xff] %v13631_v40  ;;  %16990 = vst [vmem:[#allocation72_spill] sm:$0xff] %v13633_v25 }
 0x404   : > { %v7957_v22 = vadd.f32 1.0, %v5773_v35  ;;  %v5519_v46 = vadd.f32 %v10551_v34, %v5221_v2  ;;  %vm13639_vm0 = vcmp.lt.f32.partialorder %v7954_v41, 0.0004427343  ;;  %v4926_v17 = vmax.f32 %v4924_v61, %v4925_v38  ;;  %v13643_v49 = vpop.f32.mrb[150].mxu0  ;;  %v16994_v25 = vld [vmem:[#allocation78_spill] sm:$0xff] }
 0x405   : > { %v13637_v7 = vsel %vm8361_vm13, %v8741_v56, %v13552_v44  ;;  %v4938_v8 = vmax.f32 %v4936_v29, %v4937_v53  ;;  %16993 = vst [vmem:[#allocation75_spill] sm:$0xff] %v13643_v49  ;;  %v7953_v59 = vmul.f32 %v7952_v62, %v5772_v1  ;;  %v7960_v55 = vmul.f32 -0.5, %v5773_v35  ;;  %v17003_v40 = vld [vmem:[#allocation50_spill] sm:$0xff] }
 0x406   : > { %9564 = vlog2.f32 %v7957_v22  ;;  %v5775_v2 = vmax.f32 %v5519_v46, 0.0  ;;  %v4927_v32 = vrot.slane %v4926_v17, 1  ;;  %v4929_v47 = vmax.f32 %v13569_v3, %v3179_v57  ;;  %v13652_v22 = vpop.f32.mrb[150].mxu1 }
 0x407   : > { %v4939_v24 = vrot.slane %v4938_v8, 2  ;;  %v3181_v44 = vadd.f32 %v13579_v60, %v16994_v25  ;;  %v7970_v41 = vadd.f32 1.0, %v7969_v58  ;;  %vm13648_vm4 = vcmp.lt.f32.partialorder %v7972_v11, 0.0004427343 }
 0x408   : > { %v9561_v56 = vpop.eup %9560  ;;  %v7975_v61 = vadd.f32 1.0, %v5775_v2  ;;  %v7978_v29 = vmul.f32 -0.5, %v5775_v2  ;;  %v4928_v1 = vmax.f32 %v4926_v17, %v4927_v32  ;;  %v4930_v53 = vrot.slane %v4929_v47, 4 }
 0x409   : > { %v7950_v38 = vmul.f32 0.6931472, %v9561_v56  ;;  %v4940_v62 = vmax.f32 %v4938_v8, %v4939_v24  ;;  %v7961_v46 = vadd.f32 1.0, %v7960_v55  ;;  %v7963_v20 = vand.u32 2147483647, %v5773_v35 }
 0x40a   : > { %9566 = vlog2.f32 %v7975_v61  ;;  %v4943_v3 = vmax.f32 %v3173_v19, %v3181_v44  ;;  %v5226_v58 = vmax.f32 %v4928_v1, -2.3819763e+38  ;;  %v4931_v25 = vmax.f32 %v4929_v47, %v4930_v53 }
 0x40b   : > { %v7956_v57 = vsel %vm13639_vm0, %v7953_v59, %v7950_v38  ;;  %v4941_v11 = vrot.slane %v4940_v62, 1  ;;  %v7979_v49 = vadd.f32 1.0, %v7978_v29  ;;  %v7981_v30 = vand.u32 2147483647, %v5775_v2  ;;  %v13666_v38 = vpop.f32.mrb[151].mxu0 }
 0x40c   : > { %v8701_v60 = vrot.slane %v7956_v57, 2  ;;  %v4944_v45 = vrot.slane %v4943_v3, 4  ;;  %v7971_v17 = vmul.f32 %v7970_v41, %v13609_v37  ;;  %v5524_v8 = vadd.f32 %v10542_v23, %v5226_v58 }
 0x40d   : > { %v9563_v56 = vpop.eup %9562  ;;  %v4942_v32 = vmax.f32 %v4940_v62, %v4941_v11  ;;  %v4932_v55 = vrot.slane %v4931_v25, 2  ;;  %vm13662_vm5 = vcmp.lt.f32.partialorder %v7963_v20, 0.0004427343  ;;  %v7962_v24 = vmul.f32 %v7961_v46, %v5773_v35  ;;  %v17002_v35 = vld [vmem:[#allocation12_spill] sm:$0xff]  ;;  %v13676_v46 = vpop.f32.mrb[151].mxu1  ;;  %v17004_v11 = vld [vmem:[#allocation9_spill] sm:$0xff] }
 0x40e   : > { %v13660_v19 = vsel %vm8364_vm3, %v8701_v60, %v13583_v12  ;;  %v7968_v14 = vmul.f32 0.6931472, %v9563_v56  ;;  %v4945_v47 = vmax.f32 %v4943_v3, %v4944_v45  ;;  %v5780_v44 = vmax.f32 %v5524_v8, 0.0  ;;  %v17001_v45 = vld [vmem:[#allocation103_spill] sm:$0xff] }
 0x40f   : > { %v5228_v61 = vmax.f32 %v4942_v32, -2.3819763e+38  ;;  %v4933_v29 = vmax.f32 %v4931_v25, %v4932_v55  ;;  %v7980_v41 = vmul.f32 %v7979_v49, %v5775_v2  ;;  %vm13670_vm8 = vcmp.lt.f32.partialorder %v7981_v30, 0.0004427343  ;;  %v17005_v25 = vld [vmem:[#allocation100_spill] sm:$0xff] }
 0x410   : > { %v9565_v37 = vpop.eup %9564  ;;  %v7974_v23 = vsel %vm13648_vm4, %v7971_v17, %v7968_v14  ;;  %v4946_v12 = vrot.slane %v4945_v47, 2  ;;  %v8020_v62 = vadd.f32 1.0, %v5780_v44  ;;  %v2686_v53 = vadd.f32 %v17002_v35, %v17001_v45 }
 0x411   : > { %v8729_v20 = vrot.slane %v7974_v23, 2  ;;  %v7959_v1 = vmul.f32 0.6931472, %v9565_v37  ;;  %v5526_v3 = vadd.f32 %v10545_v26, %v5228_v61  ;;  %v4934_v57 = vrot.slane %v4933_v29, 1  ;;  %v17006_v61 = vld [vmem:[#allocation101_spill] sm:$0xff] }
 0x412   : > { %v4947_v58 = vmax.f32 %v4945_v47, %v4946_v12  ;;  %v2678_v49 = vadd.f32 %v17004_v11, %v17003_v40  ;;  %9568 = vlog2.f32 %v8020_v62  ;;  %v2680_v56 = vadd.f32 %v17004_v11, %v17005_v25  ;;  %v17007_v12 = vld [vmem:[#allocation102_spill] sm:$0xff] }
 0x413   : > { %v13683_v30 = vsel %vm8364_vm3, %v8729_v20, %v13595_v33  ;;  %v7965_v2 = vsel %vm13662_vm5, %v7962_v24, %v7959_v1  ;;  %v8023_v32 = vmul.f32 -0.5, %v5780_v44  ;;  %v5782_v26 = vmax.f32 %v5526_v3, 0.0 }
 0x414   : > { %v9567_v17 = vpop.eup %9566  ;;  %v8715_v8 = vrot.slane %v7965_v2, 2  ;;  %v4935_v55 = vmax.f32 %v4933_v29, %v4934_v57  ;;  %v4948_v47 = vrot.slane %v4947_v58, 1  ;;  %v2679_v37 = vadd.f32 %v17004_v11, %v17006_v61 }
 0x415   : > { %v7977_v14 = vmul.f32 0.6931472, %v9567_v17  ;;  %v3214_v23 = vmax.f32 %v2678_v49, %v2686_v53  ;;  %v8038_v59 = vadd.f32 1.0, %v5782_v26  ;;  %v8041_v24 = vmul.f32 -0.5, %v5782_v26  ;;  %v17008_v17 = vld [vmem:[#allocation10_spill] sm:$0xff] }
 0x416   : > { %v13693_v33 = vsel %vm8364_vm3, %v8715_v8, %v13614_v54  ;;  %v13697_v20 = vadd.f32 %v17004_v11, %v17007_v12  ;;  %v5227_v29 = vmax.f32 %v4935_v55, -2.3819763e+38  ;;  %v4949_v62 = vmax.f32 %v4947_v58, %v4948_v47  ;;  %v13709_v8 = vpop.f32.mrb[152].mxu0  ;;  %v17010_v47 = vld [vmem:[#allocation38_spill] sm:$0xff] }
 0x417   : > { %v7983_v1 = vsel %vm13670_vm8, %v7980_v41, %v7977_v14  ;;  %v3215_v45 = vrot.slane %v3214_v23, 4  ;;  %v8024_v57 = vadd.f32 1.0, %v8023_v32  ;;  %v8026_v40 = vand.u32 2147483647, %v5780_v44  ;;  %v17009_v41 = vld [vmem:[#allocation53_spill] sm:$0xff]  ;;  %v13711_v32 = vpop.f32.mrb[152].mxu1 }
 0x418   : > { %v8743_v3 = vrot.slane %v7983_v1, 2  ;;  %9570 = vlog2.f32 %v8038_v59  ;;  %v8044_v53 = vand.u32 2147483647, %v5782_v26  ;;  %v5525_v54 = vadd.f32 %v10547_v28, %v5227_v29 }
 0x419   : > { %v5229_v49 = vmax.f32 %v4949_v62, -2.3819763e+38  ;;  %v3216_v2 = vmax.f32 %v3214_v23, %v3215_v45  ;;  %v8042_v11 = vadd.f32 1.0, %v8041_v24  ;;  %v5254_v60 = vsub.s32 4, %v17008_v17  ;;  %v13716_v23 = vpop.f32.mrb[153].mxu0 }
 0x41a   : > { %v13704_v25 = vsel %vm8364_vm3, %v8743_v3, %v13637_v7  ;;  %v2688_v58 = vadd.f32 %v17002_v35, %v17009_v41  ;;  %v5781_v55 = vmax.f32 %v5525_v54, 0.0  ;;  %v2687_v61 = vadd.f32 %v17002_v35, %v17010_v47  ;;  %17011 = vst [vmem:[#allocation77_spill] sm:$0xff] %v13716_v23  ;;  %v13718_v7 = vpop.f32.mrb[153].mxu1  ;;  %v13725_v29 = vpop.f32.mrb[154].mxu0 }
 0x41b   : > { %v5527_v14 = vadd.f32 %v10551_v34, %v5229_v49  ;;  %v3217_v28 = vrot.slane %v3216_v2, 2  ;;  %17012 = vst [vmem:[#allocation27_spill] sm:$0xff] %v13718_v7  ;;  %v8025_v59 = vmul.f32 %v8024_v57, %v5780_v44  ;;  %vm13720_vm9 = vcmp.lt.f32.partialorder %v8026_v40, 0.0004427343  ;;  %17015 = vst [vmem:[#allocation80_spill] sm:$0xff] %v13725_v29  ;;  %v13727_v34 = vpop.f32.mrb[154].mxu1 }
 0x41c   : > { %v3228_v12 = vmax.f32 %v2680_v56, %v2688_v58  ;;  %v5262_v1 = vsub.s32 6, %v17008_v17  ;;  %17016 = vst [vmem:[#allocation16_spill] sm:$0xff] %v13727_v34  ;;  %v9569_v62 = vpop.eup %9568  ;;  %vm13729_vm12 = vcmp.lt.f32.partialorder %v8044_v53, 0.0004427343  ;;  %v8029_v3 = vadd.f32 1.0, %v5781_v55  ;;  %v13733_v57 = vpop.f32.mrb[155].mxu0 }
 0x41d   : > { %v8032_v54 = vmul.f32 -0.5, %v5781_v55  ;;  %v5783_v44 = vmax.f32 %v5527_v14, 0.0  ;;  %17019 = vst [vmem:[#allocation20_spill] sm:$0xff] %v13733_v57  ;;  %v8022_v40 = vmul.f32 0.6931472, %v9569_v62  ;;  %v3218_v49 = vmax.f32 %v3216_v2, %v3217_v28  ;;  %v9864_v7 = vld [vmem:[%s10521_s12] sm:$0xff] }
 0x41e   : > { %v3229_v56 = vrot.slane %v3228_v12, 4  ;;  %v3221_v41 = vmax.f32 %v2679_v37, %v2687_v61  ;;  %v8043_v58 = vmul.f32 %v8042_v11, %v5782_v26  ;;  %9572 = vlog2.f32 %v8029_v3  ;;  %s9213_s12 = sshll.u32 %s9967_s18, 10  ;;  %s16225_s18 = scalar_lea.sflag [#allocation4], %s313_s7 }
 0x41f   : > { %v8047_v47 = vadd.f32 1.0, %v5783_v44  ;;  %v13736_v23 = vrot.slane %v9864_v7, %v5254_v60  ;;  %v8028_v53 = vsel %vm13720_vm9, %v8025_v59, %v8022_v40  ;;  %v3219_v34 = vrot.slane %v3218_v49, 1  ;;  %s16217_s5 = scalar_lea.hbm %s16276_s4, %s9213_s12 }
 0x420   : > { %v13740_v29 = vrot.slane %v9864_v7, %v5262_v1  ;;  %v2689_v14 = vadd.f32 %v17002_v35, %v13270_v27  ;;  %v8703_v62 = vrot.slane %v8028_v53, 1  ;;  %v8050_v2 = vmul.f32 -0.5, %v5783_v44 }
 0x421   : > { %9574 = vlog2.f32 %v8047_v47  ;;  %v3230_v37 = vmax.f32 %v3228_v12, %v3229_v56  ;;  %v8033_v11 = vadd.f32 1.0, %v8032_v54  ;;  %v8035_v28 = vand.u32 2147483647, %v5781_v55 }
 0x422   : > { %v9571_v26 = vpop.eup %9570  ;;  %v3220_v61 = vmax.f32 %v3218_v49, %v3219_v34  ;;  %v3222_v60 = vrot.slane %v3221_v41, 4  ;;  %v8704_v24 = vsel %vm8367_vm11, %v8703_v62, %v13660_v19  ;;  %v8053_v3 = vand.u32 2147483647, %v5783_v44 }
 0x423   : > { %v8040_v59 = vmul.f32 0.6931472, %v9571_v26  ;;  %v3231_v40 = vrot.slane %v3230_v37, 2  ;;  %8859 = vst [vmem:[%s11470_s10 + $0xc0] sm:$0xff] %v8704_v24  ;;  %v5258_v27 = vsub.s32 5, %v17008_v17  ;;  %v3235_v35 = vmax.f32 %v13697_v20, %v2689_v14 }
 0x424   : > { %v4982_v1 = vmax.f32 %v3220_v61, -2.3819763e+38  ;;  %v3223_v57 = vmax.f32 %v3221_v41, %v3222_v60  ;;  %v8051_v54 = vadd.f32 1.0, %v8050_v2  ;;  %v5266_v34 = vsub.s32 7, %v17008_v17  ;;  %v17026_v60 = vld [vmem:[#allocation13_spill] sm:$0xff] }
 0x425   : > { %v8046_v12 = vsel %vm13729_vm12, %v8043_v58, %v8040_v59  ;;  %v3232_v56 = vmax.f32 %v3230_v37, %v3231_v40  ;;  %v3236_v53 = vrot.slane %v3235_v35, 4  ;;  %v8034_v62 = vmul.f32 %v8033_v11, %v5781_v55  ;;  %v13761_v58 = vpop.f32.mrb[155].mxu1 }
 0x426   : > { %v8731_v49 = vrot.slane %v8046_v12, 1  ;;  %v5280_v19 = vadd.f32 %v13736_v23, %v4982_v1  ;;  %v3224_v47 = vrot.slane %v3223_v57, 2  ;;  %vm13753_vm14 = vcmp.lt.f32.partialorder %v8035_v28, 0.0004427343  ;;  %17024 = vst [vmem:[#allocation82_spill] sm:$0xff] %v13761_v58  ;;  %v17025_v28 = vld [vmem:[#allocation11_spill] sm:$0xff] }
 0x427   : > { %vm13757_vm1 = vcmp.lt.f32.partialorder %v8053_v3, 0.0004427343  ;;  %v3233_v45 = vrot.slane %v3232_v56, 1  ;;  %v3237_v37 = vmax.f32 %v3235_v35, %v3236_v53  ;;  %v13768_v11 = vrot.slane %v9864_v7, %v5258_v27 }
 0x428   : > { %v8732_v17 = vsel %vm8367_vm11, %v8731_v49, %v13683_v30  ;;  %v13765_v14 = vmax.f32 %v5280_v19, 0.0  ;;  %v3225_v2 = vmax.f32 %v3223_v57, %v3224_v47  ;;  %v9573_v26 = vpop.eup %9572  ;;  %v2694_v61 = vadd.f32 %v17025_v28, %v13307_v63 }
 0x429   : > { %8861 = vst [vmem:[%s11470_s10 + $0xd0] sm:$0xff] %v8732_v17  ;;  %v3234_v55 = vmax.f32 %v3232_v56, %v3233_v45  ;;  %v2702_v24 = vadd.f32 %v17026_v60, %v13316_v39  ;;  %v8031_v59 = vmul.f32 0.6931472, %v9573_v26  ;;  %v8052_v3 = vmul.f32 %v8051_v54, %v5783_v44 }
 0x42a   : > { %v5824_v40 = vadd.f32 1.0, %v13765_v14  ;;  %v13775_v30 = vrot.slane %v9864_v7, %v5266_v34  ;;  %v3226_v35 = vrot.slane %v3225_v2, 1  ;;  %v3238_v12 = vrot.slane %v3237_v37, 2 }
 0x42b   : > { %v9575_v1 = vpop.eup %9574  ;;  %v4984_v57 = vmax.f32 %v3234_v55, -2.3819763e+38  ;;  %v3270_v49 = vmax.f32 %v2694_v61, %v2702_v24  ;;  %v8037_v27 = vsel %vm13753_vm14, %v8034_v62, %v8031_v59  ;;  %v2696_v63 = vadd.f32 %v17025_v28, %v13309_v5 }
 0x42c   : > { %v8049_v56 = vmul.f32 0.6931472, %v9575_v1  ;;  %v2704_v39 = vadd.f32 %v17026_v60, %v13318_v31  ;;  %v8717_v44 = vrot.slane %v8037_v27, 1  ;;  %9576 = vlog2.f32 %v5824_v40  ;;  %v13799_v40 = vpop.f32.mrb[156].mxu0 }
 0x42d   : > { %v5282_v7 = vadd.f32 %v13740_v29, %v4984_v57  ;;  %v3227_v54 = vmax.f32 %v3225_v2, %v3226_v35  ;;  %v5827_v19 = vmul.f32 -0.5, %v13765_v14  ;;  %v3239_v47 = vmax.f32 %v3237_v37, %v3238_v12  ;;  %17027 = vst [vmem:[#allocation78_spill] sm:$0xff] %v13799_v40  ;;  %v13801_v35 = vpop.f32.mrb[156].mxu1 }
 0x42e   : > { %v8055_v34 = vsel %vm13757_vm1, %v8052_v3, %v8049_v56  ;;  %v3271_v53 = vrot.slane %v3270_v49, 4  ;;  %v8718_v62 = vsel %vm8367_vm11, %v8717_v44, %v13693_v33  ;;  %v3284_v26 = vmax.f32 %v2696_v63, %v2704_v39  ;;  %17028 = vst [vmem:[#allocation103_spill] sm:$0xff] %v13801_v35  ;;  %v13803_v56 = vpop.f32.mrb[157].mxu0  ;;  %v13807_v39 = vpop.f32.mrb[157].mxu1 }
 0x42f   : > { %v8745_v5 = vrot.slane %v8055_v34, 1  ;;  %v5538_v41 = vmax.f32 %v5282_v7, 0.0  ;;  %v4983_v45 = vmax.f32 %v3227_v54, -2.3819763e+38  ;;  %8860 = vst [vmem:[%s11470_s10 + $0xc8] sm:$0xff] %v8718_v62  ;;  %v3240_v31 = vrot.slane %v3239_v47, 1 }
 0x430   : > { %v3272_v17 = vmax.f32 %v3270_v49, %v3271_v53  ;;  %v2703_v2 = vadd.f32 %v17026_v60, %v13337_v50  ;;  %v5830_v55 = vand.u32 2147483647, %v13765_v14  ;;  %v2695_v61 = vadd.f32 %v17025_v28, %v13311_v4  ;;  %17029 = vst [vmem:[#allocation12_spill] sm:$0xff] %v13803_v56  ;;  %17030 = vst [vmem:[#allocation50_spill] sm:$0xff] %v13807_v39 }
 0x431   : > { %v8746_v20 = vsel %vm8367_vm11, %v8745_v5, %v13704_v25  ;;  %v5842_v37 = vadd.f32 1.0, %v5538_v41  ;;  %v5281_v33 = vadd.f32 %v13768_v11, %v4983_v45  ;;  %v3241_v24 = vmax.f32 %v3239_v47, %v3240_v31  ;;  %v13816_v47 = vpop.f32.mrb[158].mxu1 }
 0x432   : > { %8862 = vst [vmem:[%s11470_s10 + $0xd8] sm:$0xff] %v8746_v20  ;;  %v3273_v59 = vrot.slane %v3272_v17, 2  ;;  %v3285_v3 = vrot.slane %v3284_v26, 4  ;;  %v5828_v1 = vadd.f32 1.0, %v5827_v19  ;;  %v5845_v50 = vmul.f32 -0.5, %v5538_v41  ;;  %v13814_v19 = vpop.f32.mrb[158].mxu0 }
 0x433   : > { %9578 = vlog2.f32 %v5842_v37  ;;  %v3277_v57 = vmax.f32 %v2695_v61, %v2703_v2  ;;  %v5537_v25 = vmax.f32 %v5281_v33, 0.0  ;;  %v4985_v12 = vmax.f32 %v3241_v24, -2.3819763e+38  ;;  %17033 = vst [vmem:[#allocation9_spill] sm:$0xff] %v13814_v19  ;;  %17034 = vst [vmem:[#allocation100_spill] sm:$0xff] %v13816_v47  ;;  %v13823_v37 = vpop.f32.mrb[159].mxu0 }
 0x434   : > { %v3274_v49 = vmax.f32 %v3272_v17, %v3273_v59  ;;  %v3286_v27 = vmax.f32 %v3284_v26, %v3285_v3  ;;  %v2697_v4 = vadd.f32 %v17025_v28, %v13313_v0  ;;  %vm13809_vm2 = vcmp.lt.f32.partialorder %v5830_v55, 0.0004427343  ;;  %17035 = vst [vmem:[#allocation101_spill] sm:$0xff] %v13823_v37 }
 0x435   : > { %v3278_v63 = vrot.slane %v3277_v57, 4  ;;  %v5833_v7 = vadd.f32 1.0, %v5537_v25  ;;  %v5836_v54 = vmul.f32 -0.5, %v5537_v25  ;;  %v5283_v34 = vadd.f32 %v13775_v30, %v4985_v12 }
 0x436   : > { %v9577_v53 = vpop.eup %9576  ;;  %v3275_v62 = vrot.slane %v3274_v49, 1  ;;  %v3287_v5 = vrot.slane %v3286_v27, 2  ;;  %v2705_v0 = vadd.f32 %v17026_v60, %v13341_v52  ;;  %v13821_v28 = vmul.f32 %v5828_v1, %v13765_v14 }
 0x437   : > { %v3279_v45 = vmax.f32 %v3277_v57, %v3278_v63  ;;  %v5846_v31 = vadd.f32 1.0, %v5845_v50  ;;  %v5848_v17 = vand.u32 2147483647, %v5538_v41  ;;  %v5539_v26 = vmax.f32 %v5283_v34, 0.0  ;;  %v13834_v34 = vpop.f32.mrb[159].mxu1 }
 0x438   : > { %9580 = vlog2.f32 %v5833_v7  ;;  %v3276_v2 = vmax.f32 %v3274_v49, %v3275_v62  ;;  %v3288_v20 = vmax.f32 %v3286_v27, %v3287_v5  ;;  %v13825_v61 = vmul.f32 0.6931472, %v9577_v53  ;;  %17038 = vst [vmem:[#allocation102_spill] sm:$0xff] %v13834_v34  ;;  %v17039_v62 = vld [vmem:[#allocation14_spill] sm:$0xff] }
 0x439   : > { %v3280_v55 = vrot.slane %v3279_v45, 2  ;;  %v5837_v33 = vadd.f32 1.0, %v5836_v54  ;;  %v5851_v24 = vadd.f32 1.0, %v5539_v26  ;;  %v5854_v59 = vmul.f32 -0.5, %v5539_v26 }
 0x43a   : > { %v4990_v3 = vmax.f32 %v3276_v2, -2.3819763e+38  ;;  %v3289_v57 = vrot.slane %v3288_v20, 1  ;;  %v3291_v60 = vmax.f32 %v2697_v4, %v2705_v0  ;;  %v13827_v14 = vmul.f32 %v5846_v31, %v5538_v41 }
 0x43b   : > { %v3281_v52 = vmax.f32 %v3279_v45, %v3280_v55  ;;  %vm13829_vm0 = vcmp.lt.f32.partialorder %v5848_v17, 0.0004427343  ;;  %v5839_v50 = vand.u32 2147483647, %v5537_v25  ;;  %9582 = vlog2.f32 %v5851_v24  ;;  %v17041_v24 = vld [vmem:[#allocation57_spill] sm:$0xff] }
 0x43c   : > { %v5855_v12 = vadd.f32 1.0, %v5854_v59  ;;  %v5288_v27 = vadd.f32 %v13736_v23, %v4990_v3  ;;  %v3290_v63 = vmax.f32 %v3288_v20, %v3289_v57  ;;  %v3292_v54 = vrot.slane %v3291_v60, 4  ;;  %v17040_v20 = vld [vmem:[#allocation39_spill] sm:$0xff] }
 0x43d   : > { %v9579_v49 = vpop.eup %9578  ;;  %v3282_v7 = vrot.slane %v3281_v52, 1  ;;  %v13840_v4 = vmul.f32 %v5837_v33, %v5537_v25  ;;  %v5857_v53 = vand.u32 2147483647, %v5539_v26  ;;  %v2710_v5 = vadd.f32 %v17039_v62, %v13379_v9  ;;  %v17042_v59 = vld [vmem:[#allocation15_spill] sm:$0xff] }
 0x43e   : > { %v5544_v45 = vmax.f32 %v5288_v27, 0.0  ;;  %v4992_v0 = vmax.f32 %v3290_v63, -2.3819763e+38  ;;  %v3293_v17 = vmax.f32 %v3291_v60, %v3292_v54  ;;  %v13844_v2 = vmul.f32 0.6931472, %v9579_v49  ;;  %v17043_v57 = vld [vmem:[#allocation43_spill] sm:$0xff] }
 0x43f   : > { %v3283_v31 = vmax.f32 %v3281_v52, %v3282_v7  ;;  %v2712_v55 = vadd.f32 %v17039_v62, %v17040_v20  ;;  %v2718_v3 = vadd.f32 %v17042_v59, %v17041_v24  ;;  %v2720_v25 = vadd.f32 %v17042_v59, %v17043_v57  ;;  %v17046_v60 = vld [vmem:[#allocation92_spill] sm:$0xff]  ;;  %v17049_v57 = vld [vmem:[#allocation37_spill] sm:$0xff] }
 0x440   : > { %vm13852_vm4 = vcmp.lt.f32.partialorder %v5839_v50, 0.0004427343  ;;  %v13856_v9 = vmul.f32 %v5855_v12, %v5539_v26  ;;  %v5896_v27 = vadd.f32 1.0, %v5544_v45  ;;  %v5290_v52 = vadd.f32 %v13740_v29, %v4992_v0  ;;  %v17050_v12 = vld [vmem:[#allocation58_spill] sm:$0xff] }
 0x441   : > { %v2719_v49 = vadd.f32 %v17042_v59, %v17046_v60  ;;  %v4991_v63 = vmax.f32 %v3283_v31, -2.3819763e+38  ;;  %v3294_v7 = vrot.slane %v3293_v17, 2  ;;  %v3326_v54 = vmax.f32 %v2710_v5, %v2718_v3 }
 0x442   : > { %v3340_v20 = vmax.f32 %v2712_v55, %v2720_v25  ;;  %v9581_v24 = vpop.eup %9580  ;;  %vm13861_vm5 = vcmp.lt.f32.partialorder %v5857_v53, 0.0004427343  ;;  %9584 = vlog2.f32 %v5896_v27  ;;  %v5899_v50 = vmul.f32 -0.5, %v5544_v45  ;;  %v13874_v25 = vpop.f32.mrb[160].mxu0 }
 0x443   : > { %v2711_v26 = vadd.f32 %v17039_v62, %v17049_v57  ;;  %v2713_v0 = vadd.f32 %v17039_v62, %v17050_v12  ;;  %v5546_v34 = vmax.f32 %v5290_v52, 0.0  ;;  %v5289_v60 = vadd.f32 %v13768_v11, %v4991_v63  ;;  %17051 = vst [vmem:[#allocation10_spill] sm:$0xff] %v13874_v25  ;;  %v13876_v27 = vpop.f32.mrb[160].mxu1 }
 0x444   : > { %v3295_v31 = vmax.f32 %v3293_v17, %v3294_v7  ;;  %v3327_v37 = vrot.slane %v3326_v54, 4  ;;  %v5902_v5 = vand.u32 2147483647, %v5544_v45  ;;  %v3341_v55 = vrot.slane %v3340_v20, 4  ;;  %17052 = vst [vmem:[#allocation53_spill] sm:$0xff] %v13876_v27  ;;  %v13880_v17 = vpop.f32.mrb[161].mxu0 }
 0x445   : > { %v3333_v3 = vmax.f32 %v2711_v26, %v2719_v49  ;;  %v9583_v57 = vpop.eup %9582  ;;  %v13878_v47 = vmul.f32 0.6931472, %v9581_v24  ;;  %v5914_v62 = vadd.f32 1.0, %v5546_v34  ;;  %v5917_v52 = vmul.f32 -0.5, %v5546_v34  ;;  %17053 = vst [vmem:[#allocation38_spill] sm:$0xff] %v13880_v17  ;;  %v13882_v53 = vpop.f32.mrb[161].mxu1 }
 0x446   : > { %v5545_v63 = vmax.f32 %v5289_v60, 0.0  ;;  %v5900_v7 = vadd.f32 1.0, %v5899_v50  ;;  %v3296_v12 = vrot.slane %v3295_v31, 1  ;;  %v3328_v19 = vmax.f32 %v3326_v54, %v3327_v37  ;;  %17054 = vst [vmem:[#allocation11_spill] sm:$0xff] %v13882_v53  ;;  %v13884_v56 = vpop.f32.mrb[162].mxu0  ;;  %v13906_v37 = vpop.f32.mrb[162].mxu1 }
 0x447   : > { %v3342_v39 = vmax.f32 %v3340_v20, %v3341_v55  ;;  %17055 = vst [vmem:[#allocation13_spill] sm:$0xff] %v13884_v56  ;;  %v13886_v49 = vmul.f32 0.6931472, %v9583_v57  ;;  %9586 = vlog2.f32 %v5914_v62  ;;  %v5920_v26 = vand.u32 2147483647, %v5546_v34  ;;  %17060 = vst [vmem:[#allocation14_spill] sm:$0xff] %v13906_v37 }
 0x448   : > { %v5905_v27 = vadd.f32 1.0, %v5545_v63  ;;  %vm13888_vm8 = vcmp.lt.f32.partialorder %v5902_v5, 0.0004427343  ;;  %v5918_v60 = vadd.f32 1.0, %v5917_v52  ;;  %v5908_v25 = vmul.f32 -0.5, %v5545_v63 }
 0x449   : > { %v3297_v17 = vmax.f32 %v3295_v31, %v3296_v12  ;;  %v3329_v54 = vrot.slane %v3328_v19, 2  ;;  %v3343_v20 = vrot.slane %v3342_v39, 2  ;;  %v5901_v50 = vmul.f32 %v5900_v7, %v5544_v45 }
 0x44a   : > { %9588 = vlog2.f32 %v5905_v27  ;;  %v5911_v55 = vand.u32 2147483647, %v5545_v63  ;;  %v3334_v62 = vrot.slane %v3333_v3, 4  ;;  %vm13900_vm9 = vcmp.lt.f32.partialorder %v5920_v26, 0.0004427343 }
 0x44b   : > { %v4993_v57 = vmax.f32 %v3297_v17, -2.3819763e+38  ;;  %v3330_v31 = vmax.f32 %v3328_v19, %v3329_v54  ;;  %v3344_v12 = vmax.f32 %v3342_v39, %v3343_v20  ;;  %v2721_v27 = vadd.f32 %v17042_v59, %v13425_v36  ;;  %v17063_v36 = vld [vmem:[#allocation23_spill] sm:$0xff] }
 0x44c   : > { %v9585_v45 = vpop.eup %9584  ;;  %v5919_v7 = vmul.f32 %v5918_v60, %v5546_v34  ;;  %v5909_v17 = vadd.f32 1.0, %v5908_v25  ;;  %v3335_v56 = vmax.f32 %v3333_v3, %v3334_v62  ;;  %vm13909_vm12 = vcmp.lt.f32.partialorder %v5911_v55, 0.0004427343  ;;  %v13919_v55 = vpop.f32.mrb[163].mxu0 }
 0x44d   : > { %v5291_v53 = vadd.f32 %v13775_v30, %v4993_v57  ;;  %v5898_v35 = vmul.f32 0.6931472, %v9585_v45  ;;  %v3331_v40 = vrot.slane %v3330_v31, 1  ;;  %v3345_v5 = vrot.slane %v3344_v12, 1 }
 0x44e   : > { %v3347_v26 = vmax.f32 %v2713_v0, %v2721_v27  ;;  %v3336_v19 = vrot.slane %v3335_v56, 2  ;;  %v2726_v59 = vadd.f32 %v17063_v36, %v13455_v16  ;;  %v5910_v20 = vmul.f32 %v5909_v17, %v5545_v63  ;;  %v13921_v16 = vpop.f32.mrb[163].mxu1 }
 0x44f   : > { %v5547_v39 = vmax.f32 %v5291_v53, 0.0  ;;  %v5904_v34 = vsel %vm13888_vm8, %v5901_v50, %v5898_v35  ;;  %v3332_v25 = vmax.f32 %v3330_v31, %v3331_v40  ;;  %v3346_v60 = vmax.f32 %v3344_v12, %v3345_v5 }
 0x450   : > { %v3348_v54 = vrot.slane %v3347_v26, 4  ;;  %v8411_v3 = vrot.slane %v5904_v34, 7  ;;  %v2728_v0 = vadd.f32 %v17063_v36, %v13457_v10  ;;  %v3337_v45 = vmax.f32 %v3335_v56, %v3336_v19 }
 0x451   : > { %v5923_v57 = vadd.f32 1.0, %v5547_v39  ;;  %v9587_v62 = vpop.eup %9586  ;;  %v4998_v53 = vmax.f32 %v3332_v25, -2.3819763e+38  ;;  %v5000_v27 = vmax.f32 %v3346_v60, -2.3819763e+38  ;;  %v17064_v40 = vsel %vm13809_vm2, %v13821_v28, %v13825_v61 }
 0x452   : > { %v3349_v37 = vmax.f32 %v3347_v26, %v3348_v54  ;;  %v13929_v35 = vsel %vm8349_vm6, %v8411_v3, %v17064_v40  ;;  %v5916_v63 = vmul.f32 0.6931472, %v9587_v62  ;;  %v5926_v10 = vmul.f32 -0.5, %v5547_v39  ;;  %v17065_v3 = vld [vmem:[#allocation24_spill] sm:$0xff] }
 0x453   : > { %9590 = vlog2.f32 %v5923_v57  ;;  %v5296_v50 = vadd.f32 %v13736_v23, %v4998_v53  ;;  %v5298_v5 = vadd.f32 %v13740_v29, %v5000_v27  ;;  %v3338_v56 = vrot.slane %v3337_v45, 1 }
 0x454   : > { %v9589_v24 = vpop.eup %9588  ;;  %v2727_v31 = vadd.f32 %v17063_v36, %v13471_v51  ;;  %v5922_v44 = vsel %vm13900_vm9, %v5919_v7, %v5916_v63  ;;  %v5929_v28 = vand.u32 2147483647, %v5547_v39  ;;  %v3350_v61 = vrot.slane %v3349_v37, 2 }
 0x455   : > { %v5907_v12 = vmul.f32 0.6931472, %v9589_v24  ;;  %v8439_v17 = vrot.slane %v5922_v44, 7  ;;  %v5552_v26 = vmax.f32 %v5296_v50, 0.0  ;;  %v5554_v19 = vmax.f32 %v5298_v5, 0.0 }
 0x456   : > { %v3339_v34 = vmax.f32 %v3337_v45, %v3338_v56  ;;  %v5927_v60 = vadd.f32 1.0, %v5926_v10  ;;  %v3351_v54 = vmax.f32 %v3349_v37, %v3350_v61  ;;  %v2734_v57 = vadd.f32 %v17065_v3, %v13476_v6  ;;  %v13966_v10 = vpop.f32.mrb[164].mxu0 }
 0x457   : > { %v5913_v25 = vsel %vm13909_vm12, %v5910_v20, %v5907_v12  ;;  %v17066_v51 = vsel %vm13829_vm0, %v13827_v14, %v13844_v2  ;;  %v5968_v62 = vadd.f32 1.0, %v5552_v26  ;;  %v5971_v53 = vmul.f32 -0.5, %v5552_v26  ;;  %v13974_v56 = vpop.f32.mrb[165].mxu0 }
 0x458   : > { %v13947_v52 = vsel %vm8349_vm6, %v8439_v17, %v17066_v51  ;;  %v8425_v7 = vrot.slane %v5913_v25, 7  ;;  %v5986_v27 = vadd.f32 1.0, %v5554_v19  ;;  %v5989_v45 = vmul.f32 -0.5, %v5554_v19 }
 0x459   : > { %v2729_v58 = vadd.f32 %v17063_v36, %v13473_v13  ;;  %v2736_v37 = vadd.f32 %v17065_v3, %v13482_v18  ;;  %v17067_v6 = vsel %vm13852_vm4, %v13840_v4, %v13878_v47  ;;  %9592 = vlog2.f32 %v5968_v62  ;;  %v13968_v47 = vpop.f32.mrb[164].mxu1 }
 0x45a   : > { %v13959_v14 = vsel %vm8349_vm6, %v8425_v7, %v17067_v6  ;;  %v5974_v1 = vand.u32 2147483647, %v5552_v26  ;;  %v4999_v2 = vmax.f32 %v3339_v34, -2.3819763e+38  ;;  %v5928_v20 = vmul.f32 %v5927_v60, %v5547_v39  ;;  %v13976_v44 = vpop.f32.mrb[165].mxu1  ;;  %v13982_v34 = vpop.f32.mrb[166].mxu0 }
 0x45b   : > { %vm13961_vm14 = vcmp.lt.f32.partialorder %v5929_v28, 0.0004427343  ;;  %9594 = vlog2.f32 %v5986_v27  ;;  %v5992_v13 = vand.u32 2147483647, %v5554_v19  ;;  %v5972_v36 = vadd.f32 1.0, %v5971_v53 }
 0x45c   : > { %v5297_v18 = vadd.f32 %v13768_v11, %v4999_v2  ;;  %v3352_v33 = vrot.slane %v3351_v54, 1  ;;  %v3382_v63 = vmax.f32 %v2726_v59, %v2734_v57  ;;  %v5990_v24 = vadd.f32 1.0, %v5989_v45 }
 0x45d   : > { %v9591_v4 = vpop.eup %9590  ;;  %v3396_v50 = vmax.f32 %v2728_v0, %v2736_v37  ;;  %v2735_v39 = vadd.f32 %v17065_v3, %v13486_v48  ;;  %v2737_v5 = vadd.f32 %v17065_v3, %v13499_v15  ;;  %vm13978_vm1 = vcmp.lt.f32.partialorder %v5974_v1, 0.0004427343 }
 0x45e   : > { %v5925_v12 = vmul.f32 0.6931472, %v9591_v4  ;;  %v5553_v28 = vmax.f32 %v5297_v18, 0.0  ;;  %v3353_v61 = vmax.f32 %v3351_v54, %v3352_v33  ;;  %v3383_v17 = vrot.slane %v3382_v63, 4  ;;  %v14001_v33 = vpop.f32.mrb[166].mxu1 }
 0x45f   : > { %vm13984_vm2 = vcmp.lt.f32.partialorder %v5992_v13, 0.0004427343  ;;  %v3397_v48 = vrot.slane %v3396_v50, 4  ;;  %v3389_v15 = vmax.f32 %v2727_v31, %v2735_v39  ;;  %v3403_v25 = vmax.f32 %v2729_v58, %v2737_v5  ;;  %v14021_v0 = vpop.f32.mrb[167].mxu1 }
 0x460   : > { %v5931_v60 = vsel %vm13961_vm14, %v5928_v20, %v5925_v12  ;;  %v5973_v3 = vmul.f32 %v5972_v36, %v5552_v26  ;;  %v5977_v57 = vadd.f32 1.0, %v5553_v28  ;;  %v5980_v51 = vmul.f32 -0.5, %v5553_v28  ;;  %v17075_v36 = vld [vmem:[#allocation35_spill] sm:$0xff] }
 0x461   : > { %v8453_v7 = vrot.slane %v5931_v60, 7  ;;  %v5001_v62 = vmax.f32 %v3353_v61, -2.3819763e+38  ;;  %v3384_v53 = vmax.f32 %v3382_v63, %v3383_v17  ;;  %v3398_v54 = vmax.f32 %v3396_v50, %v3397_v48 }
 0x462   : > { %9596 = vlog2.f32 %v5977_v57  ;;  %v5981_v27 = vadd.f32 1.0, %v5980_v51  ;;  %v5983_v45 = vand.u32 2147483647, %v5553_v28  ;;  %v3390_v37 = vrot.slane %v3389_v15, 4 }
 0x463   : > { %v17074_v31 = vsel %vm13861_vm5, %v13856_v9, %v13886_v49  ;;  %v5299_v26 = vadd.f32 %v13775_v30, %v5001_v62  ;;  %v3385_v6 = vrot.slane %v3384_v53, 2  ;;  %v3399_v1 = vrot.slane %v3398_v54, 2  ;;  %v9593_v2 = vpop.eup %9592  ;;  %v14019_v62 = vpop.f32.mrb[167].mxu0 }
 0x464   : > { %v13996_v58 = vsel %vm8349_vm6, %v8453_v7, %v17074_v31  ;;  %v5991_v20 = vmul.f32 %v5990_v24, %v5554_v19  ;;  %v3391_v40 = vmax.f32 %v3389_v15, %v3390_v37  ;;  %v3404_v13 = vrot.slane %v3403_v25, 4 }
 0x465   : > { %v2742_v18 = vadd.f32 %v17075_v36, %v13537_v42  ;;  %v9595_v41 = vpop.eup %9594  ;;  %v5970_v63 = vmul.f32 0.6931472, %v9593_v2  ;;  %v5555_v4 = vmax.f32 %v5299_v26, 0.0  ;;  %v3386_v9 = vmax.f32 %v3384_v53, %v3385_v6  ;;  %v17079_v26 = vld [vmem:[#allocation36_spill] sm:$0xff] }
 0x466   : > { %v3400_v49 = vmax.f32 %v3398_v54, %v3399_v1  ;;  %v5988_v50 = vmul.f32 0.6931472, %v9595_v41  ;;  %v5982_v39 = vmul.f32 %v5981_v27, %v5553_v28  ;;  %vm14003_vm0 = vcmp.lt.f32.partialorder %v5983_v45, 0.0004427343 }
 0x467   : > { %v3392_v12 = vrot.slane %v3391_v40, 2  ;;  %v5976_v19 = vsel %vm13978_vm1, %v5973_v3, %v5970_v63  ;;  %v5995_v24 = vadd.f32 1.0, %v5555_v4  ;;  %v5998_v61 = vmul.f32 -0.5, %v5555_v4 }
 0x468   : > { %v3405_v42 = vmax.f32 %v3403_v25, %v3404_v13  ;;  %v8413_v17 = vrot.slane %v5976_v19, 6  ;;  %v5994_v48 = vsel %vm13984_vm2, %v5991_v20, %v5988_v50  ;;  %v3387_v15 = vrot.slane %v3386_v9, 1  ;;  %v17080_v20 = vld [vmem:[#allocation64_spill] sm:$0xff]  ;;  %v17081_v13 = vld [vmem:[#allocation42_spill] sm:$0xff] }
 0x469   : > { %v3401_v60 = vrot.slane %v3400_v49, 1  ;;  %v8441_v57 = vrot.slane %v5994_v48, 6  ;;  %9598 = vlog2.f32 %v5995_v24  ;;  %v2744_v28 = vadd.f32 %v17075_v36, %v13539_v43 }
 0x46a   : > { %v2743_v51 = vadd.f32 %v17075_v36, %v13542_v21  ;;  %v14017_v59 = vsel %vm8352_vm10, %v8413_v17, %v13929_v35  ;;  %v3388_v3 = vmax.f32 %v3386_v9, %v3387_v15  ;;  %v3393_v7 = vmax.f32 %v3391_v40, %v3392_v12  ;;  %v17078_v35 = vld [vmem:[#allocation41_spill] sm:$0xff] }
 0x46b   : > { %v3402_v25 = vmax.f32 %v3400_v49, %v3401_v60  ;;  %v14025_v53 = vsel %vm8352_vm10, %v8441_v57, %v13947_v52  ;;  %v5999_v54 = vadd.f32 1.0, %v5998_v61  ;;  %v6001_v43 = vand.u32 2147483647, %v5555_v4 }
 0x46c   : > { %v3406_v27 = vrot.slane %v3405_v42, 2  ;;  %v9597_v45 = vpop.eup %9596  ;;  %v5006_v21 = vmax.f32 %v3388_v3, -2.3819763e+38  ;;  %v3394_v31 = vrot.slane %v3393_v7, 1  ;;  %v2750_v6 = vadd.f32 %v17079_v26, %v17078_v35 }
 0x46d   : > { %v5008_v37 = vmax.f32 %v3402_v25, -2.3819763e+38  ;;  %v5979_v1 = vmul.f32 0.6931472, %v9597_v45  ;;  %v2752_v40 = vadd.f32 %v17079_v26, %v17080_v20  ;;  %v2751_v41 = vadd.f32 %v17079_v26, %v17081_v13 }
 0x46e   : > { %v3407_v2 = vmax.f32 %v3405_v42, %v3406_v27  ;;  %v5304_v52 = vadd.f32 %v13736_v23, %v5006_v21  ;;  %v3395_v9 = vmax.f32 %v3393_v7, %v3394_v31  ;;  %v3438_v49 = vmax.f32 %v2742_v18, %v2750_v6 }
 0x46f   : > { %v5306_v63 = vadd.f32 %v13740_v29, %v5008_v37  ;;  %v5985_v50 = vsel %vm14003_vm0, %v5982_v39, %v5979_v1  ;;  %v3452_v19 = vmax.f32 %v2744_v28, %v2752_v40  ;;  %v3445_v24 = vmax.f32 %v2743_v51, %v2751_v41  ;;  %v14045_v39 = vpop.f32.mrb[168].mxu0  ;;  %v14047_v28 = vpop.f32.mrb[168].mxu1 }
 0x470   : > { %v3408_v12 = vrot.slane %v3407_v2, 1  ;;  %v8427_v61 = vrot.slane %v5985_v50, 6  ;;  %v5560_v42 = vmax.f32 %v5304_v52, 0.0  ;;  %v5007_v48 = vmax.f32 %v3395_v9, -2.3819763e+38  ;;  %v14052_v27 = vpop.f32.mrb[169].mxu0 }
 0x471   : > { %v5562_v17 = vmax.f32 %v5306_v63, 0.0  ;;  %v6000_v15 = vmul.f32 %v5999_v54, %v5555_v4  ;;  %vm14037_vm4 = vcmp.lt.f32.partialorder %v6001_v43, 0.0004427343  ;;  %v3439_v5 = vrot.slane %v3438_v49, 4  ;;  %v17084_v54 = vld [vmem:[#allocation94_spill] sm:$0xff]  ;;  %v14054_v45 = vpop.f32.mrb[169].mxu1 }
 0x472   : > { %v14043_v57 = vsel %vm8352_vm10, %v8427_v61, %v13959_v14  ;;  %v6040_v18 = vadd.f32 1.0, %v5560_v42  ;;  %v3409_v3 = vmax.f32 %v3407_v2, %v3408_v12  ;;  %v6043_v25 = vmul.f32 -0.5, %v5560_v42  ;;  %v14056_v31 = vpop.f32.mrb[170].mxu0  ;;  %v14058_v2 = vpop.f32.mrb[170].mxu1 }
 0x473   : > { %v9599_v51 = vpop.eup %9598  ;;  %v6058_v7 = vadd.f32 1.0, %v5562_v17  ;;  %v5305_v4 = vadd.f32 %v13768_v11, %v5007_v48  ;;  %v2745_v43 = vadd.f32 %v17075_v36, %v17084_v54  ;;  %v6061_v21 = vmul.f32 -0.5, %v5562_v17 }
 0x474   : > { %v5997_v14 = vmul.f32 0.6931472, %v9599_v51  ;;  %9600 = vlog2.f32 %v6040_v18  ;;  %v3453_v37 = vrot.slane %v3452_v19, 4  ;;  %v6046_v35 = vand.u32 2147483647, %v5560_v42 }
 0x475   : > { %9602 = vlog2.f32 %v6058_v7  ;;  %v5561_v6 = vmax.f32 %v5305_v4, 0.0  ;;  %v3446_v1 = vrot.slane %v3445_v24, 4  ;;  %v6064_v36 = vand.u32 2147483647, %v5562_v17  ;;  %v17089_v4 = vld [vmem:[#allocation63_spill] sm:$0xff] }
 0x476   : > { %v6003_v20 = vsel %vm14037_vm4, %v6000_v15, %v5997_v14  ;;  %v5009_v40 = vmax.f32 %v3409_v3, -2.3819763e+38  ;;  %v3440_v13 = vmax.f32 %v3438_v49, %v3439_v5  ;;  %v6044_v52 = vadd.f32 1.0, %v6043_v25  ;;  %v14067_v15 = vpop.f32.mrb[171].mxu0 }
 0x477   : > { %v8455_v41 = vrot.slane %v6003_v20, 6  ;;  %v6049_v63 = vadd.f32 1.0, %v5561_v6  ;;  %v6052_v9 = vmul.f32 -0.5, %v5561_v6  ;;  %v6062_v50 = vadd.f32 1.0, %v6061_v21 }
 0x478   : > { %v5307_v12 = vadd.f32 %v13775_v30, %v5009_v40  ;;  %v3441_v61 = vrot.slane %v3440_v13, 2  ;;  %v3454_v48 = vmax.f32 %v3452_v19, %v3453_v37  ;;  %v6055_v51 = vand.u32 2147483647, %v5561_v6 }
 0x479   : > { %v14065_v18 = vsel %vm8352_vm10, %v8455_v41, %v13996_v58  ;;  %9604 = vlog2.f32 %v6049_v63  ;;  %v3447_v60 = vmax.f32 %v3445_v24, %v3446_v1  ;;  %v6053_v3 = vadd.f32 1.0, %v6052_v9 }
 0x47a   : > { %v14069_v49 = vmax.f32 %v5307_v12, 0.0  ;;  %v3442_v5 = vmax.f32 %v3440_v13, %v3441_v61  ;;  %v3455_v25 = vrot.slane %v3454_v48, 2  ;;  %vm14071_vm5 = vcmp.lt.f32.partialorder %v6046_v35, 0.0004427343 }
 0x47b   : > { %vm14075_vm8 = vcmp.lt.f32.partialorder %v6064_v36, 0.0004427343  ;;  %v3448_v58 = vrot.slane %v3447_v60, 2  ;;  %v2753_v54 = vadd.f32 %v17079_v26, %v17089_v4  ;;  %v6045_v24 = vmul.f32 %v6044_v52, %v5560_v42 }
 0x47c   : > { %v6063_v14 = vmul.f32 %v6062_v50, %v5562_v17  ;;  %v6067_v21 = vadd.f32 1.0, %v14069_v49  ;;  %v3443_v37 = vrot.slane %v3442_v5, 1  ;;  %vm14082_vm9 = vcmp.lt.f32.partialorder %v6055_v51, 0.0004427343  ;;  %v14087_v50 = vpop.f32.mrb[171].mxu1 }
 0x47d   : > { %v3456_v35 = vmax.f32 %v3454_v48, %v3455_v25  ;;  %v3449_v20 = vmax.f32 %v3447_v60, %v3448_v58  ;;  %v3459_v40 = vmax.f32 %v2745_v43, %v2753_v54  ;;  %v6054_v13 = vmul.f32 %v6053_v3, %v5561_v6  ;;  %17092 = vst [vmem:[#allocation39_spill] sm:$0xff] %v14087_v50  ;;  %v17093_v48 = vld [vmem:[#allocation68_spill] sm:$0xff] }
 0x47e   : > { %v9601_v36 = vpop.eup %9600  ;;  %9606 = vlog2.f32 %v6067_v21  ;;  %v6070_v41 = vmul.f32 -0.5, %v14069_v49  ;;  %v3444_v63 = vmax.f32 %v3442_v5, %v3443_v37  ;;  %v6073_v61 = vand.u32 2147483647, %v14069_v49  ;;  %v17094_v60 = vld [vmem:[#allocation44_spill] sm:$0xff] }
 0x47f   : > { %v9603_v9 = vpop.eup %9602  ;;  %v6042_v26 = vmul.f32 0.6931472, %v9601_v36  ;;  %v3457_v42 = vrot.slane %v3456_v35, 1  ;;  %v3450_v17 = vrot.slane %v3449_v20, 1  ;;  %v3460_v52 = vrot.slane %v3459_v40, 4 }
 0x480   : > { %v6060_v12 = vmul.f32 0.6931472, %v9603_v9  ;;  %v5014_v51 = vmax.f32 %v3444_v63, -2.3819763e+38  ;;  %v2758_v43 = vadd.f32 %v17094_v60, %v17093_v48  ;;  %v6071_v54 = vadd.f32 1.0, %v6070_v41 }
 0x481   : > { %v6048_v6 = vsel %vm14071_vm5, %v6045_v24, %v6042_v26  ;;  %v3458_v3 = vmax.f32 %v3456_v35, %v3457_v42  ;;  %v3451_v25 = vmax.f32 %v3449_v20, %v3450_v17  ;;  %v3461_v5 = vmax.f32 %v3459_v40, %v3460_v52  ;;  %v17095_v35 = vld [vmem:[#allocation75_spill] sm:$0xff]  ;;  %v17096_v20 = vld [vmem:[#allocation46_spill] sm:$0xff] }
 0x482   : > { %v8415_v58 = vrot.slane %v6048_v6, 5  ;;  %v6066_v4 = vsel %vm14075_vm8, %v6063_v14, %v6060_v12  ;;  %v5312_v21 = vadd.f32 %v13736_v23, %v5014_v51  ;;  %v2766_v40 = vadd.f32 %v17096_v20, %v17095_v35  ;;  %v14122_v35 = vpop.f32.mrb[172].mxu1 }
 0x483   : > { %v9605_v37 = vpop.eup %9604  ;;  %v8443_v36 = vrot.slane %v6066_v4, 5  ;;  %v5016_v9 = vmax.f32 %v3458_v3, -2.3819763e+38  ;;  %v5015_v63 = vmax.f32 %v3451_v25, -2.3819763e+38  ;;  %v3462_v50 = vrot.slane %v3461_v5, 2 }
 0x484   : > { %v14099_v48 = vsel %vm8355_vm15, %v8415_v58, %v14017_v59  ;;  %v6051_v7 = vmul.f32 0.6931472, %v9605_v37  ;;  %v5568_v24 = vmax.f32 %v5312_v21, 0.0  ;;  %v6072_v59 = vmul.f32 %v6071_v54, %v14069_v49  ;;  %v17098_v37 = vld [vmem:[#allocation67_spill] sm:$0xff]  ;;  %17099 = vst [vmem:[#allocation57_spill] sm:$0xff] %v14122_v35 }
 0x485   : > { %v14105_v19 = vsel %vm8355_vm15, %v8443_v36, %v14025_v53  ;;  %v5314_v14 = vadd.f32 %v13740_v29, %v5016_v9  ;;  %v5313_v41 = vadd.f32 %v13768_v11, %v5015_v63  ;;  %v3463_v26 = vmax.f32 %v3461_v5, %v3462_v50  ;;  %v17097_v5 = vld [vmem:[#allocation69_spill] sm:$0xff] }
 0x486   : > { %v6057_v42 = vsel %vm14082_vm9, %v6054_v13, %v6051_v7  ;;  %v6112_v17 = vadd.f32 1.0, %v5568_v24  ;;  %v6115_v52 = vmul.f32 -0.5, %v5568_v24  ;;  %v6118_v51 = vand.u32 2147483647, %v5568_v24 }
 0x487   : > { %v8429_v12 = vrot.slane %v6057_v42, 5  ;;  %v5570_v6 = vmax.f32 %v5314_v14, 0.0  ;;  %v5569_v3 = vmax.f32 %v5313_v41, 0.0  ;;  %v3464_v58 = vrot.slane %v3463_v26, 1  ;;  %v17100_v14 = vld [vmem:[#allocation72_spill] sm:$0xff]  ;;  %v14128_v42 = vpop.f32.mrb[173].mxu1 }
 0x488   : > { %v9607_v25 = vpop.eup %9606  ;;  %9608 = vlog2.f32 %v6112_v17  ;;  %v6116_v53 = vadd.f32 1.0, %v6115_v52  ;;  %v3494_v4 = vmax.f32 %v2758_v43, %v2766_v40  ;;  %vm6074_vm12 = vcmp.lt.f32.partialorder %v6073_v61, 0.0004427343  ;;  %v14120_v43 = vpop.f32.mrb[172].mxu0  ;;  %17102 = vst [vmem:[#allocation43_spill] sm:$0xff] %v14128_v42 }
 0x489   : > { %v14114_v21 = vsel %vm8355_vm15, %v8429_v12, %v14043_v57  ;;  %v6069_v50 = vmul.f32 0.6931472, %v9607_v25  ;;  %v6130_v1 = vadd.f32 1.0, %v5570_v6  ;;  %v6133_v13 = vmul.f32 -0.5, %v5570_v6  ;;  %v14126_v41 = vpop.f32.mrb[173].mxu0 }
 0x48a   : > { %v6121_v49 = vadd.f32 1.0, %v5569_v3  ;;  %v2760_v54 = vadd.f32 %v17094_v60, %v17097_v5  ;;  %v2759_v36 = vadd.f32 %v17094_v60, %v17098_v37  ;;  %v6136_v63 = vand.u32 2147483647, %v5570_v6  ;;  %17101 = vst [vmem:[#allocation15_spill] sm:$0xff] %v14126_v41  ;;  %v14134_v25 = vpop.f32.mrb[174].mxu0  ;;  %v17108_v37 = vld [vmem:[#allocation21_spill] sm:$0xff] }
 0x48b   : > { %v6075_v9 = vsel %vm6074_vm12, %v6072_v59, %v6069_v50  ;;  %9610 = vlog2.f32 %v6130_v1  ;;  %v6124_v7 = vmul.f32 -0.5, %v5569_v3  ;;  %v6134_v40 = vadd.f32 1.0, %v6133_v13  ;;  %17105 = vst [vmem:[#allocation92_spill] sm:$0xff] %v14134_v25 }
 0x48c   : > { %v8457_v57 = vrot.slane %v6075_v9, 5  ;;  %9612 = vlog2.f32 %v6121_v49  ;;  %v2761_v61 = vadd.f32 %v17094_v60, %v17100_v14  ;;  %v6117_v17 = vmul.f32 %v6116_v53, %v5568_v24 }
 0x48d   : > { %vm14130_vm14 = vcmp.lt.f32.partialorder %v6118_v51, 0.0004427343  ;;  %v3465_v52 = vmax.f32 %v3463_v26, %v3464_v58  ;;  %v3495_v12 = vrot.slane %v3494_v4, 4  ;;  %v6127_v1 = vand.u32 2147483647, %v5569_v3 }
 0x48e   : > { %v14138_v50 = vsel %vm8355_vm15, %v8457_v57, %v14065_v18  ;;  %v2768_v60 = vadd.f32 %v17096_v20, %v13652_v22  ;;  %v2767_v13 = vadd.f32 %v17096_v20, %v13666_v38  ;;  %vm14144_vm1 = vcmp.lt.f32.partialorder %v6136_v63, 0.0004427343  ;;  %v14152_v22 = vpop.f32.mrb[174].mxu1 }
 0x48f   : > { %v6125_v51 = vadd.f32 1.0, %v6124_v7  ;;  %v5017_v26 = vmax.f32 %v3465_v52, -2.3819763e+38  ;;  %v3496_v53 = vmax.f32 %v3494_v4, %v3495_v12  ;;  %v2769_v58 = vadd.f32 %v17096_v20, %v13676_v46  ;;  %17109 = vst [vmem:[#allocation37_spill] sm:$0xff] %v14152_v22  ;;  %v17110_v12 = vld [vmem:[#allocation80_spill] sm:$0xff]  ;;  %v17111_v46 = vld [vmem:[#allocation22_spill] sm:$0xff] }
 0x490   : > { %v6135_v49 = vmul.f32 %v6134_v40, %v5570_v6  ;;  %v3508_v18 = vmax.f32 %v2760_v54, %v2768_v60  ;;  %v3501_v5 = vmax.f32 %v2759_v36, %v2767_v13  ;;  %v2774_v9 = vadd.f32 %v17108_v37, %v13709_v8  ;;  %v17112_v6 = vld [vmem:[#allocation16_spill] sm:$0xff] }
 0x491   : > { %v5315_v38 = vadd.f32 %v13775_v30, %v5017_v26  ;;  %v3497_v63 = vrot.slane %v3496_v53, 2  ;;  %v3515_v57 = vmax.f32 %v2761_v61, %v2769_v58  ;;  %v2776_v7 = vadd.f32 %v17108_v37, %v13711_v32  ;;  %v14167_v58 = vpop.f32.mrb[175].mxu0 }
 0x492   : > { %v9609_v14 = vpop.eup %9608  ;;  %v3509_v4 = vrot.slane %v3508_v18, 4  ;;  %v3502_v52 = vrot.slane %v3501_v5, 4  ;;  %v2782_v20 = vadd.f32 %v17111_v46, %v17110_v12  ;;  %v2784_v54 = vadd.f32 %v17111_v46, %v17112_v6 }
 0x493   : > { %v6114_v36 = vmul.f32 0.6931472, %v9609_v14  ;;  %vm14161_vm2 = vcmp.lt.f32.partialorder %v6127_v1, 0.0004427343  ;;  %v14165_v40 = vmax.f32 %v5315_v38, 0.0  ;;  %v3498_v61 = vmax.f32 %v3496_v53, %v3497_v63  ;;  %v14172_v53 = vpop.f32.mrb[175].mxu1 }
 0x494   : > { %v6126_v60 = vmul.f32 %v6125_v51, %v5569_v3  ;;  %v3510_v13 = vmax.f32 %v3508_v18, %v3509_v4  ;;  %v3550_v32 = vmax.f32 %v2774_v9, %v2782_v20  ;;  %v3564_v26 = vmax.f32 %v2776_v7, %v2784_v54  ;;  %v17115_v18 = vld [vmem:[#allocation77_spill] sm:$0xff] }
 0x495   : > { %v9611_v22 = vpop.eup %9610  ;;  %v6120_v12 = vsel %vm14130_vm14, %v6117_v17, %v6114_v36  ;;  %v6139_v6 = vadd.f32 1.0, %v14165_v40  ;;  %v3503_v14 = vmax.f32 %v3501_v5, %v3502_v52  ;;  %v3516_v1 = vrot.slane %v3515_v57, 4 }
 0x496   : > { %v9613_v25 = vpop.eup %9612  ;;  %v8417_v42 = vrot.slane %v6120_v12, 4  ;;  %v6132_v41 = vmul.f32 0.6931472, %v9611_v22  ;;  %v3499_v38 = vrot.slane %v3498_v61, 1  ;;  %v3511_v35 = vrot.slane %v3510_v13, 2 }
 0x497   : > { %v6123_v3 = vmul.f32 0.6931472, %v9613_v25  ;;  %9614 = vlog2.f32 %v6139_v6  ;;  %v6142_v51 = vmul.f32 -0.5, %v14165_v40  ;;  %v2775_v9 = vadd.f32 %v17108_v37, %v17115_v18  ;;  %v17116_v6 = vld [vmem:[#allocation20_spill] sm:$0xff] }
 0x498   : > { %v14179_v17 = vsel %vm8358_vm7, %v8417_v42, %v14099_v48  ;;  %v6138_v59 = vsel %vm14144_vm1, %v6135_v49, %v6132_v41  ;;  %v3500_v5 = vmax.f32 %v3498_v61, %v3499_v38  ;;  %v3512_v22 = vmax.f32 %v3510_v13, %v3511_v35 }
 0x499   : > { %v8445_v63 = vrot.slane %v6138_v59, 4  ;;  %v6129_v7 = vsel %vm14161_vm2, %v6126_v60, %v6123_v3  ;;  %v6145_v25 = vand.u32 2147483647, %v14165_v40  ;;  %v3504_v4 = vrot.slane %v3503_v14, 2 }
 0x49a   : > { %v8431_v52 = vrot.slane %v6129_v7, 4  ;;  %v5022_v20 = vmax.f32 %v3500_v5, -2.3819763e+38  ;;  %v3513_v54 = vrot.slane %v3512_v22, 1  ;;  %v3517_v36 = vmax.f32 %v3515_v57, %v3516_v1 }
 0x49b   : > { %v14188_v48 = vsel %vm8358_vm7, %v8445_v63, %v14105_v19  ;;  %v3505_v42 = vmax.f32 %v3503_v14, %v3504_v4  ;;  %v3551_v24 = vrot.slane %v3550_v32, 4  ;;  %v3565_v41 = vrot.slane %v3564_v26, 4  ;;  %v14199_v63 = vpop.f32.mrb[176].mxu1 }
 0x49c   : > { %v14192_v35 = vsel %vm8358_vm7, %v8431_v52, %v14114_v21  ;;  %v5320_v49 = vadd.f32 %v13736_v23, %v5022_v20  ;;  %v3514_v8 = vmax.f32 %v3512_v22, %v3513_v54  ;;  %v3518_v61 = vrot.slane %v3517_v36, 2  ;;  %v14197_v21 = vpop.f32.mrb[176].mxu0  ;;  %17117 = vst [vmem:[#allocation58_spill] sm:$0xff] %v14199_v63  ;;  %v14204_v4 = vpop.f32.mrb[177].mxu1 }
 0x49d   : > { %v3506_v60 = vrot.slane %v3505_v42, 1  ;;  %v3552_v13 = vmax.f32 %v3550_v32, %v3551_v24  ;;  %v3566_v12 = vmax.f32 %v3564_v26, %v3565_v41  ;;  %v2783_v57 = vadd.f32 %v17111_v46, %v17116_v6  ;;  %v14202_v26 = vpop.f32.mrb[177].mxu0  ;;  %17119 = vst [vmem:[#allocation24_spill] sm:$0xff] %v14204_v4 }
 0x49e   : > { %v6143_v1 = vadd.f32 1.0, %v6142_v51  ;;  %v5576_v19 = vmax.f32 %v5320_v49, 0.0  ;;  %v5024_v38 = vmax.f32 %v3514_v8, -2.3819763e+38  ;;  %v3519_v14 = vmax.f32 %v3517_v36, %v3518_v61  ;;  %17118 = vst [vmem:[#allocation23_spill] sm:$0xff] %v14202_v26  ;;  %v17150_v26 = vld [vmem:[#allocation101_spill] sm:$0xff] }
 0x49f   : > { %v3507_v3 = vmax.f32 %v3505_v42, %v3506_v60  ;;  %v3553_v18 = vrot.slane %v3552_v13, 2  ;;  %v3567_v59 = vrot.slane %v3566_v12, 2  ;;  %v3557_v5 = vmax.f32 %v2775_v9, %v2783_v57  ;;  %v14206_v42 = vpop.f32.mrb[178].mxu0 }
 0x4a0   : > { %v6184_v22 = vadd.f32 1.0, %v5576_v19  ;;  %v6187_v7 = vmul.f32 -0.5, %v5576_v19  ;;  %v5322_v32 = vadd.f32 %v13740_v29, %v5024_v38  ;;  %v3520_v20 = vrot.slane %v3519_v14, 1  ;;  %17120 = vst [vmem:[#allocation35_spill] sm:$0xff] %v14206_v42 }
 0x4a1   : > { %v9615_v51 = vpop.eup %9614  ;;  %v5023_v52 = vmax.f32 %v3507_v3, -2.3819763e+38  ;;  %v3554_v54 = vmax.f32 %v3552_v13, %v3553_v18  ;;  %v3568_v36 = vmax.f32 %v3566_v12, %v3567_v59  ;;  %v6144_v24 = vmul.f32 %v6143_v1, %v14165_v40  ;;  %v14210_v3 = vpop.f32.mrb[178].mxu1 }
 0x4a2   : > { %v6141_v9 = vmul.f32 0.6931472, %v9615_v51  ;;  %vm6146_vm0 = vcmp.lt.f32.partialorder %v6145_v25, 0.0004427343  ;;  %9616 = vlog2.f32 %v6184_v22  ;;  %v5578_v41 = vmax.f32 %v5322_v32, 0.0  ;;  %17121 = vst [vmem:[#allocation41_spill] sm:$0xff] %v14210_v3 }
 0x4a3   : > { %v5321_v49 = vadd.f32 %v13768_v11, %v5023_v52  ;;  %v3521_v8 = vmax.f32 %v3519_v14, %v3520_v20  ;;  %v3555_v61 = vrot.slane %v3554_v54, 1  ;;  %v6188_v6 = vadd.f32 1.0, %v6187_v7  ;;  %v17122_v22 = vld [vmem:[#allocation82_spill] sm:$0xff] }
 0x4a4   : > { %v6147_v60 = vsel %vm6146_vm0, %v6144_v24, %v6141_v9  ;;  %v6190_v57 = vand.u32 2147483647, %v5576_v19  ;;  %v3569_v38 = vrot.slane %v3568_v36, 1  ;;  %v6202_v12 = vadd.f32 1.0, %v5578_v41  ;;  %v17123_v9 = vld [vmem:[#allocation27_spill] sm:$0xff] }
 0x4a5   : > { %v8459_v13 = vrot.slane %v6147_v60, 4  ;;  %v6205_v18 = vmul.f32 -0.5, %v5578_v41  ;;  %v3558_v59 = vrot.slane %v3557_v5, 4  ;;  %v5577_v51 = vmax.f32 %v5321_v49, 0.0 }
 0x4a6   : > { %v5025_v4 = vmax.f32 %v3521_v8, -2.3819763e+38  ;;  %v3556_v40 = vmax.f32 %v3554_v54, %v3555_v61  ;;  %v3570_v25 = vmax.f32 %v3568_v36, %v3569_v38  ;;  %9618 = vlog2.f32 %v6202_v12  ;;  %v14231_v12 = vpop.f32.mrb[179].mxu0 }
 0x4a7   : > { %v14214_v1 = vsel %vm8358_vm7, %v8459_v13, %v14138_v50  ;;  %v6208_v14 = vand.u32 2147483647, %v5578_v41  ;;  %v2785_v7 = vadd.f32 %v17111_v46, %v17122_v22  ;;  %v6206_v32 = vadd.f32 1.0, %v6205_v18  ;;  %17128 = vst [vmem:[#allocation36_spill] sm:$0xff] %v14231_v12  ;;  %v14235_v22 = vpop.f32.mrb[179].mxu1  ;;  %v17141_v46 = vld [vmem:[#allocation12_spill] sm:$0xff] }
 0x4a8   : > { %v6193_v52 = vadd.f32 1.0, %v5577_v51  ;;  %v5323_v20 = vadd.f32 %v13775_v30, %v5025_v4  ;;  %v2777_v24 = vadd.f32 %v17108_v37, %v17123_v9  ;;  %v6196_v49 = vmul.f32 -0.5, %v5577_v51  ;;  %17129 = vst [vmem:[#allocation64_spill] sm:$0xff] %v14235_v22 }
 0x4a9   : > { %v5030_v8 = vmax.f32 %v3556_v40, -2.3819763e+38  ;;  %v5032_v54 = vmax.f32 %v3570_v25, -2.3819763e+38  ;;  %v3559_v36 = vmax.f32 %v3557_v5, %v3558_v59  ;;  %v6189_v61 = vmul.f32 %v6188_v6, %v5576_v19 }
 0x4aa   : > { %vm14221_vm4 = vcmp.lt.f32.partialorder %v6190_v57, 0.0004427343  ;;  %9620 = vlog2.f32 %v6193_v52  ;;  %v5579_v60 = vmax.f32 %v5323_v20, 0.0  ;;  %vm14225_vm5 = vcmp.lt.f32.partialorder %v6208_v14, 0.0004427343 }
 0x4ab   : > { %v5328_v4 = vadd.f32 %v13736_v23, %v5030_v8  ;;  %v5330_v38 = vadd.f32 %v13740_v29, %v5032_v54  ;;  %v3560_v37 = vrot.slane %v3559_v36, 2  ;;  %v3571_v13 = vmax.f32 %v2777_v24, %v2785_v7 }
 0x4ac   : > { %v9617_v5 = vpop.eup %9616  ;;  %v6207_v19 = vmul.f32 %v6206_v32, %v5578_v41  ;;  %v6199_v6 = vand.u32 2147483647, %v5577_v51  ;;  %v6211_v57 = vadd.f32 1.0, %v5579_v60  ;;  %v6214_v18 = vmul.f32 -0.5, %v5579_v60 }
 0x4ad   : > { %v6186_v59 = vmul.f32 0.6931472, %v9617_v5  ;;  %v6197_v40 = vadd.f32 1.0, %v6196_v49  ;;  %v5584_v25 = vmax.f32 %v5328_v4, 0.0  ;;  %v14233_v14 = vmax.f32 %v5330_v38, 0.0 }
 0x4ae   : > { %9622 = vlog2.f32 %v6211_v57  ;;  %v6215_v52 = vadd.f32 1.0, %v6214_v18  ;;  %v6217_v20 = vand.u32 2147483647, %v5579_v60  ;;  %v3561_v9 = vmax.f32 %v3559_v36, %v3560_v37 }
 0x4af   : > { %v6192_v7 = vsel %vm14221_vm4, %v6189_v61, %v6186_v59  ;;  %v6256_v24 = vadd.f32 1.0, %v5584_v25  ;;  %v6259_v8 = vmul.f32 -0.5, %v5584_v25  ;;  %v3572_v41 = vrot.slane %v3571_v13, 4 }
 0x4b0   : > { %v8419_v32 = vrot.slane %v6192_v7, 3  ;;  %vm14239_vm8 = vcmp.lt.f32.partialorder %v6199_v6, 0.0004427343  ;;  %v6274_v49 = vadd.f32 1.0, %v14233_v14  ;;  %v6277_v4 = vmul.f32 -0.5, %v14233_v14  ;;  %v9619_v38 = vpop.eup %9618 }
 0x4b1   : > { %v6198_v5 = vmul.f32 %v6197_v40, %v5577_v51  ;;  %9624 = vlog2.f32 %v6256_v24  ;;  %v6260_v57 = vadd.f32 1.0, %v6259_v8  ;;  %v6262_v36 = vand.u32 2147483647, %v5584_v25  ;;  %v17134_v8 = vld [vmem:[#allocation78_spill] sm:$0xff] }
 0x4b2   : > { %v14247_v61 = vsel %vm8361_vm13, %v8419_v32, %v14179_v17  ;;  %v6204_v50 = vmul.f32 0.6931472, %v9619_v38  ;;  %vm14249_vm9 = vcmp.lt.f32.partialorder %v6217_v20, 0.0004427343  ;;  %9626 = vlog2.f32 %v6274_v49  ;;  %v17135_v17 = vld [vmem:[#allocation31_spill] sm:$0xff] }
 0x4b3   : > { %v6280_v6 = vand.u32 2147483647, %v14233_v14  ;;  %v6216_v18 = vmul.f32 %v6215_v52, %v5579_v60  ;;  %v6278_v59 = vadd.f32 1.0, %v6277_v4  ;;  %v3562_v7 = vrot.slane %v3561_v9, 1  ;;  %v17136_v38 = vld [vmem:[#allocation103_spill] sm:$0xff]  ;;  %v17143_v4 = vld [vmem:[#allocation9_spill] sm:$0xff] }
 0x4b4   : > { %v3573_v22 = vmax.f32 %v3571_v13, %v3572_v41  ;;  %v9621_v51 = vpop.eup %9620  ;;  %v6210_v40 = vsel %vm14225_vm5, %v6207_v19, %v6204_v50  ;;  %v6261_v24 = vmul.f32 %v6260_v57, %v5584_v25  ;;  %v2790_v32 = vadd.f32 %v17135_v17, %v17134_v8  ;;  %v17142_v25 = vld [vmem:[#allocation50_spill] sm:$0xff]  ;;  %v17144_v57 = vld [vmem:[#allocation49_spill] sm:$0xff] }
 0x4b5   : > { %v2792_v20 = vadd.f32 %v17135_v17, %v17136_v38  ;;  %v8447_v12 = vrot.slane %v6210_v40, 3  ;;  %v6195_v3 = vmul.f32 0.6931472, %v9621_v51  ;;  %vm14260_vm12 = vcmp.lt.f32.partialorder %v6262_v36, 0.0004427343  ;;  %v17145_v51 = vld [vmem:[#allocation100_spill] sm:$0xff] }
 0x4b6   : > { %v3563_v60 = vmax.f32 %v3561_v9, %v3562_v7  ;;  %v3574_v52 = vrot.slane %v3573_v22, 2  ;;  %vm14264_vm14 = vcmp.lt.f32.partialorder %v6280_v6, 0.0004427343  ;;  %v2791_v19 = vadd.f32 %v17135_v17, %v17141_v46  ;;  %v14276_v40 = vpop.f32.mrb[180].mxu0  ;;  %v14278_v9 = vpop.f32.mrb[180].mxu1 }
 0x4b7   : > { %v2793_v41 = vadd.f32 %v17135_v17, %v17142_v25  ;;  %v2798_v50 = vadd.f32 %v17144_v57, %v17143_v4  ;;  %v2800_v36 = vadd.f32 %v17144_v57, %v17145_v51  ;;  %17146 = vst [vmem:[#allocation42_spill] sm:$0xff] %v14276_v40  ;;  %17147 = vst [vmem:[#allocation94_spill] sm:$0xff] %v14278_v9  ;;  %v14284_v46 = vpop.f32.mrb[181].mxu0  ;;  %v14286_v17 = vpop.f32.mrb[181].mxu1 }
 0x4b8   : > { %v8448_v6 = vsel %vm8361_vm13, %v8447_v12, %v14188_v48  ;;  %v6201_v7 = vsel %vm14239_vm8, %v6198_v5, %v6195_v3  ;;  %v5031_v8 = vmax.f32 %v3563_v60, -2.3819763e+38  ;;  %v3575_v38 = vmax.f32 %v3573_v22, %v3574_v52  ;;  %17148 = vst [vmem:[#allocation63_spill] sm:$0xff] %v14284_v46  ;;  %17149 = vst [vmem:[#allocation68_spill] sm:$0xff] %v14286_v17  ;;  %v9623_v25 = vpop.eup %9622  ;;  %v14290_v9 = vpop.f32.mrb[182].mxu0  ;;  %v17151_v3 = vld [vmem:[#allocation102_spill] sm:$0xff] }
 0x4b9   : > { %v8433_v4 = vrot.slane %v6201_v7, 3  ;;  %v3606_v42 = vmax.f32 %v2790_v32, %v2798_v50  ;;  %v3620_v51 = vmax.f32 %v2792_v20, %v2800_v36  ;;  %v2799_v40 = vadd.f32 %v17144_v57, %v17150_v26 }
 0x4ba   : > { %v6213_v63 = vmul.f32 0.6931472, %v9623_v25  ;;  %v5329_v48 = vadd.f32 %v13768_v11, %v5031_v8  ;;  %v3576_v12 = vrot.slane %v3575_v38, 1  ;;  %v2801_v22 = vadd.f32 %v17144_v57, %v17151_v3 }
 0x4bb   : > { %v14297_v54 = vsel %vm8361_vm13, %v8433_v4, %v14192_v35  ;;  %v3607_v5 = vrot.slane %v3606_v42, 4  ;;  %v3621_v60 = vrot.slane %v3620_v51, 4  ;;  %v3613_v32 = vmax.f32 %v2791_v19, %v2799_v40  ;;  %v9625_v20 = vpop.eup %9624 }
 0x4bc   : > { %v6219_v26 = vsel %vm14249_vm9, %v6216_v18, %v6213_v63  ;;  %v5585_v52 = vmax.f32 %v5329_v48, 0.0  ;;  %v3577_v50 = vmax.f32 %v3575_v38, %v3576_v12  ;;  %v3627_v36 = vmax.f32 %v2793_v41, %v2801_v22  ;;  %v9627_v7 = vpop.eup %9626  ;;  %v14308_v41 = vpop.f32.mrb[182].mxu1 }
 0x4bd   : > { %v8461_v8 = vrot.slane %v6219_v26, 3  ;;  %v6258_v25 = vmul.f32 0.6931472, %v9625_v20  ;;  %v6279_v17 = vmul.f32 %v6278_v59, %v14233_v14  ;;  %v3608_v57 = vmax.f32 %v3606_v42, %v3607_v5  ;;  %v14317_v12 = vpop.f32.mrb[183].mxu0 }
 0x4be   : > { %v6276_v3 = vmul.f32 0.6931472, %v9627_v7  ;;  %v6265_v46 = vadd.f32 1.0, %v5585_v52  ;;  %v6268_v35 = vmul.f32 -0.5, %v5585_v52  ;;  %v3622_v4 = vmax.f32 %v3620_v51, %v3621_v60  ;;  %17152 = vst [vmem:[#allocation44_spill] sm:$0xff] %v14317_v12 }
 0x4bf   : > { %v14304_v19 = vsel %vm8361_vm13, %v8461_v8, %v14214_v1  ;;  %v6264_v63 = vsel %vm14260_vm12, %v6261_v24, %v6258_v25  ;;  %v5033_v37 = vmax.f32 %v3577_v50, -2.3819763e+38  ;;  %v3609_v18 = vrot.slane %v3608_v57, 2  ;;  %v14326_v50 = vpop.f32.mrb[183].mxu1 }
 0x4c0   : > { %v8421_v40 = vrot.slane %v6264_v63, 2  ;;  %v6282_v14 = vsel %vm14264_vm14, %v6279_v17, %v6276_v3  ;;  %9628 = vlog2.f32 %v6265_v46  ;;  %v6271_v59 = vand.u32 2147483647, %v5585_v52  ;;  %17155 = vst [vmem:[#allocation75_spill] sm:$0xff] %v14326_v50  ;;  %v17156_v3 = vld [vmem:[#allocation10_spill] sm:$0xff] }
 0x4c1   : > { %v8449_v42 = vrot.slane %v6282_v14, 2  ;;  %v5331_v38 = vadd.f32 %v13775_v30, %v5033_v37  ;;  %v3610_v51 = vmax.f32 %v3608_v57, %v3609_v18  ;;  %v6269_v49 = vadd.f32 1.0, %v6268_v35  ;;  %v17157_v35 = vld [vmem:[#allocation51_spill] sm:$0xff]  ;;  %v17158_v37 = vld [vmem:[#allocation53_spill] sm:$0xff] }
 0x4c2   : > { %v14315_v1 = vsel %vm8364_vm3, %v8421_v40, %v14247_v61  ;;  %v3623_v24 = vrot.slane %v3622_v4, 2  ;;  %v3614_v48 = vrot.slane %v3613_v32, 4  ;;  %v3628_v46 = vrot.slane %v3627_v36, 4 }
 0x4c3   : > { %v14320_v22 = vsel %vm8364_vm3, %v8449_v42, %v8448_v6  ;;  %v5587_v13 = vmax.f32 %v5331_v38, 0.0  ;;  %v3611_v17 = vrot.slane %v3610_v51, 1  ;;  %vm14322_vm1 = vcmp.lt.f32.partialorder %v6271_v59, 0.0004427343  ;;  %v17159_v59 = vld [vmem:[#allocation38_spill] sm:$0xff]  ;;  %v17160_v38 = vld [vmem:[#allocation13_spill] sm:$0xff] }
 0x4c4   : > { %v3624_v5 = vmax.f32 %v3622_v4, %v3623_v24  ;;  %v3615_v60 = vmax.f32 %v3613_v32, %v3614_v48  ;;  %v6270_v7 = vmul.f32 %v6269_v49, %v5585_v52  ;;  %v3629_v57 = vmax.f32 %v3627_v36, %v3628_v46  ;;  %v17162_v49 = vld [vmem:[#allocation14_spill] sm:$0xff] }
 0x4c5   : > { %v6283_v26 = vadd.f32 1.0, %v5587_v13  ;;  %v3612_v61 = vmax.f32 %v3610_v51, %v3611_v17  ;;  %v2806_v63 = vadd.f32 %v17157_v35, %v17156_v3  ;;  %v2808_v32 = vadd.f32 %v17157_v35, %v17158_v37  ;;  %v17161_v51 = vld [vmem:[#allocation52_spill] sm:$0xff] }
 0x4c6   : > { %v3625_v8 = vrot.slane %v3624_v5, 1  ;;  %v3616_v25 = vrot.slane %v3615_v60, 2  ;;  %v6286_v4 = vmul.f32 -0.5, %v5587_v13  ;;  %v3630_v14 = vrot.slane %v3629_v57, 2 }
 0x4c7   : > { %9630 = vlog2.f32 %v6283_v26  ;;  %v5038_v6 = vmax.f32 %v3612_v61, -2.3819763e+38  ;;  %v2807_v52 = vadd.f32 %v17157_v35, %v17159_v59  ;;  %v2814_v36 = vadd.f32 %v17161_v51, %v17160_v38 }
 0x4c8   : > { %v3626_v18 = vmax.f32 %v3624_v5, %v3625_v8  ;;  %v3617_v40 = vmax.f32 %v3615_v60, %v3616_v25  ;;  %v2816_v24 = vadd.f32 %v17161_v51, %v17162_v49  ;;  %v3631_v26 = vmax.f32 %v3629_v57, %v3630_v14 }
 0x4c9   : > { %v5336_v42 = vadd.f32 %v13736_v23, %v5038_v6  ;;  %v2815_v5 = vadd.f32 %v17161_v51, %v13919_v55  ;;  %v3662_v8 = vmax.f32 %v2806_v63, %v2814_v36  ;;  %v6287_v49 = vadd.f32 1.0, %v6286_v4 }
 0x4ca   : > { %v9629_v48 = vpop.eup %9628  ;;  %v5040_v17 = vmax.f32 %v3626_v18, -2.3819763e+38  ;;  %v3618_v46 = vrot.slane %v3617_v40, 1  ;;  %v3676_v25 = vmax.f32 %v2808_v32, %v2816_v24  ;;  %v3632_v37 = vrot.slane %v3631_v26, 1 }
 0x4cb   : > { %v6267_v60 = vmul.f32 0.6931472, %v9629_v48  ;;  %v5592_v61 = vmax.f32 %v5336_v42, 0.0  ;;  %v3669_v59 = vmax.f32 %v2807_v52, %v2815_v5  ;;  %v6289_v50 = vand.u32 2147483647, %v5587_v13  ;;  %v14359_v5 = vpop.f32.mrb[184].mxu0 }
 0x4cc   : > { %v5338_v6 = vadd.f32 %v13740_v29, %v5040_v17  ;;  %v3619_v3 = vmax.f32 %v3617_v40, %v3618_v46  ;;  %v3633_v55 = vmax.f32 %v3631_v26, %v3632_v37  ;;  %v3663_v42 = vrot.slane %v3662_v8, 4 }
 0x4cd   : > { %v6273_v38 = vsel %vm14322_vm1, %v6270_v7, %v6267_v60  ;;  %v6328_v18 = vadd.f32 1.0, %v5592_v61  ;;  %v6331_v32 = vmul.f32 -0.5, %v5592_v61  ;;  %vm14351_vm2 = vcmp.lt.f32.partialorder %v6289_v50, 0.0004427343  ;;  %v14361_v50 = vpop.f32.mrb[184].mxu1 }
 0x4ce   : > { %v8435_v12 = vrot.slane %v6273_v38, 2  ;;  %v14344_v57 = vmax.f32 %v5338_v6, 0.0  ;;  %v5039_v14 = vmax.f32 %v3619_v3, -2.3819763e+38  ;;  %v5041_v4 = vmax.f32 %v3633_v55, -2.3819763e+38 }
 0x4cf   : > { %9632 = vlog2.f32 %v6328_v18  ;;  %v3664_v36 = vmax.f32 %v3662_v8, %v3663_v42  ;;  %v6288_v48 = vmul.f32 %v6287_v49, %v5587_v13  ;;  %v6334_v17 = vand.u32 2147483647, %v5592_v61  ;;  %v14366_v13 = vpop.f32.mrb[185].mxu0  ;;  %v14368_v37 = vpop.f32.mrb[185].mxu1 }
 0x4d0   : > { %v14348_v63 = vsel %vm8364_vm3, %v8435_v12, %v14297_v54  ;;  %v6346_v40 = vadd.f32 1.0, %v14344_v57  ;;  %v5337_v7 = vadd.f32 %v13768_v11, %v5039_v14  ;;  %v5339_v54 = vadd.f32 %v13775_v30, %v5041_v4  ;;  %17165 = vst [vmem:[#allocation46_spill] sm:$0xff] %v14366_v13  ;;  %17166 = vst [vmem:[#allocation69_spill] sm:$0xff] %v14368_v37  ;;  %v14374_v55 = vpop.f32.mrb[186].mxu0  ;;  %v14378_v20 = vpop.f32.mrb[186].mxu1 }
 0x4d1   : > { %v9631_v52 = vpop.eup %9630  ;;  %v3665_v12 = vrot.slane %v3664_v36, 2  ;;  %v3677_v26 = vrot.slane %v3676_v25, 4  ;;  %v6332_v6 = vadd.f32 1.0, %v6331_v32  ;;  %v6349_v8 = vmul.f32 -0.5, %v14344_v57  ;;  %v14399_v37 = vpop.f32.mrb[187].mxu1 }
 0x4d2   : > { %v6285_v24 = vmul.f32 0.6931472, %v9631_v52  ;;  %9634 = vlog2.f32 %v6346_v40  ;;  %v14356_v46 = vmax.f32 %v5337_v7, 0.0  ;;  %v3670_v3 = vrot.slane %v3669_v59, 4 }
 0x4d3   : > { %v6352_v49 = vand.u32 2147483647, %v14344_v57  ;;  %v2817_v14 = vadd.f32 %v17161_v51, %v13921_v16  ;;  %v14376_v42 = vmax.f32 %v5339_v54, 0.0  ;;  %v3666_v32 = vmax.f32 %v3664_v36, %v3665_v12 }
 0x4d4   : > { %v6291_v60 = vsel %vm14351_vm2, %v6288_v48, %v6285_v24  ;;  %v6337_v18 = vadd.f32 1.0, %v14356_v46  ;;  %v3678_v40 = vmax.f32 %v3676_v25, %v3677_v26  ;;  %v3671_v52 = vmax.f32 %v3669_v59, %v3670_v3  ;;  %v17169_v24 = vld [vmem:[#allocation11_spill] sm:$0xff] }
 0x4d5   : > { %v8463_v38 = vrot.slane %v6291_v60, 2  ;;  %vm14384_vm0 = vcmp.lt.f32.partialorder %v6334_v17, 0.0004427343  ;;  %v2809_v16 = vadd.f32 %v17157_v35, %v17169_v24  ;;  %v6350_v51 = vadd.f32 1.0, %v6349_v8  ;;  %v14392_v60 = vpop.f32.mrb[187].mxu0 }
 0x4d6   : > { %9636 = vlog2.f32 %v6337_v18  ;;  %v6340_v48 = vmul.f32 -0.5, %v14356_v46  ;;  %v6355_v25 = vadd.f32 1.0, %v14376_v42  ;;  %v3667_v59 = vrot.slane %v3666_v32, 1  ;;  %17170 = vst [vmem:[#allocation67_spill] sm:$0xff] %v14392_v60 }
 0x4d7   : > { %v14382_v7 = vsel %vm8364_vm3, %v8463_v38, %v14304_v19  ;;  %v6333_v54 = vmul.f32 %v6332_v6, %v5592_v61  ;;  %v3679_v12 = vrot.slane %v3678_v40, 2  ;;  %v3672_v26 = vrot.slane %v3671_v52, 2 }
 0x4d8   : > { %v3683_v19 = vmax.f32 %v2809_v16, %v2817_v14  ;;  %vm14394_vm4 = vcmp.lt.f32.partialorder %v6352_v49, 0.0004427343  ;;  %9638 = vlog2.f32 %v6355_v25  ;;  %v6358_v35 = vmul.f32 -0.5, %v14376_v42 }
 0x4d9   : > { %v9633_v36 = vpop.eup %9632  ;;  %v3668_v8 = vmax.f32 %v3666_v32, %v3667_v59  ;;  %v3680_v38 = vmax.f32 %v3678_v40, %v3679_v12  ;;  %v3673_v18 = vmax.f32 %v3671_v52, %v3672_v26  ;;  %v6351_v14 = vmul.f32 %v6350_v51, %v14344_v57 }
 0x4da   : > { %v6330_v17 = vmul.f32 0.6931472, %v9633_v36  ;;  %v3684_v24 = vrot.slane %v3683_v19, 4  ;;  %v6341_v49 = vadd.f32 1.0, %v6340_v48  ;;  %v6343_v16 = vand.u32 2147483647, %v14356_v46 }
 0x4db   : > { %v5046_v13 = vmax.f32 %v3668_v8, -2.3819763e+38  ;;  %v3681_v60 = vrot.slane %v3680_v38, 1  ;;  %v6359_v32 = vadd.f32 1.0, %v6358_v35  ;;  %v6361_v40 = vand.u32 2147483647, %v14376_v42 }
 0x4dc   : > { %v9635_v61 = vpop.eup %9634  ;;  %v6336_v6 = vsel %vm14384_vm0, %v6333_v54, %v6330_v17  ;;  %v3674_v52 = vrot.slane %v3673_v18, 1  ;;  %v3685_v59 = vmax.f32 %v3683_v19, %v3684_v24  ;;  %v17173_v17 = vld [vmem:[#allocation54_spill] sm:$0xff]  ;;  %v6342_v19 = vmul.f32 %v6341_v49, %v14356_v46 }
 0x4dd   : > { %v8423_v36 = vrot.slane %v6336_v6, 1  ;;  %v6348_v25 = vmul.f32 0.6931472, %v9635_v61  ;;  %v5344_v57 = vadd.f32 %v13736_v23, %v5046_v13  ;;  %v3682_v51 = vmax.f32 %v3680_v38, %v3681_v60 }
 0x4de   : > { %v3675_v54 = vmax.f32 %v3673_v18, %v3674_v52  ;;  %v3686_v26 = vrot.slane %v3685_v59, 2  ;;  %v2830_v35 = vadd.f32 %v17173_v17, %v13982_v34  ;;  %vm6344_vm5 = vcmp.lt.f32.partialorder %v6343_v16, 0.0004427343 }
 0x4df   : > { %v8424_v12 = vsel %vm8367_vm11, %v8423_v36, %v14315_v1  ;;  %v6354_v4 = vsel %vm14394_vm4, %v6351_v14, %v6348_v25  ;;  %v5600_v24 = vmax.f32 %v5344_v57, 0.0  ;;  %v5048_v61 = vmax.f32 %v3682_v51, -2.3819763e+38  ;;  %v17174_v1 = vld [vmem:[#allocation34_spill] sm:$0xff] }
 0x4e0   : > { %8839 = vst [vmem:[%s11470_s10 + $0x20] sm:$0xff] %v8424_v12  ;;  %v8451_v48 = vrot.slane %v6354_v4, 1  ;;  %v9637_v8 = vpop.eup %9636  ;;  %v2822_v3 = vadd.f32 %v17174_v1, %v13966_v10  ;;  %v5047_v60 = vmax.f32 %v3675_v54, -2.3819763e+38  ;;  %v3687_v38 = vmax.f32 %v3685_v59, %v3686_v26  ;;  %v14435_v54 = vpop.f32.mrb[188].mxu1 }
 0x4e1   : > { %v6339_v6 = vmul.f32 0.6931472, %v9637_v8  ;;  %v6360_v18 = vmul.f32 %v6359_v32, %v14376_v42  ;;  %v6400_v14 = vadd.f32 1.0, %v5600_v24  ;;  %v5346_v34 = vadd.f32 %v13740_v29, %v5048_v61 }
 0x4e2   : > { %v8452_v13 = vsel %vm8367_vm11, %v8451_v48, %v14320_v22  ;;  %v9639_v36 = vpop.eup %9638  ;;  %v5345_v49 = vadd.f32 %v13768_v11, %v5047_v60  ;;  %v3688_v25 = vrot.slane %v3687_v38, 1  ;;  %v3718_v10 = vmax.f32 %v2822_v3, %v2830_v35  ;;  %v14433_v48 = vpop.f32.mrb[188].mxu0 }
 0x4e3   : > { %8841 = vst [vmem:[%s11470_s10 + $0x30] sm:$0xff] %v8452_v13  ;;  %v6345_v46 = vsel %vm6344_vm5, %v6342_v19, %v6339_v6  ;;  %v6357_v12 = vmul.f32 0.6931472, %v9639_v36  ;;  %9640 = vlog2.f32 %v6400_v14  ;;  %v6403_v22 = vmul.f32 -0.5, %v5600_v24 }
 0x4e4   : > { %v8437_v52 = vrot.slane %v6345_v46, 1  ;;  %vm6362_vm8 = vcmp.lt.f32.partialorder %v6361_v40, 0.0004427343  ;;  %v14423_v59 = vmax.f32 %v5346_v34, 0.0  ;;  %v14425_v16 = vmax.f32 %v5345_v49, 0.0 }
 0x4e5   : > { %v3689_v42 = vmax.f32 %v3687_v38, %v3688_v25  ;;  %v6363_v4 = vsel %vm6362_vm8, %v6360_v18, %v6357_v12  ;;  %v2832_v57 = vadd.f32 %v17173_v17, %v14001_v33  ;;  %v2831_v51 = vadd.f32 %v17173_v17, %v14019_v62  ;;  %v14450_v38 = vpop.f32.mrb[189].mxu1 }
 0x4e6   : > { %v8438_v32 = vsel %vm8367_vm11, %v8437_v52, %v14348_v63  ;;  %v8465_v40 = vrot.slane %v6363_v4, 1  ;;  %v6418_v26 = vadd.f32 1.0, %v14423_v59  ;;  %v6421_v35 = vmul.f32 -0.5, %v14423_v59  ;;  %v14440_v63 = vpop.f32.mrb[189].mxu0  ;;  %17175 = vst [vmem:[#allocation72_spill] sm:$0xff] %v14450_v38 }
 0x4e7   : > { %8840 = vst [vmem:[%s11470_s10 + $0x28] sm:$0xff] %v8438_v32  ;;  %v3719_v8 = vrot.slane %v3718_v10, 4  ;;  %v6404_v19 = vadd.f32 1.0, %v6403_v22  ;;  %v6406_v61 = vand.u32 2147483647, %v5600_v24  ;;  %v6412_v33 = vmul.f32 -0.5, %v14425_v16 }
 0x4e8   : > { %v5049_v3 = vmax.f32 %v3689_v42, -2.3819763e+38  ;;  %v8466_v62 = vsel %vm8367_vm11, %v8465_v40, %v14382_v7  ;;  %v6409_v13 = vadd.f32 1.0, %v14425_v16  ;;  %v2824_v6 = vadd.f32 %v17174_v1, %v13968_v47  ;;  %v14452_v18 = vpop.f32.mrb[190].mxu0  ;;  %v14458_v7 = vpop.f32.mrb[190].mxu1 }
 0x4e9   : > { %v2823_v60 = vadd.f32 %v17174_v1, %v13974_v56  ;;  %8842 = vst [vmem:[%s11470_s10 + $0x38] sm:$0xff] %v8466_v62  ;;  %9642 = vlog2.f32 %v6418_v26  ;;  %v2825_v34 = vadd.f32 %v17174_v1, %v13976_v44  ;;  %17176 = vst [vmem:[#allocation21_spill] sm:$0xff] %v14458_v7  ;;  %v6422_v36 = vadd.f32 1.0, %v6421_v35  ;;  %v17211_v56 = vld [vmem:[#allocation92_spill] sm:$0xff] }
 0x4ea   : > { %v5347_v14 = vadd.f32 %v13775_v30, %v5049_v3  ;;  %v3720_v46 = vmax.f32 %v3718_v10, %v3719_v8  ;;  %v3732_v49 = vmax.f32 %v2824_v6, %v2832_v57  ;;  %v14460_v25 = vmul.f32 %v6404_v19, %v5600_v24  ;;  %v14476_v19 = vpop.f32.mrb[191].mxu0 }
 0x4eb   : > { %v3725_v47 = vmax.f32 %v2823_v60, %v2831_v51  ;;  %vm14462_vm9 = vcmp.lt.f32.partialorder %v6406_v61, 0.0004427343  ;;  %v6413_v52 = vadd.f32 1.0, %v6412_v33  ;;  %v2833_v22 = vadd.f32 %v17173_v17, %v14021_v0  ;;  %17179 = vst [vmem:[#allocation80_spill] sm:$0xff] %v14476_v19  ;;  %v17212_v19 = vld [vmem:[#allocation19_spill] sm:$0xff] }
 0x4ec   : > { %v5603_v12 = vmax.f32 %v5347_v14, 0.0  ;;  %9644 = vlog2.f32 %v6409_v13  ;;  %v3721_v42 = vrot.slane %v3720_v46, 2  ;;  %v3733_v44 = vrot.slane %v3732_v49, 4 }
 0x4ed   : > { %v3726_v1 = vrot.slane %v3725_v47, 4  ;;  %v9641_v32 = vpop.eup %9640  ;;  %v6424_v10 = vand.u32 2147483647, %v14423_v59  ;;  %v6415_v4 = vand.u32 2147483647, %v14425_v16  ;;  %v3739_v57 = vmax.f32 %v2825_v34, %v2833_v22 }
 0x4ee   : > { %v6427_v24 = vadd.f32 1.0, %v5603_v12  ;;  %v14471_v51 = vmul.f32 %v6422_v36, %v14423_v59  ;;  %v3722_v40 = vmax.f32 %v3720_v46, %v3721_v42  ;;  %v3734_v26 = vmax.f32 %v3732_v49, %v3733_v44  ;;  %v17180_v59 = vld [vmem:[#allocation40_spill] sm:$0xff]  ;;  %v17182_v49 = vld [vmem:[#allocation59_spill] sm:$0xff] }
 0x4ef   : > { %v3727_v35 = vmax.f32 %v3725_v47, %v3726_v1  ;;  %v14474_v8 = vmul.f32 %v6413_v52, %v14425_v16  ;;  %v6430_v0 = vmul.f32 -0.5, %v5603_v12  ;;  %v3740_v17 = vrot.slane %v3739_v57, 4  ;;  %v14484_v16 = vpop.f32.mrb[191].mxu1 }
 0x4f0   : > { %9646 = vlog2.f32 %v6427_v24  ;;  %v14478_v61 = vmul.f32 0.6931472, %v9641_v32  ;;  %v3723_v33 = vrot.slane %v3722_v40, 1  ;;  %v3735_v3 = vrot.slane %v3734_v26, 2  ;;  %17181 = vst [vmem:[#allocation22_spill] sm:$0xff] %v14484_v16 }
 0x4f1   : > { %v3728_v62 = vrot.slane %v3727_v35, 2  ;;  %v6433_v13 = vand.u32 2147483647, %v5603_v12  ;;  %v3741_v6 = vmax.f32 %v3739_v57, %v3740_v17  ;;  %v2838_v60 = vadd.f32 %v17180_v59, %v14045_v39 }
 0x4f2   : > { %v2840_v14 = vadd.f32 %v17180_v59, %v14047_v28  ;;  %v3724_v34 = vmax.f32 %v3722_v40, %v3723_v33  ;;  %v3736_v36 = vmax.f32 %v3734_v26, %v3735_v3  ;;  %v2846_v47 = vadd.f32 %v17182_v49, %v14056_v31 }
 0x4f3   : > { %v3729_v46 = vmax.f32 %v3727_v35, %v3728_v62  ;;  %v9643_v52 = vpop.eup %9642  ;;  %vm14488_vm12 = vcmp.lt.f32.partialorder %v6424_v10, 0.0004427343  ;;  %v6431_v42 = vadd.f32 1.0, %v6430_v0  ;;  %v3742_v44 = vrot.slane %v3741_v6, 2 }
 0x4f4   : > { %v2848_v39 = vadd.f32 %v17182_v49, %v14058_v2  ;;  %v2847_v28 = vadd.f32 %v17182_v49, %v14067_v15  ;;  %v5054_v32 = vmax.f32 %v3724_v34, -2.3819763e+38  ;;  %v3737_v31 = vrot.slane %v3736_v36, 1 }
 0x4f5   : > { %v3730_v24 = vrot.slane %v3729_v46, 1  ;;  %vm14500_vm14 = vcmp.lt.f32.partialorder %v6415_v4, 0.0004427343  ;;  %v3743_v57 = vmax.f32 %v3741_v6, %v3742_v44  ;;  %v2839_v40 = vadd.f32 %v17180_v59, %v14052_v27 }
 0x4f6   : > { %v3774_v2 = vmax.f32 %v2838_v60, %v2846_v47  ;;  %v3788_v26 = vmax.f32 %v2840_v14, %v2848_v39  ;;  %v9645_v35 = vpop.eup %9644  ;;  %v14506_v15 = vmul.f32 0.6931472, %v9643_v52  ;;  %vm14508_vm1 = vcmp.lt.f32.partialorder %v6433_v13, 0.0004427343 }
 0x4f7   : > { %v5352_v17 = vadd.f32 %v13736_v23, %v5054_v32  ;;  %v3738_v33 = vmax.f32 %v3736_v36, %v3737_v31  ;;  %v3731_v4 = vmax.f32 %v3729_v46, %v3730_v24  ;;  %v3744_v3 = vrot.slane %v3743_v57, 1  ;;  %v17189_v31 = vld [vmem:[#allocation39_spill] sm:$0xff] }
 0x4f8   : > { %v3775_v62 = vrot.slane %v3774_v2, 4  ;;  %v3789_v34 = vrot.slane %v3788_v26, 4  ;;  %v3781_v6 = vmax.f32 %v2839_v40, %v2847_v28  ;;  %v14513_v44 = vmul.f32 %v6431_v42, %v5603_v12 }
 0x4f9   : > { %v5608_v27 = vmax.f32 %v5352_v17, 0.0  ;;  %v5056_v60 = vmax.f32 %v3738_v33, -2.3819763e+38  ;;  %v5055_v14 = vmax.f32 %v3731_v4, -2.3819763e+38  ;;  %v3745_v13 = vmax.f32 %v3743_v57, %v3744_v3  ;;  %v14527_v57 = vpop.f32.mrb[192].mxu1 }
 0x4fa   : > { %v9647_v47 = vpop.eup %9646  ;;  %v14515_v52 = vmul.f32 0.6931472, %v9645_v35  ;;  %v2841_v39 = vadd.f32 %v17180_v59, %v14054_v45  ;;  %v3776_v1 = vmax.f32 %v3774_v2, %v3775_v62  ;;  %v3790_v46 = vmax.f32 %v3788_v26, %v3789_v34  ;;  %v14525_v35 = vpop.f32.mrb[192].mxu0  ;;  %17191 = vst [vmem:[#allocation77_spill] sm:$0xff] %v14527_v57  ;;  %v17209_v57 = vld [vmem:[#allocation43_spill] sm:$0xff] }
 0x4fb   : > { %v14519_v32 = vmul.f32 0.6931472, %v9647_v47  ;;  %v6472_v36 = vadd.f32 1.0, %v5608_v27  ;;  %v2849_v28 = vadd.f32 %v17182_v49, %v17189_v31  ;;  %v5354_v12 = vadd.f32 %v13740_v29, %v5056_v60  ;;  %17190 = vst [vmem:[#allocation16_spill] sm:$0xff] %v14525_v35  ;;  %v14533_v26 = vpop.f32.mrb[193].mxu0  ;;  %v14535_v49 = vpop.f32.mrb[193].mxu1 }
 0x4fc   : > { %v5353_v42 = vadd.f32 %v13768_v11, %v5055_v14  ;;  %v5057_v24 = vmax.f32 %v3745_v13, -2.3819763e+38  ;;  %v3777_v40 = vrot.slane %v3776_v1, 2  ;;  %v6475_v59 = vmul.f32 -0.5, %v5608_v27  ;;  %17192 = vst [vmem:[#allocation20_spill] sm:$0xff] %v14533_v26  ;;  %17193 = vst [vmem:[#allocation82_spill] sm:$0xff] %v14535_v49 }
 0x4fd   : > { %9648 = vlog2.f32 %v6472_v36  ;;  %v3782_v2 = vrot.slane %v3781_v6, 4  ;;  %v5610_v17 = vmax.f32 %v5354_v12, 0.0  ;;  %v14538_v62 = vpop.f32.mrb[194].mxu0  ;;  %v6478_v60 = vand.u32 2147483647, %v5608_v27 }
 0x4fe   : > { %v5609_v33 = vmax.f32 %v5353_v42, 0.0  ;;  %v5355_v4 = vadd.f32 %v13775_v30, %v5057_v24  ;;  %v3778_v3 = vmax.f32 %v3776_v1, %v3777_v40  ;;  %17194 = vst [vmem:[#allocation27_spill] sm:$0xff] %v14538_v62  ;;  %v3791_v14 = vrot.slane %v3790_v46, 2 }
 0x4ff   : > { %v3795_v47 = vmax.f32 %v2841_v39, %v2849_v28  ;;  %v6490_v36 = vadd.f32 1.0, %v5610_v17  ;;  %v6493_v31 = vmul.f32 -0.5, %v5610_v17  ;;  %v3783_v40 = vmax.f32 %v3781_v6, %v3782_v2  ;;  %v14548_v28 = vpop.f32.mrb[194].mxu1  ;;  %v14554_v2 = vpop.f32.mrb[195].mxu0 }
 0x500   : > { %v6481_v12 = vadd.f32 1.0, %v5609_v33  ;;  %v6484_v42 = vmul.f32 -0.5, %v5609_v33  ;;  %v5611_v1 = vmax.f32 %v5355_v4, 0.0  ;;  %v3779_v24 = vrot.slane %v3778_v3, 1  ;;  %17195 = vst [vmem:[#allocation78_spill] sm:$0xff] %v14548_v28  ;;  %17198 = vst [vmem:[#allocation31_spill] sm:$0xff] %v14554_v2 }
 0x501   : > { %v6476_v45 = vadd.f32 1.0, %v6475_v59  ;;  %9650 = vlog2.f32 %v6490_v36  ;;  %v6496_v49 = vand.u32 2147483647, %v5610_v17  ;;  %v3792_v26 = vmax.f32 %v3790_v46, %v3791_v14 }
 0x502   : > { %v6494_v34 = vadd.f32 1.0, %v6493_v31  ;;  %9652 = vlog2.f32 %v6481_v12  ;;  %v6487_v62 = vand.u32 2147483647, %v5609_v33  ;;  %v6499_v39 = vadd.f32 1.0, %v5611_v1 }
 0x503   : > { %vm14550_vm2 = vcmp.lt.f32.partialorder %v6478_v60, 0.0004427343  ;;  %v6485_v13 = vadd.f32 1.0, %v6484_v42  ;;  %v6502_v35 = vmul.f32 -0.5, %v5611_v1  ;;  %v3780_v16 = vmax.f32 %v3778_v3, %v3779_v24 }
 0x504   : > { %9654 = vlog2.f32 %v6499_v39  ;;  %v6505_v4 = vand.u32 2147483647, %v5611_v1  ;;  %v3793_v6 = vrot.slane %v3792_v26, 1  ;;  %v3784_v59 = vrot.slane %v3783_v40, 2 }
 0x505   : > { %v6477_v46 = vmul.f32 %v6476_v45, %v5608_v27  ;;  %vm14556_vm0 = vcmp.lt.f32.partialorder %v6496_v49, 0.0004427343  ;;  %v5062_v36 = vmax.f32 %v3780_v16, -2.3819763e+38  ;;  %v3796_v31 = vrot.slane %v3795_v47, 4 }
 0x506   : > { %v6495_v12 = vmul.f32 %v6494_v34, %v5610_v17  ;;  %vm14560_vm4 = vcmp.lt.f32.partialorder %v6487_v62, 0.0004427343  ;;  %v6503_v3 = vadd.f32 1.0, %v6502_v35  ;;  %v3794_v42 = vmax.f32 %v3792_v26, %v3793_v6  ;;  %v17205_v17 = vld [vmem:[#allocation62_spill] sm:$0xff] }
 0x507   : > { %v9649_v60 = vpop.eup %9648  ;;  %v3785_v24 = vmax.f32 %v3783_v40, %v3784_v59  ;;  %v6486_v38 = vmul.f32 %v6485_v13, %v5609_v33  ;;  %v5360_v2 = vadd.f32 %v13736_v23, %v5062_v36  ;;  %v3797_v27 = vmax.f32 %v3795_v47, %v3796_v31  ;;  %v17206_v40 = vld [vmem:[#allocation57_spill] sm:$0xff]  ;;  %v14576_v59 = vpop.f32.mrb[195].mxu1 }
 0x508   : > { %v6474_v39 = vmul.f32 0.6931472, %v9649_v60  ;;  %vm14565_vm5 = vcmp.lt.f32.partialorder %v6505_v4, 0.0004427343  ;;  %v5064_v16 = vmax.f32 %v3794_v42, -2.3819763e+38  ;;  %v2854_v62 = vadd.f32 %v17205_v17, %v14120_v43 }
 0x509   : > { %v3786_v49 = vrot.slane %v3785_v24, 1  ;;  %v5616_v35 = vmax.f32 %v5360_v2, 0.0  ;;  %v3798_v26 = vrot.slane %v3797_v27, 2  ;;  %v2856_v33 = vadd.f32 %v17205_v17, %v17206_v40  ;;  %17207 = vst [vmem:[#allocation103_spill] sm:$0xff] %v14576_v59  ;;  %v17208_v42 = vld [vmem:[#allocation15_spill] sm:$0xff] }
 0x50a   : > { %v6480_v34 = vsel %vm14550_vm2, %v6477_v46, %v6474_v39  ;;  %v6504_v6 = vmul.f32 %v6503_v3, %v5611_v1  ;;  %v5362_v47 = vadd.f32 %v13740_v29, %v5064_v16  ;;  %v2855_v43 = vadd.f32 %v17205_v17, %v17208_v42 }
 0x50b   : > { %v8523_v13 = vrot.slane %v6480_v34, 7  ;;  %v3787_v4 = vmax.f32 %v3785_v24, %v3786_v49  ;;  %v9651_v36 = vpop.eup %9650  ;;  %v6544_v31 = vadd.f32 1.0, %v5616_v35  ;;  %v6547_v60 = vmul.f32 -0.5, %v5616_v35 }
 0x50c   : > { %v2857_v2 = vadd.f32 %v17205_v17, %v17209_v57  ;;  %v9653_v46 = vpop.eup %9652  ;;  %v17210_v1 = vsel %vm14462_vm9, %v14460_v25, %v14478_v61  ;;  %v6492_v24 = vmul.f32 0.6931472, %v9651_v36  ;;  %v6550_v39 = vand.u32 2147483647, %v5616_v35  ;;  %v17213_v36 = vld [vmem:[#allocation37_spill] sm:$0xff] }
 0x50d   : > { %v14588_v3 = vsel %vm8349_vm6, %v8523_v13, %v17210_v1  ;;  %v5618_v16 = vmax.f32 %v5362_v47, 0.0  ;;  %v6483_v49 = vmul.f32 0.6931472, %v9653_v46  ;;  %9656 = vlog2.f32 %v6544_v31 }
 0x50e   : > { %v5063_v34 = vmax.f32 %v3787_v4, -2.3819763e+38  ;;  %v3799_v40 = vmax.f32 %v3797_v27, %v3798_v26  ;;  %v9655_v42 = vpop.eup %9654  ;;  %v6498_v17 = vsel %vm14556_vm0, %v6495_v12, %v6492_v24  ;;  %v2862_v7 = vadd.f32 %v17212_v19, %v17211_v56 }
 0x50f   : > { %v6562_v57 = vadd.f32 1.0, %v5618_v16  ;;  %v6565_v59 = vmul.f32 -0.5, %v5618_v16  ;;  %v8551_v25 = vrot.slane %v6498_v17, 7  ;;  %v6489_v61 = vsel %vm14560_vm4, %v6486_v38, %v6483_v49 }
 0x510   : > { %v6501_v13 = vmul.f32 0.6931472, %v9655_v42  ;;  %v2864_v47 = vadd.f32 %v17212_v19, %v17213_v36  ;;  %v8537_v31 = vrot.slane %v6489_v61, 7  ;;  %v6548_v4 = vadd.f32 1.0, %v6547_v60 }
 0x511   : > { %9658 = vlog2.f32 %v6562_v57  ;;  %v6568_v27 = vand.u32 2147483647, %v5618_v16  ;;  %v17214_v14 = vsel %vm14488_vm12, %v14471_v51, %v14506_v15  ;;  %vm14608_vm8 = vcmp.lt.f32.partialorder %v6550_v39, 0.0004427343 }
 0x512   : > { %v14604_v12 = vsel %vm8349_vm6, %v8551_v25, %v17214_v14  ;;  %v6507_v28 = vsel %vm14565_vm5, %v6504_v6, %v6501_v13  ;;  %v5361_v26 = vadd.f32 %v13768_v11, %v5063_v34  ;;  %v3800_v60 = vrot.slane %v3799_v40, 1 }
 0x513   : > { %v17217_v22 = vsel %vm14500_vm14, %v14474_v8, %v14515_v52  ;;  %v8565_v15 = vrot.slane %v6507_v28, 7  ;;  %v6566_v46 = vadd.f32 1.0, %v6565_v59  ;;  %v3830_v1 = vmax.f32 %v2854_v62, %v2862_v7 }
 0x514   : > { %v14619_v51 = vsel %vm8349_vm6, %v8537_v31, %v17217_v22  ;;  %v5617_v45 = vmax.f32 %v5361_v26, 0.0  ;;  %v3801_v6 = vmax.f32 %v3799_v40, %v3800_v60  ;;  %v3844_v24 = vmax.f32 %v2856_v33, %v2864_v47 }
 0x515   : > { %v2863_v39 = vadd.f32 %v17212_v19, %v14167_v58  ;;  %v17218_v10 = vsel %vm14508_vm1, %v14513_v44, %v14519_v32  ;;  %v6549_v8 = vmul.f32 %v6548_v4, %v5616_v35  ;;  %v3831_v52 = vrot.slane %v3830_v1, 4  ;;  %v14637_v44 = vpop.f32.mrb[196].mxu0  ;;  %v14639_v32 = vpop.f32.mrb[196].mxu1  ;;  %v17221_v4 = vld [vmem:[#allocation17_spill] sm:$0xff] }
 0x516   : > { %v14629_v49 = vsel %vm8349_vm6, %v8565_v15, %v17218_v10  ;;  %v2865_v59 = vadd.f32 %v17212_v19, %v14172_v53  ;;  %vm14633_vm9 = vcmp.lt.f32.partialorder %v6568_v27, 0.0004427343  ;;  %v6553_v62 = vadd.f32 1.0, %v5617_v45  ;;  %v14642_v19 = vpop.f32.mrb[197].mxu0  ;;  %v14644_v56 = vpop.f32.mrb[197].mxu1 }
 0x517   : > { %v6556_v33 = vmul.f32 -0.5, %v5617_v45  ;;  %v5065_v58 = vmax.f32 %v3801_v6, -2.3819763e+38  ;;  %v3832_v34 = vmax.f32 %v3830_v1, %v3831_v52  ;;  %v3845_v0 = vrot.slane %v3844_v24, 4  ;;  %v9657_v35 = vpop.eup %9656 }
 0x518   : > { %v3837_v40 = vmax.f32 %v2855_v43, %v2863_v39  ;;  %v3851_v42 = vmax.f32 %v2857_v2, %v2865_v59  ;;  %v6567_v17 = vmul.f32 %v6566_v46, %v5618_v16  ;;  %9660 = vlog2.f32 %v6553_v62  ;;  %v14646_v43 = vpop.f32.mrb[198].mxu0  ;;  %v14648_v2 = vpop.f32.mrb[198].mxu1 }
 0x519   : > { %v6559_v57 = vand.u32 2147483647, %v5617_v45  ;;  %v5363_v53 = vadd.f32 %v13775_v30, %v5065_v58  ;;  %v6546_v25 = vmul.f32 0.6931472, %v9657_v35  ;;  %v3833_v61 = vrot.slane %v3832_v34, 2  ;;  %v14670_v62 = vpop.f32.mrb[199].mxu1 }
 0x51a   : > { %v3846_v13 = vmax.f32 %v3844_v24, %v3845_v0  ;;  %v3838_v36 = vrot.slane %v3837_v40, 4  ;;  %v6557_v47 = vadd.f32 1.0, %v6556_v33  ;;  %v3852_v16 = vrot.slane %v3851_v42, 4  ;;  %v14658_v24 = vpop.f32.mrb[199].mxu0  ;;  %v17224_v0 = vld [vmem:[#allocation58_spill] sm:$0xff] }
 0x51b   : > { %v14650_v31 = vmax.f32 %v5363_v53, 0.0  ;;  %v2870_v27 = vadd.f32 %v17221_v4, %v14197_v21  ;;  %v9659_v14 = vpop.eup %9658  ;;  %v6552_v28 = vsel %vm14608_vm8, %v6549_v8, %v6546_v25  ;;  %v3834_v26 = vmax.f32 %v3832_v34, %v3833_v61 }
 0x51c   : > { %v3847_v60 = vrot.slane %v3846_v13, 2  ;;  %v3839_v22 = vmax.f32 %v3837_v40, %v3838_v36  ;;  %v8525_v15 = vrot.slane %v6552_v28, 6  ;;  %v6564_v46 = vmul.f32 0.6931472, %v9659_v14  ;;  %v17226_v14 = vld [vmem:[#allocation35_spill] sm:$0xff]  ;;  %v17227_v28 = vld [vmem:[#allocation18_spill] sm:$0xff] }
 0x51d   : > { %v6571_v1 = vadd.f32 1.0, %v14650_v31  ;;  %v6574_v6 = vmul.f32 -0.5, %v14650_v31  ;;  %vm14660_vm12 = vcmp.lt.f32.partialorder %v6559_v57, 0.0004427343  ;;  %v3835_v21 = vrot.slane %v3834_v26, 1 }
 0x51e   : > { %v3848_v10 = vmax.f32 %v3846_v13, %v3847_v60  ;;  %v3840_v52 = vrot.slane %v3839_v22, 2  ;;  %v14666_v38 = vsel %vm8352_vm10, %v8525_v15, %v14588_v3  ;;  %v6570_v8 = vsel %vm14633_vm9, %v6567_v17, %v6564_v46  ;;  %v17225_v17 = vld [vmem:[#allocation23_spill] sm:$0xff]  ;;  %v17228_v60 = vld [vmem:[#allocation41_spill] sm:$0xff] }
 0x51f   : > { %v6558_v59 = vmul.f32 %v6557_v47, %v5617_v45  ;;  %9662 = vlog2.f32 %v6571_v1  ;;  %v8553_v33 = vrot.slane %v6570_v8, 6  ;;  %v3836_v58 = vmax.f32 %v3834_v26, %v3835_v21 }
 0x520   : > { %v3849_v34 = vrot.slane %v3848_v10, 1  ;;  %v2872_v40 = vadd.f32 %v17221_v4, %v17224_v0  ;;  %v6575_v35 = vadd.f32 1.0, %v6574_v6  ;;  %v6577_v57 = vand.u32 2147483647, %v14650_v31 }
 0x521   : > { %v3841_v53 = vmax.f32 %v3839_v22, %v3840_v52  ;;  %v3853_v25 = vmax.f32 %v3851_v42, %v3852_v16  ;;  %v14677_v3 = vsel %vm8352_vm10, %v8553_v33, %v14604_v12  ;;  %v5070_v7 = vmax.f32 %v3836_v58, -2.3819763e+38  ;;  %v17229_v12 = vld [vmem:[#allocation36_spill] sm:$0xff] }
 0x522   : > { %v3850_v45 = vmax.f32 %v3848_v10, %v3849_v34  ;;  %v2871_v61 = vadd.f32 %v17221_v4, %v17225_v17  ;;  %v9661_v13 = vpop.eup %9660  ;;  %v2878_v26 = vadd.f32 %v17227_v28, %v17226_v14  ;;  %v2880_v15 = vadd.f32 %v17227_v28, %v17228_v60 }
 0x523   : > { %v3842_v36 = vrot.slane %v3841_v53, 1  ;;  %v3854_v47 = vrot.slane %v3853_v25, 2  ;;  %v6555_v22 = vmul.f32 0.6931472, %v9661_v13  ;;  %v5368_v42 = vadd.f32 %v13736_v23, %v5070_v7 }
 0x524   : > { %v5072_v16 = vmax.f32 %v3850_v45, -2.3819763e+38  ;;  %v2879_v46 = vadd.f32 %v17227_v28, %v17229_v12  ;;  %v3886_v21 = vmax.f32 %v2870_v27, %v2878_v26  ;;  %v3900_v10 = vmax.f32 %v2872_v40, %v2880_v15 }
 0x525   : > { %v3843_v1 = vmax.f32 %v3841_v53, %v3842_v36  ;;  %v3855_v6 = vmax.f32 %v3853_v25, %v3854_v47  ;;  %v6561_v52 = vsel %vm14660_vm12, %v6558_v59, %v6555_v22  ;;  %v5624_v8 = vmax.f32 %v5368_v42, 0.0 }
 0x526   : > { %v5370_v33 = vadd.f32 %v13740_v29, %v5072_v16  ;;  %v3893_v58 = vmax.f32 %v2871_v61, %v2879_v46  ;;  %v8539_v34 = vrot.slane %v6561_v52, 6  ;;  %v3887_v13 = vrot.slane %v3886_v21, 4 }
 0x527   : > { %v5071_v0 = vmax.f32 %v3843_v1, -2.3819763e+38  ;;  %v3856_v17 = vrot.slane %v3855_v6, 1  ;;  %v6616_v7 = vadd.f32 1.0, %v5624_v8  ;;  %v6619_v45 = vmul.f32 -0.5, %v5624_v8  ;;  %v14699_v1 = vpop.f32.mrb[200].mxu0 }
 0x528   : > { %v5626_v14 = vmax.f32 %v5370_v33, 0.0  ;;  %v14693_v53 = vsel %vm8352_vm10, %v8539_v34, %v14619_v51  ;;  %v3888_v59 = vmax.f32 %v3886_v21, %v3887_v13  ;;  %v6576_v25 = vmul.f32 %v6575_v35, %v14650_v31  ;;  %v17230_v51 = vld [vmem:[#allocation24_spill] sm:$0xff]  ;;  %v14708_v52 = vpop.f32.mrb[201].mxu0 }
 0x529   : > { %v9663_v60 = vpop.eup %9662  ;;  %v5369_v27 = vadd.f32 %v13768_v11, %v5071_v0  ;;  %v3857_v39 = vmax.f32 %v3855_v6, %v3856_v17  ;;  %9664 = vlog2.f32 %v6616_v7  ;;  %v6622_v61 = vand.u32 2147483647, %v5624_v8  ;;  %v14701_v6 = vpop.f32.mrb[200].mxu1 }
 0x52a   : > { %v6573_v40 = vmul.f32 0.6931472, %v9663_v60  ;;  %vm6578_vm14 = vcmp.lt.f32.partialorder %v6577_v57, 0.0004427343  ;;  %v6620_v36 = vadd.f32 1.0, %v6619_v45  ;;  %v6634_v47 = vadd.f32 1.0, %v5626_v14 }
 0x52b   : > { %v5625_v26 = vmax.f32 %v5369_v27, 0.0  ;;  %v6637_v22 = vmul.f32 -0.5, %v5626_v14  ;;  %v5073_v42 = vmax.f32 %v3857_v39, -2.3819763e+38  ;;  %v3889_v16 = vrot.slane %v3888_v59, 2  ;;  %v14710_v33 = vpop.f32.mrb[201].mxu1 }
 0x52c   : > { %v6579_v15 = vsel %vm6578_vm14, %v6576_v25, %v6573_v40  ;;  %9666 = vlog2.f32 %v6634_v47  ;;  %v2873_v46 = vadd.f32 %v17221_v4, %v17230_v51  ;;  %vm14703_vm1 = vcmp.lt.f32.partialorder %v6622_v61, 0.0004427343  ;;  %v14716_v13 = vpop.f32.mrb[202].mxu0  ;;  %v14718_v7 = vpop.f32.mrb[202].mxu1  ;;  %v17235_v47 = vld [vmem:[#allocation64_spill] sm:$0xff] }
 0x52d   : > { %v8567_v12 = vrot.slane %v6579_v15, 6  ;;  %v6625_v35 = vadd.f32 1.0, %v5625_v26  ;;  %v6628_v57 = vmul.f32 -0.5, %v5625_v26  ;;  %v5371_v21 = vadd.f32 %v13775_v30, %v5073_v42  ;;  %17233 = vst [vmem:[#allocation12_spill] sm:$0xff] %v14716_v13  ;;  %17234 = vst [vmem:[#allocation50_spill] sm:$0xff] %v14718_v7  ;;  %v14720_v39 = vpop.f32.mrb[203].mxu0 }
 0x52e   : > { %v6640_v4 = vand.u32 2147483647, %v5626_v14  ;;  %v3890_v0 = vmax.f32 %v3888_v59, %v3889_v16  ;;  %v3901_v17 = vrot.slane %v3900_v10, 4  ;;  %v6621_v45 = vmul.f32 %v6620_v36, %v5624_v8 }
 0x52f   : > { %v14714_v34 = vsel %vm8352_vm10, %v8567_v12, %v14629_v49  ;;  %v6638_v60 = vadd.f32 1.0, %v6637_v22  ;;  %9668 = vlog2.f32 %v6625_v35  ;;  %v5627_v27 = vmax.f32 %v5371_v21, 0.0  ;;  %v14728_v35 = vpop.f32.mrb[203].mxu1 }
 0x530   : > { %v3891_v40 = vrot.slane %v3890_v0, 1  ;;  %v3902_v25 = vmax.f32 %v3900_v10, %v3901_v17  ;;  %v3894_v61 = vrot.slane %v3893_v58, 4  ;;  %v2881_v49 = vadd.f32 %v17227_v28, %v17235_v47 }
 0x531   : > { %v6629_v15 = vadd.f32 1.0, %v6628_v57  ;;  %v6631_v42 = vand.u32 2147483647, %v5625_v26  ;;  %v6643_v59 = vadd.f32 1.0, %v5627_v27  ;;  %v6646_v16 = vmul.f32 -0.5, %v5627_v27 }
 0x532   : > { %v3892_v12 = vmax.f32 %v3890_v0, %v3891_v40  ;;  %v3903_v51 = vrot.slane %v3902_v25, 2  ;;  %v3895_v13 = vmax.f32 %v3893_v58, %v3894_v61  ;;  %v3907_v7 = vmax.f32 %v2873_v46, %v2881_v49 }
 0x533   : > { %v9665_v8 = vpop.eup %9664  ;;  %v6639_v36 = vmul.f32 %v6638_v60, %v5626_v14  ;;  %vm14724_vm2 = vcmp.lt.f32.partialorder %v6640_v4, 0.0004427343  ;;  %9670 = vlog2.f32 %v6643_v59  ;;  %v6649_v10 = vand.u32 2147483647, %v5627_v27 }
 0x534   : > { %v6618_v21 = vmul.f32 0.6931472, %v9665_v8  ;;  %v5078_v28 = vmax.f32 %v3892_v12, -2.3819763e+38  ;;  %v3904_v57 = vmax.f32 %v3902_v25, %v3903_v51  ;;  %v3896_v17 = vrot.slane %v3895_v13, 2  ;;  %v17242_v12 = vld [vmem:[#allocation42_spill] sm:$0xff] }
 0x535   : > { %v6630_v47 = vmul.f32 %v6629_v15, %v5625_v26  ;;  %vm14730_vm0 = vcmp.lt.f32.partialorder %v6631_v42, 0.0004427343  ;;  %v6647_v58 = vadd.f32 1.0, %v6646_v16  ;;  %v3908_v46 = vrot.slane %v3907_v7, 4  ;;  %v17243_v51 = vld [vmem:[#allocation30_spill] sm:$0xff]  ;;  %v17247_v25 = vld [vmem:[#allocation63_spill] sm:$0xff] }
 0x536   : > { %v9667_v14 = vpop.eup %9666  ;;  %v6624_v4 = vsel %vm14703_vm1, %v6621_v45, %v6618_v21  ;;  %v5376_v60 = vadd.f32 %v13736_v23, %v5078_v28  ;;  %v3905_v40 = vrot.slane %v3904_v57, 1  ;;  %v3897_v61 = vmax.f32 %v3895_v13, %v3896_v17 }
 0x537   : > { %v8527_v49 = vrot.slane %v6624_v4, 5  ;;  %v6636_v59 = vmul.f32 0.6931472, %v9667_v14  ;;  %vm14737_vm4 = vcmp.lt.f32.partialorder %v6649_v10, 0.0004427343  ;;  %v3909_v26 = vmax.f32 %v3907_v7, %v3908_v46 }
 0x538   : > { %v14741_v15 = vmax.f32 %v5376_v60, 0.0  ;;  %v3906_v42 = vmax.f32 %v3904_v57, %v3905_v40  ;;  %v3898_v16 = vrot.slane %v3897_v61, 1  ;;  %v2886_v8 = vadd.f32 %v17243_v51, %v17242_v12  ;;  %v17244_v57 = vld [vmem:[#allocation26_spill] sm:$0xff] }
 0x539   : > { %v9669_v31 = vpop.eup %9668  ;;  %v14747_v45 = vsel %vm8355_vm15, %v8527_v49, %v14666_v38  ;;  %v6642_v13 = vsel %vm14724_vm2, %v6639_v36, %v6636_v59  ;;  %v6648_v10 = vmul.f32 %v6647_v58, %v5627_v27  ;;  %v3910_v21 = vrot.slane %v3909_v26, 2 }
 0x53a   : > { %v8555_v28 = vrot.slane %v6642_v13, 5  ;;  %v6627_v17 = vmul.f32 0.6931472, %v9669_v31  ;;  %v6688_v7 = vadd.f32 1.0, %v14741_v15  ;;  %v2894_v46 = vadd.f32 %v17244_v57, %v14290_v9 }
 0x53b   : > { %v5080_v14 = vmax.f32 %v3906_v42, -2.3819763e+38  ;;  %v3899_v4 = vmax.f32 %v3897_v61, %v3898_v16  ;;  %v3911_v60 = vmax.f32 %v3909_v26, %v3910_v21  ;;  %v2896_v40 = vadd.f32 %v17244_v57, %v14308_v41  ;;  %v17245_v61 = vld [vmem:[#allocation94_spill] sm:$0xff] }
 0x53c   : > { %v14758_v38 = vsel %vm8355_vm15, %v8555_v28, %v14677_v3  ;;  %v6633_v27 = vsel %vm14730_vm0, %v6630_v47, %v6627_v17  ;;  %9672 = vlog2.f32 %v6688_v7  ;;  %v6691_v36 = vmul.f32 -0.5, %v14741_v15 }
 0x53d   : > { %v9671_v22 = vpop.eup %9670  ;;  %v8541_v58 = vrot.slane %v6633_v27, 5  ;;  %v5378_v9 = vadd.f32 %v13740_v29, %v5080_v14  ;;  %v5079_v49 = vmax.f32 %v3899_v4, -2.3819763e+38  ;;  %v2888_v59 = vadd.f32 %v17243_v51, %v17245_v61  ;;  %v17246_v4 = vld [vmem:[#allocation44_spill] sm:$0xff] }
 0x53e   : > { %v6645_v26 = vmul.f32 0.6931472, %v9671_v22  ;;  %v6694_v41 = vand.u32 2147483647, %v14741_v15  ;;  %v3912_v42 = vrot.slane %v3911_v60, 1  ;;  %v3942_v3 = vmax.f32 %v2886_v8, %v2894_v46 }
 0x53f   : > { %v14769_v0 = vsel %vm8355_vm15, %v8541_v58, %v14693_v53  ;;  %v5634_v47 = vmax.f32 %v5378_v9, 0.0  ;;  %v5377_v16 = vadd.f32 %v13768_v11, %v5079_v49  ;;  %v3956_v12 = vmax.f32 %v2888_v59, %v2896_v40  ;;  %v14785_v59 = vpop.f32.mrb[204].mxu0 }
 0x540   : > { %v6651_v31 = vsel %vm14737_vm4, %v6648_v10, %v6645_v26  ;;  %v6692_v13 = vadd.f32 1.0, %v6691_v36  ;;  %v3913_v21 = vmax.f32 %v3911_v60, %v3912_v42  ;;  %v3943_v28 = vrot.slane %v3942_v3, 4  ;;  %v17248_v60 = vld [vmem:[#allocation68_spill] sm:$0xff]  ;;  %v14787_v26 = vpop.f32.mrb[204].mxu1 }
 0x541   : > { %v8569_v17 = vrot.slane %v6651_v31, 5  ;;  %v6706_v7 = vadd.f32 1.0, %v5634_v47  ;;  %v6709_v14 = vmul.f32 -0.5, %v5634_v47  ;;  %v2895_v8 = vadd.f32 %v17244_v57, %v17246_v4  ;;  %17249 = vst [vmem:[#allocation9_spill] sm:$0xff] %v14787_v26  ;;  %v14793_v31 = vpop.f32.mrb[205].mxu0 }
 0x542   : > { %v5633_v46 = vmax.f32 %v5377_v16, 0.0  ;;  %v5081_v27 = vmax.f32 %v3913_v21, -2.3819763e+38  ;;  %v3944_v53 = vmax.f32 %v3942_v3, %v3943_v28  ;;  %v3957_v22 = vrot.slane %v3956_v12, 4  ;;  %17252 = vst [vmem:[#allocation49_spill] sm:$0xff] %v14793_v31  ;;  %v14795_v21 = vpop.f32.mrb[205].mxu1 }
 0x543   : > { %v14778_v58 = vsel %vm8355_vm15, %v8569_v17, %v14714_v34  ;;  %9674 = vlog2.f32 %v6706_v7  ;;  %v2887_v10 = vadd.f32 %v17243_v51, %v17247_v25  ;;  %v2889_v40 = vadd.f32 %v17243_v51, %v17248_v60  ;;  %17253 = vst [vmem:[#allocation100_spill] sm:$0xff] %v14795_v21  ;;  %v14798_v4 = vpop.f32.mrb[206].mxu0  ;;  %v14800_v26 = vpop.f32.mrb[206].mxu1 }
 0x544   : > { %v6712_v36 = vand.u32 2147483647, %v5634_v47  ;;  %v6697_v9 = vadd.f32 1.0, %v5633_v46  ;;  %v6700_v49 = vmul.f32 -0.5, %v5633_v46  ;;  %v5379_v61 = vadd.f32 %v13775_v30, %v5081_v27  ;;  %17254 = vst [vmem:[#allocation101_spill] sm:$0xff] %v14798_v4  ;;  %17255 = vst [vmem:[#allocation102_spill] sm:$0xff] %v14800_v26 }
 0x545   : > { %vm14789_vm5 = vcmp.lt.f32.partialorder %v6694_v41, 0.0004427343  ;;  %v3945_v34 = vrot.slane %v3944_v53, 2  ;;  %v3958_v3 = vmax.f32 %v3956_v12, %v3957_v22  ;;  %v3949_v16 = vmax.f32 %v2887_v10, %v2895_v8  ;;  %v17258_v4 = vld [vmem:[#allocation75_spill] sm:$0xff]  ;;  %v14812_v31 = vpop.f32.mrb[207].mxu1 }
 0x546   : > { %v9673_v51 = vpop.eup %9672  ;;  %v6693_v28 = vmul.f32 %v6692_v13, %v14741_v15  ;;  %v6710_v17 = vadd.f32 1.0, %v6709_v14  ;;  %9676 = vlog2.f32 %v6697_v9  ;;  %v5635_v7 = vmax.f32 %v5379_v61, 0.0  ;;  %v14808_v61 = vpop.f32.mrb[207].mxu0 }
 0x547   : > { %v6690_v27 = vmul.f32 0.6931472, %v9673_v51  ;;  %v3946_v41 = vmax.f32 %v3944_v53, %v3945_v34  ;;  %v3959_v25 = vrot.slane %v3958_v3, 2  ;;  %v3950_v60 = vrot.slane %v3949_v16, 4 }
 0x548   : > { %vm14802_vm8 = vcmp.lt.f32.partialorder %v6712_v36, 0.0004427343  ;;  %v6701_v8 = vadd.f32 1.0, %v6700_v49  ;;  %v6703_v22 = vand.u32 2147483647, %v5633_v46  ;;  %v6715_v10 = vadd.f32 1.0, %v5635_v7 }
 0x549   : > { %v6696_v15 = vsel %vm14789_vm5, %v6693_v28, %v6690_v27  ;;  %v3947_v13 = vrot.slane %v3946_v41, 1  ;;  %v3960_v14 = vmax.f32 %v3958_v3, %v3959_v25  ;;  %v3951_v9 = vmax.f32 %v3949_v16, %v3950_v60  ;;  %v17266_v16 = vld [vmem:[#allocation67_spill] sm:$0xff] }
 0x54a   : > { %v8529_v53 = vrot.slane %v6696_v15, 4  ;;  %v6711_v34 = vmul.f32 %v6710_v17, %v5634_v47  ;;  %9678 = vlog2.f32 %v6715_v10  ;;  %v6718_v51 = vmul.f32 -0.5, %v5635_v7  ;;  %v17262_v15 = vld [vmem:[#allocation47_spill] sm:$0xff] }
 0x54b   : > { %v3948_v21 = vmax.f32 %v3946_v41, %v3947_v13  ;;  %v3961_v36 = vrot.slane %v3960_v14, 1  ;;  %v3952_v26 = vrot.slane %v3951_v9, 2  ;;  %v2897_v49 = vadd.f32 %v17244_v57, %v17258_v4  ;;  %v17261_v57 = vld [vmem:[#allocation25_spill] sm:$0xff] }
 0x54c   : > { %v14816_v42 = vsel %vm8358_vm7, %v8529_v53, %v14747_v45  ;;  %v6702_v3 = vmul.f32 %v6701_v8, %v5633_v46  ;;  %vm14818_vm9 = vcmp.lt.f32.partialorder %v6703_v22, 0.0004427343  ;;  %v6721_v47 = vand.u32 2147483647, %v5635_v7 }
 0x54d   : > { %v9675_v28 = vpop.eup %9674  ;;  %v5086_v17 = vmax.f32 %v3948_v21, -2.3819763e+38  ;;  %v3962_v27 = vmax.f32 %v3960_v14, %v3961_v36  ;;  %v3953_v41 = vmax.f32 %v3951_v9, %v3952_v26  ;;  %v3963_v25 = vmax.f32 %v2889_v40, %v2897_v49 }
 0x54e   : > { %v6708_v60 = vmul.f32 0.6931472, %v9675_v28  ;;  %v6719_v10 = vadd.f32 1.0, %v6718_v51  ;;  %v2902_v4 = vadd.f32 %v17261_v57, %v14359_v5  ;;  %v2910_v45 = vadd.f32 %v17262_v15, %v14374_v55 }
 0x54f   : > { %v5384_v46 = vadd.f32 %v13736_v23, %v5086_v17  ;;  %v5088_v8 = vmax.f32 %v3962_v27, -2.3819763e+38  ;;  %v3954_v22 = vrot.slane %v3953_v41, 1  ;;  %v3964_v13 = vrot.slane %v3963_v25, 4 }
 0x550   : > { %v9677_v53 = vpop.eup %9676  ;;  %v6714_v21 = vsel %vm14802_vm8, %v6711_v34, %v6708_v60  ;;  %v2904_v40 = vadd.f32 %v17261_v57, %v14361_v50  ;;  %v3998_v26 = vmax.f32 %v2902_v4, %v2910_v45  ;;  %v2912_v14 = vadd.f32 %v17262_v15, %v14378_v20 }
 0x551   : > { %v8557_v5 = vrot.slane %v6714_v21, 4  ;;  %v6699_v9 = vmul.f32 0.6931472, %v9677_v53  ;;  %v5640_v51 = vmax.f32 %v5384_v46, 0.0  ;;  %v5386_v55 = vadd.f32 %v13740_v29, %v5088_v8 }
 0x552   : > { %vm14834_vm12 = vcmp.lt.f32.partialorder %v6721_v47, 0.0004427343  ;;  %v3955_v49 = vmax.f32 %v3953_v41, %v3954_v22  ;;  %v3965_v28 = vmax.f32 %v3963_v25, %v3964_v13  ;;  %v4012_v12 = vmax.f32 %v2904_v40, %v2912_v14  ;;  %v14844_v25 = vpop.f32.mrb[208].mxu0  ;;  %v14846_v22 = vpop.f32.mrb[208].mxu1  ;;  %v17269_v14 = vld [vmem:[#allocation46_spill] sm:$0xff] }
 0x553   : > { %v14840_v34 = vsel %vm8358_vm7, %v8557_v5, %v14758_v38  ;;  %v6705_v50 = vsel %vm14818_vm9, %v6702_v3, %v6699_v9  ;;  %v6720_v20 = vmul.f32 %v6719_v10, %v5635_v7  ;;  %v6760_v17 = vadd.f32 1.0, %v5640_v51  ;;  %17265 = vst [vmem:[#allocation10_spill] sm:$0xff] %v14846_v22  ;;  %v14854_v13 = vpop.f32.mrb[209].mxu0  ;;  %v14856_v53 = vpop.f32.mrb[209].mxu1  ;;  %v17270_v9 = vld [vmem:[#allocation69_spill] sm:$0xff] }
 0x554   : > { %v9679_v27 = vpop.eup %9678  ;;  %v8543_v60 = vrot.slane %v6705_v50, 4  ;;  %v6763_v4 = vmul.f32 -0.5, %v5640_v51  ;;  %v5642_v45 = vmax.f32 %v5386_v55, 0.0  ;;  %v5087_v47 = vmax.f32 %v3955_v49, -2.3819763e+38  ;;  %17267 = vst [vmem:[#allocation51_spill] sm:$0xff] %v14854_v13 }
 0x555   : > { %v6717_v46 = vmul.f32 0.6931472, %v9679_v27  ;;  %9680 = vlog2.f32 %v6760_v17  ;;  %v3966_v8 = vrot.slane %v3965_v28, 2  ;;  %v3999_v41 = vrot.slane %v3998_v26, 4  ;;  %17268 = vst [vmem:[#allocation53_spill] sm:$0xff] %v14856_v53  ;;  %v14865_v55 = vpop.f32.mrb[210].mxu0 }
 0x556   : > { %v14850_v38 = vsel %vm8358_vm7, %v8543_v60, %v14769_v0  ;;  %v6766_v3 = vand.u32 2147483647, %v5640_v51  ;;  %v6778_v7 = vadd.f32 1.0, %v5642_v45  ;;  %v2911_v10 = vadd.f32 %v17262_v15, %v17266_v16  ;;  %17271 = vst [vmem:[#allocation38_spill] sm:$0xff] %v14865_v55 }
 0x557   : > { %v6723_v21 = vsel %vm14834_vm12, %v6720_v20, %v6717_v46  ;;  %v5385_v40 = vadd.f32 %v13768_v11, %v5087_v47  ;;  %v2903_v5 = vadd.f32 %v17261_v57, %v17269_v14  ;;  %v2905_v0 = vadd.f32 %v17261_v57, %v17270_v9 }
 0x558   : > { %v8571_v49 = vrot.slane %v6723_v21, 4  ;;  %v6764_v50 = vadd.f32 1.0, %v6763_v4  ;;  %9682 = vlog2.f32 %v6778_v7  ;;  %v3967_v17 = vmax.f32 %v3965_v28, %v3966_v8  ;;  %v14875_v7 = vpop.f32.mrb[210].mxu1 }
 0x559   : > { %v6781_v27 = vmul.f32 -0.5, %v5642_v45  ;;  %v5641_v60 = vmax.f32 %v5385_v40, 0.0  ;;  %v4000_v16 = vmax.f32 %v3998_v26, %v3999_v41  ;;  %v4013_v53 = vrot.slane %v4012_v12, 4 }
 0x55a   : > { %v14869_v36 = vsel %vm8358_vm7, %v8571_v49, %v14778_v58  ;;  %vm14871_vm14 = vcmp.lt.f32.partialorder %v6766_v3, 0.0004427343  ;;  %v3968_v47 = vrot.slane %v3967_v17, 1  ;;  %v4005_v57 = vmax.f32 %v2903_v5, %v2911_v10 }
 0x55b   : > { %v6784_v46 = vand.u32 2147483647, %v5642_v45  ;;  %v6769_v14 = vadd.f32 1.0, %v5641_v60  ;;  %v6772_v21 = vmul.f32 -0.5, %v5641_v60  ;;  %v4001_v4 = vrot.slane %v4000_v16, 2 }
 0x55c   : > { %v3969_v28 = vmax.f32 %v3967_v17, %v3968_v47  ;;  %v4014_v8 = vmax.f32 %v4012_v12, %v4013_v53  ;;  %v4006_v26 = vrot.slane %v4005_v57, 4  ;;  %v2913_v41 = vadd.f32 %v17262_v15, %v14399_v37 }
 0x55d   : > { %v6782_v58 = vadd.f32 1.0, %v6781_v27  ;;  %9684 = vlog2.f32 %v6769_v14  ;;  %v6775_v3 = vand.u32 2147483647, %v5641_v60  ;;  %v4002_v40 = vmax.f32 %v4000_v16, %v4001_v4  ;;  %v14888_v14 = vpop.f32.mrb[211].mxu0  ;;  %v17282_v16 = vld [vmem:[#allocation21_spill] sm:$0xff] }
 0x55e   : > { %v5089_v9 = vmax.f32 %v3969_v28, -2.3819763e+38  ;;  %v4015_v49 = vrot.slane %v4014_v8, 2  ;;  %v4007_v55 = vmax.f32 %v4005_v57, %v4006_v26  ;;  %v4019_v10 = vmax.f32 %v2905_v0, %v2913_v41  ;;  %v14894_v41 = vpop.f32.mrb[211].mxu1 }
 0x55f   : > { %v9681_v5 = vpop.eup %9680  ;;  %v6765_v13 = vmul.f32 %v6764_v50, %v5640_v51  ;;  %vm14879_vm1 = vcmp.lt.f32.partialorder %v6784_v46, 0.0004427343  ;;  %v6773_v17 = vadd.f32 1.0, %v6772_v21  ;;  %v4003_v12 = vrot.slane %v4002_v40, 1 }
 0x560   : > { %v6762_v53 = vmul.f32 0.6931472, %v9681_v5  ;;  %v5387_v47 = vadd.f32 %v13775_v30, %v5089_v9  ;;  %v4016_v37 = vmax.f32 %v4014_v8, %v4015_v49  ;;  %v4008_v15 = vrot.slane %v4007_v55, 2  ;;  %v17278_v9 = vld [vmem:[#allocation33_spill] sm:$0xff] }
 0x561   : > { %v6783_v27 = vmul.f32 %v6782_v58, %v5642_v45  ;;  %vm14884_vm2 = vcmp.lt.f32.partialorder %v6775_v3, 0.0004427343  ;;  %v4004_v57 = vmax.f32 %v4002_v40, %v4003_v12  ;;  %v4020_v0 = vrot.slane %v4019_v10, 4 }
 0x562   : > { %v9683_v51 = vpop.eup %9682  ;;  %v6768_v50 = vsel %vm14871_vm14, %v6765_v13, %v6762_v53  ;;  %v14892_v46 = vmax.f32 %v5387_v47, 0.0  ;;  %v4017_v21 = vrot.slane %v4016_v37, 1  ;;  %v4009_v4 = vmax.f32 %v4007_v55, %v4008_v15 }
 0x563   : > { %v8531_v28 = vrot.slane %v6768_v50, 3  ;;  %v6780_v8 = vmul.f32 0.6931472, %v9683_v51  ;;  %v5094_v26 = vmax.f32 %v4004_v57, -2.3819763e+38  ;;  %v4021_v45 = vmax.f32 %v4019_v10, %v4020_v0 }
 0x564   : > { %v6774_v58 = vmul.f32 %v6773_v17, %v5641_v60  ;;  %v6787_v3 = vadd.f32 1.0, %v14892_v46  ;;  %v4018_v40 = vmax.f32 %v4016_v37, %v4017_v21  ;;  %v2918_v49 = vadd.f32 %v17278_v9, %v14433_v48 }
 0x565   : > { %v14901_v13 = vsel %vm8361_vm13, %v8531_v28, %v14816_v42  ;;  %v6786_v55 = vsel %vm14879_vm1, %v6783_v27, %v6780_v8  ;;  %v5392_v20 = vadd.f32 %v13736_v23, %v5094_v26  ;;  %v4010_v5 = vrot.slane %v4009_v4, 1  ;;  %v17279_v27 = vld [vmem:[#allocation55_spill] sm:$0xff] }
 0x566   : > { %v8559_v10 = vrot.slane %v6786_v55, 3  ;;  %9686 = vlog2.f32 %v6787_v3  ;;  %v6790_v60 = vmul.f32 -0.5, %v14892_v46  ;;  %v2920_v17 = vadd.f32 %v17278_v9, %v14435_v54 }
 0x567   : > { %v9685_v12 = vpop.eup %9684  ;;  %v5648_v53 = vmax.f32 %v5392_v20, 0.0  ;;  %v5096_v48 = vmax.f32 %v4018_v40, -2.3819763e+38  ;;  %v4011_v47 = vmax.f32 %v4009_v4, %v4010_v5  ;;  %v4022_v37 = vrot.slane %v4021_v45, 2 }
 0x568   : > { %v14911_v42 = vsel %vm8361_vm13, %v8559_v10, %v14840_v34  ;;  %v6771_v22 = vmul.f32 0.6931472, %v9685_v12  ;;  %v2919_v15 = vadd.f32 %v17278_v9, %v14440_v63  ;;  %v2926_v57 = vadd.f32 %v17279_v27, %v14452_v18 }
 0x569   : > { %v6793_v0 = vand.u32 2147483647, %v14892_v46  ;;  %v6832_v51 = vadd.f32 1.0, %v5648_v53  ;;  %v6835_v54 = vmul.f32 -0.5, %v5648_v53  ;;  %v5394_v50 = vadd.f32 %v13740_v29, %v5096_v48 }
 0x56a   : > { %v6777_v21 = vsel %vm14884_vm2, %v6774_v58, %v6771_v22  ;;  %v5095_v4 = vmax.f32 %v4011_v47, -2.3819763e+38  ;;  %v4023_v28 = vmax.f32 %v4021_v45, %v4022_v37  ;;  %v4054_v34 = vmax.f32 %v2918_v49, %v2926_v57  ;;  %v17283_v58 = vld [vmem:[#allocation80_spill] sm:$0xff]  ;;  %v14936_v47 = vpop.f32.mrb[212].mxu0 }
 0x56b   : > { %v8545_v8 = vrot.slane %v6777_v21, 3  ;;  %v6791_v26 = vadd.f32 1.0, %v6790_v60  ;;  %9688 = vlog2.f32 %v6832_v51  ;;  %v6838_v3 = vand.u32 2147483647, %v5648_v53  ;;  %v14940_v51 = vpop.f32.mrb[213].mxu0 }
 0x56c   : > { %v5650_v63 = vmax.f32 %v5394_v50, 0.0  ;;  %v5393_v40 = vadd.f32 %v13768_v11, %v5095_v4  ;;  %v4024_v18 = vrot.slane %v4023_v28, 1  ;;  %v4055_v55 = vrot.slane %v4054_v34, 4  ;;  %17285 = vst [vmem:[#allocation52_spill] sm:$0xff] %v14940_v51  ;;  %v17288_v4 = vld [vmem:[#allocation72_spill] sm:$0xff] }
 0x56d   : > { %v14924_v20 = vsel %vm8361_vm13, %v8545_v8, %v14850_v38  ;;  %vm14926_vm0 = vcmp.lt.f32.partialorder %v6793_v0, 0.0004427343  ;;  %v2928_v45 = vadd.f32 %v17279_v27, %v17282_v16  ;;  %v2927_v49 = vadd.f32 %v17279_v27, %v17283_v58  ;;  %v14938_v0 = vpop.f32.mrb[212].mxu1 }
 0x56e   : > { %v6836_v10 = vadd.f32 1.0, %v6835_v54  ;;  %v6850_v60 = vadd.f32 1.0, %v5650_v63  ;;  %v6853_v12 = vmul.f32 -0.5, %v5650_v63  ;;  %v14934_v48 = vmax.f32 %v5393_v40, 0.0  ;;  %17284 = vst [vmem:[#allocation13_spill] sm:$0xff] %v14938_v0  ;;  %v14949_v40 = vpop.f32.mrb[213].mxu1 }
 0x56f   : > { %v4025_v37 = vmax.f32 %v4023_v28, %v4024_v18  ;;  %v4056_v38 = vmax.f32 %v4054_v34, %v4055_v55  ;;  %v4068_v22 = vmax.f32 %v2920_v17, %v2928_v45  ;;  %v4061_v57 = vmax.f32 %v2919_v15, %v2927_v49  ;;  %17289 = vst [vmem:[#allocation14_spill] sm:$0xff] %v14949_v40  ;;  %v14951_v28 = vpop.f32.mrb[214].mxu0  ;;  %v14954_v45 = vpop.f32.mrb[214].mxu1 }
 0x570   : > { %v9687_v50 = vpop.eup %9686  ;;  %vm14942_vm4 = vcmp.lt.f32.partialorder %v6838_v3, 0.0004427343  ;;  %9690 = vlog2.f32 %v6850_v60  ;;  %v6841_v54 = vadd.f32 1.0, %v14934_v48  ;;  %v2921_v8 = vadd.f32 %v17278_v9, %v17288_v4  ;;  %17290 = vst [vmem:[#allocation11_spill] sm:$0xff] %v14951_v28  ;;  %17291 = vst [vmem:[#allocation54_spill] sm:$0xff] %v14954_v45 }
 0x571   : > { %v6789_v17 = vmul.f32 0.6931472, %v9687_v50  ;;  %v6792_v15 = vmul.f32 %v6791_v26, %v14892_v46  ;;  %v6856_v34 = vand.u32 2147483647, %v5650_v63  ;;  %v4057_v18 = vrot.slane %v4056_v38, 2 }
 0x572   : > { %v6837_v55 = vmul.f32 %v6836_v10, %v5648_v53  ;;  %9692 = vlog2.f32 %v6841_v54  ;;  %v5097_v3 = vmax.f32 %v4025_v37, -2.3819763e+38  ;;  %v4069_v16 = vrot.slane %v4068_v22, 4  ;;  %v17294_v54 = vld [vmem:[#allocation22_spill] sm:$0xff] }
 0x573   : > { %v6795_v58 = vsel %vm14926_vm0, %v6792_v15, %v6789_v17  ;;  %v6854_v49 = vadd.f32 1.0, %v6853_v12  ;;  %v6844_v9 = vmul.f32 -0.5, %v14934_v48  ;;  %v4058_v60 = vmax.f32 %v4056_v38, %v4057_v18 }
 0x574   : > { %v8573_v4 = vrot.slane %v6795_v58, 3  ;;  %v5395_v50 = vadd.f32 %v13775_v30, %v5097_v3  ;;  %v4070_v40 = vmax.f32 %v4068_v22, %v4069_v16  ;;  %v4062_v46 = vrot.slane %v4061_v57, 4  ;;  %v14971_v22 = vpop.f32.mrb[215].mxu0 }
 0x575   : > { %v9689_v26 = vpop.eup %9688  ;;  %vm14960_vm5 = vcmp.lt.f32.partialorder %v6856_v34, 0.0004427343  ;;  %v6847_v10 = vand.u32 2147483647, %v14934_v48  ;;  %v4059_v37 = vrot.slane %v4058_v60, 1  ;;  %v2929_v5 = vadd.f32 %v17279_v27, %v17294_v54  ;;  %17295 = vst [vmem:[#allocation34_spill] sm:$0xff] %v14971_v22 }
 0x576   : > { %v14969_v12 = vsel %vm8361_vm13, %v8573_v4, %v14869_v36  ;;  %v6834_v38 = vmul.f32 0.6931472, %v9689_v26  ;;  %v5651_v17 = vmax.f32 %v5395_v50, 0.0  ;;  %v4071_v15 = vrot.slane %v4070_v40, 2 }
 0x577   : > { %v6855_v18 = vmul.f32 %v6854_v49, %v5650_v63  ;;  %v4060_v34 = vmax.f32 %v4058_v60, %v4059_v37  ;;  %v4063_v3 = vmax.f32 %v4061_v57, %v4062_v46  ;;  %v4075_v16 = vmax.f32 %v2921_v8, %v2929_v5  ;;  %v14979_v57 = vpop.f32.mrb[215].mxu1 }
 0x578   : > { %v6840_v58 = vsel %vm14942_vm4, %v6837_v55, %v6834_v38  ;;  %v6845_v51 = vadd.f32 1.0, %v6844_v9  ;;  %v6859_v45 = vadd.f32 1.0, %v5651_v17  ;;  %v6862_v0 = vmul.f32 -0.5, %v5651_v17  ;;  %17298 = vst [vmem:[#allocation40_spill] sm:$0xff] %v14979_v57 }
 0x579   : > { %v8533_v27 = vrot.slane %v6840_v58, 2  ;;  %v5102_v54 = vmax.f32 %v4060_v34, -2.3819763e+38  ;;  %v4072_v28 = vmax.f32 %v4070_v40, %v4071_v15  ;;  %v4064_v36 = vrot.slane %v4063_v3, 2  ;;  %v17299_v58 = vld [vmem:[#allocation16_spill] sm:$0xff] }
 0x57a   : > { %v9691_v4 = vpop.eup %9690  ;;  %vm14975_vm8 = vcmp.lt.f32.partialorder %v6847_v10, 0.0004427343  ;;  %9694 = vlog2.f32 %v6859_v45  ;;  %v6865_v63 = vand.u32 2147483647, %v5651_v17  ;;  %v4076_v49 = vrot.slane %v4075_v16, 4 }
 0x57b   : > { %v14983_v21 = vsel %vm8364_vm3, %v8533_v27, %v14901_v13  ;;  %v6852_v8 = vmul.f32 0.6931472, %v9691_v4  ;;  %v5400_v55 = vadd.f32 %v13736_v23, %v5102_v54  ;;  %v4073_v9 = vrot.slane %v4072_v28, 1  ;;  %v17300_v27 = vld [vmem:[#allocation56_spill] sm:$0xff] }
 0x57c   : > { %v9693_v40 = vpop.eup %9692  ;;  %v6846_v60 = vmul.f32 %v6845_v51, %v14934_v48  ;;  %v6863_v46 = vadd.f32 1.0, %v6862_v0  ;;  %v4065_v26 = vmax.f32 %v4063_v3, %v4064_v36  ;;  %v4077_v10 = vmax.f32 %v4075_v16, %v4076_v49  ;;  %v17303_v51 = vld [vmem:[#allocation77_spill] sm:$0xff] }
 0x57d   : > { %v6858_v45 = vsel %vm14960_vm5, %v6855_v18, %v6852_v8  ;;  %v6843_v37 = vmul.f32 0.6931472, %v9693_v40  ;;  %v5656_v5 = vmax.f32 %v5400_v55, 0.0  ;;  %v4074_v38 = vmax.f32 %v4072_v28, %v4073_v9  ;;  %v17304_v9 = vld [vmem:[#allocation27_spill] sm:$0xff]  ;;  %v17305_v40 = vld [vmem:[#allocation60_spill] sm:$0xff] }
 0x57e   : > { %v8561_v15 = vrot.slane %v6858_v45, 2  ;;  %v4066_v34 = vrot.slane %v4065_v26, 1  ;;  %v4078_v13 = vrot.slane %v4077_v10, 2  ;;  %v2934_v4 = vadd.f32 %v17300_v27, %v17299_v58 }
 0x57f   : > { %v6849_v54 = vsel %vm14975_vm8, %v6846_v60, %v6843_v37  ;;  %vm14993_vm9 = vcmp.lt.f32.partialorder %v6865_v63, 0.0004427343  ;;  %v6904_v0 = vadd.f32 1.0, %v5656_v5  ;;  %v2936_v53 = vadd.f32 %v17300_v27, %v17303_v51 }
 0x580   : > { %v15001_v28 = vsel %vm8364_vm3, %v8561_v15, %v14911_v42  ;;  %v8547_v18 = vrot.slane %v6849_v54, 2  ;;  %v5104_v3 = vmax.f32 %v4074_v38, -2.3819763e+38  ;;  %v4067_v16 = vmax.f32 %v4065_v26, %v4066_v34  ;;  %v17306_v42 = vld [vmem:[#allocation20_spill] sm:$0xff]  ;;  %v17307_v38 = vld [vmem:[#allocation78_spill] sm:$0xff] }
 0x581   : > { %v6864_v36 = vmul.f32 %v6863_v46, %v5651_v17  ;;  %9696 = vlog2.f32 %v6904_v0  ;;  %v6907_v49 = vmul.f32 -0.5, %v5656_v5  ;;  %v4079_v50 = vmax.f32 %v4077_v10, %v4078_v13  ;;  %v17308_v46 = vld [vmem:[#allocation31_spill] sm:$0xff] }
 0x582   : > { %v15005_v63 = vsel %vm8364_vm3, %v8547_v18, %v14924_v20  ;;  %v5402_v8 = vadd.f32 %v13740_v29, %v5104_v3  ;;  %v5103_v55 = vmax.f32 %v4067_v16, -2.3819763e+38  ;;  %v2942_v60 = vadd.f32 %v17305_v40, %v17304_v9 }
 0x583   : > { %v4080_v45 = vrot.slane %v4079_v50, 1  ;;  %v2935_v37 = vadd.f32 %v17300_v27, %v17306_v42  ;;  %v2944_v17 = vadd.f32 %v17305_v40, %v17307_v38  ;;  %v2943_v26 = vadd.f32 %v17305_v40, %v17308_v46  ;;  %v15017_v42 = vpop.f32.mrb[216].mxu0 }
 0x584   : > { %v9695_v10 = vpop.eup %9694  ;;  %v6910_v15 = vand.u32 2147483647, %v5656_v5  ;;  %v5658_v20 = vmax.f32 %v5402_v8, 0.0  ;;  %v5401_v34 = vadd.f32 %v13768_v11, %v5103_v55  ;;  %v4110_v13 = vmax.f32 %v2934_v4, %v2942_v60  ;;  %v15021_v8 = vpop.f32.mrb[216].mxu1 }
 0x585   : > { %v6861_v58 = vmul.f32 0.6931472, %v9695_v10  ;;  %v4081_v54 = vmax.f32 %v4079_v50, %v4080_v45  ;;  %v4124_v0 = vmax.f32 %v2936_v53, %v2944_v17  ;;  %v4117_v51 = vmax.f32 %v2935_v37, %v2943_v26  ;;  %v15023_v55 = vpop.f32.mrb[217].mxu0  ;;  %v15031_v60 = vpop.f32.mrb[217].mxu1 }
 0x586   : > { %v6908_v18 = vadd.f32 1.0, %v6907_v49  ;;  %v6922_v3 = vadd.f32 1.0, %v5658_v20  ;;  %v6925_v16 = vmul.f32 -0.5, %v5658_v20  ;;  %v5657_v9 = vmax.f32 %v5401_v34, 0.0  ;;  %17309 = vst [vmem:[#allocation59_spill] sm:$0xff] %v15023_v55  ;;  %v17312_v49 = vld [vmem:[#allocation82_spill] sm:$0xff] }
 0x587   : > { %v6867_v38 = vsel %vm14993_vm9, %v6864_v36, %v6861_v58  ;;  %v5105_v46 = vmax.f32 %v4081_v54, -2.3819763e+38  ;;  %v4111_v57 = vrot.slane %v4110_v13, 4  ;;  %v4125_v22 = vrot.slane %v4124_v0, 4  ;;  %17313 = vst [vmem:[#allocation39_spill] sm:$0xff] %v15031_v60  ;;  %v15033_v48 = vpop.f32.mrb[218].mxu0 }
 0x588   : > { %v8575_v4 = vrot.slane %v6867_v38, 2  ;;  %vm15025_vm12 = vcmp.lt.f32.partialorder %v6910_v15, 0.0004427343  ;;  %9698 = vlog2.f32 %v6922_v3  ;;  %v2937_v50 = vadd.f32 %v17300_v27, %v17312_v49  ;;  %17314 = vst [vmem:[#allocation62_spill] sm:$0xff] %v15033_v48  ;;  %v15036_v26 = vpop.f32.mrb[218].mxu1  ;;  %v17316_v38 = vld [vmem:[#allocation103_spill] sm:$0xff] }
 0x589   : > { %v6928_v36 = vand.u32 2147483647, %v5658_v20  ;;  %v6913_v45 = vadd.f32 1.0, %v5657_v9  ;;  %v6916_v37 = vmul.f32 -0.5, %v5657_v9  ;;  %v5403_v17 = vadd.f32 %v13775_v30, %v5105_v46  ;;  %17315 = vst [vmem:[#allocation57_spill] sm:$0xff] %v15036_v26  ;;  %v15046_v60 = vpop.f32.mrb[219].mxu0 }
 0x58a   : > { %v15040_v10 = vsel %vm8364_vm3, %v8575_v4, %v14969_v12  ;;  %v6909_v15 = vmul.f32 %v6908_v18, %v5656_v5  ;;  %v4112_v34 = vmax.f32 %v4110_v13, %v4111_v57  ;;  %v4126_v58 = vmax.f32 %v4124_v0, %v4125_v22  ;;  %17317 = vst [vmem:[#allocation15_spill] sm:$0xff] %v15046_v60 }
 0x58b   : > { %v9697_v54 = vpop.eup %9696  ;;  %v6926_v27 = vadd.f32 1.0, %v6925_v16  ;;  %9700 = vlog2.f32 %v6913_v45  ;;  %v15042_v3 = vmax.f32 %v5403_v17, 0.0  ;;  %v2945_v49 = vadd.f32 %v17305_v40, %v17316_v38 }
 0x58c   : > { %v6906_v46 = vmul.f32 0.6931472, %v9697_v54  ;;  %v4113_v55 = vrot.slane %v4112_v34, 2  ;;  %v4127_v26 = vrot.slane %v4126_v58, 2  ;;  %v4118_v48 = vrot.slane %v4117_v51, 4 }
 0x58d   : > { %vm15048_vm14 = vcmp.lt.f32.partialorder %v6928_v36, 0.0004427343  ;;  %v6917_v57 = vadd.f32 1.0, %v6916_v37  ;;  %v6919_v22 = vand.u32 2147483647, %v5657_v9  ;;  %v6931_v5 = vadd.f32 1.0, %v15042_v3 }
 0x58e   : > { %v6912_v13 = vsel %vm15025_vm12, %v6909_v15, %v6906_v46  ;;  %v4114_v0 = vmax.f32 %v4112_v34, %v4113_v55  ;;  %v4128_v18 = vmax.f32 %v4126_v58, %v4127_v26  ;;  %v4119_v40 = vmax.f32 %v4117_v51, %v4118_v48  ;;  %v15063_v51 = vpop.f32.mrb[219].mxu1 }
 0x58f   : > { %v8535_v16 = vrot.slane %v6912_v13, 1  ;;  %v6927_v4 = vmul.f32 %v6926_v27, %v5658_v20  ;;  %9702 = vlog2.f32 %v6931_v5  ;;  %v6934_v45 = vmul.f32 -0.5, %v15042_v3  ;;  %v17322_v27 = vld [vmem:[#allocation45_spill] sm:$0xff] }
 0x590   : > { %v4115_v36 = vrot.slane %v4114_v0, 1  ;;  %v4129_v17 = vrot.slane %v4128_v18, 1  ;;  %v4120_v54 = vrot.slane %v4119_v40, 2  ;;  %v4131_v38 = vmax.f32 %v2937_v50, %v2945_v49 }
 0x591   : > { %v8536_v37 = vsel %vm8367_vm11, %v8535_v16, %v14983_v21  ;;  %v6918_v60 = vmul.f32 %v6917_v57, %v5657_v9  ;;  %vm15058_vm1 = vcmp.lt.f32.partialorder %v6919_v22, 0.0004427343  ;;  %v6937_v55 = vand.u32 2147483647, %v15042_v3  ;;  %v17323_v9 = vld [vmem:[#allocation66_spill] sm:$0xff] }
 0x592   : > { %v9699_v20 = vpop.eup %9698  ;;  %8847 = vst [vmem:[%s11470_s10 + $0x60] sm:$0xff] %v8536_v37  ;;  %v4116_v48 = vmax.f32 %v4114_v0, %v4115_v36  ;;  %v4130_v26 = vmax.f32 %v4128_v18, %v4129_v17  ;;  %v4121_v15 = vmax.f32 %v4119_v40, %v4120_v54  ;;  %v4132_v34 = vrot.slane %v4131_v38, 4 }
 0x593   : > { %v6924_v58 = vmul.f32 0.6931472, %v9699_v20  ;;  %v6935_v50 = vadd.f32 1.0, %v6934_v45  ;;  %v2950_v21 = vadd.f32 %v17322_v27, %v14637_v44  ;;  %v2958_v49 = vadd.f32 %v17323_v9, %v14646_v43 }
 0x594   : > { %v5110_v46 = vmax.f32 %v4116_v48, -2.3819763e+38  ;;  %v5112_v57 = vmax.f32 %v4130_v26, -2.3819763e+38  ;;  %v4122_v22 = vrot.slane %v4121_v15, 1  ;;  %v4133_v5 = vmax.f32 %v4131_v38, %v4132_v34 }
 0x595   : > { %v9701_v13 = vpop.eup %9700  ;;  %v6930_v16 = vsel %vm15048_vm14, %v6927_v4, %v6924_v58  ;;  %v2952_v0 = vadd.f32 %v17322_v27, %v14639_v32  ;;  %v4166_v18 = vmax.f32 %v2950_v21, %v2958_v49  ;;  %v2960_v40 = vadd.f32 %v17323_v9, %v14648_v2 }
 0x596   : > { %v8563_v44 = vrot.slane %v6930_v16, 1  ;;  %v6915_v45 = vmul.f32 0.6931472, %v9701_v13  ;;  %v5408_v43 = vadd.f32 %v13736_v23, %v5110_v46  ;;  %v5410_v36 = vadd.f32 %v13740_v29, %v5112_v57 }
 0x597   : > { %v4123_v17 = vmax.f32 %v4121_v15, %v4122_v22  ;;  %v4134_v54 = vrot.slane %v4133_v5, 2  ;;  %v4167_v38 = vrot.slane %v4166_v18, 4  ;;  %v4180_v37 = vmax.f32 %v2952_v0, %v2960_v40 }
 0x598   : > { %v8564_v12 = vsel %vm8367_vm11, %v8563_v44, %v15001_v28  ;;  %v6921_v32 = vsel %vm15058_vm1, %v6918_v60, %v6915_v45  ;;  %v5664_v4 = vmax.f32 %v5408_v43, 0.0  ;;  %v15082_v20 = vmax.f32 %v5410_v36, 0.0 }
 0x599   : > { %v9703_v2 = vpop.eup %9702  ;;  %8849 = vst [vmem:[%s11470_s10 + $0x70] sm:$0xff] %v8564_v12  ;;  %v8549_v48 = vrot.slane %v6921_v32, 1  ;;  %v6936_v26 = vmul.f32 %v6935_v50, %v15042_v3  ;;  %v5111_v34 = vmax.f32 %v4123_v17, -2.3819763e+38  ;;  %v4135_v21 = vmax.f32 %v4133_v5, %v4134_v54 }
 0x59a   : > { %v6933_v15 = vmul.f32 0.6931472, %v9703_v2  ;;  %v6976_v58 = vadd.f32 1.0, %v5664_v4  ;;  %v4168_v49 = vmax.f32 %v4166_v18, %v4167_v38  ;;  %vm6938_vm2 = vcmp.lt.f32.partialorder %v6937_v55, 0.0004427343  ;;  %v15100_v18 = vpop.f32.mrb[220].mxu0 }
 0x59b   : > { %v8550_v28 = vsel %vm8367_vm11, %v8549_v48, %v15005_v63  ;;  %v6994_v60 = vadd.f32 1.0, %v15082_v20  ;;  %v2959_v53 = vadd.f32 %v17323_v9, %v14658_v24  ;;  %v2951_v3 = vadd.f32 %v17322_v27, %v14642_v19  ;;  %v15102_v19 = vpop.f32.mrb[220].mxu1  ;;  %v15107_v45 = vpop.f32.mrb[221].mxu0 }
 0x59c   : > { %8848 = vst [vmem:[%s11470_s10 + $0x68] sm:$0xff] %v8550_v28  ;;  %v6939_v46 = vsel %vm6938_vm2, %v6936_v26, %v6933_v15  ;;  %9704 = vlog2.f32 %v6976_v58  ;;  %v6979_v57 = vmul.f32 -0.5, %v5664_v4  ;;  %v2953_v22 = vadd.f32 %v17322_v27, %v14644_v56  ;;  %17324 = vst [vmem:[#allocation43_spill] sm:$0xff] %v15107_v45  ;;  %v15109_v43 = vpop.f32.mrb[221].mxu1  ;;  %v15111_v38 = vpop.f32.mrb[222].mxu0 }
 0x59d   : > { %v8577_v50 = vrot.slane %v6939_v46, 1  ;;  %v6997_v63 = vmul.f32 -0.5, %v15082_v20  ;;  %v5409_v55 = vadd.f32 %v13768_v11, %v5111_v34  ;;  %v4136_v5 = vrot.slane %v4135_v21, 1  ;;  %17325 = vst [vmem:[#allocation92_spill] sm:$0xff] %v15109_v43  ;;  %v15113_v12 = vpop.f32.mrb[222].mxu1  ;;  %v15117_v28 = vpop.f32.mrb[223].mxu0 }
 0x59e   : > { %v4169_v13 = vrot.slane %v4168_v49, 2  ;;  %9706 = vlog2.f32 %v6994_v60  ;;  %v4181_v16 = vrot.slane %v4180_v37, 4  ;;  %v4173_v0 = vmax.f32 %v2951_v3, %v2959_v53  ;;  %17326 = vst [vmem:[#allocation19_spill] sm:$0xff] %v15117_v28 }
 0x59f   : > { %v8578_v24 = vsel %vm8367_vm11, %v8577_v50, %v15040_v10  ;;  %v5665_v40 = vmax.f32 %v5409_v55, 0.0  ;;  %v4137_v44 = vmax.f32 %v4135_v21, %v4136_v5  ;;  %v2961_v27 = vadd.f32 %v17323_v9, %v14670_v62  ;;  %v15130_v55 = vpop.f32.mrb[223].mxu1 }
 0x5a0   : > { %8850 = vst [vmem:[%s11470_s10 + $0x78] sm:$0xff] %v8578_v24  ;;  %v4170_v56 = vmax.f32 %v4168_v49, %v4169_v13  ;;  %v6980_v36 = vadd.f32 1.0, %v6979_v57  ;;  %v6982_v10 = vand.u32 2147483647, %v5664_v4  ;;  %v4182_v17 = vmax.f32 %v4180_v37, %v4181_v16  ;;  %17330 = vst [vmem:[#allocation37_spill] sm:$0xff] %v15130_v55 }
 0x5a1   : > { %v4174_v54 = vrot.slane %v4173_v0, 4  ;;  %v6998_v32 = vadd.f32 1.0, %v6997_v63  ;;  %v6985_v2 = vadd.f32 1.0, %v5665_v40  ;;  %v6988_v48 = vmul.f32 -0.5, %v5665_v40 }
 0x5a2   : > { %v5113_v26 = vmax.f32 %v4137_v44, -2.3819763e+38  ;;  %v4171_v34 = vrot.slane %v4170_v56, 1  ;;  %v4183_v15 = vrot.slane %v4182_v17, 2  ;;  %v4187_v62 = vmax.f32 %v2953_v22, %v2961_v27  ;;  %v17329_v22 = vld [vmem:[#allocation74_spill] sm:$0xff] }
 0x5a3   : > { %v4175_v58 = vmax.f32 %v4173_v0, %v4174_v54  ;;  %v7000_v9 = vand.u32 2147483647, %v15082_v20  ;;  %v6989_v21 = vadd.f32 1.0, %v6988_v48  ;;  %9708 = vlog2.f32 %v6985_v2 }
 0x5a4   : > { %v5411_v49 = vadd.f32 %v13775_v30, %v5113_v26  ;;  %v4172_v37 = vmax.f32 %v4170_v56, %v4171_v34  ;;  %v4184_v60 = vmax.f32 %v4182_v17, %v4183_v15  ;;  %v15119_v46 = vmul.f32 %v6980_v36, %v5664_v4 }
 0x5a5   : > { %v4176_v53 = vrot.slane %v4175_v58, 2  ;;  %vm15121_vm0 = vcmp.lt.f32.partialorder %v6982_v10, 0.0004427343  ;;  %v15126_v50 = vmul.f32 %v6998_v32, %v15082_v20  ;;  %v2966_v63 = vadd.f32 %v17329_v22, %v14699_v1 }
 0x5a6   : > { %v5667_v57 = vmax.f32 %v5411_v49, 0.0  ;;  %v9705_v5 = vpop.eup %9704  ;;  %v5118_v13 = vmax.f32 %v4172_v37, -2.3819763e+38  ;;  %v4185_v24 = vrot.slane %v4184_v60, 1  ;;  %v4188_v0 = vrot.slane %v4187_v62, 4  ;;  %v17335_v37 = vld [vmem:[#allocation50_spill] sm:$0xff] }
 0x5a7   : > { %v4177_v16 = vmax.f32 %v4175_v58, %v4176_v53  ;;  %vm15132_vm4 = vcmp.lt.f32.partialorder %v7000_v9, 0.0004427343  ;;  %v15136_v44 = vmul.f32 %v6989_v21, %v5665_v40  ;;  %v6991_v56 = vand.u32 2147483647, %v5665_v40  ;;  %v17333_v9 = vld [vmem:[#allocation12_spill] sm:$0xff] }
 0x5a8   : > { %v7003_v20 = vadd.f32 1.0, %v5667_v57  ;;  %v2968_v27 = vadd.f32 %v17329_v22, %v14701_v6  ;;  %v9707_v36 = vpop.eup %9706  ;;  %v7006_v1 = vmul.f32 -0.5, %v5667_v57  ;;  %v5416_v10 = vadd.f32 %v13736_v23, %v5118_v13  ;;  %v17334_v21 = vld [vmem:[#allocation76_spill] sm:$0xff] }
 0x5a9   : > { %v4186_v17 = vmax.f32 %v4184_v60, %v4185_v24  ;;  %v4178_v54 = vrot.slane %v4177_v16, 1  ;;  %v15141_v32 = vmul.f32 0.6931472, %v9705_v5  ;;  %v2967_v2 = vadd.f32 %v17329_v22, %v14708_v52 }
 0x5aa   : > { %9710 = vlog2.f32 %v7003_v20  ;;  %v15147_v48 = vadd.f32 %v17329_v22, %v14710_v33  ;;  %v5672_v40 = vmax.f32 %v5416_v10, 0.0  ;;  %v4189_v6 = vmax.f32 %v4187_v62, %v4188_v0 }
 0x5ab   : > { %v5120_v26 = vmax.f32 %v4186_v17, -2.3819763e+38  ;;  %v4179_v34 = vmax.f32 %v4177_v16, %v4178_v54  ;;  %v15149_v15 = vmul.f32 0.6931472, %v9707_v36  ;;  %v7009_v58 = vand.u32 2147483647, %v5667_v57 }
 0x5ac   : > { %v2974_v49 = vadd.f32 %v17334_v21, %v17333_v9  ;;  %v2976_v60 = vadd.f32 %v17334_v21, %v17335_v37  ;;  %vm15155_vm5 = vcmp.lt.f32.partialorder %v6991_v56, 0.0004427343  ;;  %v7007_v52 = vadd.f32 1.0, %v7006_v1 }
 0x5ad   : > { %v7048_v33 = vadd.f32 1.0, %v5672_v40  ;;  %v5418_v22 = vadd.f32 %v13740_v29, %v5120_v26  ;;  %v2975_v62 = vadd.f32 %v17334_v21, %v14720_v39  ;;  %v5119_v5 = vmax.f32 %v4179_v34, -2.3819763e+38  ;;  %v9709_v0 = vpop.eup %9708 }
 0x5ae   : > { %v4190_v13 = vrot.slane %v4189_v6, 2  ;;  %v4222_v24 = vmax.f32 %v2966_v63, %v2974_v49  ;;  %v4236_v16 = vmax.f32 %v2968_v27, %v2976_v60  ;;  %v7051_v20 = vmul.f32 -0.5, %v5672_v40 }
 0x5af   : > { %9712 = vlog2.f32 %v7048_v33  ;;  %v7054_v36 = vand.u32 2147483647, %v5672_v40  ;;  %v5674_v1 = vmax.f32 %v5418_v22, 0.0  ;;  %v5417_v10 = vadd.f32 %v13768_v11, %v5119_v5 }
 0x5b0   : > { %v4191_v17 = vmax.f32 %v4189_v6, %v4190_v13  ;;  %v4223_v54 = vrot.slane %v4222_v24, 4  ;;  %v15171_v63 = vmul.f32 %v7007_v52, %v5667_v57  ;;  %v4237_v27 = vrot.slane %v4236_v16, 4  ;;  %v15183_v52 = vpop.f32.mrb[224].mxu0 }
 0x5b1   : > { %v4229_v26 = vmax.f32 %v2967_v2, %v2975_v62  ;;  %v15173_v34 = vmul.f32 0.6931472, %v9709_v0  ;;  %vm15175_vm8 = vcmp.lt.f32.partialorder %v7009_v58, 0.0004427343  ;;  %v7066_v49 = vadd.f32 1.0, %v5674_v1  ;;  %17342 = vst [vmem:[#allocation17_spill] sm:$0xff] %v15183_v52 }
 0x5b2   : > { %v7069_v37 = vmul.f32 -0.5, %v5674_v1  ;;  %v5673_v60 = vmax.f32 %v5417_v10, 0.0  ;;  %v7052_v6 = vadd.f32 1.0, %v7051_v20  ;;  %v4192_v33 = vrot.slane %v4191_v17, 1  ;;  %v15185_v58 = vpop.f32.mrb[224].mxu1  ;;  %v15187_v20 = vpop.f32.mrb[225].mxu0 }
 0x5b3   : > { %v4224_v22 = vmax.f32 %v4222_v24, %v4223_v54  ;;  %v4238_v5 = vmax.f32 %v4236_v16, %v4237_v27  ;;  %vm15179_vm9 = vcmp.lt.f32.partialorder %v7054_v36, 0.0004427343  ;;  %9714 = vlog2.f32 %v7066_v49  ;;  %17343 = vst [vmem:[#allocation58_spill] sm:$0xff] %v15185_v58  ;;  %17344 = vst [vmem:[#allocation23_spill] sm:$0xff] %v15187_v20  ;;  %v15193_v54 = vpop.f32.mrb[225].mxu1  ;;  %v15195_v27 = vpop.f32.mrb[226].mxu0 }
 0x5b4   : > { %v9711_v13 = vpop.eup %9710  ;;  %v7057_v57 = vadd.f32 1.0, %v5673_v60  ;;  %v4230_v2 = vrot.slane %v4229_v26, 4  ;;  %v7070_v62 = vadd.f32 1.0, %v7069_v37  ;;  %v7072_v0 = vand.u32 2147483647, %v5674_v1  ;;  %17345 = vst [vmem:[#allocation35_spill] sm:$0xff] %v15193_v54 }
 0x5b5   : > { %v7060_v56 = vmul.f32 -0.5, %v5673_v60  ;;  %v4193_v10 = vmax.f32 %v4191_v17, %v4192_v33  ;;  %v4225_v16 = vrot.slane %v4224_v22, 2  ;;  %v4239_v36 = vrot.slane %v4238_v5, 2  ;;  %17346 = vst [vmem:[#allocation18_spill] sm:$0xff] %v15195_v27  ;;  %v15201_v28 = vpop.f32.mrb[226].mxu1 }
 0x5b6   : > { %9716 = vlog2.f32 %v7057_v57  ;;  %v15197_v49 = vmul.f32 0.6931472, %v9711_v13  ;;  %v7053_v37 = vmul.f32 %v7052_v6, %v5672_v40  ;;  %v7063_v58 = vand.u32 2147483647, %v5673_v60  ;;  %17347 = vst [vmem:[#allocation41_spill] sm:$0xff] %v15201_v28 }
 0x5b7   : > { %v5121_v52 = vmax.f32 %v4193_v10, -2.3819763e+38  ;;  %v4226_v17 = vmax.f32 %v4224_v22, %v4225_v16  ;;  %v4240_v33 = vmax.f32 %v4238_v5, %v4239_v36  ;;  %v4231_v20 = vmax.f32 %v4229_v26, %v4230_v2 }
 0x5b8   : > { %v2977_v55 = vadd.f32 %v17334_v21, %v14728_v35  ;;  %v7071_v24 = vmul.f32 %v7070_v62, %v5674_v1  ;;  %vm15203_vm12 = vcmp.lt.f32.partialorder %v7072_v0, 0.0004427343  ;;  %v7061_v54 = vadd.f32 1.0, %v7060_v56  ;;  %v15219_v62 = vpop.f32.mrb[227].mxu0 }
 0x5b9   : > { %v9713_v57 = vpop.eup %9712  ;;  %v5419_v13 = vadd.f32 %v13775_v30, %v5121_v52  ;;  %v4227_v6 = vrot.slane %v4226_v17, 1  ;;  %v4241_v10 = vrot.slane %v4240_v33, 1  ;;  %v4232_v22 = vrot.slane %v4231_v20, 2 }
 0x5ba   : > { %v7050_v40 = vmul.f32 0.6931472, %v9713_v57  ;;  %vm15212_vm14 = vcmp.lt.f32.partialorder %v7063_v58, 0.0004427343  ;;  %v4243_v26 = vmax.f32 %v15147_v48, %v2977_v55  ;;  %v7062_v16 = vmul.f32 %v7061_v54, %v5673_v60  ;;  %v17352_v57 = vld [vmem:[#allocation83_spill] sm:$0xff] }
 0x5bb   : > { %v5675_v1 = vmax.f32 %v5419_v13, 0.0  ;;  %v4228_v5 = vmax.f32 %v4226_v17, %v4227_v6  ;;  %v4242_v2 = vmax.f32 %v4240_v33, %v4241_v10  ;;  %v4233_v52 = vmax.f32 %v4231_v20, %v4232_v22  ;;  %v17354_v17 = vld [vmem:[#allocation9_spill] sm:$0xff] }
 0x5bc   : > { %v7056_v56 = vsel %vm15179_vm9, %v7053_v37, %v7050_v40  ;;  %v2982_v58 = vadd.f32 %v17352_v57, %v14785_v59  ;;  %v4244_v45 = vrot.slane %v4243_v26, 4  ;;  %v17353_v55 = vsel %vm15121_vm0, %v15119_v46, %v15141_v32  ;;  %v15235_v40 = vpop.f32.mrb[227].mxu1  ;;  %v17355_v6 = vld [vmem:[#allocation49_spill] sm:$0xff] }
 0x5bd   : > { %v8635_v0 = vrot.slane %v7056_v56, 7  ;;  %v7075_v36 = vadd.f32 1.0, %v5675_v1  ;;  %v9715_v35 = vpop.eup %9714  ;;  %v5126_v28 = vmax.f32 %v4228_v5, -2.3819763e+38  ;;  %v5128_v27 = vmax.f32 %v4242_v2, -2.3819763e+38 }
 0x5be   : > { %v4234_v13 = vrot.slane %v4233_v52, 1  ;;  %v7068_v39 = vmul.f32 0.6931472, %v9715_v35  ;;  %v7078_v60 = vmul.f32 -0.5, %v5675_v1  ;;  %v2984_v33 = vadd.f32 %v17352_v57, %v17354_v17 }
 0x5bf   : > { %v15229_v48 = vsel %vm8349_vm6, %v8635_v0, %v17353_v55  ;;  %9718 = vlog2.f32 %v7075_v36  ;;  %v5424_v54 = vadd.f32 %v13736_v23, %v5126_v28  ;;  %v5426_v59 = vadd.f32 %v13740_v29, %v5128_v27  ;;  %v17357_v0 = vld [vmem:[#allocation101_spill] sm:$0xff]  ;;  %v17358_v36 = vld [vmem:[#allocation84_spill] sm:$0xff] }
 0x5c0   : > { %v9717_v20 = vpop.eup %9716  ;;  %v4235_v37 = vmax.f32 %v4233_v52, %v4234_v13  ;;  %v7074_v46 = vsel %vm15203_vm12, %v7071_v24, %v7068_v39  ;;  %v4245_v32 = vmax.f32 %v4243_v26, %v4244_v45  ;;  %v2983_v10 = vadd.f32 %v17352_v57, %v17355_v6  ;;  %v17359_v39 = vld [vmem:[#allocation102_spill] sm:$0xff] }
 0x5c1   : > { %v7059_v3 = vmul.f32 0.6931472, %v9717_v20  ;;  %v8663_v22 = vrot.slane %v7074_v46, 7  ;;  %v5680_v35 = vmax.f32 %v5424_v54, 0.0  ;;  %v15241_v56 = vmax.f32 %v5426_v59, 0.0 }
 0x5c2   : > { %v5127_v28 = vmax.f32 %v4235_v37, -2.3819763e+38  ;;  %v7079_v5 = vadd.f32 1.0, %v7078_v60  ;;  %v7081_v2 = vand.u32 2147483647, %v5675_v1  ;;  %v4246_v52 = vrot.slane %v4245_v32, 2 }
 0x5c3   : > { %v7065_v27 = vsel %vm15212_vm14, %v7062_v16, %v7059_v3  ;;  %v17356_v43 = vsel %vm15132_vm4, %v15126_v50, %v15149_v15  ;;  %v7120_v26 = vadd.f32 1.0, %v5680_v35  ;;  %v2990_v13 = vadd.f32 %v17358_v36, %v17357_v0  ;;  %v17363_v37 = vld [vmem:[#allocation100_spill] sm:$0xff] }
 0x5c4   : > { %v15251_v45 = vsel %vm8349_vm6, %v8663_v22, %v17356_v43  ;;  %v8649_v24 = vrot.slane %v7065_v27, 7  ;;  %v7123_v55 = vmul.f32 -0.5, %v5680_v35  ;;  %v7138_v21 = vadd.f32 1.0, %v15241_v56 }
 0x5c5   : > { %v7141_v16 = vmul.f32 -0.5, %v15241_v56  ;;  %v2992_v60 = vadd.f32 %v17358_v36, %v17359_v39  ;;  %v17360_v50 = vsel %vm15155_vm5, %v15136_v44, %v15173_v34  ;;  %9720 = vlog2.f32 %v7120_v26  ;;  %v15283_v26 = vpop.f32.mrb[228].mxu0 }
 0x5c6   : > { %v15265_v4 = vsel %vm8349_vm6, %v8649_v24, %v17360_v50  ;;  %v7126_v15 = vand.u32 2147483647, %v5680_v35  ;;  %v5425_v20 = vadd.f32 %v13768_v11, %v5127_v28  ;;  %v7080_v54 = vmul.f32 %v7079_v5, %v5675_v1 }
 0x5c7   : > { %vm15268_vm1 = vcmp.lt.f32.partialorder %v7081_v2, 0.0004427343  ;;  %9722 = vlog2.f32 %v7138_v21  ;;  %v2985_v17 = vadd.f32 %v17352_v57, %v17363_v37  ;;  %v7144_v53 = vand.u32 2147483647, %v15241_v56 }
 0x5c8   : > { %v5681_v46 = vmax.f32 %v5425_v20, 0.0  ;;  %v4247_v44 = vmax.f32 %v4245_v32, %v4246_v52  ;;  %v4278_v34 = vmax.f32 %v2982_v58, %v2990_v13  ;;  %v7124_v6 = vadd.f32 1.0, %v7123_v55  ;;  %v15293_v55 = vpop.f32.mrb[229].mxu0 }
 0x5c9   : > { %v9719_v3 = vpop.eup %9718  ;;  %v7142_v22 = vadd.f32 1.0, %v7141_v16  ;;  %v4292_v27 = vmax.f32 %v2984_v33, %v2992_v60  ;;  %v2991_v1 = vadd.f32 %v17358_v36, %v14808_v61  ;;  %vm15277_vm2 = vcmp.lt.f32.partialorder %v7126_v15, 0.0004427343  ;;  %v15285_v33 = vpop.f32.mrb[228].mxu1 }
 0x5ca   : > { %v7077_v28 = vmul.f32 0.6931472, %v9719_v3  ;;  %v7129_v2 = vadd.f32 1.0, %v5681_v46  ;;  %v7132_v43 = vmul.f32 -0.5, %v5681_v46  ;;  %v2993_v57 = vadd.f32 %v17358_v36, %v14812_v31  ;;  %v15295_v31 = vpop.f32.mrb[229].mxu1  ;;  %v15297_v39 = vpop.f32.mrb[230].mxu0 }
 0x5cb   : > { %v4248_v24 = vrot.slane %v4247_v44, 1  ;;  %v4279_v32 = vrot.slane %v4278_v34, 4  ;;  %v4293_v58 = vrot.slane %v4292_v27, 4  ;;  %v4285_v52 = vmax.f32 %v2983_v10, %v2991_v1  ;;  %v15299_v60 = vpop.f32.mrb[230].mxu1 }
 0x5cc   : > { %v7083_v61 = vsel %vm15268_vm1, %v7080_v54, %v7077_v28  ;;  %vm15289_vm0 = vcmp.lt.f32.partialorder %v7144_v53, 0.0004427343  ;;  %9724 = vlog2.f32 %v7129_v2  ;;  %v7135_v13 = vand.u32 2147483647, %v5681_v46 }
 0x5cd   : > { %v8677_v36 = vrot.slane %v7083_v61, 7  ;;  %v4249_v21 = vmax.f32 %v4247_v44, %v4248_v24  ;;  %v4280_v10 = vmax.f32 %v4278_v34, %v4279_v32  ;;  %v4294_v16 = vmax.f32 %v4292_v27, %v4293_v58 }
 0x5ce   : > { %v7125_v50 = vmul.f32 %v7124_v6, %v5680_v35  ;;  %v7133_v15 = vadd.f32 1.0, %v7132_v43  ;;  %v4286_v20 = vrot.slane %v4285_v52, 4  ;;  %v4299_v54 = vmax.f32 %v2985_v17, %v2993_v57  ;;  %v15314_v6 = vpop.f32.mrb[231].mxu0 }
 0x5cf   : > { %v17368_v59 = vsel %vm15175_vm8, %v15171_v63, %v15197_v49  ;;  %v5129_v53 = vmax.f32 %v4249_v21, -2.3819763e+38  ;;  %v4281_v44 = vrot.slane %v4280_v10, 2  ;;  %v4295_v34 = vrot.slane %v4294_v16, 2  ;;  %v9721_v3 = vpop.eup %9720  ;;  %v17371_v21 = vld [vmem:[#allocation89_spill] sm:$0xff] }
 0x5d0   : > { %v15307_v37 = vsel %vm8349_vm6, %v8677_v36, %v17368_v59  ;;  %v7143_v27 = vmul.f32 %v7142_v22, %v15241_v56  ;;  %vm15310_vm4 = vcmp.lt.f32.partialorder %v7135_v13, 0.0004427343  ;;  %v4287_v35 = vmax.f32 %v4285_v52, %v4286_v20  ;;  %v17372_v20 = vld [vmem:[#allocation10_spill] sm:$0xff] }
 0x5d1   : > { %v4300_v17 = vrot.slane %v4299_v54, 4  ;;  %v9723_v9 = vpop.eup %9722  ;;  %v7122_v28 = vmul.f32 0.6931472, %v9721_v3  ;;  %v5427_v63 = vadd.f32 %v13775_v30, %v5129_v53  ;;  %v4282_v49 = vmax.f32 %v4280_v10, %v4281_v44  ;;  %v15332_v44 = vpop.f32.mrb[231].mxu1  ;;  %v17373_v3 = vld [vmem:[#allocation51_spill] sm:$0xff] }
 0x5d2   : > { %v4296_v2 = vmax.f32 %v4294_v16, %v4295_v34  ;;  %v7140_v43 = vmul.f32 0.6931472, %v9723_v9  ;;  %v7134_v57 = vmul.f32 %v7133_v15, %v5681_v46  ;;  %v4288_v24 = vrot.slane %v4287_v35, 2 }
 0x5d3   : > { %v4301_v32 = vmax.f32 %v4299_v54, %v4300_v17  ;;  %v7128_v56 = vsel %vm15277_vm2, %v7125_v50, %v7122_v28  ;;  %v15319_v22 = vmax.f32 %v5427_v63, 0.0  ;;  %v4283_v58 = vrot.slane %v4282_v49, 1 }
 0x5d4   : > { %v4297_v52 = vrot.slane %v4296_v2, 1  ;;  %v8637_v61 = vrot.slane %v7128_v56, 6  ;;  %v7146_v13 = vsel %vm15289_vm0, %v7143_v27, %v7140_v43  ;;  %v4289_v36 = vmax.f32 %v4287_v35, %v4288_v24  ;;  %v17375_v43 = vld [vmem:[#allocation90_spill] sm:$0xff] }
 0x5d5   : > { %v2998_v10 = vadd.f32 %v17371_v21, %v14844_v25  ;;  %v8665_v16 = vrot.slane %v7146_v13, 6  ;;  %v7147_v46 = vadd.f32 1.0, %v15319_v22  ;;  %v4302_v15 = vrot.slane %v4301_v32, 2 }
 0x5d6   : > { %v3000_v5 = vadd.f32 %v17371_v21, %v17372_v20  ;;  %v9725_v50 = vpop.eup %9724  ;;  %v15330_v54 = vsel %vm8352_vm10, %v8637_v61, %v15229_v48  ;;  %v4284_v59 = vmax.f32 %v4282_v49, %v4283_v58  ;;  %v4298_v53 = vmax.f32 %v4296_v2, %v4297_v52  ;;  %v17374_v2 = vld [vmem:[#allocation38_spill] sm:$0xff] }
 0x5d7   : > { %v4290_v0 = vrot.slane %v4289_v36, 1  ;;  %v15336_v25 = vsel %vm8352_vm10, %v8665_v16, %v15251_v45  ;;  %v7131_v34 = vmul.f32 0.6931472, %v9725_v50  ;;  %9726 = vlog2.f32 %v7147_v46 }
 0x5d8   : > { %v2999_v27 = vadd.f32 %v17371_v21, %v17373_v3  ;;  %v7150_v35 = vmul.f32 -0.5, %v15319_v22  ;;  %v5134_v17 = vmax.f32 %v4284_v59, -2.3819763e+38  ;;  %v5136_v9 = vmax.f32 %v4298_v53, -2.3819763e+38 }
 0x5d9   : > { %v4291_v48 = vmax.f32 %v4289_v36, %v4290_v0  ;;  %v7137_v28 = vsel %vm15310_vm4, %v7134_v57, %v7131_v34  ;;  %v7153_v63 = vand.u32 2147483647, %v15319_v22  ;;  %v4303_v49 = vmax.f32 %v4301_v32, %v4302_v15 }
 0x5da   : > { %v3006_v45 = vadd.f32 %v17375_v43, %v17374_v2  ;;  %v8651_v24 = vrot.slane %v7137_v28, 6  ;;  %v5432_v56 = vadd.f32 %v13736_v23, %v5134_v17  ;;  %v5434_v58 = vadd.f32 %v13740_v29, %v5136_v9 }
 0x5db   : > { %v5135_v52 = vmax.f32 %v4291_v48, -2.3819763e+38  ;;  %v4304_v61 = vrot.slane %v4303_v49, 1  ;;  %v3008_v36 = vadd.f32 %v17375_v43, %v14875_v7  ;;  %v3007_v1 = vadd.f32 %v17375_v43, %v14888_v14  ;;  %v15359_v48 = vpop.f32.mrb[232].mxu1 }
 0x5dc   : > { %v4334_v13 = vmax.f32 %v2998_v10, %v3006_v45  ;;  %v15354_v57 = vsel %vm8352_vm10, %v8651_v24, %v15265_v4  ;;  %v5688_v32 = vmax.f32 %v5432_v56, 0.0  ;;  %v5690_v16 = vmax.f32 %v5434_v58, 0.0  ;;  %v15357_v4 = vpop.f32.mrb[232].mxu0  ;;  %v15369_v45 = vpop.f32.mrb[233].mxu1 }
 0x5dd   : > { %v5433_v46 = vadd.f32 %v13768_v11, %v5135_v52  ;;  %v4305_v15 = vmax.f32 %v4303_v49, %v4304_v61  ;;  %v4348_v50 = vmax.f32 %v3000_v5, %v3008_v36  ;;  %v4341_v59 = vmax.f32 %v2999_v27, %v3007_v1  ;;  %v17378_v27 = vld [vmem:[#allocation53_spill] sm:$0xff]  ;;  %v15367_v2 = vpop.f32.mrb[233].mxu0  ;;  %17379 = vst [vmem:[#allocation36_spill] sm:$0xff] %v15369_v45  ;;  %v15375_v1 = vpop.f32.mrb[234].mxu1 }
 0x5de   : > { %v4335_v20 = vrot.slane %v4334_v13, 4  ;;  %v7151_v53 = vadd.f32 1.0, %v7150_v35  ;;  %v7192_v10 = vadd.f32 1.0, %v5688_v32  ;;  %v7195_v0 = vmul.f32 -0.5, %v5688_v32  ;;  %v15372_v61 = vpop.f32.mrb[234].mxu0  ;;  %17380 = vst [vmem:[#allocation24_spill] sm:$0xff] %v15375_v1 }
 0x5df   : > { %v7210_v34 = vadd.f32 1.0, %v5690_v16  ;;  %v5689_v7 = vmax.f32 %v5433_v46, 0.0  ;;  %v5137_v3 = vmax.f32 %v4305_v15, -2.3819763e+38  ;;  %v7198_v14 = vand.u32 2147483647, %v5688_v32 }
 0x5e0   : > { %9728 = vlog2.f32 %v7192_v10  ;;  %v7213_v17 = vmul.f32 -0.5, %v5690_v16  ;;  %v4336_v9 = vmax.f32 %v4334_v13, %v4335_v20  ;;  %vm15361_vm5 = vcmp.lt.f32.partialorder %v7153_v63, 0.0004427343 }
 0x5e1   : > { %v9727_v28 = vpop.eup %9726  ;;  %9730 = vlog2.f32 %v7210_v34  ;;  %v7201_v5 = vadd.f32 1.0, %v5689_v7  ;;  %v3001_v35 = vadd.f32 %v17371_v21, %v17378_v27  ;;  %v7152_v56 = vmul.f32 %v7151_v53, %v15319_v22 }
 0x5e2   : > { %v7149_v24 = vmul.f32 0.6931472, %v9727_v28  ;;  %v7196_v58 = vadd.f32 1.0, %v7195_v0  ;;  %v7216_v52 = vand.u32 2147483647, %v5690_v16  ;;  %v7204_v63 = vmul.f32 -0.5, %v5689_v7 }
 0x5e3   : > { %9732 = vlog2.f32 %v7201_v5  ;;  %v5435_v13 = vadd.f32 %v13775_v30, %v5137_v3  ;;  %v4337_v36 = vrot.slane %v4336_v9, 2  ;;  %vm15379_vm8 = vcmp.lt.f32.partialorder %v7198_v14, 0.0004427343 }
 0x5e4   : > { %v7155_v21 = vsel %vm15361_vm5, %v7152_v56, %v7149_v24  ;;  %v7214_v15 = vadd.f32 1.0, %v7213_v17  ;;  %v7207_v22 = vand.u32 2147483647, %v5689_v7  ;;  %v4349_v20 = vrot.slane %v4348_v50, 4 }
 0x5e5   : > { %v8679_v53 = vrot.slane %v7155_v21, 6  ;;  %v15383_v10 = vmax.f32 %v5435_v13, 0.0  ;;  %v4338_v0 = vmax.f32 %v4336_v9, %v4337_v36  ;;  %v4342_v34 = vrot.slane %v4341_v59, 4  ;;  %v15402_v21 = vpop.f32.mrb[235].mxu0 }
 0x5e6   : > { %v7197_v28 = vmul.f32 %v7196_v58, %v5688_v32  ;;  %vm15385_vm9 = vcmp.lt.f32.partialorder %v7216_v52, 0.0004427343  ;;  %v4350_v5 = vmax.f32 %v4348_v50, %v4349_v20  ;;  %v3009_v14 = vadd.f32 %v17375_v43, %v14894_v41  ;;  %v15404_v20 = vpop.f32.mrb[235].mxu1 }
 0x5e7   : > { %v15393_v49 = vsel %vm8352_vm10, %v8679_v53, %v15307_v37  ;;  %v7205_v17 = vadd.f32 1.0, %v7204_v63  ;;  %v7219_v27 = vadd.f32 1.0, %v15383_v10  ;;  %v7222_v24 = vmul.f32 -0.5, %v15383_v10 }
 0x5e8   : > { %v4339_v9 = vrot.slane %v4338_v0, 1  ;;  %v4351_v56 = vrot.slane %v4350_v5, 2  ;;  %v4343_v32 = vmax.f32 %v4341_v59, %v4342_v34  ;;  %v4355_v58 = vmax.f32 %v3001_v35, %v3009_v14 }
 0x5e9   : > { %v7215_v52 = vmul.f32 %v7214_v15, %v5690_v16  ;;  %vm15397_vm12 = vcmp.lt.f32.partialorder %v7207_v22, 0.0004427343  ;;  %9734 = vlog2.f32 %v7219_v27  ;;  %v7225_v41 = vand.u32 2147483647, %v15383_v10  ;;  %v17387_v15 = vld [vmem:[#allocation28_spill] sm:$0xff] }
 0x5ea   : > { %v9729_v43 = vpop.eup %9728  ;;  %v4340_v37 = vmax.f32 %v4338_v0, %v4339_v9  ;;  %v4352_v50 = vmax.f32 %v4350_v5, %v4351_v56  ;;  %v4344_v63 = vrot.slane %v4343_v32, 2  ;;  %v4356_v36 = vrot.slane %v4355_v58, 4  ;;  %v17390_v56 = vld [vmem:[#allocation11_spill] sm:$0xff] }
 0x5eb   : > { %v9731_v53 = vpop.eup %9730  ;;  %v7194_v59 = vmul.f32 0.6931472, %v9729_v43  ;;  %v7206_v35 = vmul.f32 %v7205_v17, %v5689_v7  ;;  %v7223_v16 = vadd.f32 1.0, %v7222_v24  ;;  %v3014_v22 = vadd.f32 %v17387_v15, %v14936_v47  ;;  %v17391_v43 = vld [vmem:[#allocation65_spill] sm:$0xff] }
 0x5ec   : > { %v7212_v34 = vmul.f32 0.6931472, %v9731_v53  ;;  %v5142_v14 = vmax.f32 %v4340_v37, -2.3819763e+38  ;;  %v4353_v27 = vrot.slane %v4352_v50, 1  ;;  %v4345_v1 = vmax.f32 %v4343_v32, %v4344_v63 }
 0x5ed   : > { %v9733_v45 = vpop.eup %9732  ;;  %v7200_v0 = vsel %vm15379_vm8, %v7197_v28, %v7194_v59  ;;  %vm15410_vm14 = vcmp.lt.f32.partialorder %v7225_v41, 0.0004427343  ;;  %v4357_v9 = vmax.f32 %v4355_v58, %v4356_v36  ;;  %v3022_v7 = vadd.f32 %v17391_v43, %v17390_v56 }
 0x5ee   : > { %v8639_v17 = vrot.slane %v7200_v0, 5  ;;  %v7218_v47 = vsel %vm15385_vm9, %v7215_v52, %v7212_v34  ;;  %v7203_v24 = vmul.f32 0.6931472, %v9733_v45  ;;  %v5440_v37 = vadd.f32 %v13736_v23, %v5142_v14  ;;  %v17392_v14 = vld [vmem:[#allocation13_spill] sm:$0xff]  ;;  %v17393_v0 = vld [vmem:[#allocation54_spill] sm:$0xff] }
 0x5ef   : > { %v8667_v32 = vrot.slane %v7218_v47, 5  ;;  %v4354_v63 = vmax.f32 %v4352_v50, %v4353_v27  ;;  %v4346_v53 = vrot.slane %v4345_v1, 1  ;;  %v4358_v46 = vrot.slane %v4357_v9, 2 }
 0x5f0   : > { %v15421_v28 = vsel %vm8355_vm15, %v8639_v17, %v15330_v54  ;;  %v7209_v58 = vsel %vm15397_vm12, %v7206_v35, %v7203_v24  ;;  %v5696_v41 = vmax.f32 %v5440_v37, 0.0  ;;  %v4390_v36 = vmax.f32 %v3014_v22, %v3022_v7  ;;  %v15438_v7 = vpop.f32.mrb[236].mxu0 }
 0x5f1   : > { %v15427_v3 = vsel %vm8355_vm15, %v8667_v32, %v15336_v25  ;;  %v8653_v45 = vrot.slane %v7209_v58, 5  ;;  %v5144_v52 = vmax.f32 %v4354_v63, -2.3819763e+38  ;;  %v4347_v59 = vmax.f32 %v4345_v1, %v4346_v53  ;;  %17394 = vst [vmem:[#allocation64_spill] sm:$0xff] %v15438_v7  ;;  %v15440_v1 = vpop.f32.mrb[236].mxu1  ;;  %v15443_v24 = vpop.f32.mrb[237].mxu0 }
 0x5f2   : > { %v7264_v34 = vadd.f32 1.0, %v5696_v41  ;;  %v4359_v50 = vmax.f32 %v4357_v9, %v4358_v46  ;;  %v3016_v27 = vadd.f32 %v17387_v15, %v17392_v14  ;;  %v3024_v54 = vadd.f32 %v17391_v43, %v17393_v0  ;;  %17395 = vst [vmem:[#allocation42_spill] sm:$0xff] %v15440_v1  ;;  %17396 = vst [vmem:[#allocation30_spill] sm:$0xff] %v15443_v24  ;;  %v15446_v53 = vpop.f32.mrb[237].mxu1  ;;  %v17399_v14 = vld [vmem:[#allocation34_spill] sm:$0xff] }
 0x5f3   : > { %v9735_v56 = vpop.eup %9734  ;;  %v15435_v13 = vsel %vm8355_vm15, %v8653_v45, %v15354_v57  ;;  %v5442_v35 = vadd.f32 %v13740_v29, %v5144_v52  ;;  %v5143_v25 = vmax.f32 %v4347_v59, -2.3819763e+38  ;;  %v4391_v22 = vrot.slane %v4390_v36, 4  ;;  %17397 = vst [vmem:[#allocation26_spill] sm:$0xff] %v15446_v53  ;;  %v17398_v45 = vld [vmem:[#allocation52_spill] sm:$0xff]  ;;  %v15466_v24 = vpop.f32.mrb[238].mxu1 }
 0x5f4   : > { %v7221_v9 = vmul.f32 0.6931472, %v9735_v56  ;;  %v7224_v17 = vmul.f32 %v7223_v16, %v15383_v10  ;;  %9736 = vlog2.f32 %v7264_v34  ;;  %v7267_v47 = vmul.f32 -0.5, %v5696_v41  ;;  %v15454_v56 = vpop.f32.mrb[238].mxu0  ;;  %17404 = vst [vmem:[#allocation44_spill] sm:$0xff] %v15466_v24 }
 0x5f5   : > { %v5698_v37 = vmax.f32 %v5442_v35, 0.0  ;;  %v5441_v32 = vadd.f32 %v13768_v11, %v5143_v25  ;;  %v4360_v57 = vrot.slane %v4359_v50, 1  ;;  %v4392_v63 = vmax.f32 %v4390_v36, %v4391_v22  ;;  %17400 = vst [vmem:[#allocation94_spill] sm:$0xff] %v15454_v56  ;;  %v17405_v56 = vld [vmem:[#allocation40_spill] sm:$0xff] }
 0x5f6   : > { %v7227_v46 = vsel %vm15410_vm14, %v7224_v17, %v7221_v9  ;;  %v7270_v58 = vand.u32 2147483647, %v5696_v41  ;;  %v3015_v52 = vadd.f32 %v17387_v15, %v17398_v45  ;;  %v4404_v59 = vmax.f32 %v3016_v27, %v3024_v54  ;;  %v17401_v17 = vld [vmem:[#allocation14_spill] sm:$0xff] }
 0x5f7   : > { %v8681_v10 = vrot.slane %v7227_v46, 5  ;;  %v7282_v16 = vadd.f32 1.0, %v5698_v37  ;;  %v7285_v34 = vmul.f32 -0.5, %v5698_v37  ;;  %v3023_v0 = vadd.f32 %v17391_v43, %v17399_v14 }
 0x5f8   : > { %v5697_v35 = vmax.f32 %v5441_v32, 0.0  ;;  %v4361_v36 = vmax.f32 %v4359_v50, %v4360_v57  ;;  %v4393_v25 = vrot.slane %v4392_v63, 2  ;;  %v4405_v22 = vrot.slane %v4404_v59, 4 }
 0x5f9   : > { %v15458_v5 = vsel %vm8355_vm15, %v8681_v10, %v15393_v49  ;;  %v7268_v9 = vadd.f32 1.0, %v7267_v47  ;;  %9738 = vlog2.f32 %v7282_v16  ;;  %v3017_v27 = vadd.f32 %v17387_v15, %v17401_v17 }
 0x5fa   : > { %v7288_v54 = vand.u32 2147483647, %v5698_v37  ;;  %v7273_v46 = vadd.f32 1.0, %v5697_v35  ;;  %v7276_v45 = vmul.f32 -0.5, %v5697_v35  ;;  %v5145_v53 = vmax.f32 %v4361_v36, -2.3819763e+38 }
 0x5fb   : > { %vm15462_vm1 = vcmp.lt.f32.partialorder %v7270_v58, 0.0004427343  ;;  %v4394_v50 = vmax.f32 %v4392_v63, %v4393_v25  ;;  %v4406_v32 = vmax.f32 %v4404_v59, %v4405_v22  ;;  %v4397_v57 = vmax.f32 %v3015_v52, %v3023_v0 }
 0x5fc   : > { %v7286_v49 = vadd.f32 1.0, %v7285_v34  ;;  %9740 = vlog2.f32 %v7273_v46  ;;  %v7279_v47 = vand.u32 2147483647, %v5697_v35  ;;  %v5443_v10 = vadd.f32 %v13775_v30, %v5145_v53 }
 0x5fd   : > { %v4395_v16 = vrot.slane %v4394_v50, 1  ;;  %v4407_v15 = vrot.slane %v4406_v32, 2  ;;  %v4398_v17 = vrot.slane %v4397_v57, 4  ;;  %v3025_v36 = vadd.f32 %v17391_v43, %v17405_v56  ;;  %v15479_v43 = vpop.f32.mrb[239].mxu0 }
 0x5fe   : > { %v9737_v58 = vpop.eup %9736  ;;  %v7269_v1 = vmul.f32 %v7268_v9, %v5696_v41  ;;  %vm15471_vm2 = vcmp.lt.f32.partialorder %v7288_v54, 0.0004427343  ;;  %v7277_v63 = vadd.f32 1.0, %v7276_v45  ;;  %v5699_v52 = vmax.f32 %v5443_v10, 0.0 }
 0x5ff   : > { %v7266_v59 = vmul.f32 0.6931472, %v9737_v58  ;;  %v4396_v34 = vmax.f32 %v4394_v50, %v4395_v16  ;;  %v4408_v0 = vmax.f32 %v4406_v32, %v4407_v15  ;;  %v4399_v25 = vmax.f32 %v4397_v57, %v4398_v17  ;;  %v15483_v32 = vpop.f32.mrb[239].mxu1  ;;  %v17410_v15 = vld [vmem:[#allocation91_spill] sm:$0xff] }
 0x600   : > { %v7287_v22 = vmul.f32 %v7286_v49, %v5698_v37  ;;  %vm15475_vm0 = vcmp.lt.f32.partialorder %v7279_v47, 0.0004427343  ;;  %v7291_v46 = vadd.f32 1.0, %v5699_v52  ;;  %v4411_v24 = vmax.f32 %v3017_v27, %v3025_v36 }
 0x601   : > { %v7272_v41 = vsel %vm15462_vm1, %v7269_v1, %v7266_v59  ;;  %v5150_v56 = vmax.f32 %v4396_v34, -2.3819763e+38  ;;  %v4409_v9 = vrot.slane %v4408_v0, 1  ;;  %v4400_v54 = vrot.slane %v4399_v25, 2 }
 0x602   : > { %v8641_v45 = vrot.slane %v7272_v41, 4  ;;  %v7278_v10 = vmul.f32 %v7277_v63, %v5697_v35  ;;  %9742 = vlog2.f32 %v7291_v46  ;;  %v7294_v50 = vmul.f32 -0.5, %v5699_v52  ;;  %v17411_v46 = vld [vmem:[#allocation62_spill] sm:$0xff] }
 0x603   : > { %v9739_v37 = vpop.eup %9738  ;;  %v5448_v57 = vadd.f32 %v13736_v23, %v5150_v56  ;;  %v4410_v49 = vmax.f32 %v4408_v0, %v4409_v9  ;;  %v4401_v47 = vmax.f32 %v4399_v25, %v4400_v54  ;;  %v4412_v27 = vrot.slane %v4411_v24, 4 }
 0x604   : > { %v15488_v16 = vsel %vm8358_vm7, %v8641_v45, %v15421_v28  ;;  %v7284_v1 = vmul.f32 0.6931472, %v9739_v37  ;;  %v7297_v14 = vand.u32 2147483647, %v5699_v52  ;;  %v3030_v17 = vadd.f32 %v17410_v15, %v15017_v42  ;;  %v17412_v28 = vld [vmem:[#allocation93_spill] sm:$0xff] }
 0x605   : > { %v5704_v35 = vmax.f32 %v5448_v57, 0.0  ;;  %v5152_v36 = vmax.f32 %v4410_v49, -2.3819763e+38  ;;  %v4402_v58 = vrot.slane %v4401_v47, 1  ;;  %v4413_v63 = vmax.f32 %v4411_v24, %v4412_v27  ;;  %v17413_v45 = vld [vmem:[#allocation57_spill] sm:$0xff] }
 0x606   : > { %v9741_v59 = vpop.eup %9740  ;;  %v7290_v34 = vsel %vm15471_vm2, %v7287_v22, %v7284_v1  ;;  %v7295_v0 = vadd.f32 1.0, %v7294_v50  ;;  %v3032_v25 = vadd.f32 %v17410_v15, %v15021_v8  ;;  %v3038_v41 = vadd.f32 %v17412_v28, %v17411_v46 }
 0x607   : > { %v8669_v56 = vrot.slane %v7290_v34, 4  ;;  %v7275_v9 = vmul.f32 0.6931472, %v9741_v59  ;;  %v7336_v54 = vadd.f32 1.0, %v5704_v35  ;;  %v3040_v42 = vadd.f32 %v17412_v28, %v17413_v45 }
 0x608   : > { %v7339_v37 = vmul.f32 -0.5, %v5704_v35  ;;  %v5450_v24 = vadd.f32 %v13740_v29, %v5152_v36  ;;  %v4403_v57 = vmax.f32 %v4401_v47, %v4402_v58  ;;  %v4414_v49 = vrot.slane %v4413_v63, 2  ;;  %v17416_v36 = vld [vmem:[#allocation59_spill] sm:$0xff] }
 0x609   : > { %v15503_v7 = vsel %vm8358_vm7, %v8669_v56, %v15427_v3  ;;  %v7281_v8 = vsel %vm15475_vm0, %v7278_v10, %v7275_v9  ;;  %vm15507_vm4 = vcmp.lt.f32.partialorder %v7297_v14, 0.0004427343  ;;  %9744 = vlog2.f32 %v7336_v54  ;;  %v15513_v3 = vpop.f32.mrb[240].mxu0  ;;  %v15515_v56 = vpop.f32.mrb[240].mxu1 }
 0x60a   : > { %v8655_v50 = vrot.slane %v7281_v8, 4  ;;  %v7296_v27 = vmul.f32 %v7295_v0, %v5699_v52  ;;  %v5706_v1 = vmax.f32 %v5450_v24, 0.0  ;;  %v5151_v59 = vmax.f32 %v4403_v57, -2.3819763e+38  ;;  %17417 = vst [vmem:[#allocation63_spill] sm:$0xff] %v15513_v3  ;;  %17418 = vst [vmem:[#allocation68_spill] sm:$0xff] %v15515_v56 }
 0x60b   : > { %v4415_v34 = vmax.f32 %v4413_v63, %v4414_v49  ;;  %v3031_v47 = vadd.f32 %v17410_v15, %v17416_v36  ;;  %v4446_v58 = vmax.f32 %v3030_v17, %v3038_v41  ;;  %v4460_v46 = vmax.f32 %v3032_v25, %v3040_v42  ;;  %v15521_v0 = vpop.f32.mrb[241].mxu0  ;;  %v15523_v63 = vpop.f32.mrb[241].mxu1  ;;  %v17422_v36 = vld [vmem:[#allocation39_spill] sm:$0xff] }
 0x60c   : > { %v9743_v53 = vpop.eup %9742  ;;  %v15519_v10 = vsel %vm8358_vm7, %v8655_v50, %v15435_v13  ;;  %v7340_v14 = vadd.f32 1.0, %v7339_v37  ;;  %v7342_v9 = vand.u32 2147483647, %v5704_v35  ;;  %v7354_v52 = vadd.f32 1.0, %v5706_v1  ;;  %17419 = vst [vmem:[#allocation75_spill] sm:$0xff] %v15521_v0  ;;  %17420 = vst [vmem:[#allocation25_spill] sm:$0xff] %v15523_v63 }
 0x60d   : > { %v7293_v54 = vmul.f32 0.6931472, %v9743_v53  ;;  %v5449_v17 = vadd.f32 %v13768_v11, %v5151_v59  ;;  %v4416_v25 = vrot.slane %v4415_v34, 1  ;;  %v4447_v41 = vrot.slane %v4446_v58, 4  ;;  %v15526_v45 = vpop.f32.mrb[242].mxu0  ;;  %v17423_v59 = vld [vmem:[#allocation15_spill] sm:$0xff] }
 0x60e   : > { %17421 = vst [vmem:[#allocation47_spill] sm:$0xff] %v15526_v45  ;;  %9746 = vlog2.f32 %v7354_v52  ;;  %v7357_v42 = vmul.f32 -0.5, %v5706_v1  ;;  %v7360_v24 = vand.u32 2147483647, %v5706_v1  ;;  %v4461_v57 = vrot.slane %v4460_v46, 4 }
 0x60f   : > { %v7299_v13 = vsel %vm15507_vm4, %v7296_v27, %v7293_v54  ;;  %v5705_v37 = vmax.f32 %v5449_v17, 0.0  ;;  %v4417_v49 = vmax.f32 %v4415_v34, %v4416_v25  ;;  %v4448_v8 = vmax.f32 %v4446_v58, %v4447_v41  ;;  %v15542_v54 = vpop.f32.mrb[242].mxu1  ;;  %v17431_v17 = vld [vmem:[#allocation99_spill] sm:$0xff] }
 0x610   : > { %v8683_v50 = vrot.slane %v7299_v13, 4  ;;  %v3033_v53 = vadd.f32 %v17410_v15, %v17422_v36  ;;  %v4462_v63 = vmax.f32 %v4460_v46, %v4461_v57  ;;  %v3039_v0 = vadd.f32 %v17412_v28, %v17423_v59 }
 0x611   : > { %v7341_v56 = vmul.f32 %v7340_v14, %v5704_v35  ;;  %vm15534_vm5 = vcmp.lt.f32.partialorder %v7342_v9, 0.0004427343  ;;  %v7345_v45 = vadd.f32 1.0, %v5705_v37  ;;  %v5153_v3 = vmax.f32 %v4417_v49, -2.3819763e+38 }
 0x612   : > { %v15540_v22 = vsel %vm8358_vm7, %v8683_v50, %v15458_v5  ;;  %v4449_v27 = vrot.slane %v4448_v8, 2  ;;  %v4463_v34 = vrot.slane %v4462_v63, 2  ;;  %v4453_v58 = vmax.f32 %v3031_v47, %v3039_v0  ;;  %v15551_v0 = vpop.f32.mrb[243].mxu0 }
 0x613   : > { %v9745_v15 = vpop.eup %9744  ;;  %v7358_v46 = vadd.f32 1.0, %v7357_v42  ;;  %vm15544_vm8 = vcmp.lt.f32.partialorder %v7360_v24, 0.0004427343  ;;  %9748 = vlog2.f32 %v7345_v45  ;;  %v5451_v35 = vadd.f32 %v13775_v30, %v5153_v3 }
 0x614   : > { %v7338_v14 = vmul.f32 0.6931472, %v9745_v15  ;;  %v4450_v9 = vmax.f32 %v4448_v8, %v4449_v27  ;;  %v4464_v25 = vmax.f32 %v4462_v63, %v4463_v34  ;;  %v4454_v41 = vrot.slane %v4453_v58, 4 }
 0x615   : > { %v7348_v5 = vmul.f32 -0.5, %v5705_v37  ;;  %v7351_v57 = vand.u32 2147483647, %v5705_v37  ;;  %v5707_v13 = vmax.f32 %v5451_v35, 0.0  ;;  %v3041_v47 = vadd.f32 %v17412_v28, %v15063_v51 }
 0x616   : > { %v7344_v42 = vsel %vm15534_vm5, %v7341_v56, %v7338_v14  ;;  %v4451_v24 = vrot.slane %v4450_v9, 1  ;;  %v4465_v49 = vrot.slane %v4464_v25, 1  ;;  %v4455_v45 = vmax.f32 %v4453_v58, %v4454_v41 }
 0x617   : > { %v8643_v50 = vrot.slane %v7344_v42, 3  ;;  %v7359_v3 = vmul.f32 %v7358_v46, %v5706_v1  ;;  %v7363_v36 = vadd.f32 1.0, %v5707_v13  ;;  %v7366_v8 = vmul.f32 -0.5, %v5707_v13 }
 0x618   : > { %v9747_v63 = vpop.eup %9746  ;;  %v4452_v59 = vmax.f32 %v4450_v9, %v4451_v24  ;;  %v4466_v27 = vmax.f32 %v4464_v25, %v4465_v49  ;;  %v4456_v34 = vrot.slane %v4455_v45, 2  ;;  %v4467_v15 = vmax.f32 %v3033_v53, %v3041_v47  ;;  %v15565_v25 = vpop.f32.mrb[243].mxu1  ;;  %v17430_v49 = vld [vmem:[#allocation98_spill] sm:$0xff] }
 0x619   : > { %v15557_v51 = vsel %vm8361_vm13, %v8643_v50, %v15488_v16  ;;  %v7356_v28 = vmul.f32 0.6931472, %v9747_v63  ;;  %v7349_v35 = vadd.f32 1.0, %v7348_v5  ;;  %9750 = vlog2.f32 %v7363_v36 }
 0x61a   : > { %vm15559_vm9 = vcmp.lt.f32.partialorder %v7351_v57, 0.0004427343  ;;  %v5158_v52 = vmax.f32 %v4452_v59, -2.3819763e+38  ;;  %v5160_v1 = vmax.f32 %v4466_v27, -2.3819763e+38  ;;  %v4457_v58 = vmax.f32 %v4455_v45, %v4456_v34 }
 0x61b   : > { %v7362_v46 = vsel %vm15544_vm8, %v7359_v3, %v7356_v28  ;;  %v7367_v14 = vadd.f32 1.0, %v7366_v8  ;;  %v7369_v9 = vand.u32 2147483647, %v5707_v13  ;;  %v4468_v53 = vrot.slane %v4467_v15, 4 }
 0x61c   : > { %v8671_v16 = vrot.slane %v7362_v46, 3  ;;  %v5456_v41 = vadd.f32 %v13736_v23, %v5158_v52  ;;  %v5458_v5 = vadd.f32 %v13740_v29, %v5160_v1  ;;  %v4458_v57 = vrot.slane %v4457_v58, 1  ;;  %v17434_v46 = vld [vmem:[#allocation43_spill] sm:$0xff] }
 0x61d   : > { %v9749_v47 = vpop.eup %9748  ;;  %v7350_v42 = vmul.f32 %v7349_v35, %v5705_v37  ;;  %v4469_v24 = vmax.f32 %v4467_v15, %v4468_v53  ;;  %v3046_v45 = vadd.f32 %v17430_v49, %v15100_v18  ;;  %v3054_v50 = vadd.f32 %v17431_v17, %v15111_v38 }
 0x61e   : > { %v15575_v3 = vsel %vm8361_vm13, %v8671_v16, %v15503_v7  ;;  %v7347_v36 = vmul.f32 0.6931472, %v9749_v47  ;;  %v5712_v8 = vmax.f32 %v5456_v41, 0.0  ;;  %v15577_v63 = vmax.f32 %v5458_v5, 0.0  ;;  %v15599_v41 = vpop.f32.mrb[244].mxu0 }
 0x61f   : > { %v7368_v59 = vmul.f32 %v7367_v14, %v5707_v13  ;;  %vm15579_vm12 = vcmp.lt.f32.partialorder %v7369_v9, 0.0004427343  ;;  %v4459_v37 = vmax.f32 %v4457_v58, %v4458_v57  ;;  %v4502_v34 = vmax.f32 %v3046_v45, %v3054_v50  ;;  %v17435_v14 = vld [vmem:[#allocation92_spill] sm:$0xff] }
 0x620   : > { %v7353_v18 = vsel %vm15559_vm9, %v7350_v42, %v7347_v36  ;;  %v7408_v15 = vadd.f32 1.0, %v5712_v8  ;;  %v4470_v38 = vrot.slane %v4469_v24, 2  ;;  %v3048_v7 = vadd.f32 %v17430_v49, %v15102_v19 }
 0x621   : > { %v8657_v28 = vrot.slane %v7353_v18, 3  ;;  %v7411_v35 = vmul.f32 -0.5, %v5712_v8  ;;  %v7426_v52 = vadd.f32 1.0, %v15577_v63  ;;  %v3056_v13 = vadd.f32 %v17431_v17, %v15113_v12  ;;  %v15601_v12 = vpop.f32.mrb[244].mxu1 }
 0x622   : > { %9752 = vlog2.f32 %v7408_v15  ;;  %v5159_v1 = vmax.f32 %v4459_v37, -2.3819763e+38  ;;  %v3047_v58 = vadd.f32 %v17430_v49, %v17434_v46  ;;  %v3049_v56 = vadd.f32 %v17430_v49, %v17435_v14  ;;  %17436 = vst [vmem:[#allocation67_spill] sm:$0xff] %v15601_v12  ;;  %v15605_v49 = vpop.f32.mrb[245].mxu0  ;;  %v15607_v45 = vpop.f32.mrb[245].mxu1  ;;  %v17439_v37 = vld [vmem:[#allocation19_spill] sm:$0xff] }
 0x623   : > { %v9751_v9 = vpop.eup %9750  ;;  %v15596_v53 = vsel %vm8361_vm13, %v8657_v28, %v15519_v10  ;;  %v7414_v19 = vand.u32 2147483647, %v5712_v8  ;;  %9754 = vlog2.f32 %v7426_v52  ;;  %v7429_v16 = vmul.f32 -0.5, %v15577_v63  ;;  %17437 = vst [vmem:[#allocation46_spill] sm:$0xff] %v15605_v49  ;;  %17438 = vst [vmem:[#allocation69_spill] sm:$0xff] %v15607_v45  ;;  %v15611_v15 = vpop.f32.mrb[246].mxu0 }
 0x624   : > { %v7365_v5 = vmul.f32 0.6931472, %v9751_v9  ;;  %v7432_v57 = vand.u32 2147483647, %v15577_v63  ;;  %v5457_v47 = vadd.f32 %v13768_v11, %v5159_v1  ;;  %v4471_v42 = vmax.f32 %v4469_v24, %v4470_v38  ;;  %17440 = vst [vmem:[#allocation33_spill] sm:$0xff] %v15611_v15  ;;  %v17441_v14 = vld [vmem:[#allocation37_spill] sm:$0xff] }
 0x625   : > { %v7412_v10 = vadd.f32 1.0, %v7411_v35  ;;  %v4503_v50 = vrot.slane %v4502_v34, 4  ;;  %v4516_v36 = vmax.f32 %v3048_v7, %v3056_v13  ;;  %v3055_v18 = vadd.f32 %v17431_v17, %v17439_v37 }
 0x626   : > { %v7371_v28 = vsel %vm15579_vm12, %v7368_v59, %v7365_v5  ;;  %v5713_v52 = vmax.f32 %v5457_v47, 0.0  ;;  %v4472_v46 = vrot.slane %v4471_v42, 1  ;;  %v3057_v24 = vadd.f32 %v17431_v17, %v17441_v14 }
 0x627   : > { %v8685_v38 = vrot.slane %v7371_v28, 3  ;;  %v4504_v1 = vmax.f32 %v4502_v34, %v4503_v50  ;;  %v4517_v9 = vrot.slane %v4516_v36, 4  ;;  %v4509_v45 = vmax.f32 %v3047_v58, %v3055_v18  ;;  %v15625_v28 = vpop.f32.mrb[246].mxu1 }
 0x628   : > { %vm15617_vm14 = vcmp.lt.f32.partialorder %v7414_v19, 0.0004427343  ;;  %v7417_v7 = vadd.f32 1.0, %v5713_v52  ;;  %v7420_v13 = vmul.f32 -0.5, %v5713_v52  ;;  %v4473_v37 = vmax.f32 %v4471_v42, %v4472_v46  ;;  %17444 = vst [vmem:[#allocation55_spill] sm:$0xff] %v15625_v28 }
 0x629   : > { %v15623_v27 = vsel %vm8361_vm13, %v8685_v38, %v15540_v22  ;;  %v4505_v59 = vrot.slane %v4504_v1, 2  ;;  %v4518_v5 = vmax.f32 %v4516_v36, %v4517_v9  ;;  %v4510_v47 = vrot.slane %v4509_v45, 4 }
 0x62a   : > { %v7430_v49 = vadd.f32 1.0, %v7429_v16  ;;  %9756 = vlog2.f32 %v7417_v7  ;;  %v7423_v17 = vand.u32 2147483647, %v5713_v52  ;;  %v5161_v34 = vmax.f32 %v4473_v37, -2.3819763e+38 }
 0x62b   : > { %v4506_v50 = vmax.f32 %v4504_v1, %v4505_v59  ;;  %v4519_v58 = vrot.slane %v4518_v5, 2  ;;  %v4511_v19 = vmax.f32 %v4509_v45, %v4510_v47  ;;  %v4523_v18 = vmax.f32 %v3049_v56, %v3057_v24  ;;  %v15632_v1 = vpop.f32.mrb[247].mxu0 }
 0x62c   : > { %v9753_v14 = vpop.eup %9752  ;;  %v7413_v15 = vmul.f32 %v7412_v10, %v5712_v8  ;;  %vm15627_vm1 = vcmp.lt.f32.partialorder %v7432_v57, 0.0004427343  ;;  %v7421_v22 = vadd.f32 1.0, %v7420_v13  ;;  %v5459_v36 = vadd.f32 %v13775_v30, %v5161_v34  ;;  %17447 = vst [vmem:[#allocation21_spill] sm:$0xff] %v15632_v1 }
 0x62d   : > { %v9755_v46 = vpop.eup %9754  ;;  %v7410_v16 = vmul.f32 0.6931472, %v9753_v14  ;;  %v4507_v38 = vrot.slane %v4506_v50, 1  ;;  %v4520_v9 = vmax.f32 %v4518_v5, %v4519_v58  ;;  %v4512_v7 = vrot.slane %v4511_v19, 2 }
 0x62e   : > { %v7428_v45 = vmul.f32 0.6931472, %v9755_v46  ;;  %v7431_v56 = vmul.f32 %v7430_v49, %v15577_v63  ;;  %vm15635_vm2 = vcmp.lt.f32.partialorder %v7423_v17, 0.0004427343  ;;  %v5715_v8 = vmax.f32 %v5459_v36, 0.0  ;;  %v17451_v46 = vld [vmem:[#allocation17_spill] sm:$0xff] }
 0x62f   : > { %v7416_v57 = vsel %vm15617_vm14, %v7413_v15, %v7410_v16  ;;  %v4508_v10 = vmax.f32 %v4506_v50, %v4507_v38  ;;  %v4521_v13 = vrot.slane %v4520_v9, 1  ;;  %v4513_v37 = vmax.f32 %v4511_v19, %v4512_v7  ;;  %v15647_v50 = vpop.f32.mrb[247].mxu1  ;;  %v17453_v7 = vld [vmem:[#allocation58_spill] sm:$0xff] }
 0x630   : > { %v8645_v59 = vrot.slane %v7416_v57, 2  ;;  %v7434_v5 = vsel %vm15627_vm1, %v7431_v56, %v7428_v45  ;;  %v7435_v47 = vadd.f32 1.0, %v5715_v8  ;;  %v4524_v34 = vrot.slane %v4523_v18, 4  ;;  %17450 = vst [vmem:[#allocation80_spill] sm:$0xff] %v15647_v50 }
 0x631   : > { %v8673_v58 = vrot.slane %v7434_v5, 2  ;;  %v7422_v14 = vmul.f32 %v7421_v22, %v5713_v52  ;;  %v5166_v63 = vmax.f32 %v4508_v10, -2.3819763e+38  ;;  %v4522_v49 = vmax.f32 %v4520_v9, %v4521_v13  ;;  %v17452_v52 = vld [vmem:[#allocation85_spill] sm:$0xff]  ;;  %v17454_v13 = vld [vmem:[#allocation18_spill] sm:$0xff] }
 0x632   : > { %v15645_v17 = vsel %vm8364_vm3, %v8645_v59, %v15557_v51  ;;  %9758 = vlog2.f32 %v7435_v47  ;;  %v7438_v35 = vmul.f32 -0.5, %v5715_v8  ;;  %v4514_v15 = vrot.slane %v4513_v37, 1 }
 0x633   : > { %v15651_v19 = vsel %vm8364_vm3, %v8673_v58, %v15575_v3  ;;  %v5464_v42 = vadd.f32 %v13736_v23, %v5166_v63  ;;  %v5168_v36 = vmax.f32 %v4522_v49, -2.3819763e+38  ;;  %v3062_v22 = vadd.f32 %v17452_v52, %v17451_v46  ;;  %v17455_v3 = vld [vmem:[#allocation86_spill] sm:$0xff]  ;;  %v17456_v63 = vld [vmem:[#allocation23_spill] sm:$0xff] }
 0x634   : > { %v9757_v16 = vpop.eup %9756  ;;  %v7441_v38 = vand.u32 2147483647, %v5715_v8  ;;  %v4515_v9 = vmax.f32 %v4513_v37, %v4514_v15  ;;  %v4525_v51 = vmax.f32 %v4523_v18, %v4524_v34  ;;  %v3064_v45 = vadd.f32 %v17452_v52, %v17453_v7  ;;  %v17457_v15 = vld [vmem:[#allocation41_spill] sm:$0xff] }
 0x635   : > { %v7419_v56 = vmul.f32 0.6931472, %v9757_v16  ;;  %v5720_v57 = vmax.f32 %v5464_v42, 0.0  ;;  %v5466_v10 = vadd.f32 %v13740_v29, %v5168_v36  ;;  %v3070_v59 = vadd.f32 %v17455_v3, %v17454_v13 }
 0x636   : > { %v7439_v5 = vadd.f32 1.0, %v7438_v35  ;;  %v5167_v47 = vmax.f32 %v4515_v9, -2.3819763e+38  ;;  %v4526_v58 = vrot.slane %v4525_v51, 2  ;;  %v3063_v49 = vadd.f32 %v17452_v52, %v17456_v63 }
 0x637   : > { %v7425_v37 = vsel %vm15635_vm2, %v7422_v14, %v7419_v56  ;;  %v7480_v18 = vadd.f32 1.0, %v5720_v57  ;;  %v7483_v34 = vmul.f32 -0.5, %v5720_v57  ;;  %v3072_v46 = vadd.f32 %v17455_v3, %v17457_v15 }
 0x638   : > { %v8659_v42 = vrot.slane %v7425_v37, 2  ;;  %v5722_v16 = vmax.f32 %v5466_v10, 0.0  ;;  %v5465_v36 = vadd.f32 %v13768_v11, %v5167_v47  ;;  %v4527_v7 = vmax.f32 %v4525_v51, %v4526_v58 }
 0x639   : > { %vm15668_vm0 = vcmp.lt.f32.partialorder %v7441_v38, 0.0004427343  ;;  %9760 = vlog2.f32 %v7480_v18  ;;  %v7486_v9 = vand.u32 2147483647, %v5720_v57  ;;  %v4558_v13 = vmax.f32 %v3062_v22, %v3070_v59  ;;  %v17460_v38 = vld [vmem:[#allocation35_spill] sm:$0xff]  ;;  %v15680_v59 = vpop.f32.mrb[248].mxu0 }
 0x63a   : > { %v15674_v24 = vsel %vm8364_vm3, %v8659_v42, %v15596_v53  ;;  %v7440_v14 = vmul.f32 %v7439_v5, %v5715_v8  ;;  %v7484_v56 = vadd.f32 1.0, %v7483_v34  ;;  %v7498_v63 = vadd.f32 1.0, %v5722_v16  ;;  %17461 = vst [vmem:[#allocation72_spill] sm:$0xff] %v15680_v59  ;;  %v15682_v53 = vpop.f32.mrb[248].mxu1 }
 0x63b   : > { %v7501_v15 = vmul.f32 -0.5, %v5722_v16  ;;  %v5721_v37 = vmax.f32 %v5465_v36, 0.0  ;;  %v4528_v10 = vrot.slane %v4527_v7, 1  ;;  %v4559_v50 = vrot.slane %v4558_v13, 4  ;;  %17462 = vst [vmem:[#allocation22_spill] sm:$0xff] %v15682_v53 }
 0x63c   : > { %v9759_v47 = vpop.eup %9758  ;;  %9762 = vlog2.f32 %v7498_v63  ;;  %v3065_v51 = vadd.f32 %v17452_v52, %v17460_v38  ;;  %v4572_v58 = vmax.f32 %v3064_v45, %v3072_v46  ;;  %v3071_v22 = vadd.f32 %v17455_v3, %v15219_v62  ;;  %v15688_v52 = vpop.f32.mrb[249].mxu0 }
 0x63d   : > { %v7437_v8 = vmul.f32 0.6931472, %v9759_v47  ;;  %vm15684_vm4 = vcmp.lt.f32.partialorder %v7486_v9, 0.0004427343  ;;  %v7489_v18 = vadd.f32 1.0, %v5721_v37  ;;  %v7492_v34 = vmul.f32 -0.5, %v5721_v37 }
 0x63e   : > { %v7504_v42 = vand.u32 2147483647, %v5722_v16  ;;  %v4529_v36 = vmax.f32 %v4527_v7, %v4528_v10  ;;  %v4560_v63 = vmax.f32 %v4558_v13, %v4559_v50  ;;  %v4573_v1 = vrot.slane %v4572_v58, 4  ;;  %v15690_v45 = vpop.f32.mrb[249].mxu1  ;;  %v15694_v9 = vpop.f32.mrb[250].mxu0 }
 0x63f   : > { %v7443_v62 = vsel %vm15668_vm0, %v7440_v14, %v7437_v8  ;;  %v7485_v46 = vmul.f32 %v7484_v56, %v5720_v57  ;;  %v7502_v38 = vadd.f32 1.0, %v7501_v15  ;;  %9764 = vlog2.f32 %v7489_v18  ;;  %v15696_v12 = vpop.f32.mrb[250].mxu1  ;;  %v15705_v15 = vpop.f32.mrb[251].mxu0 }
 0x640   : > { %v8687_v47 = vrot.slane %v7443_v62, 2  ;;  %v5169_v53 = vmax.f32 %v4529_v36, -2.3819763e+38  ;;  %v4561_v59 = vrot.slane %v4560_v63, 2  ;;  %v4574_v28 = vmax.f32 %v4572_v58, %v4573_v1 }
 0x641   : > { %v7493_v50 = vadd.f32 1.0, %v7492_v34  ;;  %v7495_v7 = vand.u32 2147483647, %v5721_v37  ;;  %v4565_v13 = vmax.f32 %v3063_v49, %v3071_v22  ;;  %v3073_v10 = vadd.f32 %v17455_v3, %v15235_v40 }
 0x642   : > { %v15702_v35 = vsel %vm8364_vm3, %v8687_v47, %v15623_v27  ;;  %v5467_v57 = vadd.f32 %v13775_v30, %v5169_v53  ;;  %v4562_v14 = vmax.f32 %v4560_v63, %v4561_v59  ;;  %v4575_v56 = vrot.slane %v4574_v28, 2  ;;  %v17469_v53 = vld [vmem:[#allocation71_spill] sm:$0xff] }
 0x643   : > { %v9761_v8 = vpop.eup %9760  ;;  %v7503_v1 = vmul.f32 %v7502_v38, %v5722_v16  ;;  %vm15707_vm5 = vcmp.lt.f32.partialorder %v7504_v42, 0.0004427343  ;;  %v4566_v49 = vrot.slane %v4565_v13, 4  ;;  %v4579_v22 = vmax.f32 %v3065_v51, %v3073_v10  ;;  %v15717_v16 = vpop.f32.mrb[251].mxu1 }
 0x644   : > { %v7482_v18 = vmul.f32 0.6931472, %v9761_v8  ;;  %v5723_v40 = vmax.f32 %v5467_v57, 0.0  ;;  %v4563_v3 = vrot.slane %v4562_v14, 1  ;;  %v4576_v34 = vmax.f32 %v4574_v28, %v4575_v56  ;;  %v17470_v28 = vld [vmem:[#allocation73_spill] sm:$0xff] }
 0x645   : > { %v7494_v27 = vmul.f32 %v7493_v50, %v5721_v37  ;;  %vm15711_vm8 = vcmp.lt.f32.partialorder %v7495_v7, 0.0004427343  ;;  %v4567_v59 = vmax.f32 %v4565_v13, %v4566_v49  ;;  %v3078_v63 = vadd.f32 %v17469_v53, %v15283_v26 }
 0x646   : > { %v9763_v42 = vpop.eup %9762  ;;  %v7488_v62 = vsel %vm15684_vm4, %v7485_v46, %v7482_v18  ;;  %v7507_v51 = vadd.f32 1.0, %v5723_v40  ;;  %v4580_v38 = vrot.slane %v4579_v22, 4  ;;  %v3086_v37 = vadd.f32 %v17470_v28, %v15297_v39 }
 0x647   : > { %v8647_v47 = vrot.slane %v7488_v62, 1  ;;  %v7500_v50 = vmul.f32 0.6931472, %v9763_v42  ;;  %v4564_v7 = vmax.f32 %v4562_v14, %v4563_v3  ;;  %v4577_v10 = vrot.slane %v4576_v34, 1 }
 0x648   : > { %9766 = vlog2.f32 %v7507_v51  ;;  %v7510_v13 = vmul.f32 -0.5, %v5723_v40  ;;  %v4568_v57 = vrot.slane %v4567_v59, 2  ;;  %v3080_v26 = vadd.f32 %v17469_v53, %v15285_v33 }
 0x649   : > { %v9765_v56 = vpop.eup %9764  ;;  %v8648_v5 = vsel %vm8367_vm11, %v8647_v47, %v15645_v17  ;;  %v7506_v46 = vsel %vm15707_vm5, %v7503_v1, %v7500_v50  ;;  %v5174_v8 = vmax.f32 %v4564_v7, -2.3819763e+38  ;;  %v4578_v39 = vmax.f32 %v4576_v34, %v4577_v10 }
 0x64a   : > { %8855 = vst [vmem:[%s11470_s10 + $0xa0] sm:$0xff] %v8648_v5  ;;  %v8675_v49 = vrot.slane %v7506_v46, 1  ;;  %v7491_v14 = vmul.f32 0.6931472, %v9765_v56  ;;  %v7513_v18 = vand.u32 2147483647, %v5723_v40  ;;  %v4569_v3 = vmax.f32 %v4567_v59, %v4568_v57 }
 0x64b   : > { %v5472_v42 = vadd.f32 %v13736_v23, %v5174_v8  ;;  %v5176_v62 = vmax.f32 %v4578_v39, -2.3819763e+38  ;;  %v4581_v51 = vmax.f32 %v4579_v22, %v4580_v38  ;;  %v4614_v33 = vmax.f32 %v3078_v63, %v3086_v37 }
 0x64c   : > { %v8676_v17 = vsel %vm8367_vm11, %v8675_v49, %v15651_v19  ;;  %v7497_v1 = vsel %vm15711_vm8, %v7494_v27, %v7491_v14  ;;  %v4570_v58 = vrot.slane %v4569_v3, 1  ;;  %v3088_v34 = vadd.f32 %v17470_v28, %v15299_v60 }
 0x64d   : > { %8857 = vst [vmem:[%s11470_s10 + $0xb0] sm:$0xff] %v8676_v17  ;;  %v8661_v47 = vrot.slane %v7497_v1, 1  ;;  %v5728_v50 = vmax.f32 %v5472_v42, 0.0  ;;  %v5474_v59 = vadd.f32 %v13740_v29, %v5176_v62  ;;  %v4582_v7 = vrot.slane %v4581_v51, 2 }
 0x64e   : > { %v7511_v10 = vadd.f32 1.0, %v7510_v13  ;;  %v4571_v22 = vmax.f32 %v4569_v3, %v4570_v58  ;;  %v4615_v63 = vrot.slane %v4614_v33, 4  ;;  %v4628_v38 = vmax.f32 %v3080_v26, %v3088_v34 }
 0x64f   : > { %v8662_v19 = vsel %vm8367_vm11, %v8661_v47, %v15674_v24  ;;  %v7552_v37 = vadd.f32 1.0, %v5728_v50  ;;  %v5730_v27 = vmax.f32 %v5474_v59, 0.0  ;;  %v4583_v57 = vmax.f32 %v4581_v51, %v4582_v7  ;;  %v15753_v51 = vpop.f32.mrb[252].mxu0 }
 0x650   : > { %8856 = vst [vmem:[%s11470_s10 + $0xa8] sm:$0xff] %v8662_v19  ;;  %v5175_v36 = vmax.f32 %v4571_v22, -2.3819763e+38  ;;  %v4616_v56 = vmax.f32 %v4614_v33, %v4615_v63  ;;  %vm15742_vm9 = vcmp.lt.f32.partialorder %v7513_v18, 0.0004427343  ;;  %v3079_v5 = vadd.f32 %v17469_v53, %v15293_v55  ;;  %v15759_v1 = vpop.f32.mrb[253].mxu0 }
 0x651   : > { %v3081_v13 = vadd.f32 %v17469_v53, %v15295_v31  ;;  %v4629_v26 = vrot.slane %v4628_v38, 4  ;;  %v7512_v8 = vmul.f32 %v7511_v10, %v5723_v40  ;;  %9768 = vlog2.f32 %v7552_v37  ;;  %v15755_v31 = vpop.f32.mrb[252].mxu1  ;;  %17473 = vst [vmem:[#allocation16_spill] sm:$0xff] %v15759_v1 }
 0x652   : > { %v9767_v46 = vpop.eup %9766  ;;  %v7570_v24 = vadd.f32 1.0, %v5730_v27  ;;  %v5473_v39 = vadd.f32 %v13768_v11, %v5175_v36  ;;  %v7555_v14 = vmul.f32 -0.5, %v5728_v50  ;;  %v4584_v3 = vrot.slane %v4583_v57, 1  ;;  %v15761_v58 = vpop.f32.mrb[253].mxu1 }
 0x653   : > { %v7509_v49 = vmul.f32 0.6931472, %v9767_v46  ;;  %v4617_v18 = vrot.slane %v4616_v56, 2  ;;  %v7573_v42 = vmul.f32 -0.5, %v5730_v27  ;;  %v3087_v55 = vadd.f32 %v17470_v28, %v15314_v6  ;;  %17474 = vst [vmem:[#allocation56_spill] sm:$0xff] %v15761_v58  ;;  %v15763_v6 = vpop.f32.mrb[254].mxu0 }
 0x654   : > { %9770 = vlog2.f32 %v7570_v24  ;;  %v5729_v62 = vmax.f32 %v5473_v39, 0.0  ;;  %v4585_v53 = vmax.f32 %v4583_v57, %v4584_v3  ;;  %v4630_v17 = vmax.f32 %v4628_v38, %v4629_v26 }
 0x655   : > { %v7515_v40 = vsel %vm15742_vm9, %v7512_v8, %v7509_v49  ;;  %v4618_v33 = vmax.f32 %v4616_v56, %v4617_v18  ;;  %v7558_v47 = vand.u32 2147483647, %v5728_v50  ;;  %v7556_v10 = vadd.f32 1.0, %v7555_v14  ;;  %v15767_v56 = vpop.f32.mrb[254].mxu1 }
 0x656   : > { %v8689_v34 = vrot.slane %v7515_v40, 1  ;;  %v7561_v59 = vadd.f32 1.0, %v5729_v62  ;;  %v7564_v7 = vmul.f32 -0.5, %v5729_v62  ;;  %v5177_v22 = vmax.f32 %v4585_v53, -2.3819763e+38  ;;  %17475 = vst [vmem:[#allocation77_spill] sm:$0xff] %v15767_v56 }
 0x657   : > { %v4619_v63 = vrot.slane %v4618_v33, 1  ;;  %v4631_v19 = vrot.slane %v4630_v17, 2  ;;  %v7574_v36 = vadd.f32 1.0, %v7573_v42  ;;  %v7576_v38 = vand.u32 2147483647, %v5730_v27 }
 0x658   : > { %v8690_v37 = vsel %vm8367_vm11, %v8689_v34, %v15702_v35  ;;  %v4621_v57 = vmax.f32 %v3079_v5, %v3087_v55  ;;  %9772 = vlog2.f32 %v7561_v59  ;;  %v5475_v60 = vadd.f32 %v13775_v30, %v5177_v22 }
 0x659   : > { %8858 = vst [vmem:[%s11470_s10 + $0xb8] sm:$0xff] %v8690_v37  ;;  %v4620_v26 = vmax.f32 %v4618_v33, %v4619_v63  ;;  %v4632_v46 = vmax.f32 %v4630_v17, %v4631_v19  ;;  %vm15771_vm12 = vcmp.lt.f32.partialorder %v7558_v47, 0.0004427343  ;;  %v7565_v24 = vadd.f32 1.0, %v7564_v7 }
 0x65a   : > { %v4622_v39 = vrot.slane %v4621_v57, 4  ;;  %v3089_v35 = vadd.f32 %v17470_v28, %v15332_v44  ;;  %v15777_v49 = vmul.f32 %v7556_v10, %v5728_v50  ;;  %v5731_v5 = vmax.f32 %v5475_v60, 0.0  ;;  %v15788_v10 = vpop.f32.mrb[255].mxu0 }
 0x65b   : > { %v5182_v14 = vmax.f32 %v4620_v26, -2.3819763e+38  ;;  %v4633_v3 = vrot.slane %v4632_v46, 1  ;;  %v9769_v18 = vpop.eup %9768  ;;  %v15779_v42 = vmul.f32 %v7574_v36, %v5730_v27  ;;  %vm15781_vm14 = vcmp.lt.f32.partialorder %v7576_v38, 0.0004427343  ;;  %17480 = vst [vmem:[#allocation27_spill] sm:$0xff] %v15788_v10 }
 0x65c   : > { %v4623_v40 = vmax.f32 %v4621_v57, %v4622_v39  ;;  %v4635_v53 = vmax.f32 %v3081_v13, %v3089_v35  ;;  %v7567_v33 = vand.u32 2147483647, %v5729_v62  ;;  %v7579_v17 = vadd.f32 1.0, %v5731_v5  ;;  %v17481_v13 = vld [vmem:[#allocation79_spill] sm:$0xff]  ;;  %v15796_v57 = vpop.f32.mrb[255].mxu1  ;;  %v17487_v10 = vld [vmem:[#allocation24_spill] sm:$0xff] }
 0x65d   : > { %v7582_v34 = vmul.f32 -0.5, %v5731_v5  ;;  %v5480_v47 = vadd.f32 %v13736_v23, %v5182_v14  ;;  %v15786_v28 = vmul.f32 %v7565_v24, %v5729_v62  ;;  %v4634_v50 = vmax.f32 %v4632_v46, %v4633_v3  ;;  %17482 = vst [vmem:[#allocation60_spill] sm:$0xff] %v15796_v57  ;;  %v17485_v24 = vld [vmem:[#allocation81_spill] sm:$0xff] }
 0x65e   : > { %v9771_v44 = vpop.eup %9770  ;;  %v4624_v59 = vrot.slane %v4623_v40, 2  ;;  %v4636_v7 = vrot.slane %v4635_v53, 4  ;;  %v15790_v27 = vmul.f32 0.6931472, %v9769_v18  ;;  %9774 = vlog2.f32 %v7579_v17 }
 0x65f   : > { %v15792_v22 = vmul.f32 0.6931472, %v9771_v44  ;;  %v3094_v63 = vadd.f32 %v17481_v13, %v15357_v4  ;;  %v5736_v19 = vmax.f32 %v5480_v47, 0.0  ;;  %v5184_v37 = vmax.f32 %v4634_v50, -2.3819763e+38 }
 0x660   : > { %v4625_v36 = vmax.f32 %v4623_v40, %v4624_v59  ;;  %v4637_v38 = vmax.f32 %v4635_v53, %v4636_v7  ;;  %vm15798_vm1 = vcmp.lt.f32.partialorder %v7567_v33, 0.0004427343  ;;  %v7583_v60 = vadd.f32 1.0, %v7582_v34  ;;  %v17486_v40 = vld [vmem:[#allocation36_spill] sm:$0xff] }
 0x661   : > { %v3096_v26 = vadd.f32 %v17481_v13, %v15359_v48  ;;  %v3095_v46 = vadd.f32 %v17481_v13, %v15367_v2  ;;  %v3102_v4 = vadd.f32 %v17485_v24, %v15372_v61  ;;  %v7585_v39 = vand.u32 2147483647, %v5731_v5 }
 0x662   : > { %v7624_v35 = vadd.f32 1.0, %v5736_v19  ;;  %v7627_v14 = vmul.f32 -0.5, %v5736_v19  ;;  %v5482_v3 = vadd.f32 %v13740_v29, %v5184_v37  ;;  %v9773_v18 = vpop.eup %9772  ;;  %v4626_v53 = vrot.slane %v4625_v36, 1 }
 0x663   : > { %v4638_v33 = vrot.slane %v4637_v38, 2  ;;  %v4670_v48 = vmax.f32 %v3094_v63, %v3102_v4  ;;  %v7630_v61 = vand.u32 2147483647, %v5736_v19  ;;  %v15817_v34 = vmul.f32 %v7583_v60, %v5731_v5  ;;  %v17497_v5 = vld [vmem:[#allocation64_spill] sm:$0xff] }
 0x664   : > { %9776 = vlog2.f32 %v7624_v35  ;;  %v5738_v17 = vmax.f32 %v5482_v3, 0.0  ;;  %v4627_v47 = vmax.f32 %v4625_v36, %v4626_v53  ;;  %v15819_v59 = vmul.f32 0.6931472, %v9773_v18 }
 0x665   : > { %v4639_v44 = vmax.f32 %v4637_v38, %v4638_v33  ;;  %v4671_v50 = vrot.slane %v4670_v48, 4  ;;  %v7628_v7 = vadd.f32 1.0, %v7627_v14  ;;  %v3097_v63 = vadd.f32 %v17481_v13, %v17486_v40 }
 0x666   : > { %v7642_v37 = vadd.f32 1.0, %v5738_v17  ;;  %v5183_v4 = vmax.f32 %v4627_v47, -2.3819763e+38  ;;  %v3104_v35 = vadd.f32 %v17485_v24, %v17487_v10  ;;  %vm15825_vm2 = vcmp.lt.f32.partialorder %v7585_v39, 0.0004427343 }
 0x667   : > { %v4640_v57 = vrot.slane %v4639_v44, 1  ;;  %v4672_v58 = vmax.f32 %v4670_v48, %v4671_v50  ;;  %vm15829_vm0 = vcmp.lt.f32.partialorder %v7630_v61, 0.0004427343  ;;  %v7645_v36 = vmul.f32 -0.5, %v5738_v17 }
 0x668   : > { %9778 = vlog2.f32 %v7642_v37  ;;  %v3103_v38 = vadd.f32 %v17485_v24, %v15402_v21  ;;  %v9775_v13 = vpop.eup %9774  ;;  %v5481_v60 = vadd.f32 %v13768_v11, %v5183_v4  ;;  %v4684_v40 = vmax.f32 %v3096_v26, %v3104_v35 }
 0x669   : > { %v4641_v14 = vmax.f32 %v4639_v44, %v4640_v57  ;;  %v4673_v18 = vrot.slane %v4672_v58, 2  ;;  %v7648_v39 = vand.u32 2147483647, %v5738_v17  ;;  %v3105_v33 = vadd.f32 %v17485_v24, %v15404_v20 }
 0x66a   : > { %v4677_v53 = vmax.f32 %v3095_v46, %v3103_v38  ;;  %v5737_v48 = vmax.f32 %v5481_v60, 0.0  ;;  %v4685_v21 = vrot.slane %v4684_v40, 4  ;;  %v7629_v50 = vmul.f32 %v7628_v7, %v5736_v19 }
 0x66b   : > { %v5185_v61 = vmax.f32 %v4641_v14, -2.3819763e+38  ;;  %v4674_v47 = vmax.f32 %v4672_v58, %v4673_v18  ;;  %v7646_v37 = vadd.f32 1.0, %v7645_v36  ;;  %v4691_v57 = vmax.f32 %v3097_v63, %v3105_v33 }
 0x66c   : > { %v4678_v4 = vrot.slane %v4677_v53, 4  ;;  %v15842_v44 = vmul.f32 0.6931472, %v9775_v13  ;;  %v7633_v26 = vadd.f32 1.0, %v5737_v48  ;;  %v7636_v35 = vmul.f32 -0.5, %v5737_v48 }
 0x66d   : > { %v5483_v2 = vadd.f32 %v13775_v30, %v5185_v61  ;;  %v4675_v56 = vrot.slane %v4674_v47, 1  ;;  %v4686_v46 = vmax.f32 %v4684_v40, %v4685_v21  ;;  %v4692_v1 = vrot.slane %v4691_v57, 4 }
 0x66e   : > { %v9777_v10 = vpop.eup %9776  ;;  %v4679_v38 = vmax.f32 %v4677_v53, %v4678_v4  ;;  %vm15845_vm4 = vcmp.lt.f32.partialorder %v7648_v39, 0.0004427343  ;;  %9780 = vlog2.f32 %v7633_v26  ;;  %v7639_v58 = vand.u32 2147483647, %v5737_v48 }
 0x66f   : > { %v7626_v20 = vmul.f32 0.6931472, %v9777_v10  ;;  %v5739_v19 = vmax.f32 %v5483_v2, 0.0  ;;  %v4676_v7 = vmax.f32 %v4674_v47, %v4675_v56  ;;  %v4687_v63 = vrot.slane %v4686_v46, 2 }
 0x670   : > { %v4680_v36 = vrot.slane %v4679_v38, 2  ;;  %v7587_v13 = vsel %vm15825_vm2, %v15817_v34, %v15842_v44  ;;  %v7647_v14 = vmul.f32 %v7646_v37, %v5738_v17  ;;  %v7637_v18 = vadd.f32 1.0, %v7636_v35 }
 0x671   : > { %v7632_v60 = vsel %vm15829_vm0, %v7629_v50, %v7626_v20  ;;  %v7651_v39 = vadd.f32 1.0, %v5739_v19  ;;  %v7654_v53 = vmul.f32 -0.5, %v5739_v19  ;;  %v4693_v33 = vmax.f32 %v4691_v57, %v4692_v1  ;;  %v17498_v50 = vld [vmem:[#allocation87_spill] sm:$0xff] }
 0x672   : > { %v9779_v40 = vpop.eup %9778  ;;  %v8747_v10 = vrot.slane %v7632_v60, 7  ;;  %v5190_v2 = vmax.f32 %v4676_v7, -2.3819763e+38  ;;  %v4688_v56 = vmax.f32 %v4686_v46, %v4687_v63  ;;  %v4681_v47 = vmax.f32 %v4679_v38, %v4680_v36  ;;  %v17500_v60 = vld [vmem:[#allocation42_spill] sm:$0xff] }
 0x673   : > { %v7644_v61 = vmul.f32 0.6931472, %v9779_v40  ;;  %v17494_v21 = vsel %vm15771_vm12, %v15777_v49, %v15790_v27  ;;  %vm15863_vm5 = vcmp.lt.f32.partialorder %v7639_v58, 0.0004427343  ;;  %9782 = vlog2.f32 %v7651_v39  ;;  %v17501_v40 = vld [vmem:[#allocation94_spill] sm:$0xff] }
 0x674   : > { %v15861_v4 = vsel %vm8349_vm6, %v8747_v10, %v17494_v21  ;;  %v3110_v1 = vadd.f32 %v17498_v50, %v17497_v5  ;;  %v5488_v57 = vadd.f32 %v13736_v23, %v5190_v2  ;;  %v4689_v8 = vrot.slane %v4688_v56, 1  ;;  %v17503_v2 = vld [vmem:[#allocation44_spill] sm:$0xff] }
 0x675   : > { %v7650_v37 = vsel %vm15845_vm4, %v7647_v14, %v7644_v61  ;;  %v4682_v26 = vrot.slane %v4681_v47, 1  ;;  %v7638_v49 = vmul.f32 %v7637_v18, %v5737_v48  ;;  %v7657_v27 = vand.u32 2147483647, %v5739_v19  ;;  %v17502_v48 = vld [vmem:[#allocation88_spill] sm:$0xff] }
 0x676   : > { %v8775_v35 = vrot.slane %v7650_v37, 7  ;;  %v4694_v46 = vrot.slane %v4693_v33, 2  ;;  %v7655_v38 = vadd.f32 1.0, %v7654_v53  ;;  %v5744_v20 = vmax.f32 %v5488_v57, 0.0 }
 0x677   : > { %v4690_v58 = vmax.f32 %v4688_v56, %v4689_v8  ;;  %v4683_v7 = vmax.f32 %v4681_v47, %v4682_v26  ;;  %v17499_v63 = vsel %vm15781_vm14, %v15779_v42, %v15792_v22  ;;  %v3112_v14 = vadd.f32 %v17498_v50, %v17500_v60 }
 0x678   : > { %v15878_v24 = vsel %vm8349_vm6, %v8775_v35, %v17499_v63  ;;  %v4695_v36 = vmax.f32 %v4693_v33, %v4694_v46  ;;  %v3118_v18 = vadd.f32 %v17502_v48, %v17501_v40  ;;  %v9781_v10 = vpop.eup %9780  ;;  %v7696_v39 = vadd.f32 1.0, %v5744_v20 }
 0x679   : > { %v7699_v53 = vmul.f32 -0.5, %v5744_v20  ;;  %v5192_v61 = vmax.f32 %v4690_v58, -2.3819763e+38  ;;  %v3120_v55 = vadd.f32 %v17502_v48, %v17503_v2  ;;  %v7635_v56 = vmul.f32 0.6931472, %v9781_v10  ;;  %v17506_v58 = vld [vmem:[#allocation30_spill] sm:$0xff] }
 0x67a   : > { %v5191_v47 = vmax.f32 %v4683_v7, -2.3819763e+38  ;;  %v4696_v42 = vrot.slane %v4695_v36, 1  ;;  %v4726_v22 = vmax.f32 %v3110_v1, %v3118_v18  ;;  %v7656_v21 = vmul.f32 %v7655_v38, %v5739_v19 }
 0x67b   : > { %vm15886_vm8 = vcmp.lt.f32.partialorder %v7657_v27, 0.0004427343  ;;  %9784 = vlog2.f32 %v7696_v39  ;;  %v5490_v5 = vadd.f32 %v13740_v29, %v5192_v61  ;;  %v7641_v37 = vsel %vm15863_vm5, %v7638_v49, %v7635_v56 }
 0x67c   : > { %v5489_v57 = vadd.f32 %v13768_v11, %v5191_v47  ;;  %v4697_v8 = vmax.f32 %v4695_v36, %v4696_v42  ;;  %v4727_v26 = vrot.slane %v4726_v22, 4  ;;  %v8761_v35 = vrot.slane %v7641_v37, 7 }
 0x67d   : > { %v5746_v46 = vmax.f32 %v5490_v5, 0.0  ;;  %v3111_v1 = vadd.f32 %v17498_v50, %v17506_v58  ;;  %v4740_v19 = vmax.f32 %v3112_v14, %v3120_v55  ;;  %v9783_v27 = vpop.eup %9782  ;;  %v7700_v38 = vadd.f32 1.0, %v7699_v53  ;;  %v17510_v55 = vld [vmem:[#allocation26_spill] sm:$0xff] }
 0x67e   : > { %v7702_v7 = vand.u32 2147483647, %v5744_v20  ;;  %v5745_v63 = vmax.f32 %v5489_v57, 0.0  ;;  %v5193_v60 = vmax.f32 %v4697_v8, -2.3819763e+38  ;;  %v17507_v17 = vsel %vm15798_vm1, %v15786_v28, %v15819_v59 }
 0x67f   : > { %v15902_v49 = vsel %vm8349_vm6, %v8761_v35, %v17507_v17  ;;  %v7653_v36 = vmul.f32 0.6931472, %v9783_v27  ;;  %v7714_v40 = vadd.f32 1.0, %v5746_v46  ;;  %v4728_v18 = vmax.f32 %v4726_v22, %v4727_v26 }
 0x680   : > { %v7717_v10 = vmul.f32 -0.5, %v5746_v46  ;;  %v7720_v39 = vand.u32 2147483647, %v5746_v46  ;;  %v7705_v61 = vadd.f32 1.0, %v5745_v63  ;;  %v3119_v14 = vadd.f32 %v17502_v48, %v15479_v43 }
 0x681   : > { %v7659_v53 = vsel %vm15886_vm8, %v7656_v21, %v7653_v36  ;;  %9786 = vlog2.f32 %v7714_v40  ;;  %v7708_v62 = vmul.f32 -0.5, %v5745_v63  ;;  %v5491_v2 = vadd.f32 %v13775_v30, %v5193_v60 }
 0x682   : > { %v8789_v28 = vrot.slane %v7659_v53, 7  ;;  %vm15909_vm9 = vcmp.lt.f32.partialorder %v7702_v7, 0.0004427343  ;;  %9788 = vlog2.f32 %v7705_v61  ;;  %v3113_v56 = vadd.f32 %v17498_v50, %v17510_v55 }
 0x683   : > { %v7701_v47 = vmul.f32 %v7700_v38, %v5744_v20  ;;  %v7711_v42 = vand.u32 2147483647, %v5745_v63  ;;  %v5747_v22 = vmax.f32 %v5491_v2, 0.0  ;;  %v4729_v43 = vrot.slane %v4728_v18, 2 }
 0x684   : > { %v15921_v21 = vsel %vm8349_vm6, %v8789_v28, %v7587_v13  ;;  %v7718_v33 = vadd.f32 1.0, %v7717_v10  ;;  %v4741_v5 = vrot.slane %v4740_v19, 4  ;;  %v4733_v37 = vmax.f32 %v3111_v1, %v3119_v14 }
 0x685   : > { %v9785_v57 = vpop.eup %9784  ;;  %vm15923_vm12 = vcmp.lt.f32.partialorder %v7720_v39, 0.0004427343  ;;  %v7709_v50 = vadd.f32 1.0, %v7708_v62  ;;  %v7723_v20 = vadd.f32 1.0, %v5747_v22  ;;  %v7726_v26 = vmul.f32 -0.5, %v5747_v22 }
 0x686   : > { %v4730_v35 = vmax.f32 %v4728_v18, %v4729_v43  ;;  %v7698_v58 = vmul.f32 0.6931472, %v9785_v57  ;;  %v4742_v3 = vmax.f32 %v4740_v19, %v4741_v5  ;;  %v4734_v27 = vrot.slane %v4733_v37, 4  ;;  %v17518_v43 = vld [vmem:[#allocation29_spill] sm:$0xff]  ;;  %v17519_v5 = vld [vmem:[#allocation47_spill] sm:$0xff] }
 0x687   : > { %v3121_v34 = vadd.f32 %v17502_v48, %v15483_v32  ;;  %9790 = vlog2.f32 %v7723_v20  ;;  %v7727_v44 = vadd.f32 1.0, %v7726_v26  ;;  %v7729_v13 = vand.u32 2147483647, %v5747_v22 }
 0x688   : > { %v4731_v38 = vrot.slane %v4730_v35, 1  ;;  %v7704_v1 = vsel %vm15909_vm9, %v7701_v47, %v7698_v58  ;;  %v4743_v7 = vrot.slane %v4742_v3, 2  ;;  %v4735_v60 = vmax.f32 %v4733_v37, %v4734_v27 }
 0x689   : > { %v4747_v17 = vmax.f32 %v3113_v56, %v3121_v34  ;;  %v8749_v36 = vrot.slane %v7704_v1, 6  ;;  %v7719_v40 = vmul.f32 %v7718_v33, %v5746_v46  ;;  %vm15931_vm6 = vcmp.lt.f32.partialorder %v7711_v42, 0.0004427343  ;;  %v17517_v42 = vld [vmem:[#allocation63_spill] sm:$0xff] }
 0x68a   : > { %v4732_v19 = vmax.f32 %v4730_v35, %v4731_v38  ;;  %v7710_v10 = vmul.f32 %v7709_v50, %v5745_v63  ;;  %v4744_v39 = vmax.f32 %v4742_v3, %v4743_v7  ;;  %v4736_v32 = vrot.slane %v4735_v60, 2 }
 0x68b   : > { %v4748_v48 = vrot.slane %v4747_v17, 4  ;;  %v9787_v61 = vpop.eup %9786  ;;  %v15937_v14 = vsel %vm8352_vm10, %v8749_v36, %v15861_v4  ;;  %v7728_v53 = vmul.f32 %v7727_v44, %v5747_v22  ;;  %vm15939_vm14 = vcmp.lt.f32.partialorder %v7729_v13, 0.0004427343  ;;  %v17520_v4 = vld [vmem:[#allocation32_spill] sm:$0xff] }
 0x68c   : > { %v5198_v46 = vmax.f32 %v4732_v19, -2.3819763e+38  ;;  %v9789_v2 = vpop.eup %9788  ;;  %v7716_v28 = vmul.f32 0.6931472, %v9787_v61  ;;  %v4745_v59 = vrot.slane %v4744_v39, 1  ;;  %v4737_v55 = vmax.f32 %v4735_v60, %v4736_v32 }
 0x68d   : > { %v4749_v56 = vmax.f32 %v4747_v17, %v4748_v48  ;;  %v7707_v63 = vmul.f32 0.6931472, %v9789_v2  ;;  %v3126_v33 = vadd.f32 %v17518_v43, %v17517_v42  ;;  %v3134_v37 = vadd.f32 %v17520_v4, %v17519_v5 }
 0x68e   : > { %v5496_v47 = vadd.f32 %v13736_v23, %v5198_v46  ;;  %v7722_v22 = vsel %vm15923_vm12, %v7719_v40, %v7716_v28  ;;  %v4746_v57 = vmax.f32 %v4744_v39, %v4745_v59  ;;  %v4738_v50 = vrot.slane %v4737_v55, 1 }
 0x68f   : > { %v4750_v20 = vrot.slane %v4749_v56, 2  ;;  %v8777_v26 = vrot.slane %v7722_v22, 6  ;;  %v7713_v35 = vsel %vm15931_vm6, %v7710_v10, %v7707_v63  ;;  %v4782_v3 = vmax.f32 %v3126_v33, %v3134_v37  ;;  %v17521_v10 = vld [vmem:[#allocation68_spill] sm:$0xff]  ;;  %v17523_v22 = vld [vmem:[#allocation25_spill] sm:$0xff] }
 0x690   : > { %v5752_v58 = vmax.f32 %v5496_v47, 0.0  ;;  %v8763_v27 = vrot.slane %v7713_v35, 6  ;;  %v5200_v34 = vmax.f32 %v4746_v57, -2.3819763e+38  ;;  %v4739_v44 = vmax.f32 %v4737_v55, %v4738_v50 }
 0x691   : > { %v4751_v13 = vmax.f32 %v4749_v56, %v4750_v20  ;;  %v9791_v38 = vpop.eup %9790  ;;  %v15954_v1 = vsel %vm8352_vm10, %v8777_v26, %v15878_v24  ;;  %v3136_v60 = vadd.f32 %v17520_v4, %v15542_v54  ;;  %v3128_v39 = vadd.f32 %v17518_v43, %v17521_v10  ;;  %v17522_v24 = vld [vmem:[#allocation75_spill] sm:$0xff] }
 0x692   : > { %v7768_v8 = vadd.f32 1.0, %v5752_v58  ;;  %v7771_v7 = vmul.f32 -0.5, %v5752_v58  ;;  %v15960_v17 = vsel %vm8352_vm10, %v8763_v27, %v15902_v49  ;;  %v7725_v36 = vmul.f32 0.6931472, %v9791_v38  ;;  %v17533_v27 = vld [vmem:[#allocation61_spill] sm:$0xff] }
 0x693   : > { %v5498_v40 = vadd.f32 %v13740_v29, %v5200_v34  ;;  %v5199_v18 = vmax.f32 %v4739_v44, -2.3819763e+38  ;;  %v4752_v19 = vrot.slane %v4751_v13, 1  ;;  %v3127_v32 = vadd.f32 %v17518_v43, %v17522_v24 }
 0x694   : > { %9792 = vlog2.f32 %v7768_v8  ;;  %v7731_v48 = vsel %vm15939_vm14, %v7728_v53, %v7725_v36  ;;  %v4783_v49 = vrot.slane %v4782_v3, 4  ;;  %v7774_v2 = vand.u32 2147483647, %v5752_v58 }
 0x695   : > { %v5754_v54 = vmax.f32 %v5498_v40, 0.0  ;;  %v5497_v61 = vadd.f32 %v13768_v11, %v5199_v18  ;;  %v8791_v46 = vrot.slane %v7731_v48, 6  ;;  %v4753_v28 = vmax.f32 %v4751_v13, %v4752_v19 }
 0x696   : > { %v4796_v59 = vmax.f32 %v3128_v39, %v3136_v60  ;;  %v7772_v55 = vadd.f32 1.0, %v7771_v7  ;;  %v4784_v5 = vmax.f32 %v4782_v3, %v4783_v49  ;;  %v3129_v57 = vadd.f32 %v17518_v43, %v17523_v22  ;;  %v17531_v22 = vld [vmem:[#allocation67_spill] sm:$0xff] }
 0x697   : > { %v7786_v56 = vadd.f32 1.0, %v5754_v54  ;;  %v7789_v63 = vmul.f32 -0.5, %v5754_v54  ;;  %v5753_v47 = vmax.f32 %v5497_v61, 0.0  ;;  %v15972_v42 = vsel %vm8352_vm10, %v8791_v46, %v15921_v21  ;;  %v17530_v61 = vld [vmem:[#allocation48_spill] sm:$0xff] }
 0x698   : > { %v5201_v33 = vmax.f32 %v4753_v28, -2.3819763e+38  ;;  %v4797_v62 = vrot.slane %v4796_v59, 4  ;;  %v7792_v53 = vand.u32 2147483647, %v5754_v54  ;;  %v4785_v35 = vrot.slane %v4784_v5, 2 }
 0x699   : > { %9794 = vlog2.f32 %v7786_v56  ;;  %v7777_v37 = vadd.f32 1.0, %v5753_v47  ;;  %v7790_v50 = vadd.f32 1.0, %v7789_v63  ;;  %v7780_v20 = vmul.f32 -0.5, %v5753_v47 }
 0x69a   : > { %v5499_v26 = vadd.f32 %v13775_v30, %v5201_v33  ;;  %vm15977_vm1 = vcmp.lt.f32.partialorder %v7774_v2, 0.0004427343  ;;  %v4798_v21 = vmax.f32 %v4796_v59, %v4797_v62  ;;  %v3135_v3 = vadd.f32 %v17520_v4, %v15551_v0 }
 0x69b   : > { %9796 = vlog2.f32 %v7777_v37  ;;  %v7773_v34 = vmul.f32 %v7772_v55, %v5752_v58  ;;  %v7783_v44 = vand.u32 2147483647, %v5753_v47  ;;  %v4786_v38 = vmax.f32 %v4784_v5, %v4785_v35  ;;  %v17532_v35 = vld [vmem:[#allocation33_spill] sm:$0xff] }
 0x69c   : > { %v15983_v13 = vmax.f32 %v5499_v26, 0.0  ;;  %vm15985_vm10 = vcmp.lt.f32.partialorder %v7792_v53, 0.0004427343  ;;  %v4799_v8 = vrot.slane %v4798_v21, 2  ;;  %v4789_v7 = vmax.f32 %v3127_v32, %v3135_v3 }
 0x69d   : > { %v3137_v60 = vadd.f32 %v17520_v4, %v15565_v25  ;;  %v7791_v40 = vmul.f32 %v7790_v50, %v5754_v54  ;;  %v7781_v18 = vadd.f32 1.0, %v7780_v20  ;;  %v4787_v10 = vrot.slane %v4786_v38, 1 }
 0x69e   : > { %v9793_v36 = vpop.eup %9792  ;;  %v7795_v19 = vadd.f32 1.0, %v15983_v13  ;;  %v7798_v0 = vmul.f32 -0.5, %v15983_v13  ;;  %v4800_v39 = vmax.f32 %v4798_v21, %v4799_v8  ;;  %v4790_v24 = vrot.slane %v4789_v7, 4 }
 0x69f   : > { %v7770_v58 = vmul.f32 0.6931472, %v9793_v36  ;;  %vm15993_vm2 = vcmp.lt.f32.partialorder %v7783_v44, 0.0004427343  ;;  %v4803_v32 = vmax.f32 %v3129_v57, %v3137_v60  ;;  %v3142_v25 = vadd.f32 %v17530_v61, %v15599_v41 }
 0x6a0   : > { %9798 = vlog2.f32 %v7795_v19  ;;  %v4788_v54 = vmax.f32 %v4786_v38, %v4787_v10  ;;  %v4801_v49 = vrot.slane %v4800_v39, 1  ;;  %v4791_v46 = vmax.f32 %v4789_v7, %v4790_v24 }
 0x6a1   : > { %v7776_v4 = vsel %vm15977_vm1, %v7773_v34, %v7770_v58  ;;  %v7782_v28 = vmul.f32 %v7781_v18, %v5753_v47  ;;  %v7801_v59 = vand.u32 2147483647, %v15983_v13  ;;  %v4804_v55 = vrot.slane %v4803_v32, 4 }
 0x6a2   : > { %v8751_v2 = vrot.slane %v7776_v4, 5  ;;  %v7799_v63 = vadd.f32 1.0, %v7798_v0  ;;  %v5206_v33 = vmax.f32 %v4788_v54, -2.3819763e+38  ;;  %v4802_v5 = vmax.f32 %v4800_v39, %v4801_v49 }
 0x6a3   : > { %v9795_v56 = vpop.eup %9794  ;;  %v4792_v62 = vrot.slane %v4791_v46, 2  ;;  %v4805_v37 = vmax.f32 %v4803_v32, %v4804_v55  ;;  %v3144_v57 = vadd.f32 %v17530_v61, %v17531_v22  ;;  %v3150_v21 = vadd.f32 %v17533_v27, %v17532_v35  ;;  %v17538_v55 = vld [vmem:[#allocation69_spill] sm:$0xff]  ;;  %v17540_v35 = vld [vmem:[#allocation80_spill] sm:$0xff] }
 0x6a4   : > { %v16004_v53 = vsel %vm8355_vm15, %v8751_v2, %v15937_v14  ;;  %v7788_v41 = vmul.f32 0.6931472, %v9795_v56  ;;  %v5504_v47 = vadd.f32 %v13736_v23, %v5206_v33  ;;  %v5208_v20 = vmax.f32 %v4802_v5, -2.3819763e+38  ;;  %v17534_v14 = vld [vmem:[#allocation55_spill] sm:$0xff] }
 0x6a5   : > { %v9797_v50 = vpop.eup %9796  ;;  %v4793_v26 = vmax.f32 %v4791_v46, %v4792_v62  ;;  %v4806_v44 = vrot.slane %v4805_v37, 2  ;;  %v3152_v38 = vadd.f32 %v17533_v27, %v17534_v14  ;;  %v4838_v0 = vmax.f32 %v3142_v25, %v3150_v21 }
 0x6a6   : > { %v7794_v3 = vsel %vm15985_vm10, %v7791_v40, %v7788_v41  ;;  %v7779_v34 = vmul.f32 0.6931472, %v9797_v50  ;;  %v5760_v7 = vmax.f32 %v5504_v47, 0.0  ;;  %v5506_v60 = vadd.f32 %v13740_v29, %v5208_v20  ;;  %v17539_v20 = vld [vmem:[#allocation21_spill] sm:$0xff] }
 0x6a7   : > { %v8779_v8 = vrot.slane %v7794_v3, 5  ;;  %v4794_v36 = vrot.slane %v4793_v26, 1  ;;  %v4807_v19 = vmax.f32 %v4805_v37, %v4806_v44  ;;  %v4852_v58 = vmax.f32 %v3144_v57, %v3152_v38 }
 0x6a8   : > { %v7785_v18 = vsel %vm15993_vm2, %v7782_v28, %v7779_v34  ;;  %vm16022_vm0 = vcmp.lt.f32.partialorder %v7801_v59, 0.0004427343  ;;  %v7840_v39 = vadd.f32 1.0, %v5760_v7  ;;  %v7843_v32 = vmul.f32 -0.5, %v5760_v7  ;;  %v17537_v28 = vld [vmem:[#allocation46_spill] sm:$0xff] }
 0x6a9   : > { %v16020_v43 = vsel %vm8355_vm15, %v8779_v8, %v15954_v1  ;;  %v8765_v40 = vrot.slane %v7785_v18, 5  ;;  %v5762_v4 = vmax.f32 %v5506_v60, 0.0  ;;  %v4795_v54 = vmax.f32 %v4793_v26, %v4794_v36 }
 0x6aa   : > { %v9799_v24 = vpop.eup %9798  ;;  %v4808_v49 = vrot.slane %v4807_v19, 1  ;;  %v7800_v46 = vmul.f32 %v7799_v63, %v15983_v13  ;;  %9800 = vlog2.f32 %v7840_v39  ;;  %v3143_v59 = vadd.f32 %v17530_v61, %v17537_v28  ;;  %v17546_v28 = vld [vmem:[#allocation96_spill] sm:$0xff] }
 0x6ab   : > { %v16028_v48 = vsel %vm8355_vm15, %v8765_v40, %v15960_v17  ;;  %v7797_v25 = vmul.f32 0.6931472, %v9799_v24  ;;  %v7858_v1 = vadd.f32 1.0, %v5762_v4  ;;  %v7861_v2 = vmul.f32 -0.5, %v5762_v4 }
 0x6ac   : > { %v3145_v56 = vadd.f32 %v17530_v61, %v17538_v55  ;;  %v7846_v5 = vand.u32 2147483647, %v5760_v7  ;;  %v5207_v62 = vmax.f32 %v4795_v54, -2.3819763e+38  ;;  %v4809_v41 = vmax.f32 %v4807_v19, %v4808_v49 }
 0x6ad   : > { %v7803_v33 = vsel %vm16022_vm0, %v7800_v46, %v7797_v25  ;;  %v7844_v37 = vadd.f32 1.0, %v7843_v32  ;;  %9802 = vlog2.f32 %v7858_v1  ;;  %v7864_v22 = vand.u32 2147483647, %v5762_v4 }
 0x6ae   : > { %v8793_v17 = vrot.slane %v7803_v33, 5  ;;  %v5505_v13 = vadd.f32 %v13768_v11, %v5207_v62  ;;  %v5209_v63 = vmax.f32 %v4809_v41, -2.3819763e+38  ;;  %v4839_v57 = vrot.slane %v4838_v0, 4 }
 0x6af   : > { %v4853_v50 = vrot.slane %v4852_v58, 4  ;;  %v7862_v61 = vadd.f32 1.0, %v7861_v2  ;;  %v3151_v26 = vadd.f32 %v17533_v27, %v17539_v20  ;;  %v3153_v21 = vadd.f32 %v17533_v27, %v17540_v35  ;;  %v17545_v2 = vld [vmem:[#allocation72_spill] sm:$0xff] }
 0x6b0   : > { %v16040_v47 = vsel %vm8355_vm15, %v8793_v17, %v15972_v42  ;;  %v16046_v3 = vmax.f32 %v5505_v13, 0.0  ;;  %v5507_v34 = vadd.f32 %v13775_v30, %v5209_v63  ;;  %v4840_v44 = vmax.f32 %v4838_v0, %v4839_v57 }
 0x6b1   : > { %v4854_v14 = vmax.f32 %v4852_v58, %v4853_v50  ;;  %vm16049_vm4 = vcmp.lt.f32.partialorder %v7846_v5, 0.0004427343  ;;  %v4845_v8 = vmax.f32 %v3143_v59, %v3151_v26  ;;  %v4859_v42 = vmax.f32 %v3145_v56, %v3153_v21  ;;  %v17547_v5 = vld [vmem:[#allocation22_spill] sm:$0xff] }
 0x6b2   : > { %v7845_v60 = vmul.f32 %v7844_v37, %v5760_v7  ;;  %vm16053_vm15 = vcmp.lt.f32.partialorder %v7864_v22, 0.0004427343  ;;  %v7849_v18 = vadd.f32 1.0, %v16046_v3  ;;  %v5763_v27 = vmax.f32 %v5507_v34, 0.0 }
 0x6b3   : > { %v7852_v19 = vmul.f32 -0.5, %v16046_v3  ;;  %v4841_v40 = vrot.slane %v4840_v44, 2  ;;  %v4855_v10 = vrot.slane %v4854_v14, 2  ;;  %v4846_v0 = vrot.slane %v4845_v8, 4 }
 0x6b4   : > { %v9801_v58 = vpop.eup %9800  ;;  %v7863_v39 = vmul.f32 %v7862_v61, %v5762_v4  ;;  %9804 = vlog2.f32 %v7849_v18  ;;  %v7855_v24 = vand.u32 2147483647, %v16046_v3  ;;  %v7867_v32 = vadd.f32 1.0, %v5763_v27  ;;  %v17550_v18 = vld [vmem:[#allocation97_spill] sm:$0xff] }
 0x6b5   : > { %v7842_v54 = vmul.f32 0.6931472, %v9801_v58  ;;  %v7870_v7 = vmul.f32 -0.5, %v5763_v27  ;;  %v4842_v49 = vmax.f32 %v4840_v44, %v4841_v40  ;;  %v4860_v25 = vrot.slane %v4859_v42, 4 }
 0x6b6   : > { %9806 = vlog2.f32 %v7867_v32  ;;  %v4856_v46 = vmax.f32 %v4854_v14, %v4855_v10  ;;  %v4847_v1 = vmax.f32 %v4845_v8, %v4846_v0  ;;  %v3158_v59 = vadd.f32 %v17546_v28, %v17545_v2 }
 0x6b7   : > { %v9803_v55 = vpop.eup %9802  ;;  %v7848_v56 = vsel %vm16049_vm4, %v7845_v60, %v7842_v54  ;;  %v7853_v33 = vadd.f32 1.0, %v7852_v19  ;;  %v4843_v4 = vrot.slane %v4842_v49, 1  ;;  %v3160_v62 = vadd.f32 %v17546_v28, %v17547_v5 }
 0x6b8   : > { %v8753_v41 = vrot.slane %v7848_v56, 4  ;;  %v7860_v17 = vmul.f32 0.6931472, %v9803_v55  ;;  %vm16066_vm5 = vcmp.lt.f32.partialorder %v7855_v24, 0.0004427343  ;;  %v4857_v22 = vrot.slane %v4856_v46, 1 }
 0x6b9   : > { %v4848_v13 = vrot.slane %v4847_v1, 2  ;;  %v7871_v63 = vadd.f32 1.0, %v7870_v7  ;;  %v7873_v57 = vand.u32 2147483647, %v5763_v27  ;;  %v4844_v50 = vmax.f32 %v4842_v49, %v4843_v4 }
 0x6ba   : > { %v4861_v61 = vmax.f32 %v4859_v42, %v4860_v25  ;;  %v16072_v20 = vsel %vm8358_vm7, %v8753_v41, %v16004_v53  ;;  %v7866_v26 = vsel %vm16053_vm15, %v7863_v39, %v7860_v17  ;;  %v4858_v35 = vmax.f32 %v4856_v46, %v4857_v22 }
 0x6bb   : > { %v4849_v21 = vmax.f32 %v4847_v1, %v4848_v13  ;;  %v8781_v34 = vrot.slane %v7866_v26, 4  ;;  %v5214_v44 = vmax.f32 %v4844_v50, -2.3819763e+38  ;;  %v3159_v38 = vadd.f32 %v17546_v28, %v15688_v52 }
 0x6bc   : > { %v4862_v14 = vrot.slane %v4861_v61, 2  ;;  %v5216_v8 = vmax.f32 %v4858_v35, -2.3819763e+38  ;;  %v3166_v42 = vadd.f32 %v17550_v18, %v15694_v9  ;;  %v3168_v53 = vadd.f32 %v17550_v18, %v15696_v12 }
 0x6bd   : > { %v4850_v60 = vrot.slane %v4849_v21, 1  ;;  %v16084_v36 = vsel %vm8358_vm7, %v8781_v34, %v16020_v43  ;;  %v5512_v19 = vadd.f32 %v13736_v23, %v5214_v44  ;;  %v3167_v10 = vadd.f32 %v17550_v18, %v15705_v15 }
 0x6be   : > { %v4863_v40 = vmax.f32 %v4861_v61, %v4862_v14  ;;  %v9805_v0 = vpop.eup %9804  ;;  %v5514_v52 = vadd.f32 %v13740_v29, %v5216_v8  ;;  %v4894_v39 = vmax.f32 %v3158_v59, %v3166_v42  ;;  %v4908_v24 = vmax.f32 %v3160_v62, %v3168_v53 }
 0x6bf   : > { %v4851_v58 = vmax.f32 %v4849_v21, %v4850_v60  ;;  %v7851_v9 = vmul.f32 0.6931472, %v9805_v0  ;;  %v7854_v32 = vmul.f32 %v7853_v33, %v16046_v3  ;;  %v5768_v12 = vmax.f32 %v5512_v19, 0.0  ;;  %v17561_v0 = vld [vmem:[#allocation27_spill] sm:$0xff] }
 0x6c0   : > { %v4901_v54 = vmax.f32 %v3159_v38, %v3167_v10  ;;  %v9807_v7 = vpop.eup %9806  ;;  %v7872_v43 = vmul.f32 %v7871_v63, %v5763_v27  ;;  %vm7874_vm8 = vcmp.lt.f32.partialorder %v7873_v57, 0.0004427343  ;;  %v5770_v49 = vmax.f32 %v5514_v52, 0.0 }
 0x6c1   : > { %v4864_v25 = vrot.slane %v4863_v40, 1  ;;  %v7857_v46 = vsel %vm16066_vm5, %v7854_v32, %v7851_v9  ;;  %v7869_v15 = vmul.f32 0.6931472, %v9807_v7  ;;  %v7912_v1 = vadd.f32 1.0, %v5768_v12 }
 0x6c2   : > { %v5215_v2 = vmax.f32 %v4851_v58, -2.3819763e+38  ;;  %v8767_v55 = vrot.slane %v7857_v46, 4  ;;  %v7930_v56 = vadd.f32 1.0, %v5770_v49  ;;  %v4895_v59 = vrot.slane %v4894_v39, 4 }
 0x6c3   : > { %v4909_v4 = vrot.slane %v4908_v24, 4  ;;  %v7875_v5 = vsel %vm7874_vm8, %v7872_v43, %v7869_v15  ;;  %9808 = vlog2.f32 %v7912_v1  ;;  %v7915_v33 = vmul.f32 -0.5, %v5768_v12  ;;  %v17555_v1 = vld [vmem:[#allocation95_spill] sm:$0xff] }
 0x6c4   : > { %v16095_v3 = vsel %vm8358_vm7, %v8767_v55, %v16028_v48  ;;  %v8795_v27 = vrot.slane %v7875_v5, 4  ;;  %9810 = vlog2.f32 %v7930_v56  ;;  %v7933_v62 = vmul.f32 -0.5, %v5770_v49 }
 0x6c5   : > { %v5513_v41 = vadd.f32 %v13768_v11, %v5215_v2  ;;  %v3161_v17 = vadd.f32 %v17546_v28, %v15690_v45  ;;  %v4865_v22 = vmax.f32 %v4863_v40, %v4864_v25  ;;  %v4896_v13 = vmax.f32 %v4894_v39, %v4895_v59 }
 0x6c6   : > { %v16102_v37 = vsel %vm8358_vm7, %v8795_v27, %v16040_v47  ;;  %v4910_v63 = vmax.f32 %v4908_v24, %v4909_v4  ;;  %v7918_v57 = vand.u32 2147483647, %v5768_v12  ;;  %v4902_v48 = vrot.slane %v4901_v54, 4 }
 0x6c7   : > { %v16104_v50 = vmax.f32 %v5513_v41, 0.0  ;;  %v3169_v61 = vadd.f32 %v17550_v18, %v15717_v16  ;;  %v7916_v26 = vadd.f32 1.0, %v7915_v33  ;;  %v5217_v35 = vmax.f32 %v4865_v22, -2.3819763e+38 }
 0x6c8   : > { %v4897_v21 = vrot.slane %v4896_v13, 2  ;;  %v4911_v34 = vrot.slane %v4910_v63, 2  ;;  %v7934_v44 = vadd.f32 1.0, %v7933_v62  ;;  %v7936_v45 = vand.u32 2147483647, %v5770_v49 }
 0x6c9   : > { %v7921_v28 = vadd.f32 1.0, %v16104_v50  ;;  %v4903_v47 = vmax.f32 %v4901_v54, %v4902_v48  ;;  %v5515_v14 = vadd.f32 %v13775_v30, %v5217_v35  ;;  %v4915_v60 = vmax.f32 %v3161_v17, %v3169_v61 }
 0x6ca   : > { %v4898_v38 = vmax.f32 %v4896_v13, %v4897_v21  ;;  %v4912_v8 = vmax.f32 %v4910_v63, %v4911_v34  ;;  %v7924_v53 = vmul.f32 -0.5, %v16104_v50  ;;  %v7917_v10 = vmul.f32 %v7916_v26, %v5768_v12 }
 0x6cb   : > { %9812 = vlog2.f32 %v7921_v28  ;;  %v4904_v42 = vrot.slane %v4903_v47, 2  ;;  %v5771_v19 = vmax.f32 %v5515_v14, 0.0  ;;  %vm16111_vm7 = vcmp.lt.f32.partialorder %v7918_v57, 0.0004427343  ;;  %v17556_v57 = vld [vmem:[#allocation70_spill] sm:$0xff] }
 0x6cc   : > { %v4899_v16 = vrot.slane %v4898_v38, 1  ;;  %v4913_v18 = vrot.slane %v4912_v8, 1  ;;  %vm16115_vm9 = vcmp.lt.f32.partialorder %v7936_v45, 0.0004427343  ;;  %v7935_v9 = vmul.f32 %v7934_v44, %v5770_v49 }
 0x6cd   : > { %v9809_v40 = vpop.eup %9808  ;;  %v4905_v58 = vmax.f32 %v4903_v47, %v4904_v42  ;;  %v7939_v32 = vadd.f32 1.0, %v5771_v19  ;;  %v4916_v54 = vrot.slane %v4915_v60, 4  ;;  %v7925_v15 = vadd.f32 1.0, %v7924_v53 }
 0x6ce   : > { %v9811_v39 = vpop.eup %9810  ;;  %v7914_v24 = vmul.f32 0.6931472, %v9809_v40  ;;  %v4900_v43 = vmax.f32 %v4898_v38, %v4899_v16  ;;  %v4914_v25 = vmax.f32 %v4912_v8, %v4913_v18  ;;  %v3174_v2 = vadd.f32 %v17555_v1, %v15753_v51  ;;  %v17560_v16 = vld [vmem:[#allocation77_spill] sm:$0xff] }
 0x6cf   : > { %v7932_v7 = vmul.f32 0.6931472, %v9811_v39  ;;  %v4906_v46 = vrot.slane %v4905_v58, 1  ;;  %9814 = vlog2.f32 %v7939_v32  ;;  %v7942_v5 = vmul.f32 -0.5, %v5771_v19 }
 0x6d0   : > { %v7920_v12 = vsel %vm16111_vm7, %v7917_v10, %v7914_v24  ;;  %v5222_v59 = vmax.f32 %v4900_v43, -2.3819763e+38  ;;  %v5224_v49 = vmax.f32 %v4914_v25, -2.3819763e+38  ;;  %v4917_v33 = vmax.f32 %v4915_v60, %v4916_v54  ;;  %v17557_v60 = vld [vmem:[#allocation16_spill] sm:$0xff] }
 0x6d1   : > { %v8755_v55 = vrot.slane %v7920_v12, 3  ;;  %v7938_v56 = vsel %vm16115_vm9, %v7935_v9, %v7932_v7  ;;  %v4907_v27 = vmax.f32 %v4905_v58, %v4906_v46  ;;  %v7927_v41 = vand.u32 2147483647, %v16104_v50  ;;  %v17562_v9 = vld [vmem:[#allocation56_spill] sm:$0xff] }
 0x6d2   : > { %v8783_v4 = vrot.slane %v7938_v56, 3  ;;  %v5520_v17 = vadd.f32 %v13736_v23, %v5222_v59  ;;  %v5522_v51 = vadd.f32 %v13740_v29, %v5224_v49  ;;  %v4918_v63 = vrot.slane %v4917_v33, 2 }
 0x6d3   : > { %v16127_v62 = vsel %vm8361_vm13, %v8755_v55, %v16072_v20  ;;  %v5223_v13 = vmax.f32 %v4907_v27, -2.3819763e+38  ;;  %v3182_v48 = vadd.f32 %v17556_v57, %v15763_v6  ;;  %v7926_v26 = vmul.f32 %v7925_v15, %v16104_v50 }
 0x6d4   : > { %v16134_v22 = vsel %vm8361_vm13, %v8783_v4, %v16084_v36  ;;  %v7945_v20 = vand.u32 2147483647, %v5771_v19  ;;  %v5776_v35 = vmax.f32 %v5520_v17, 0.0  ;;  %v5778_v21 = vmax.f32 %v5522_v51, 0.0  ;;  %v17563_v4 = vld [vmem:[#allocation60_spill] sm:$0xff] }
 0x6d5   : > { %v9813_v61 = vpop.eup %9812  ;;  %v7943_v44 = vadd.f32 1.0, %v7942_v5  ;;  %v5521_v45 = vadd.f32 %v13768_v11, %v5223_v13  ;;  %v4950_v28 = vmax.f32 %v3174_v2, %v3182_v48  ;;  %vm7928_vm12 = vcmp.lt.f32.partialorder %v7927_v41, 0.0004427343 }
 0x6d6   : > { %v7923_v34 = vmul.f32 0.6931472, %v9813_v61  ;;  %v7984_v47 = vadd.f32 1.0, %v5776_v35  ;;  %v8002_v36 = vadd.f32 1.0, %v5778_v21  ;;  %v3176_v14 = vadd.f32 %v17555_v1, %v15755_v31 }
 0x6d7   : > { %v16142_v8 = vmax.f32 %v5521_v45, 0.0  ;;  %v4919_v6 = vmax.f32 %v4917_v33, %v4918_v63  ;;  %v3175_v50 = vadd.f32 %v17555_v1, %v17557_v60  ;;  %vm16146_vm6 = vcmp.lt.f32.partialorder %v7945_v20, 0.0004427343 }
 0x6d8   : > { %v7929_v38 = vsel %vm7928_vm12, %v7926_v26, %v7923_v34  ;;  %9816 = vlog2.f32 %v7984_v47  ;;  %v3184_v18 = vadd.f32 %v17556_v57, %v17560_v16  ;;  %v7944_v10 = vmul.f32 %v7943_v44, %v5771_v19 }
 0x6d9   : > { %v8769_v42 = vrot.slane %v7929_v38, 3  ;;  %v9815_v40 = vpop.eup %9814  ;;  %9818 = vlog2.f32 %v8002_v36  ;;  %v7993_v31 = vadd.f32 1.0, %v16142_v8  ;;  %v3183_v52 = vadd.f32 %v17556_v57, %v17561_v0 }
 0x6da   : > { %v7941_v39 = vmul.f32 0.6931472, %v9815_v40  ;;  %v7987_v24 = vmul.f32 -0.5, %v5776_v35  ;;  %v3177_v32 = vadd.f32 %v17555_v1, %v17562_v9  ;;  %v7990_v54 = vand.u32 2147483647, %v5776_v35 }
 0x6db   : > { %v16157_v58 = vsel %vm8361_vm13, %v8769_v42, %v16095_v3  ;;  %v8005_v7 = vmul.f32 -0.5, %v5778_v21  ;;  %9820 = vlog2.f32 %v7993_v31  ;;  %v4920_v43 = vrot.slane %v4919_v6, 1 }
 0x6dc   : > { %v7947_v19 = vsel %vm16146_vm6, %v7944_v10, %v7941_v39  ;;  %v7996_v25 = vmul.f32 -0.5, %v16142_v8  ;;  %v4951_v46 = vrot.slane %v4950_v28, 4  ;;  %v4964_v12 = vmax.f32 %v3176_v14, %v3184_v18 }
 0x6dd   : > { %v8797_v15 = vrot.slane %v7947_v19, 3  ;;  %v8008_v2 = vand.u32 2147483647, %v5778_v21  ;;  %v4921_v3 = vmax.f32 %v4919_v6, %v4920_v43  ;;  %v4957_v55 = vmax.f32 %v3175_v50, %v3183_v52 }
 0x6de   : > { %v7988_v56 = vadd.f32 1.0, %v7987_v24  ;;  %v4952_v59 = vmax.f32 %v4950_v28, %v4951_v46  ;;  %v4965_v49 = vrot.slane %v4964_v12, 4  ;;  %v3185_v1 = vadd.f32 %v17556_v57, %v17563_v4 }
 0x6df   : > { %v16168_v5 = vsel %vm8361_vm13, %v8797_v15, %v16102_v37  ;;  %v8006_v27 = vadd.f32 1.0, %v8005_v7  ;;  %v5225_v33 = vmax.f32 %v4921_v3, -2.3819763e+38  ;;  %v4958_v41 = vrot.slane %v4957_v55, 4 }
 0x6e0   : > { %v7997_v17 = vadd.f32 1.0, %v7996_v25  ;;  %v4953_v51 = vrot.slane %v4952_v59, 2  ;;  %v4966_v13 = vmax.f32 %v4964_v12, %v4965_v49  ;;  %v4971_v63 = vmax.f32 %v3177_v32, %v3185_v1 }
 0x6e1   : > { %vm16170_vm14 = vcmp.lt.f32.partialorder %v7990_v54, 0.0004427343  ;;  %vm16174_vm1 = vcmp.lt.f32.partialorder %v8008_v2, 0.0004427343  ;;  %v5523_v57 = vadd.f32 %v13775_v30, %v5225_v33  ;;  %v4959_v26 = vmax.f32 %v4957_v55, %v4958_v41 }
 0x6e2   : > { %v9817_v37 = vpop.eup %9816  ;;  %v7989_v20 = vmul.f32 %v7988_v56, %v5776_v35  ;;  %v4954_v34 = vmax.f32 %v4952_v59, %v4953_v51  ;;  %v4967_v44 = vrot.slane %v4966_v13, 2  ;;  %v4972_v45 = vrot.slane %v4971_v63, 4 }
 0x6e3   : > { %v9819_v28 = vpop.eup %9818  ;;  %v7986_v47 = vmul.f32 0.6931472, %v9817_v37  ;;  %v8007_v36 = vmul.f32 %v8006_v27, %v5778_v21  ;;  %v7999_v14 = vand.u32 2147483647, %v16142_v8  ;;  %v5779_v38 = vmax.f32 %v5523_v57, 0.0 }
 0x6e4   : > { %v8004_v6 = vmul.f32 0.6931472, %v9819_v28  ;;  %v7998_v60 = vmul.f32 %v7997_v17, %v16142_v8  ;;  %v4955_v50 = vrot.slane %v4954_v34, 1  ;;  %v4968_v42 = vmax.f32 %v4966_v13, %v4967_v44 }
 0x6e5   : > { %v9821_v53 = vpop.eup %9820  ;;  %v7992_v16 = vsel %vm16170_vm14, %v7989_v20, %v7986_v47  ;;  %v8011_v18 = vadd.f32 1.0, %v5779_v38  ;;  %v4960_v35 = vrot.slane %v4959_v26, 2  ;;  %v4973_v40 = vmax.f32 %v4971_v63, %v4972_v45 }
 0x6e6   : > { %v8757_v10 = vrot.slane %v7992_v16, 2  ;;  %v8010_v31 = vsel %vm16174_vm1, %v8007_v36, %v8004_v6  ;;  %v7995_v21 = vmul.f32 0.6931472, %v9821_v53  ;;  %v4956_v0 = vmax.f32 %v4954_v34, %v4955_v50 }
 0x6e7   : > { %v8785_v52 = vrot.slane %v8010_v31, 2  ;;  %vm8000_vm13 = vcmp.lt.f32.partialorder %v7999_v14, 0.0004427343  ;;  %9822 = vlog2.f32 %v8011_v18  ;;  %v4969_v9 = vrot.slane %v4968_v42, 1 }
 0x6e8   : > { %v16187_v8 = vsel %vm8364_vm3, %v8757_v10, %v16127_v62  ;;  %v8001_v39 = vsel %vm8000_vm13, %v7998_v60, %v7995_v21  ;;  %v5230_v24 = vmax.f32 %v4956_v0, -2.3819763e+38  ;;  %v4961_v7 = vmax.f32 %v4959_v26, %v4960_v35 }
 0x6e9   : > { %v16191_v32 = vsel %vm8364_vm3, %v8785_v52, %v16134_v22  ;;  %v8771_v54 = vrot.slane %v8001_v39, 2  ;;  %v8014_v43 = vmul.f32 -0.5, %v5779_v38  ;;  %v4970_v25 = vmax.f32 %v4968_v42, %v4969_v9 }
 0x6ea   : > { %v5528_v19 = vadd.f32 %v13736_v23, %v5230_v24  ;;  %v4974_v46 = vrot.slane %v4973_v40, 2  ;;  %v4962_v62 = vrot.slane %v4961_v7, 1  ;;  %v8017_v49 = vand.u32 2147483647, %v5779_v38 }
 0x6eb   : > { %v16196_v12 = vsel %vm8364_vm3, %v8771_v54, %v16157_v58  ;;  %v5232_v2 = vmax.f32 %v4970_v25, -2.3819763e+38  ;;  %v8015_v56 = vadd.f32 1.0, %v8014_v43 }
 0x6ec   : > { %v5784_v15 = vmax.f32 %v5528_v19, 0.0  ;;  %v4975_v3 = vmax.f32 %v4973_v40, %v4974_v46  ;;  %v4963_v55 = vmax.f32 %v4961_v7, %v4962_v62  ;;  %vm8018_vm10 = vcmp.lt.f32.partialorder %v8017_v49, 0.0004427343 }
 0x6ed   : > { %v5530_v22 = vadd.f32 %v13740_v29, %v5232_v2  ;;  %v8016_v17 = vmul.f32 %v8015_v56, %v5779_v38 }
 0x6ee   : > { %v8056_v59 = vadd.f32 1.0, %v5784_v15  ;;  %v5231_v4 = vmax.f32 %v4963_v55, -2.3819763e+38  ;;  %v4976_v1 = vrot.slane %v4975_v3, 1  ;;  %v8059_v13 = vmul.f32 -0.5, %v5784_v15 }
 0x6ef   : > { %v5786_v23 = vmax.f32 %v5530_v22, 0.0 }
 0x6f0   : > { %9824 = vlog2.f32 %v8056_v59  ;;  %v5529_v33 = vadd.f32 %v13768_v11, %v5231_v4  ;;  %v4977_v41 = vmax.f32 %v4975_v3, %v4976_v1  ;;  %v8060_v20 = vadd.f32 1.0, %v8059_v13 }
 0x6f1   : > { %v9823_v27 = vpop.eup %9822  ;;  %v8074_v51 = vadd.f32 1.0, %v5786_v23  ;;  %v8077_v34 = vmul.f32 -0.5, %v5786_v23  ;;  %v8062_v11 = vand.u32 2147483647, %v5784_v15  ;;  %v8080_v6 = vand.u32 2147483647, %v5786_v23 }
 0x6f2   : > { %v8013_v58 = vmul.f32 0.6931472, %v9823_v27  ;;  %v5785_v63 = vmax.f32 %v5529_v33, 0.0  ;;  %v5233_v48 = vmax.f32 %v4977_v41, -2.3819763e+38  ;;  %v8061_v14 = vmul.f32 %v8060_v20, %v5784_v15 }
 0x6f3   : > { %9826 = vlog2.f32 %v8074_v51  ;;  %v8078_v38 = vadd.f32 1.0, %v8077_v34  ;;  %vm8063_vm2 = vcmp.lt.f32.partialorder %v8062_v11, 0.0004427343 }
 0x6f4   : > { %v8019_v61 = vsel %vm8018_vm10, %v8016_v17, %v8013_v58  ;;  %v8065_v29 = vadd.f32 1.0, %v5785_v63  ;;  %v5531_v26 = vadd.f32 %v13775_v30, %v5233_v48  ;;  %v8068_v28 = vmul.f32 -0.5, %v5785_v63 }
 0x6f5   : > { %v8799_v57 = vrot.slane %v8019_v61, 2  ;;  %v8079_v53 = vmul.f32 %v8078_v38, %v5786_v23  ;;  %v8071_v16 = vand.u32 2147483647, %v5785_v63 }
 0x6f6   : > { %9828 = vlog2.f32 %v8065_v29  ;;  %v5787_v44 = vmax.f32 %v5531_v26, 0.0  ;;  %v8069_v42 = vadd.f32 1.0, %v8068_v28 }
 0x6f7   : > { %v8800_v37 = vsel %vm8364_vm3, %v8799_v57, %v16168_v5  ;;  %vm8081_vm3 = vcmp.lt.f32.partialorder %v8080_v6, 0.0004427343  ;;  %vm8072_vm0 = vcmp.lt.f32.partialorder %v8071_v16, 0.0004427343 }
 0x6f8   : > { %v8083_v47 = vadd.f32 1.0, %v5787_v44  ;;  %v8086_v18 = vmul.f32 -0.5, %v5787_v44  ;;  %v8070_v0 = vmul.f32 %v8069_v42, %v5785_v63  ;;  %v8089_v9 = vand.u32 2147483647, %v5787_v44 }
 0x6fa   : > { %v9825_v45 = vpop.eup %9824  ;;  %9830 = vlog2.f32 %v8083_v47  ;;  %v8087_v52 = vadd.f32 1.0, %v8086_v18  ;;  %vm8090_vm4 = vcmp.lt.f32.partialorder %v8089_v9, 0.0004427343 }
 0x6fb   : > { %v8058_v36 = vmul.f32 0.6931472, %v9825_v45 }
 0x6fc   : > { %v8088_v19 = vmul.f32 %v8087_v52, %v5787_v44 }
 0x6fd   : > { %v8064_v60 = vsel %vm8063_vm2, %v8061_v14, %v8058_v36  ;;  %v9827_v30 = vpop.eup %9826 }
 0x6fe   : > { %v8759_v50 = vrot.slane %v8064_v60, 1  ;;  %v8076_v5 = vmul.f32 0.6931472, %v9827_v30 }
 0x700   : > { %v8760_v35 = vsel %vm8367_vm11, %v8759_v50, %v16187_v8  ;;  %v9829_v40 = vpop.eup %9828  ;;  %v8082_v10 = vsel %vm8081_vm3, %v8079_v53, %v8076_v5 }
 0x701   : > { %8863 = vst [vmem:[%s11470_s10 + $0xe0] sm:$0xff] %v8760_v35  ;;  %v8787_v31 = vrot.slane %v8082_v10, 1  ;;  %v8067_v21 = vmul.f32 0.6931472, %v9829_v40 }
 0x703   : > { %v8788_v39 = vsel %vm8367_vm11, %v8787_v31, %v16191_v32  ;;  %v8073_v24 = vsel %vm8072_vm0, %v8070_v0, %v8067_v21 }
 0x704   : > { %8865 = vst [vmem:[%s11470_s10 + $0xf0] sm:$0xff] %v8788_v39  ;;  %v8773_v8 = vrot.slane %v8073_v24, 1  ;;  %v9831_v54 = vpop.eup %9830 }
 0x705   : > { %v8085_v43 = vmul.f32 0.6931472, %v9831_v54 }
 0x706   : > { %v8774_v7 = vsel %vm8367_vm11, %v8773_v8, %v16196_v12 }
 0x707   : > { %8864 = vst [vmem:[%s11470_s10 + $0xe8] sm:$0xff] %v8774_v7  ;;  %v8091_v25 = vsel %vm8090_vm4, %v8088_v19, %v8085_v43 }
 0x708   : > { %v8801_v32 = vrot.slane %v8091_v25, 1 }
 0x70a   : > { %v8802_v46 = vsel %vm8367_vm11, %v8801_v32, %v8800_v37 }
 0x70b   : > { %8866 = vst [vmem:[%s11470_s10 + $0xf8] sm:$0xff] %v8802_v46 }
 0x70c   : > { %9906 = shalt.err (!%p9903_p10)
}
 0x70d   : > { %s9907_s7 = scalar_lea.hbm %s16217_s5, 4096  ;;  %s9911_s21 = scalar_lea.hbm %s16276_s4, 8192 }
 0x70e   : > { %p9908_p0 = scmp.ne.s32.totalorder %s16217_s5, %s9907_s7  ;;  %p9912_p5 = scmp.lt.u32.totalorder %s16217_s5, %s16276_s4 }
 0x70f   : > { %p9913_p11 = scmp.lt.u32.totalorder %s9911_s21, %s9907_s7  ;;  %p9915_p1 = scmp.lt.u32.totalorder %s9907_s7, %s16217_s5 }
 0x710   : > { %p9909_p3 = pnand %p9908_p0, %p17568_p13 }
 0x711   : > { %p9914_p12 = por %p9913_p11, %p9912_p5 }
 0x712   : > { %p9910_p4 = pneg %p9909_p3 }
 0x713   : > { %p9916_p6 = por %p9915_p1, %p9914_p12 }
 0x715   : > { %p9917_p7 = pnand %p9916_p6, %p9910_p4 }
 0x717   : > { %9920 = shalt.err (!%p9917_p7)
}
 0x718   : > { %s9982_s13 = smov 1024   ;;  %s9983_s12 = smov 2048  }
 0x719   : > { %s9984_s8 = smov 64  }
 0x71a   : > { %9218 = dma.vmem_to_hbm [thread:$0]  (%p17568_p13), %s16219_s14, 4096, %s16217_s5, %s16225_s18, %s9982_s13, %s9983_s12, %s9984_s8  }
 0x71b PF: > { %s8899_s25 = sand.u32 1, %s9955_s15   ;;  %p17569_p8 = scmp.ne.s32.totalorder %s16415_s29, 0 }
 0x71c   : > { %s8900_s22 = scalar_lea.sflag [#allocation4], %s8899_s25 }
 0x71d   : > { %p9225_p9 = pnand %p9006_p2, %p17569_p8 }
 0x71f   : > { %9950 = dma.done.wait (!%p9225_p9), %s8900_s22, 4096  }
 0x720   : > { %9952 = vsyncadd (!%p9225_p9), %s8900_s22, 4294963200  ;;  %s18_s20 = sadd.s32 1, %s9975_s20   ;;  %s17570_s15 = smov %s9959_s16 }
 0x721   : > { %p15_p10 = scmp.ge.s32.totalorder %s18_s20, 4   ;;  %s17571_s16 = smov %s9963_s17 }
 0x722   : > { %s17572_s17 = smov %s10064_s28  ;;  %s17573_s18 = smov %s9971_s19 }
 0x723   : > { %s17574_s19 = smov %s17576_s23  ;;  %17 = sbr.rel (!%p15_p10) target bundleno = 5 (0x5), region = 111 }
 0x72a   :  { %8905 = vsyncpa [#allocation3], 1 }
 0x72b   :  { %8907 = vsyncpa [#allocation3 + $0x1], 1 }
 0x72c   :  { %8908 = vsyncpa [#allocation4], 1 }
 0x72d   :  { %8910 = vsyncpa [#allocation4 + $0x1], 1 }

</bundles_post_ra>
